<compile_context>
chip_gen: v5e
topology: v5e:2x2
jax: 0.10.0
libtpu: 0.0.40
codegen_flags: <defaults>
</compile_context>

<pallas_src>
import functools

import jax
import jax.numpy as jnp
from jax.experimental import pallas as pl
from jax.experimental.pallas import tpu as pltpu


# Final-conv tap pairing (K: 64 -> 128).  Pair (a0,b0) with (a1,b1); `None`
# means "no second tap" (its weight block is zero, the kernel re-uses tap0).
_FINAL_TAP_PAIRS = (((0, 0), (1, 0)), ((0, 1), (1, 1)), ((0, 2), (1, 2)),
                    ((2, 0), (2, 1)), ((2, 2), None))


# ------------------------------------------------------------------------- #
# kernels
# ------------------------------------------------------------------------- #

def linear_bn_kernel(z_ref, w_ref, b_ref, g_ref, beta_ref, o_ref, *,
                     num_pos, eps):
    """Linear -> view(B,128,s,s) -> BatchNorm2d(128), fully fused.

    Weight columns are pre-permuted to NHWC order, so channel c of spatial
    position p lives in lane chunk [p*128:(p+1)*128]; all chunk slices are
    128-lane aligned (no relayout).  Variance is two-pass (subtract mean)."""
    out = jnp.dot(z_ref[...], w_ref[...],
                  preferred_element_type=jnp.float32) + b_ref[...]
    nb = out.shape[0]
    n = float(nb * num_pos)

    ssum = jnp.zeros((1, 128), jnp.float32)
    for p in range(num_pos):
        ssum = ssum + jnp.sum(out[:, p * 128:(p + 1) * 128],
                              axis=0, keepdims=True)
    mean = ssum / n

    ssq = jnp.zeros((1, 128), jnp.float32)
    for p in range(num_pos):
        d = out[:, p * 128:(p + 1) * 128] - mean
        ssq = ssq + jnp.sum(d * d, axis=0, keepdims=True)
    var = ssq / n

    scale = g_ref[...] * jax.lax.rsqrt(var + eps)
    shift = beta_ref[...] - mean * scale
    for p in range(num_pos):
        o_ref[:, p * 128:(p + 1) * 128] = (
            out[:, p * 128:(p + 1) * 128] * scale + shift)
    # TODO(synk): grid this over batch blocks (stats in VMEM scratch) when B or
    # 128*s*s grows enough to pressure the scoped VMEM limit.


def _fill_padded(xpad_ref, xb, bb, h, wd, cin):
    """Border-only zeroing + interior write of the (bb,h+2,wd+2,cin) pad buf."""
    zrow = jnp.zeros((bb, 1, wd + 2, cin), jnp.bfloat16)
    xpad_ref[:, 0:1, :, :] = zrow
    xpad_ref[:, h + 1:h + 2, :, :] = zrow
    zcol = jnp.zeros((bb, h, 1, cin), jnp.bfloat16)
    xpad_ref[:, 1:h + 1, 0:1, :] = zcol
    xpad_ref[:, 1:h + 1, wd + 1:wd + 2, :] = zcol
    xpad_ref[:, 1:h + 1, 1:wd + 1, :] = xb


def upconv_kernel(x_ref, w_ref, scale_ref, shift_ref, o_ref, stats_ref,
                  xpad_ref, *, slope, apply_act):
    """[optional per-channel affine + LeakyReLU] -> Upsample(x2, nearest)
    -> Conv3x3(pad=1), evaluated in polyphase form on the pre-upsample image.

    One grid step = a block of bB images.
      x_ref     : (bB, h, w, Cin)          pre-upsample input
      w_ref     : (6, 2*Cin, 2*Cout)       K-paired polyphase weights (bf16)
      o_ref     : (bB, h, 2, w, 2*Cout)    row/column phase packed output
      stats_ref : (1, 2, 2*Cout)           per-block [sum, sum_sq] for BN
    """
    bb, h, wd, cin = x_ref.shape
    cout2 = w_ref.shape[-1]
    m_rows = bb * h * wd

    x = x_ref[...].astype(jnp.float32)
    if apply_act:
        y = x * scale_ref[...] + shift_ref[...]        # fused BN of prev layer
        x = jnp.where(y >= 0.0, y, slope * y)          # LeakyReLU
    _fill_padded(xpad_ref, x.astype(jnp.bfloat16), bb, h, wd, cin)
    xpad = xpad_ref[...]

    ssum = jnp.zeros((1, cout2), jnp.float32)
    ssq = jnp.zeros((1, cout2), jnp.float32)
    for py in range(2):                                 # output row phase
        acc = None
        for b in range(3):                              # column tap
            # pair the two row taps of this phase along K (K = 2*Cin)
            t0 = xpad[:, py:py + h, b:b + wd, :].reshape(m_rows, cin)
            t1 = xpad[:, py + 1:py + 1 + h, b:b + wd, :].reshape(m_rows, cin)
            pair = jnp.concatenate([t0, t1], axis=-1)
            d = jnp.dot(pair, w_ref[py * 3 + b],
                        preferred_element_type=jnp.float32)
            acc = d if acc is None else acc + d
        # NOTE: at s=4 the stored sublane dim (wd) is <8 -> masked stores; that
        # only occurs for 16x16 outputs where the layer is negligible anyway.
        o_ref[:, :, py, :, :] = acc.reshape(bb, h, wd, cout2).astype(o_ref.dtype)
        ssum = ssum + jnp.sum(acc, axis=0, keepdims=True)
        ssq = ssq + jnp.sum(acc * acc, axis=0, keepdims=True)

    stats_ref[0:1, 0:1, :] = ssum[None]
    stats_ref[0:1, 1:2, :] = ssq[None]


def conv_tanh_kernel(x_ref, w_ref, b_ref, scale_ref, shift_ref, o_ref,
                     xpad_ref, *, slope):
    """Per-channel affine (BN of prev layer) + LeakyReLU -> Conv3x3(pad=1)
    + bias + Tanh.  Output channels padded to 128 for a lane-dense store."""
    bb, h, wd, cin = x_ref.shape
    coutp = w_ref.shape[-1]
    m_rows = bb * h * wd

    y = x_ref[...].astype(jnp.float32) * scale_ref[...] + shift_ref[...]
    x = jnp.where(y >= 0.0, y, slope * y)
    _fill_padded(xpad_ref, x.astype(jnp.bfloat16), bb, h, wd, cin)
    xpad = xpad_ref[...]

    acc = None
    for k, (p0, p1) in enumerate(_FINAL_TAP_PAIRS):
        if p1 is None:
            p1 = p0                                     # weight block is zero
        t0 = xpad[:, p0[0]:p0[0] + h, p0[1]:p0[1] + wd, :].reshape(m_rows, cin)
        t1 = xpad[:, p1[0]:p1[0] + h, p1[1]:p1[1] + wd, :].reshape(m_rows, cin)
        pair = jnp.concatenate([t0, t1], axis=-1)
        d = jnp.dot(pair, w_ref[k], preferred_element_type=jnp.float32)
        acc = d if acc is None else acc + d

    out = jnp.tanh(acc + b_ref[...])
    o_ref[...] = out.reshape(bb, h, wd, coutp).astype(o_ref.dtype)


# ------------------------------------------------------------------------- #
# wrapper-side (trace-time) weight / stats plumbing
# ------------------------------------------------------------------------- #

def build_upconv_weights(w):
    """Combine a (3,3,Cin,Cout) kernel into 6 K-paired polyphase matrices
    (6, 2*Cin, 2*Cout): index k = row_phase*3 + col_tap.  The two row taps of
    a phase are stacked along K; the two column phases are packed along the
    output (lane) dimension."""
    cin, cout = w.shape[2], w.shape[3]
    zero = jnp.zeros((cin, cout), w.dtype)
    sets = {(0, 0): (0,), (0, 1): (1, 2), (1, 1): (0, 1), (1, 2): (2,)}

    def m(py, px, a, b):
        if (py, a) not in sets or (px, b) not in sets:
            return zero
        acc = zero
        for dy in sets[(py, a)]:
            for dx in sets[(px, b)]:
                acc = acc + w[dy, dx]
        return acc

    def mfull(py, a, b):                                # (Cin, 2*Cout)
        return jnp.concatenate([m(py, 0, a, b), m(py, 1, a, b)], axis=1)

    mats = []
    for py in range(2):
        for b in range(3):
            mats.append(jnp.concatenate([mfull(py, py + 0, b),
                                         mfull(py, py + 1, b)], axis=0))
    return jnp.stack(mats).astype(jnp.bfloat16)         # (6, 2*Cin, 2*Cout)


def build_final_conv_weights(w, b):
    """K-pair the 9 taps of the final 3x3 conv (Cin=64 -> K=128) and pad Cout
    to 128 lanes.  Returns ((5, 2*Cin, 128) bf16, (1, 128) f32)."""
    cin, cout = w.shape[2], w.shape[3]
    wp = jnp.zeros((3, 3, cin, 128), jnp.float32).at[..., :cout].set(w)
    mats = []
    for p0, p1 in _FINAL_TAP_PAIRS:
        top = wp[p0[0], p0[1]]
        bot = wp[p1[0], p1[1]] if p1 is not None else jnp.zeros_like(top)
        mats.append(jnp.concatenate([top, bot], axis=0))
    wk = jnp.stack(mats).astype(jnp.bfloat16)           # (5, 2*Cin, 128)
    bp = jnp.zeros((1, 128), jnp.float32).at[:, :cout].set(b)
    return wk, bp


def stats_to_affine(stats, gamma, beta, n, cout, eps):
    """Reduce per-block [sum, sum_sq] (column phases packed in lanes) into the
    per-channel BatchNorm scale/shift (training-mode, biased variance).
    E[x^2]-E[x]^2 in f32; eps=0.8 keeps it well conditioned here."""
    ssum = stats[:, 0, :].reshape(-1, 2, cout).sum(axis=(0, 1))
    ssq = stats[:, 1, :].reshape(-1, 2, cout).sum(axis=(0, 1))
    mean = ssum / n
    var = ssq / n - mean * mean
    scale = gamma.reshape(cout) * jax.lax.rsqrt(var + eps)
    shift = beta.reshape(cout) - mean * scale
    return scale.reshape(1, cout), shift.reshape(1, cout)


def _pick_block_batch(B, h, w, target_rows=256):
    """Smallest divisor of B whose matmul M = bB*h*w reaches the MXU height."""
    for cand in range(1, B + 1):
        if B % cand == 0 and cand * h * w >= target_rows:
            return cand
    return B


# ------------------------------------------------------------------------- #
# pallas_call helpers
# ------------------------------------------------------------------------- #

_COMPILER_PARAMS = pltpu.CompilerParams(
    dimension_semantics=("parallel",),
    vmem_limit_bytes=48 * 1024 * 1024,
)
# TODO(synk): single-buffer the grid-invariant weight/scale/shift inputs
# (pipeline_mode=pl.Buffered(1)) and add a row-slab grid axis for >=64x64
# images so per-block VMEM stays bounded on v7x (64 MiB).


def _upconv_layer(x, wpair, scale, shift, *, bB, h, wd, cin, cout, apply_act,
                  out_dtype):
    B = x.shape[0]
    nb = B // bB
    kern = functools.partial(upconv_kernel, slope=0.2, apply_act=apply_act)
    return pl.pallas_call(
        kern,
        grid=(nb,),
        in_specs=[
            pl.BlockSpec((bB, h, wd, cin), lambda b: (b, 0, 0, 0)),
            pl.BlockSpec((6, 2 * cin, 2 * cout), lambda b: (0, 0, 0)),
            pl.BlockSpec((1, cin), lambda b: (0, 0)),
            pl.BlockSpec((1, cin), lambda b: (0, 0)),
        ],
        out_specs=(
            pl.BlockSpec((bB, h, 2, wd, 2 * cout), lambda b: (b, 0, 0, 0, 0)),
            pl.BlockSpec((1, 2, 2 * cout), lambda b: (b, 0, 0)),
        ),
        out_shape=(
            jax.ShapeDtypeStruct((B, h, 2, wd, 2 * cout), out_dtype),
            jax.ShapeDtypeStruct((nb, 2, 2 * cout), jnp.float32),
        ),
        scratch_shapes=[
            pltpu.VMEM((bB, h + 2, wd + 2, cin), jnp.bfloat16),
        ],
        compiler_params=_COMPILER_PARAMS,
    )(x, wpair, scale, shift)


def _conv_tanh_layer(x, wpair, bias, scale, shift, *, bB, h, wd, cin):
    B = x.shape[0]
    nb = B // bB
    kern = functools.partial(conv_tanh_kernel, slope=0.2)
    return pl.pallas_call(
        kern,
        grid=(nb,),
        in_specs=[
            pl.BlockSpec((bB, h, wd, cin), lambda b: (b, 0, 0, 0)),
            pl.BlockSpec((5, 2 * cin, 128), lambda b: (0, 0, 0)),
            pl.BlockSpec((1, 128), lambda b: (0, 0)),
            pl.BlockSpec((1, cin), lambda b: (0, 0)),
            pl.BlockSpec((1, cin), lambda b: (0, 0)),
        ],
        out_specs=pl.BlockSpec((bB, h, wd, 128), lambda b: (b, 0, 0, 0)),
        out_shape=jax.ShapeDtypeStruct((B, h, wd, 128), jnp.bfloat16),
        scratch_shapes=[
            pltpu.VMEM((bB, h + 2, wd + 2, cin), jnp.bfloat16),
        ],
        compiler_params=_COMPILER_PARAMS,
    )(x, wpair, bias, scale, shift)


# ------------------------------------------------------------------------- #
# parameters
# ------------------------------------------------------------------------- #

def init_params(key, latent_dim, img_shape):
    c_img, ih, _ = img_shape
    s = ih // 4
    F = 128 * s * s
    ks = jax.random.split(key, 8)
    sc = 0.05
    # Linear weight generated in PyTorch column order (c*s*s + h*s + w), then
    # permuted ONCE so the linear output is already flattened NHWC.
    w1 = jax.random.normal(ks[0], (latent_dim, F), jnp.float32) * sc
    b1 = jax.random.normal(ks[1], (F,), jnp.float32) * sc
    w1 = w1.reshape(latent_dim, 128, s, s).transpose(0, 2, 3, 1).reshape(
        latent_dim, F)
    b1 = b1.reshape(128, s, s).transpose(1, 2, 0).reshape(1, F)
    return {
        "w1": w1, "b1": b1,
        "bn0_g": jnp.ones((1, 128), jnp.float32),
        "bn0_b": jnp.zeros((1, 128), jnp.float32),
        # Conv weights stored HWIO.  conv1_b / conv2_b exist in the PyTorch
        # module but cancel exactly under the training-mode BatchNorm that
        # follows, so the kernels do not consume them.
        "conv1_w": jax.random.normal(ks[2], (3, 3, 128, 128), jnp.float32) * sc,
        "conv1_b": jax.random.normal(ks[3], (1, 128), jnp.float32) * sc,
        "bn1_g": jnp.ones((1, 128), jnp.float32),
        "bn1_b": jnp.zeros((1, 128), jnp.float32),
        "conv2_w": jax.random.normal(ks[4], (3, 3, 128, 64), jnp.float32) * sc,
        "conv2_b": jax.random.normal(ks[5], (1, 64), jnp.float32) * sc,
        "bn2_g": jnp.ones((1, 64), jnp.float32),
        "bn2_b": jnp.zeros((1, 64), jnp.float32),
        "conv3_w": jax.random.normal(ks[6], (3, 3, 64, c_img), jnp.float32) * sc,
        "conv3_b": jax.random.normal(ks[7], (1, c_img), jnp.float32) * sc,
    }


# ------------------------------------------------------------------------- #
# forward
# ------------------------------------------------------------------------- #

def generator_forward(z, params, img_shape):
    c_img, ih, _ = img_shape
    s = ih // 4
    B = z.shape[0]
    F = 128 * s * s

    # l1: Linear + view(B,128,s,s) + BatchNorm2d(128, eps=1e-5)  (one kernel)
    x0 = pl.pallas_call(
        functools.partial(linear_bn_kernel, num_pos=s * s, eps=1e-5),
        out_shape=jax.ShapeDtypeStruct((B, F), jnp.float32),
        in_specs=[pl.BlockSpec(memory_space=pltpu.MemorySpace.VMEM)] * 5,
        out_specs=pl.BlockSpec(memory_space=pltpu.MemorySpace.VMEM),
    )(z, params["w1"], params["b1"], params["bn0_g"], params["bn0_b"])
    x0 = x0.reshape(B, s, s, 128)                   # free contiguous reshape

    # Upsample(x2) + Conv2d(128,128,3,p=1): raw output + batch stats
    wc1 = build_upconv_weights(params["conv1_w"])
    bB1 = _pick_block_batch(B, s, s)
    ones128 = jnp.ones((1, 128), jnp.float32)
    zeros128 = jnp.zeros((1, 128), jnp.float32)
    o1, st1 = _upconv_layer(x0, wc1, ones128, zeros128, bB=bB1, h=s, wd=s,
                            cin=128, cout=128, apply_act=False,
                            out_dtype=jnp.bfloat16)
    h1 = 2 * s
    scale1, shift1 = stats_to_affine(st1, params["bn1_g"], params["bn1_b"],
                                     n=float(B * h1 * h1), cout=128, eps=0.8)
    x1 = o1.reshape(B, h1, h1, 128)                 # free contiguous reshape

    # [BN(128,0.8)+LeakyReLU fused on input] + Upsample(x2) + Conv2d(128,64)
    wc2 = build_upconv_weights(params["conv2_w"])
    bB2 = _pick_block_batch(B, h1, h1)
    o2, st2 = _upconv_layer(x1, wc2, scale1, shift1, bB=bB2, h=h1, wd=h1,
                            cin=128, cout=64, apply_act=True,
                            out_dtype=jnp.bfloat16)
    h2 = 2 * h1
    scale2, shift2 = stats_to_affine(st2, params["bn2_g"], params["bn2_b"],
                                     n=float(B * h2 * h2), cout=64, eps=0.8)
    x2 = o2.reshape(B, h2, h2, 64)                  # free contiguous reshape

    # [BN(64,0.8)+LeakyReLU fused on input] + Conv2d(64,C,3,p=1) + Tanh
    w3, b3 = build_final_conv_weights(params["conv3_w"], params["conv3_b"])
    bB3 = _pick_block_batch(B, h2, h2)
    o3 = _conv_tanh_layer(x2, w3, b3, scale2, shift2, bB=bB3, h=h2, wd=h2,
                          cin=64)

    # lane-padded (128) bf16 output -> real channels, f32, NCHW (PyTorch order)
    img = o3[..., :c_img].astype(jnp.float32).transpose(0, 3, 1, 2)
    return img


if __name__ == "__main__":
    latent_dim = 32
    img_shape = (3, 16, 16)   # (C, H, W)  -> init_size = 4
    batch = 2

    key = jax.random.PRNGKey(0)
    k_param, k_z = jax.random.split(key)
    params = init_params(k_param, latent_dim, img_shape)
    z = jax.random.normal(k_z, (batch, latent_dim), jnp.float32)

    fwd = jax.jit(functools.partial(generator_forward, img_shape=img_shape))
    img = jax.block_until_ready(fwd(z, params))

    assert img.shape == (batch, *img_shape), img.shape
    assert bool(jnp.all(jnp.isfinite(img)))
    print("KERNEL_OK")
</pallas_src>

<mosaic_0001>
module attributes {stable_mosaic.version = 11 : i64} {
  func.func @linear_bn_kernel(%arg0: memref<2x32xf32, #tpu.memory_space<vmem>>, %arg1: memref<32x2048xf32, #tpu.memory_space<vmem>>, %arg2: memref<1x2048xf32, #tpu.memory_space<vmem>>, %arg3: memref<1x128xf32, #tpu.memory_space<vmem>>, %arg4: memref<1x128xf32, #tpu.memory_space<vmem>>, %arg5: memref<2x2048xf32, #tpu.memory_space<vmem>>) attributes {dimension_semantics = [], scalar_prefetch = 0 : i64, scratch_operands = 0 : i64, tpu.core_type = #tpu.core_type<tc>} {
    %c0 = arith.constant 0 : index
    %c0_0 = arith.constant 0 : index
    %0 = vector.load %arg0[%c0, %c0_0] : memref<2x32xf32, #tpu.memory_space<vmem>>, vector<2x32xf32>
    %c0_1 = arith.constant 0 : index
    %c0_2 = arith.constant 0 : index
    %1 = vector.load %arg1[%c0_1, %c0_2] : memref<32x2048xf32, #tpu.memory_space<vmem>>, vector<32x2048xf32>
    %cst = arith.constant dense<0.000000e+00> : vector<2x2048xf32>
    %2 = tpu.matmul %0, %1, %cst {dimension_numbers = #tpu.dot_dimension_numbers<[1], [0], [0], [1], [0, 0, 1, 1], [], []>} : vector<2x32xf32>, vector<32x2048xf32>, vector<2x2048xf32> -> vector<2x2048xf32>
    %c0_3 = arith.constant 0 : index
    %c0_4 = arith.constant 0 : index
    %3 = vector.load %arg2[%c0_3, %c0_4] : memref<1x2048xf32, #tpu.memory_space<vmem>>, vector<1x2048xf32>
    %4 = vector.broadcast %3 : vector<1x2048xf32> to vector<2x2048xf32>
    %5 = arith.addf %2, %4 : vector<2x2048xf32>
    %cst_5 = arith.constant 0.000000e+00 : f32
    %6 = vector.broadcast %cst_5 : f32 to vector<1x128xf32>
    %7 = vector.extract_strided_slice %5 {offsets = [0, 0], sizes = [2, 128], strides = [1, 1]} : vector<2x2048xf32> to vector<2x128xf32>
    %cst_6 = arith.constant dense<0.000000e+00> : vector<128xf32>
    %8 = vector.multi_reduction <add>, %7, %cst_6 [0] : vector<2x128xf32> to vector<128xf32>
    %9 = vector.shape_cast %8 : vector<128xf32> to vector<1x128xf32>
    %10 = arith.addf %6, %9 : vector<1x128xf32>
    %11 = vector.extract_strided_slice %5 {offsets = [0, 128], sizes = [2, 128], strides = [1, 1]} : vector<2x2048xf32> to vector<2x128xf32>
    %cst_7 = arith.constant dense<0.000000e+00> : vector<128xf32>
    %12 = vector.multi_reduction <add>, %11, %cst_7 [0] : vector<2x128xf32> to vector<128xf32>
    %13 = vector.shape_cast %12 : vector<128xf32> to vector<1x128xf32>
    %14 = arith.addf %10, %13 : vector<1x128xf32>
    %15 = vector.extract_strided_slice %5 {offsets = [0, 256], sizes = [2, 128], strides = [1, 1]} : vector<2x2048xf32> to vector<2x128xf32>
    %cst_8 = arith.constant dense<0.000000e+00> : vector<128xf32>
    %16 = vector.multi_reduction <add>, %15, %cst_8 [0] : vector<2x128xf32> to vector<128xf32>
    %17 = vector.shape_cast %16 : vector<128xf32> to vector<1x128xf32>
    %18 = arith.addf %14, %17 : vector<1x128xf32>
    %19 = vector.extract_strided_slice %5 {offsets = [0, 384], sizes = [2, 128], strides = [1, 1]} : vector<2x2048xf32> to vector<2x128xf32>
    %cst_9 = arith.constant dense<0.000000e+00> : vector<128xf32>
    %20 = vector.multi_reduction <add>, %19, %cst_9 [0] : vector<2x128xf32> to vector<128xf32>
    %21 = vector.shape_cast %20 : vector<128xf32> to vector<1x128xf32>
    %22 = arith.addf %18, %21 : vector<1x128xf32>
    %23 = vector.extract_strided_slice %5 {offsets = [0, 512], sizes = [2, 128], strides = [1, 1]} : vector<2x2048xf32> to vector<2x128xf32>
    %cst_10 = arith.constant dense<0.000000e+00> : vector<128xf32>
    %24 = vector.multi_reduction <add>, %23, %cst_10 [0] : vector<2x128xf32> to vector<128xf32>
    %25 = vector.shape_cast %24 : vector<128xf32> to vector<1x128xf32>
    %26 = arith.addf %22, %25 : vector<1x128xf32>
    %27 = vector.extract_strided_slice %5 {offsets = [0, 640], sizes = [2, 128], strides = [1, 1]} : vector<2x2048xf32> to vector<2x128xf32>
    %cst_11 = arith.constant dense<0.000000e+00> : vector<128xf32>
    %28 = vector.multi_reduction <add>, %27, %cst_11 [0] : vector<2x128xf32> to vector<128xf32>
    %29 = vector.shape_cast %28 : vector<128xf32> to vector<1x128xf32>
    %30 = arith.addf %26, %29 : vector<1x128xf32>
    %31 = vector.extract_strided_slice %5 {offsets = [0, 768], sizes = [2, 128], strides = [1, 1]} : vector<2x2048xf32> to vector<2x128xf32>
    %cst_12 = arith.constant dense<0.000000e+00> : vector<128xf32>
    %32 = vector.multi_reduction <add>, %31, %cst_12 [0] : vector<2x128xf32> to vector<128xf32>
    %33 = vector.shape_cast %32 : vector<128xf32> to vector<1x128xf32>
    %34 = arith.addf %30, %33 : vector<1x128xf32>
    %35 = vector.extract_strided_slice %5 {offsets = [0, 896], sizes = [2, 128], strides = [1, 1]} : vector<2x2048xf32> to vector<2x128xf32>
    %cst_13 = arith.constant dense<0.000000e+00> : vector<128xf32>
    %36 = vector.multi_reduction <add>, %35, %cst_13 [0] : vector<2x128xf32> to vector<128xf32>
    %37 = vector.shape_cast %36 : vector<128xf32> to vector<1x128xf32>
    %38 = arith.addf %34, %37 : vector<1x128xf32>
    %39 = vector.extract_strided_slice %5 {offsets = [0, 1024], sizes = [2, 128], strides = [1, 1]} : vector<2x2048xf32> to vector<2x128xf32>
    %cst_14 = arith.constant dense<0.000000e+00> : vector<128xf32>
    %40 = vector.multi_reduction <add>, %39, %cst_14 [0] : vector<2x128xf32> to vector<128xf32>
    %41 = vector.shape_cast %40 : vector<128xf32> to vector<1x128xf32>
    %42 = arith.addf %38, %41 : vector<1x128xf32>
    %43 = vector.extract_strided_slice %5 {offsets = [0, 1152], sizes = [2, 128], strides = [1, 1]} : vector<2x2048xf32> to vector<2x128xf32>
    %cst_15 = arith.constant dense<0.000000e+00> : vector<128xf32>
    %44 = vector.multi_reduction <add>, %43, %cst_15 [0] : vector<2x128xf32> to vector<128xf32>
    %45 = vector.shape_cast %44 : vector<128xf32> to vector<1x128xf32>
    %46 = arith.addf %42, %45 : vector<1x128xf32>
    %47 = vector.extract_strided_slice %5 {offsets = [0, 1280], sizes = [2, 128], strides = [1, 1]} : vector<2x2048xf32> to vector<2x128xf32>
    %cst_16 = arith.constant dense<0.000000e+00> : vector<128xf32>
    %48 = vector.multi_reduction <add>, %47, %cst_16 [0] : vector<2x128xf32> to vector<128xf32>
    %49 = vector.shape_cast %48 : vector<128xf32> to vector<1x128xf32>
    %50 = arith.addf %46, %49 : vector<1x128xf32>
    %51 = vector.extract_strided_slice %5 {offsets = [0, 1408], sizes = [2, 128], strides = [1, 1]} : vector<2x2048xf32> to vector<2x128xf32>
    %cst_17 = arith.constant dense<0.000000e+00> : vector<128xf32>
    %52 = vector.multi_reduction <add>, %51, %cst_17 [0] : vector<2x128xf32> to vector<128xf32>
    %53 = vector.shape_cast %52 : vector<128xf32> to vector<1x128xf32>
    %54 = arith.addf %50, %53 : vector<1x128xf32>
    %55 = vector.extract_strided_slice %5 {offsets = [0, 1536], sizes = [2, 128], strides = [1, 1]} : vector<2x2048xf32> to vector<2x128xf32>
    %cst_18 = arith.constant dense<0.000000e+00> : vector<128xf32>
    %56 = vector.multi_reduction <add>, %55, %cst_18 [0] : vector<2x128xf32> to vector<128xf32>
    %57 = vector.shape_cast %56 : vector<128xf32> to vector<1x128xf32>
    %58 = arith.addf %54, %57 : vector<1x128xf32>
    %59 = vector.extract_strided_slice %5 {offsets = [0, 1664], sizes = [2, 128], strides = [1, 1]} : vector<2x2048xf32> to vector<2x128xf32>
    %cst_19 = arith.constant dense<0.000000e+00> : vector<128xf32>
    %60 = vector.multi_reduction <add>, %59, %cst_19 [0] : vector<2x128xf32> to vector<128xf32>
    %61 = vector.shape_cast %60 : vector<128xf32> to vector<1x128xf32>
    %62 = arith.addf %58, %61 : vector<1x128xf32>
    %63 = vector.extract_strided_slice %5 {offsets = [0, 1792], sizes = [2, 128], strides = [1, 1]} : vector<2x2048xf32> to vector<2x128xf32>
    %cst_20 = arith.constant dense<0.000000e+00> : vector<128xf32>
    %64 = vector.multi_reduction <add>, %63, %cst_20 [0] : vector<2x128xf32> to vector<128xf32>
    %65 = vector.shape_cast %64 : vector<128xf32> to vector<1x128xf32>
    %66 = arith.addf %62, %65 : vector<1x128xf32>
    %67 = vector.extract_strided_slice %5 {offsets = [0, 1920], sizes = [2, 128], strides = [1, 1]} : vector<2x2048xf32> to vector<2x128xf32>
    %cst_21 = arith.constant dense<0.000000e+00> : vector<128xf32>
    %68 = vector.multi_reduction <add>, %67, %cst_21 [0] : vector<2x128xf32> to vector<128xf32>
    %69 = vector.shape_cast %68 : vector<128xf32> to vector<1x128xf32>
    %70 = arith.addf %66, %69 : vector<1x128xf32>
    %cst_22 = arith.constant 3.200000e+01 : f32
    %71 = vector.broadcast %cst_22 : f32 to vector<1x128xf32>
    %72 = arith.divf %70, %71 : vector<1x128xf32>
    %cst_23 = arith.constant 0.000000e+00 : f32
    %73 = vector.broadcast %cst_23 : f32 to vector<1x128xf32>
    %74 = vector.extract_strided_slice %5 {offsets = [0, 0], sizes = [2, 128], strides = [1, 1]} : vector<2x2048xf32> to vector<2x128xf32>
    %75 = vector.broadcast %72 : vector<1x128xf32> to vector<2x128xf32>
    %76 = arith.subf %74, %75 : vector<2x128xf32>
    %77 = arith.mulf %76, %76 : vector<2x128xf32>
    %cst_24 = arith.constant dense<0.000000e+00> : vector<128xf32>
    %78 = vector.multi_reduction <add>, %77, %cst_24 [0] : vector<2x128xf32> to vector<128xf32>
    %79 = vector.shape_cast %78 : vector<128xf32> to vector<1x128xf32>
    %80 = arith.addf %73, %79 : vector<1x128xf32>
    %81 = vector.extract_strided_slice %5 {offsets = [0, 128], sizes = [2, 128], strides = [1, 1]} : vector<2x2048xf32> to vector<2x128xf32>
    %82 = vector.broadcast %72 : vector<1x128xf32> to vector<2x128xf32>
    %83 = arith.subf %81, %82 : vector<2x128xf32>
    %84 = arith.mulf %83, %83 : vector<2x128xf32>
    %cst_25 = arith.constant dense<0.000000e+00> : vector<128xf32>
    %85 = vector.multi_reduction <add>, %84, %cst_25 [0] : vector<2x128xf32> to vector<128xf32>
    %86 = vector.shape_cast %85 : vector<128xf32> to vector<1x128xf32>
    %87 = arith.addf %80, %86 : vector<1x128xf32>
    %88 = vector.extract_strided_slice %5 {offsets = [0, 256], sizes = [2, 128], strides = [1, 1]} : vector<2x2048xf32> to vector<2x128xf32>
    %89 = vector.broadcast %72 : vector<1x128xf32> to vector<2x128xf32>
    %90 = arith.subf %88, %89 : vector<2x128xf32>
    %91 = arith.mulf %90, %90 : vector<2x128xf32>
    %cst_26 = arith.constant dense<0.000000e+00> : vector<128xf32>
    %92 = vector.multi_reduction <add>, %91, %cst_26 [0] : vector<2x128xf32> to vector<128xf32>
    %93 = vector.shape_cast %92 : vector<128xf32> to vector<1x128xf32>
    %94 = arith.addf %87, %93 : vector<1x128xf32>
    %95 = vector.extract_strided_slice %5 {offsets = [0, 384], sizes = [2, 128], strides = [1, 1]} : vector<2x2048xf32> to vector<2x128xf32>
    %96 = vector.broadcast %72 : vector<1x128xf32> to vector<2x128xf32>
    %97 = arith.subf %95, %96 : vector<2x128xf32>
    %98 = arith.mulf %97, %97 : vector<2x128xf32>
    %cst_27 = arith.constant dense<0.000000e+00> : vector<128xf32>
    %99 = vector.multi_reduction <add>, %98, %cst_27 [0] : vector<2x128xf32> to vector<128xf32>
    %100 = vector.shape_cast %99 : vector<128xf32> to vector<1x128xf32>
    %101 = arith.addf %94, %100 : vector<1x128xf32>
    %102 = vector.extract_strided_slice %5 {offsets = [0, 512], sizes = [2, 128], strides = [1, 1]} : vector<2x2048xf32> to vector<2x128xf32>
    %103 = vector.broadcast %72 : vector<1x128xf32> to vector<2x128xf32>
    %104 = arith.subf %102, %103 : vector<2x128xf32>
    %105 = arith.mulf %104, %104 : vector<2x128xf32>
    %cst_28 = arith.constant dense<0.000000e+00> : vector<128xf32>
    %106 = vector.multi_reduction <add>, %105, %cst_28 [0] : vector<2x128xf32> to vector<128xf32>
    %107 = vector.shape_cast %106 : vector<128xf32> to vector<1x128xf32>
    %108 = arith.addf %101, %107 : vector<1x128xf32>
    %109 = vector.extract_strided_slice %5 {offsets = [0, 640], sizes = [2, 128], strides = [1, 1]} : vector<2x2048xf32> to vector<2x128xf32>
    %110 = vector.broadcast %72 : vector<1x128xf32> to vector<2x128xf32>
    %111 = arith.subf %109, %110 : vector<2x128xf32>
    %112 = arith.mulf %111, %111 : vector<2x128xf32>
    %cst_29 = arith.constant dense<0.000000e+00> : vector<128xf32>
    %113 = vector.multi_reduction <add>, %112, %cst_29 [0] : vector<2x128xf32> to vector<128xf32>
    %114 = vector.shape_cast %113 : vector<128xf32> to vector<1x128xf32>
    %115 = arith.addf %108, %114 : vector<1x128xf32>
    %116 = vector.extract_strided_slice %5 {offsets = [0, 768], sizes = [2, 128], strides = [1, 1]} : vector<2x2048xf32> to vector<2x128xf32>
    %117 = vector.broadcast %72 : vector<1x128xf32> to vector<2x128xf32>
    %118 = arith.subf %116, %117 : vector<2x128xf32>
    %119 = arith.mulf %118, %118 : vector<2x128xf32>
    %cst_30 = arith.constant dense<0.000000e+00> : vector<128xf32>
    %120 = vector.multi_reduction <add>, %119, %cst_30 [0] : vector<2x128xf32> to vector<128xf32>
    %121 = vector.shape_cast %120 : vector<128xf32> to vector<1x128xf32>
    %122 = arith.addf %115, %121 : vector<1x128xf32>
    %123 = vector.extract_strided_slice %5 {offsets = [0, 896], sizes = [2, 128], strides = [1, 1]} : vector<2x2048xf32> to vector<2x128xf32>
    %124 = vector.broadcast %72 : vector<1x128xf32> to vector<2x128xf32>
    %125 = arith.subf %123, %124 : vector<2x128xf32>
    %126 = arith.mulf %125, %125 : vector<2x128xf32>
    %cst_31 = arith.constant dense<0.000000e+00> : vector<128xf32>
    %127 = vector.multi_reduction <add>, %126, %cst_31 [0] : vector<2x128xf32> to vector<128xf32>
    %128 = vector.shape_cast %127 : vector<128xf32> to vector<1x128xf32>
    %129 = arith.addf %122, %128 : vector<1x128xf32>
    %130 = vector.extract_strided_slice %5 {offsets = [0, 1024], sizes = [2, 128], strides = [1, 1]} : vector<2x2048xf32> to vector<2x128xf32>
    %131 = vector.broadcast %72 : vector<1x128xf32> to vector<2x128xf32>
    %132 = arith.subf %130, %131 : vector<2x128xf32>
    %133 = arith.mulf %132, %132 : vector<2x128xf32>
    %cst_32 = arith.constant dense<0.000000e+00> : vector<128xf32>
    %134 = vector.multi_reduction <add>, %133, %cst_32 [0] : vector<2x128xf32> to vector<128xf32>
    %135 = vector.shape_cast %134 : vector<128xf32> to vector<1x128xf32>
    %136 = arith.addf %129, %135 : vector<1x128xf32>
    %137 = vector.extract_strided_slice %5 {offsets = [0, 1152], sizes = [2, 128], strides = [1, 1]} : vector<2x2048xf32> to vector<2x128xf32>
    %138 = vector.broadcast %72 : vector<1x128xf32> to vector<2x128xf32>
    %139 = arith.subf %137, %138 : vector<2x128xf32>
    %140 = arith.mulf %139, %139 : vector<2x128xf32>
    %cst_33 = arith.constant dense<0.000000e+00> : vector<128xf32>
    %141 = vector.multi_reduction <add>, %140, %cst_33 [0] : vector<2x128xf32> to vector<128xf32>
    %142 = vector.shape_cast %141 : vector<128xf32> to vector<1x128xf32>
    %143 = arith.addf %136, %142 : vector<1x128xf32>
    %144 = vector.extract_strided_slice %5 {offsets = [0, 1280], sizes = [2, 128], strides = [1, 1]} : vector<2x2048xf32> to vector<2x128xf32>
    %145 = vector.broadcast %72 : vector<1x128xf32> to vector<2x128xf32>
    %146 = arith.subf %144, %145 : vector<2x128xf32>
    %147 = arith.mulf %146, %146 : vector<2x128xf32>
    %cst_34 = arith.constant dense<0.000000e+00> : vector<128xf32>
    %148 = vector.multi_reduction <add>, %147, %cst_34 [0] : vector<2x128xf32> to vector<128xf32>
    %149 = vector.shape_cast %148 : vector<128xf32> to vector<1x128xf32>
    %150 = arith.addf %143, %149 : vector<1x128xf32>
    %151 = vector.extract_strided_slice %5 {offsets = [0, 1408], sizes = [2, 128], strides = [1, 1]} : vector<2x2048xf32> to vector<2x128xf32>
    %152 = vector.broadcast %72 : vector<1x128xf32> to vector<2x128xf32>
    %153 = arith.subf %151, %152 : vector<2x128xf32>
    %154 = arith.mulf %153, %153 : vector<2x128xf32>
    %cst_35 = arith.constant dense<0.000000e+00> : vector<128xf32>
    %155 = vector.multi_reduction <add>, %154, %cst_35 [0] : vector<2x128xf32> to vector<128xf32>
    %156 = vector.shape_cast %155 : vector<128xf32> to vector<1x128xf32>
    %157 = arith.addf %150, %156 : vector<1x128xf32>
    %158 = vector.extract_strided_slice %5 {offsets = [0, 1536], sizes = [2, 128], strides = [1, 1]} : vector<2x2048xf32> to vector<2x128xf32>
    %159 = vector.broadcast %72 : vector<1x128xf32> to vector<2x128xf32>
    %160 = arith.subf %158, %159 : vector<2x128xf32>
    %161 = arith.mulf %160, %160 : vector<2x128xf32>
    %cst_36 = arith.constant dense<0.000000e+00> : vector<128xf32>
    %162 = vector.multi_reduction <add>, %161, %cst_36 [0] : vector<2x128xf32> to vector<128xf32>
    %163 = vector.shape_cast %162 : vector<128xf32> to vector<1x128xf32>
    %164 = arith.addf %157, %163 : vector<1x128xf32>
    %165 = vector.extract_strided_slice %5 {offsets = [0, 1664], sizes = [2, 128], strides = [1, 1]} : vector<2x2048xf32> to vector<2x128xf32>
    %166 = vector.broadcast %72 : vector<1x128xf32> to vector<2x128xf32>
    %167 = arith.subf %165, %166 : vector<2x128xf32>
    %168 = arith.mulf %167, %167 : vector<2x128xf32>
    %cst_37 = arith.constant dense<0.000000e+00> : vector<128xf32>
    %169 = vector.multi_reduction <add>, %168, %cst_37 [0] : vector<2x128xf32> to vector<128xf32>
    %170 = vector.shape_cast %169 : vector<128xf32> to vector<1x128xf32>
    %171 = arith.addf %164, %170 : vector<1x128xf32>
    %172 = vector.extract_strided_slice %5 {offsets = [0, 1792], sizes = [2, 128], strides = [1, 1]} : vector<2x2048xf32> to vector<2x128xf32>
    %173 = vector.broadcast %72 : vector<1x128xf32> to vector<2x128xf32>
    %174 = arith.subf %172, %173 : vector<2x128xf32>
    %175 = arith.mulf %174, %174 : vector<2x128xf32>
    %cst_38 = arith.constant dense<0.000000e+00> : vector<128xf32>
    %176 = vector.multi_reduction <add>, %175, %cst_38 [0] : vector<2x128xf32> to vector<128xf32>
    %177 = vector.shape_cast %176 : vector<128xf32> to vector<1x128xf32>
    %178 = arith.addf %171, %177 : vector<1x128xf32>
    %179 = vector.extract_strided_slice %5 {offsets = [0, 1920], sizes = [2, 128], strides = [1, 1]} : vector<2x2048xf32> to vector<2x128xf32>
    %180 = vector.broadcast %72 : vector<1x128xf32> to vector<2x128xf32>
    %181 = arith.subf %179, %180 : vector<2x128xf32>
    %182 = arith.mulf %181, %181 : vector<2x128xf32>
    %cst_39 = arith.constant dense<0.000000e+00> : vector<128xf32>
    %183 = vector.multi_reduction <add>, %182, %cst_39 [0] : vector<2x128xf32> to vector<128xf32>
    %184 = vector.shape_cast %183 : vector<128xf32> to vector<1x128xf32>
    %185 = arith.addf %178, %184 : vector<1x128xf32>
    %cst_40 = arith.constant 3.200000e+01 : f32
    %186 = vector.broadcast %cst_40 : f32 to vector<1x128xf32>
    %187 = arith.divf %185, %186 : vector<1x128xf32>
    %c0_41 = arith.constant 0 : index
    %c0_42 = arith.constant 0 : index
    %188 = vector.load %arg3[%c0_41, %c0_42] : memref<1x128xf32, #tpu.memory_space<vmem>>, vector<1x128xf32>
    %cst_43 = arith.constant 9.99999974E-6 : f32
    %189 = vector.broadcast %cst_43 : f32 to vector<1x128xf32>
    %190 = arith.addf %187, %189 : vector<1x128xf32>
    %191 = math.rsqrt %190 : vector<1x128xf32>
    %192 = arith.mulf %188, %191 : vector<1x128xf32>
    %c0_44 = arith.constant 0 : index
    %c0_45 = arith.constant 0 : index
    %193 = vector.load %arg4[%c0_44, %c0_45] : memref<1x128xf32, #tpu.memory_space<vmem>>, vector<1x128xf32>
    %194 = arith.mulf %72, %192 : vector<1x128xf32>
    %195 = arith.subf %193, %194 : vector<1x128xf32>
    %196 = vector.extract_strided_slice %5 {offsets = [0, 0], sizes = [2, 128], strides = [1, 1]} : vector<2x2048xf32> to vector<2x128xf32>
    %197 = vector.broadcast %192 : vector<1x128xf32> to vector<2x128xf32>
    %198 = arith.mulf %196, %197 : vector<2x128xf32>
    %199 = vector.broadcast %195 : vector<1x128xf32> to vector<2x128xf32>
    %200 = arith.addf %198, %199 : vector<2x128xf32>
    %c0_46 = arith.constant 0 : index
    %c0_47 = arith.constant 0 : index
    %201 = vector.load %arg5[%c0_46, %c0_47] : memref<2x2048xf32, #tpu.memory_space<vmem>>, vector<2x128xf32>
    tpu.vector_store %arg5[%c0_46, %c0_47], %200 {strides = array<i32>} : memref<2x2048xf32, #tpu.memory_space<vmem>>, vector<2x128xf32>,
    %202 = vector.extract_strided_slice %5 {offsets = [0, 128], sizes = [2, 128], strides = [1, 1]} : vector<2x2048xf32> to vector<2x128xf32>
    %203 = vector.broadcast %192 : vector<1x128xf32> to vector<2x128xf32>
    %204 = arith.mulf %202, %203 : vector<2x128xf32>
    %205 = vector.broadcast %195 : vector<1x128xf32> to vector<2x128xf32>
    %206 = arith.addf %204, %205 : vector<2x128xf32>
    %c0_48 = arith.constant 0 : index
    %c128 = arith.constant 128 : index
    %207 = vector.load %arg5[%c0_48, %c128] : memref<2x2048xf32, #tpu.memory_space<vmem>>, vector<2x128xf32>
    tpu.vector_store %arg5[%c0_48, %c128], %206 {strides = array<i32>} : memref<2x2048xf32, #tpu.memory_space<vmem>>, vector<2x128xf32>,
    %208 = vector.extract_strided_slice %5 {offsets = [0, 256], sizes = [2, 128], strides = [1, 1]} : vector<2x2048xf32> to vector<2x128xf32>
    %209 = vector.broadcast %192 : vector<1x128xf32> to vector<2x128xf32>
    %210 = arith.mulf %208, %209 : vector<2x128xf32>
    %211 = vector.broadcast %195 : vector<1x128xf32> to vector<2x128xf32>
    %212 = arith.addf %210, %211 : vector<2x128xf32>
    %c0_49 = arith.constant 0 : index
    %c256 = arith.constant 256 : index
    %213 = vector.load %arg5[%c0_49, %c256] : memref<2x2048xf32, #tpu.memory_space<vmem>>, vector<2x128xf32>
    tpu.vector_store %arg5[%c0_49, %c256], %212 {strides = array<i32>} : memref<2x2048xf32, #tpu.memory_space<vmem>>, vector<2x128xf32>,
    %214 = vector.extract_strided_slice %5 {offsets = [0, 384], sizes = [2, 128], strides = [1, 1]} : vector<2x2048xf32> to vector<2x128xf32>
    %215 = vector.broadcast %192 : vector<1x128xf32> to vector<2x128xf32>
    %216 = arith.mulf %214, %215 : vector<2x128xf32>
    %217 = vector.broadcast %195 : vector<1x128xf32> to vector<2x128xf32>
    %218 = arith.addf %216, %217 : vector<2x128xf32>
    %c0_50 = arith.constant 0 : index
    %c384 = arith.constant 384 : index
    %219 = vector.load %arg5[%c0_50, %c384] : memref<2x2048xf32, #tpu.memory_space<vmem>>, vector<2x128xf32>
    tpu.vector_store %arg5[%c0_50, %c384], %218 {strides = array<i32>} : memref<2x2048xf32, #tpu.memory_space<vmem>>, vector<2x128xf32>,
    %220 = vector.extract_strided_slice %5 {offsets = [0, 512], sizes = [2, 128], strides = [1, 1]} : vector<2x2048xf32> to vector<2x128xf32>
    %221 = vector.broadcast %192 : vector<1x128xf32> to vector<2x128xf32>
    %222 = arith.mulf %220, %221 : vector<2x128xf32>
    %223 = vector.broadcast %195 : vector<1x128xf32> to vector<2x128xf32>
    %224 = arith.addf %222, %223 : vector<2x128xf32>
    %c0_51 = arith.constant 0 : index
    %c512 = arith.constant 512 : index
    %225 = vector.load %arg5[%c0_51, %c512] : memref<2x2048xf32, #tpu.memory_space<vmem>>, vector<2x128xf32>
    tpu.vector_store %arg5[%c0_51, %c512], %224 {strides = array<i32>} : memref<2x2048xf32, #tpu.memory_space<vmem>>, vector<2x128xf32>,
    %226 = vector.extract_strided_slice %5 {offsets = [0, 640], sizes = [2, 128], strides = [1, 1]} : vector<2x2048xf32> to vector<2x128xf32>
    %227 = vector.broadcast %192 : vector<1x128xf32> to vector<2x128xf32>
    %228 = arith.mulf %226, %227 : vector<2x128xf32>
    %229 = vector.broadcast %195 : vector<1x128xf32> to vector<2x128xf32>
    %230 = arith.addf %228, %229 : vector<2x128xf32>
    %c0_52 = arith.constant 0 : index
    %c640 = arith.constant 640 : index
    %231 = vector.load %arg5[%c0_52, %c640] : memref<2x2048xf32, #tpu.memory_space<vmem>>, vector<2x128xf32>
    tpu.vector_store %arg5[%c0_52, %c640], %230 {strides = array<i32>} : memref<2x2048xf32, #tpu.memory_space<vmem>>, vector<2x128xf32>,
    %232 = vector.extract_strided_slice %5 {offsets = [0, 768], sizes = [2, 128], strides = [1, 1]} : vector<2x2048xf32> to vector<2x128xf32>
    %233 = vector.broadcast %192 : vector<1x128xf32> to vector<2x128xf32>
    %234 = arith.mulf %232, %233 : vector<2x128xf32>
    %235 = vector.broadcast %195 : vector<1x128xf32> to vector<2x128xf32>
    %236 = arith.addf %234, %235 : vector<2x128xf32>
    %c0_53 = arith.constant 0 : index
    %c768 = arith.constant 768 : index
    %237 = vector.load %arg5[%c0_53, %c768] : memref<2x2048xf32, #tpu.memory_space<vmem>>, vector<2x128xf32>
    tpu.vector_store %arg5[%c0_53, %c768], %236 {strides = array<i32>} : memref<2x2048xf32, #tpu.memory_space<vmem>>, vector<2x128xf32>,
    %238 = vector.extract_strided_slice %5 {offsets = [0, 896], sizes = [2, 128], strides = [1, 1]} : vector<2x2048xf32> to vector<2x128xf32>
    %239 = vector.broadcast %192 : vector<1x128xf32> to vector<2x128xf32>
    %240 = arith.mulf %238, %239 : vector<2x128xf32>
    %241 = vector.broadcast %195 : vector<1x128xf32> to vector<2x128xf32>
    %242 = arith.addf %240, %241 : vector<2x128xf32>
    %c0_54 = arith.constant 0 : index
    %c896 = arith.constant 896 : index
    %243 = vector.load %arg5[%c0_54, %c896] : memref<2x2048xf32, #tpu.memory_space<vmem>>, vector<2x128xf32>
    tpu.vector_store %arg5[%c0_54, %c896], %242 {strides = array<i32>} : memref<2x2048xf32, #tpu.memory_space<vmem>>, vector<2x128xf32>,
    %244 = vector.extract_strided_slice %5 {offsets = [0, 1024], sizes = [2, 128], strides = [1, 1]} : vector<2x2048xf32> to vector<2x128xf32>
    %245 = vector.broadcast %192 : vector<1x128xf32> to vector<2x128xf32>
    %246 = arith.mulf %244, %245 : vector<2x128xf32>
    %247 = vector.broadcast %195 : vector<1x128xf32> to vector<2x128xf32>
    %248 = arith.addf %246, %247 : vector<2x128xf32>
    %c0_55 = arith.constant 0 : index
    %c1024 = arith.constant 1024 : index
    %249 = vector.load %arg5[%c0_55, %c1024] : memref<2x2048xf32, #tpu.memory_space<vmem>>, vector<2x128xf32>
    tpu.vector_store %arg5[%c0_55, %c1024], %248 {strides = array<i32>} : memref<2x2048xf32, #tpu.memory_space<vmem>>, vector<2x128xf32>,
    %250 = vector.extract_strided_slice %5 {offsets = [0, 1152], sizes = [2, 128], strides = [1, 1]} : vector<2x2048xf32> to vector<2x128xf32>
    %251 = vector.broadcast %192 : vector<1x128xf32> to vector<2x128xf32>
    %252 = arith.mulf %250, %251 : vector<2x128xf32>
    %253 = vector.broadcast %195 : vector<1x128xf32> to vector<2x128xf32>
    %254 = arith.addf %252, %253 : vector<2x128xf32>
    %c0_56 = arith.constant 0 : index
    %c1152 = arith.constant 1152 : index
    %255 = vector.load %arg5[%c0_56, %c1152] : memref<2x2048xf32, #tpu.memory_space<vmem>>, vector<2x128xf32>
    tpu.vector_store %arg5[%c0_56, %c1152], %254 {strides = array<i32>} : memref<2x2048xf32, #tpu.memory_space<vmem>>, vector<2x128xf32>,
    %256 = vector.extract_strided_slice %5 {offsets = [0, 1280], sizes = [2, 128], strides = [1, 1]} : vector<2x2048xf32> to vector<2x128xf32>
    %257 = vector.broadcast %192 : vector<1x128xf32> to vector<2x128xf32>
    %258 = arith.mulf %256, %257 : vector<2x128xf32>
    %259 = vector.broadcast %195 : vector<1x128xf32> to vector<2x128xf32>
    %260 = arith.addf %258, %259 : vector<2x128xf32>
    %c0_57 = arith.constant 0 : index
    %c1280 = arith.constant 1280 : index
    %261 = vector.load %arg5[%c0_57, %c1280] : memref<2x2048xf32, #tpu.memory_space<vmem>>, vector<2x128xf32>
    tpu.vector_store %arg5[%c0_57, %c1280], %260 {strides = array<i32>} : memref<2x2048xf32, #tpu.memory_space<vmem>>, vector<2x128xf32>,
    %262 = vector.extract_strided_slice %5 {offsets = [0, 1408], sizes = [2, 128], strides = [1, 1]} : vector<2x2048xf32> to vector<2x128xf32>
    %263 = vector.broadcast %192 : vector<1x128xf32> to vector<2x128xf32>
    %264 = arith.mulf %262, %263 : vector<2x128xf32>
    %265 = vector.broadcast %195 : vector<1x128xf32> to vector<2x128xf32>
    %266 = arith.addf %264, %265 : vector<2x128xf32>
    %c0_58 = arith.constant 0 : index
    %c1408 = arith.constant 1408 : index
    %267 = vector.load %arg5[%c0_58, %c1408] : memref<2x2048xf32, #tpu.memory_space<vmem>>, vector<2x128xf32>
    tpu.vector_store %arg5[%c0_58, %c1408], %266 {strides = array<i32>} : memref<2x2048xf32, #tpu.memory_space<vmem>>, vector<2x128xf32>,
    %268 = vector.extract_strided_slice %5 {offsets = [0, 1536], sizes = [2, 128], strides = [1, 1]} : vector<2x2048xf32> to vector<2x128xf32>
    %269 = vector.broadcast %192 : vector<1x128xf32> to vector<2x128xf32>
    %270 = arith.mulf %268, %269 : vector<2x128xf32>
    %271 = vector.broadcast %195 : vector<1x128xf32> to vector<2x128xf32>
    %272 = arith.addf %270, %271 : vector<2x128xf32>
    %c0_59 = arith.constant 0 : index
    %c1536 = arith.constant 1536 : index
    %273 = vector.load %arg5[%c0_59, %c1536] : memref<2x2048xf32, #tpu.memory_space<vmem>>, vector<2x128xf32>
    tpu.vector_store %arg5[%c0_59, %c1536], %272 {strides = array<i32>} : memref<2x2048xf32, #tpu.memory_space<vmem>>, vector<2x128xf32>,
    %274 = vector.extract_strided_slice %5 {offsets = [0, 1664], sizes = [2, 128], strides = [1, 1]} : vector<2x2048xf32> to vector<2x128xf32>
    %275 = vector.broadcast %192 : vector<1x128xf32> to vector<2x128xf32>
    %276 = arith.mulf %274, %275 : vector<2x128xf32>
    %277 = vector.broadcast %195 : vector<1x128xf32> to vector<2x128xf32>
    %278 = arith.addf %276, %277 : vector<2x128xf32>
    %c0_60 = arith.constant 0 : index
    %c1664 = arith.constant 1664 : index
    %279 = vector.load %arg5[%c0_60, %c1664] : memref<2x2048xf32, #tpu.memory_space<vmem>>, vector<2x128xf32>
    tpu.vector_store %arg5[%c0_60, %c1664], %278 {strides = array<i32>} : memref<2x2048xf32, #tpu.memory_space<vmem>>, vector<2x128xf32>,
    %280 = vector.extract_strided_slice %5 {offsets = [0, 1792], sizes = [2, 128], strides = [1, 1]} : vector<2x2048xf32> to vector<2x128xf32>
    %281 = vector.broadcast %192 : vector<1x128xf32> to vector<2x128xf32>
    %282 = arith.mulf %280, %281 : vector<2x128xf32>
    %283 = vector.broadcast %195 : vector<1x128xf32> to vector<2x128xf32>
    %284 = arith.addf %282, %283 : vector<2x128xf32>
    %c0_61 = arith.constant 0 : index
    %c1792 = arith.constant 1792 : index
    %285 = vector.load %arg5[%c0_61, %c1792] : memref<2x2048xf32, #tpu.memory_space<vmem>>, vector<2x128xf32>
    tpu.vector_store %arg5[%c0_61, %c1792], %284 {strides = array<i32>} : memref<2x2048xf32, #tpu.memory_space<vmem>>, vector<2x128xf32>,
    %286 = vector.extract_strided_slice %5 {offsets = [0, 1920], sizes = [2, 128], strides = [1, 1]} : vector<2x2048xf32> to vector<2x128xf32>
    %287 = vector.broadcast %192 : vector<1x128xf32> to vector<2x128xf32>
    %288 = arith.mulf %286, %287 : vector<2x128xf32>
    %289 = vector.broadcast %195 : vector<1x128xf32> to vector<2x128xf32>
    %290 = arith.addf %288, %289 : vector<2x128xf32>
    %c0_62 = arith.constant 0 : index
    %c1920 = arith.constant 1920 : index
    %291 = vector.load %arg5[%c0_62, %c1920] : memref<2x2048xf32, #tpu.memory_space<vmem>>, vector<2x128xf32>
    tpu.vector_store %arg5[%c0_62, %c1920], %290 {strides = array<i32>} : memref<2x2048xf32, #tpu.memory_space<vmem>>, vector<2x128xf32>,
    return
  }
}

module attributes {stable_mosaic.version = 11 : i64} {
  func.func @upconv_kernel(%arg0: i32, %arg1: memref<2x4x4x128xf32, #tpu.memory_space<vmem>>, %arg2: memref<6x256x256xbf16, #tpu.memory_space<vmem>>, %arg3: memref<1x128xf32, #tpu.memory_space<vmem>>, %arg4: memref<1x128xf32, #tpu.memory_space<vmem>>, %arg5: memref<2x4x2x4x256xbf16, #tpu.memory_space<vmem>>, %arg6: memref<1x2x256xf32, #tpu.memory_space<vmem>>, %arg7: memref<2x6x6x128xbf16, #tpu.memory_space<vmem>>) attributes {dimension_semantics = [#tpu.dimension_semantics<parallel>], iteration_bounds = array<i64: 1>, scalar_prefetch = 0 : i64, scratch_operands = 1 : i64, tpu.core_type = #tpu.core_type<tc>, window_params = [{transform_indices = @transform_0, window_bounds = array<i64: 2, 4, 4, 128>}, {pipeline_mode = #tpu.pipeline_mode<synchronous>, transform_indices = @transform_1, window_bounds = array<i64: 6, 256, 256>}, {pipeline_mode = #tpu.pipeline_mode<synchronous>, transform_indices = @transform_2, window_bounds = array<i64: 1, 128>}, {pipeline_mode = #tpu.pipeline_mode<synchronous>, transform_indices = @transform_3, window_bounds = array<i64: 1, 128>}, {transform_indices = @transform_4, window_bounds = array<i64: 2, 4, 2, 4, 256>}, {transform_indices = @transform_5, window_bounds = array<i64: 1, 2, 256>}]} {
    %c0 = arith.constant 0 : index
    %c0_0 = arith.constant 0 : index
    %c0_1 = arith.constant 0 : index
    %c0_2 = arith.constant 0 : index
    %0 = vector.load %arg1[%c0, %c0_0, %c0_1, %c0_2] : memref<2x4x4x128xf32, #tpu.memory_space<vmem>>, vector<2x4x4x128xf32>
    %1 = arith.truncf %0 : vector<2x4x4x128xf32> to vector<2x4x4x128xbf16>
    %cst = arith.constant 0.000000e+00 : bf16
    %2 = vector.broadcast %cst : bf16 to vector<2x1x6x128xbf16>
    %c0_3 = arith.constant 0 : index
    %c0_4 = arith.constant 0 : index
    %c0_5 = arith.constant 0 : index
    %c0_6 = arith.constant 0 : index
    %3 = vector.load %arg7[%c0_3, %c0_4, %c0_5, %c0_6] : memref<2x6x6x128xbf16, #tpu.memory_space<vmem>>, vector<2x1x6x128xbf16>
    tpu.vector_store %arg7[%c0_3, %c0_4, %c0_5, %c0_6], %2 {strides = array<i32>} : memref<2x6x6x128xbf16, #tpu.memory_space<vmem>>, vector<2x1x6x128xbf16>,
    %c0_7 = arith.constant 0 : index
    %c5 = arith.constant 5 : index
    %c0_8 = arith.constant 0 : index
    %c0_9 = arith.constant 0 : index
    %4 = vector.load %arg7[%c0_7, %c5, %c0_8, %c0_9] : memref<2x6x6x128xbf16, #tpu.memory_space<vmem>>, vector<2x1x6x128xbf16>
    tpu.vector_store %arg7[%c0_7, %c5, %c0_8, %c0_9], %2 {strides = array<i32>} : memref<2x6x6x128xbf16, #tpu.memory_space<vmem>>, vector<2x1x6x128xbf16>,
    %cst_10 = arith.constant 0.000000e+00 : bf16
    %5 = vector.broadcast %cst_10 : bf16 to vector<2x4x1x128xbf16>
    %c0_11 = arith.constant 0 : index
    %c1 = arith.constant 1 : index
    %c0_12 = arith.constant 0 : index
    %c0_13 = arith.constant 0 : index
    %6 = vector.load %arg7[%c0_11, %c1, %c0_12, %c0_13] : memref<2x6x6x128xbf16, #tpu.memory_space<vmem>>, vector<2x4x1x128xbf16>
    tpu.vector_store %arg7[%c0_11, %c1, %c0_12, %c0_13], %5 {strides = array<i32>} : memref<2x6x6x128xbf16, #tpu.memory_space<vmem>>, vector<2x4x1x128xbf16>,
    %c0_14 = arith.constant 0 : index
    %c1_15 = arith.constant 1 : index
    %c5_16 = arith.constant 5 : index
    %c0_17 = arith.constant 0 : index
    %7 = vector.load %arg7[%c0_14, %c1_15, %c5_16, %c0_17] : memref<2x6x6x128xbf16, #tpu.memory_space<vmem>>, vector<2x4x1x128xbf16>
    tpu.vector_store %arg7[%c0_14, %c1_15, %c5_16, %c0_17], %5 {strides = array<i32>} : memref<2x6x6x128xbf16, #tpu.memory_space<vmem>>, vector<2x4x1x128xbf16>,
    %c0_18 = arith.constant 0 : index
    %c1_19 = arith.constant 1 : index
    %c1_20 = arith.constant 1 : index
    %c0_21 = arith.constant 0 : index
    %8 = vector.load %arg7[%c0_18, %c1_19, %c1_20, %c0_21] : memref<2x6x6x128xbf16, #tpu.memory_space<vmem>>, vector<2x4x4x128xbf16>
    tpu.vector_store %arg7[%c0_18, %c1_19, %c1_20, %c0_21], %1 {strides = array<i32>} : memref<2x6x6x128xbf16, #tpu.memory_space<vmem>>, vector<2x4x4x128xbf16>,
    %c0_22 = arith.constant 0 : index
    %c0_23 = arith.constant 0 : index
    %c0_24 = arith.constant 0 : index
    %c0_25 = arith.constant 0 : index
    %9 = vector.load %arg7[%c0_22, %c0_23, %c0_24, %c0_25] : memref<2x6x6x128xbf16, #tpu.memory_space<vmem>>, vector<2x6x6x128xbf16>
    %cst_26 = arith.constant 0.000000e+00 : f32
    %10 = vector.broadcast %cst_26 : f32 to vector<1x256xf32>
    %cst_27 = arith.constant 0.000000e+00 : f32
    %11 = vector.broadcast %cst_27 : f32 to vector<1x256xf32>
    %12 = vector.extract_strided_slice %9 {offsets = [0, 0, 0, 0], sizes = [2, 4, 4, 128], strides = [1, 1, 1, 1]} : vector<2x6x6x128xbf16> to vector<2x4x4x128xbf16>
    %13 = vector.shape_cast %12 : vector<2x4x4x128xbf16> to vector<32x128xbf16>
    %14 = vector.extract_strided_slice %9 {offsets = [0, 1, 0, 0], sizes = [2, 4, 4, 128], strides = [1, 1, 1, 1]} : vector<2x6x6x128xbf16> to vector<2x4x4x128xbf16>
    %15 = vector.shape_cast %14 : vector<2x4x4x128xbf16> to vector<32x128xbf16>
    %16 = tpu.concatenate %13, %15 in 1 : vector<32x128xbf16>, vector<32x128xbf16> -> vector<32x256xbf16>
    %c0_28 = arith.constant 0 : index
    %c0_29 = arith.constant 0 : index
    %c0_30 = arith.constant 0 : index
    %17 = vector.load %arg2[%c0_28, %c0_29, %c0_30] : memref<6x256x256xbf16, #tpu.memory_space<vmem>>, vector<1x256x256xbf16>
    %18 = vector.shape_cast %17 : vector<1x256x256xbf16> to vector<256x256xbf16>
    %cst_31 = arith.constant dense<0.000000e+00> : vector<32x256xf32>
    %19 = tpu.matmul %16, %18, %cst_31 {dimension_numbers = #tpu.dot_dimension_numbers<[1], [0], [0], [1], [0, 0, 1, 1], [], []>} : vector<32x256xbf16>, vector<256x256xbf16>, vector<32x256xf32> -> vector<32x256xf32>
    %20 = vector.extract_strided_slice %9 {offsets = [0, 0, 1, 0], sizes = [2, 4, 4, 128], strides = [1, 1, 1, 1]} : vector<2x6x6x128xbf16> to vector<2x4x4x128xbf16>
    %21 = vector.shape_cast %20 : vector<2x4x4x128xbf16> to vector<32x128xbf16>
    %22 = vector.extract_strided_slice %9 {offsets = [0, 1, 1, 0], sizes = [2, 4, 4, 128], strides = [1, 1, 1, 1]} : vector<2x6x6x128xbf16> to vector<2x4x4x128xbf16>
    %23 = vector.shape_cast %22 : vector<2x4x4x128xbf16> to vector<32x128xbf16>
    %24 = tpu.concatenate %21, %23 in 1 : vector<32x128xbf16>, vector<32x128xbf16> -> vector<32x256xbf16>
    %c1_32 = arith.constant 1 : index
    %c0_33 = arith.constant 0 : index
    %c0_34 = arith.constant 0 : index
    %25 = vector.load %arg2[%c1_32, %c0_33, %c0_34] : memref<6x256x256xbf16, #tpu.memory_space<vmem>>, vector<1x256x256xbf16>
    %26 = vector.shape_cast %25 : vector<1x256x256xbf16> to vector<256x256xbf16>
    %cst_35 = arith.constant dense<0.000000e+00> : vector<32x256xf32>
    %27 = tpu.matmul %24, %26, %cst_35 {dimension_numbers = #tpu.dot_dimension_numbers<[1], [0], [0], [1], [0, 0, 1, 1], [], []>} : vector<32x256xbf16>, vector<256x256xbf16>, vector<32x256xf32> -> vector<32x256xf32>
    %28 = arith.addf %19, %27 : vector<32x256xf32>
    %29 = vector.extract_strided_slice %9 {offsets = [0, 0, 2, 0], sizes = [2, 4, 4, 128], strides = [1, 1, 1, 1]} : vector<2x6x6x128xbf16> to vector<2x4x4x128xbf16>
    %30 = vector.shape_cast %29 : vector<2x4x4x128xbf16> to vector<32x128xbf16>
    %31 = vector.extract_strided_slice %9 {offsets = [0, 1, 2, 0], sizes = [2, 4, 4, 128], strides = [1, 1, 1, 1]} : vector<2x6x6x128xbf16> to vector<2x4x4x128xbf16>
    %32 = vector.shape_cast %31 : vector<2x4x4x128xbf16> to vector<32x128xbf16>
    %33 = tpu.concatenate %30, %32 in 1 : vector<32x128xbf16>, vector<32x128xbf16> -> vector<32x256xbf16>
    %c2 = arith.constant 2 : index
    %c0_36 = arith.constant 0 : index
    %c0_37 = arith.constant 0 : index
    %34 = vector.load %arg2[%c2, %c0_36, %c0_37] : memref<6x256x256xbf16, #tpu.memory_space<vmem>>, vector<1x256x256xbf16>
    %35 = vector.shape_cast %34 : vector<1x256x256xbf16> to vector<256x256xbf16>
    %cst_38 = arith.constant dense<0.000000e+00> : vector<32x256xf32>
    %36 = tpu.matmul %33, %35, %cst_38 {dimension_numbers = #tpu.dot_dimension_numbers<[1], [0], [0], [1], [0, 0, 1, 1], [], []>} : vector<32x256xbf16>, vector<256x256xbf16>, vector<32x256xf32> -> vector<32x256xf32>
    %37 = arith.addf %28, %36 : vector<32x256xf32>
    %38 = vector.shape_cast %37 : vector<32x256xf32> to vector<2x4x4x256xf32>
    %39 = arith.truncf %38 : vector<2x4x4x256xf32> to vector<2x4x4x256xbf16>
    %c0_39 = arith.constant 0 : index
    %c0_40 = arith.constant 0 : index
    %c0_41 = arith.constant 0 : index
    %c0_42 = arith.constant 0 : index
    %c0_43 = arith.constant 0 : index
    %40 = vector.load %arg5[%c0_39, %c0_40, %c0_41, %c0_42, %c0_43] : memref<2x4x2x4x256xbf16, #tpu.memory_space<vmem>>, vector<2x4x1x4x256xbf16>
    %41 = vector.shape_cast %40 : vector<2x4x1x4x256xbf16> to vector<2x4x4x256xbf16>
    %42 = vector.shape_cast %39 : vector<2x4x4x256xbf16> to vector<2x4x1x4x256xbf16>
    tpu.vector_store %arg5[%c0_39, %c0_40, %c0_41, %c0_42, %c0_43], %42 {strides = array<i32>} : memref<2x4x2x4x256xbf16, #tpu.memory_space<vmem>>, vector<2x4x1x4x256xbf16>,
    %cst_44 = arith.constant dense<0.000000e+00> : vector<256xf32>
    %43 = vector.multi_reduction <add>, %37, %cst_44 [0] : vector<32x256xf32> to vector<256xf32>
    %44 = vector.shape_cast %43 : vector<256xf32> to vector<1x256xf32>
    %45 = arith.addf %10, %44 : vector<1x256xf32>
    %46 = arith.mulf %37, %37 : vector<32x256xf32>
    %cst_45 = arith.constant dense<0.000000e+00> : vector<256xf32>
    %47 = vector.multi_reduction <add>, %46, %cst_45 [0] : vector<32x256xf32> to vector<256xf32>
    %48 = vector.shape_cast %47 : vector<256xf32> to vector<1x256xf32>
    %49 = arith.addf %11, %48 : vector<1x256xf32>
    %50 = vector.extract_strided_slice %9 {offsets = [0, 1, 0, 0], sizes = [2, 4, 4, 128], strides = [1, 1, 1, 1]} : vector<2x6x6x128xbf16> to vector<2x4x4x128xbf16>
    %51 = vector.shape_cast %50 : vector<2x4x4x128xbf16> to vector<32x128xbf16>
    %52 = vector.extract_strided_slice %9 {offsets = [0, 2, 0, 0], sizes = [2, 4, 4, 128], strides = [1, 1, 1, 1]} : vector<2x6x6x128xbf16> to vector<2x4x4x128xbf16>
    %53 = vector.shape_cast %52 : vector<2x4x4x128xbf16> to vector<32x128xbf16>
    %54 = tpu.concatenate %51, %53 in 1 : vector<32x128xbf16>, vector<32x128xbf16> -> vector<32x256xbf16>
    %c3 = arith.constant 3 : index
    %c0_46 = arith.constant 0 : index
    %c0_47 = arith.constant 0 : index
    %55 = vector.load %arg2[%c3, %c0_46, %c0_47] : memref<6x256x256xbf16, #tpu.memory_space<vmem>>, vector<1x256x256xbf16>
    %56 = vector.shape_cast %55 : vector<1x256x256xbf16> to vector<256x256xbf16>
    %cst_48 = arith.constant dense<0.000000e+00> : vector<32x256xf32>
    %57 = tpu.matmul %54, %56, %cst_48 {dimension_numbers = #tpu.dot_dimension_numbers<[1], [0], [0], [1], [0, 0, 1, 1], [], []>} : vector<32x256xbf16>, vector<256x256xbf16>, vector<32x256xf32> -> vector<32x256xf32>
    %58 = vector.extract_strided_slice %9 {offsets = [0, 1, 1, 0], sizes = [2, 4, 4, 128], strides = [1, 1, 1, 1]} : vector<2x6x6x128xbf16> to vector<2x4x4x128xbf16>
    %59 = vector.shape_cast %58 : vector<2x4x4x128xbf16> to vector<32x128xbf16>
    %60 = vector.extract_strided_slice %9 {offsets = [0, 2, 1, 0], sizes = [2, 4, 4, 128], strides = [1, 1, 1, 1]} : vector<2x6x6x128xbf16> to vector<2x4x4x128xbf16>
    %61 = vector.shape_cast %60 : vector<2x4x4x128xbf16> to vector<32x128xbf16>
    %62 = tpu.concatenate %59, %61 in 1 : vector<32x128xbf16>, vector<32x128xbf16> -> vector<32x256xbf16>
    %c4 = arith.constant 4 : index
    %c0_49 = arith.constant 0 : index
    %c0_50 = arith.constant 0 : index
    %63 = vector.load %arg2[%c4, %c0_49, %c0_50] : memref<6x256x256xbf16, #tpu.memory_space<vmem>>, vector<1x256x256xbf16>
    %64 = vector.shape_cast %63 : vector<1x256x256xbf16> to vector<256x256xbf16>
    %cst_51 = arith.constant dense<0.000000e+00> : vector<32x256xf32>
    %65 = tpu.matmul %62, %64, %cst_51 {dimension_numbers = #tpu.dot_dimension_numbers<[1], [0], [0], [1], [0, 0, 1, 1], [], []>} : vector<32x256xbf16>, vector<256x256xbf16>, vector<32x256xf32> -> vector<32x256xf32>
    %66 = arith.addf %57, %65 : vector<32x256xf32>
    %67 = vector.extract_strided_slice %9 {offsets = [0, 1, 2, 0], sizes = [2, 4, 4, 128], strides = [1, 1, 1, 1]} : vector<2x6x6x128xbf16> to vector<2x4x4x128xbf16>
    %68 = vector.shape_cast %67 : vector<2x4x4x128xbf16> to vector<32x128xbf16>
    %69 = vector.extract_strided_slice %9 {offsets = [0, 2, 2, 0], sizes = [2, 4, 4, 128], strides = [1, 1, 1, 1]} : vector<2x6x6x128xbf16> to vector<2x4x4x128xbf16>
    %70 = vector.shape_cast %69 : vector<2x4x4x128xbf16> to vector<32x128xbf16>
    %71 = tpu.concatenate %68, %70 in 1 : vector<32x128xbf16>, vector<32x128xbf16> -> vector<32x256xbf16>
    %c5_52 = arith.constant 5 : index
    %c0_53 = arith.constant 0 : index
    %c0_54 = arith.constant 0 : index
    %72 = vector.load %arg2[%c5_52, %c0_53, %c0_54] : memref<6x256x256xbf16, #tpu.memory_space<vmem>>, vector<1x256x256xbf16>
    %73 = vector.shape_cast %72 : vector<1x256x256xbf16> to vector<256x256xbf16>
    %cst_55 = arith.constant dense<0.000000e+00> : vector<32x256xf32>
    %74 = tpu.matmul %71, %73, %cst_55 {dimension_numbers = #tpu.dot_dimension_numbers<[1], [0], [0], [1], [0, 0, 1, 1], [], []>} : vector<32x256xbf16>, vector<256x256xbf16>, vector<32x256xf32> -> vector<32x256xf32>
    %75 = arith.addf %66, %74 : vector<32x256xf32>
    %76 = vector.shape_cast %75 : vector<32x256xf32> to vector<2x4x4x256xf32>
    %77 = arith.truncf %76 : vector<2x4x4x256xf32> to vector<2x4x4x256xbf16>
    %c0_56 = arith.constant 0 : index
    %c0_57 = arith.constant 0 : index
    %c1_58 = arith.constant 1 : index
    %c0_59 = arith.constant 0 : index
    %c0_60 = arith.constant 0 : index
    %78 = vector.load %arg5[%c0_56, %c0_57, %c1_58, %c0_59, %c0_60] : memref<2x4x2x4x256xbf16, #tpu.memory_space<vmem>>, vector<2x4x1x4x256xbf16>
    %79 = vector.shape_cast %78 : vector<2x4x1x4x256xbf16> to vector<2x4x4x256xbf16>
    %80 = vector.shape_cast %77 : vector<2x4x4x256xbf16> to vector<2x4x1x4x256xbf16>
    tpu.vector_store %arg5[%c0_56, %c0_57, %c1_58, %c0_59, %c0_60], %80 {strides = array<i32>} : memref<2x4x2x4x256xbf16, #tpu.memory_space<vmem>>, vector<2x4x1x4x256xbf16>,
    %cst_61 = arith.constant dense<0.000000e+00> : vector<256xf32>
    %81 = vector.multi_reduction <add>, %75, %cst_61 [0] : vector<32x256xf32> to vector<256xf32>
    %82 = vector.shape_cast %81 : vector<256xf32> to vector<1x256xf32>
    %83 = arith.addf %45, %82 : vector<1x256xf32>
    %84 = arith.mulf %75, %75 : vector<32x256xf32>
    %cst_62 = arith.constant dense<0.000000e+00> : vector<256xf32>
    %85 = vector.multi_reduction <add>, %84, %cst_62 [0] : vector<32x256xf32> to vector<256xf32>
    %86 = vector.shape_cast %85 : vector<256xf32> to vector<1x256xf32>
    %87 = arith.addf %49, %86 : vector<1x256xf32>
    %88 = vector.shape_cast %83 : vector<1x256xf32> to vector<1x1x256xf32>
    %c0_63 = arith.constant 0 : index
    %c0_64 = arith.constant 0 : index
    %c0_65 = arith.constant 0 : index
    %89 = vector.load %arg6[%c0_63, %c0_64, %c0_65] : memref<1x2x256xf32, #tpu.memory_space<vmem>>, vector<1x1x256xf32>
    tpu.vector_store %arg6[%c0_63, %c0_64, %c0_65], %88 {strides = array<i32>} : memref<1x2x256xf32, #tpu.memory_space<vmem>>, vector<1x1x256xf32>,
    %90 = vector.shape_cast %87 : vector<1x256xf32> to vector<1x1x256xf32>
    %c0_66 = arith.constant 0 : index
    %c1_67 = arith.constant 1 : index
    %c0_68 = arith.constant 0 : index
    %91 = vector.load %arg6[%c0_66, %c1_67, %c0_68] : memref<1x2x256xf32, #tpu.memory_space<vmem>>, vector<1x1x256xf32>
    tpu.vector_store %arg6[%c0_66, %c1_67, %c0_68], %90 {strides = array<i32>} : memref<1x2x256xf32, #tpu.memory_space<vmem>>, vector<1x1x256xf32>,
    return
  }
  func.func @transform_0(%arg0: i32) -> (i32, i32, i32, i32) {
    %c0_i32 = arith.constant 0 : i32
    %c0_i32_0 = arith.constant 0 : i32
    %c0_i32_1 = arith.constant 0 : i32
    %c0_i32_2 = arith.constant 0 : i32
    return %arg0, %c0_i32, %c0_i32_0, %c0_i32_1 : i32, i32, i32, i32
  }
  func.func @transform_1(%arg0: i32) -> (i32, i32, i32) {
    %c0_i32 = arith.constant 0 : i32
    %c0_i32_0 = arith.constant 0 : i32
    %c0_i32_1 = arith.constant 0 : i32
    %c0_i32_2 = arith.constant 0 : i32
    return %c0_i32, %c0_i32_0, %c0_i32_1 : i32, i32, i32
  }
  func.func @transform_2(%arg0: i32) -> (i32, i32) {
    %c0_i32 = arith.constant 0 : i32
    %c0_i32_0 = arith.constant 0 : i32
    %c0_i32_1 = arith.constant 0 : i32
    return %c0_i32, %c0_i32_0 : i32, i32
  }
  func.func @transform_3(%arg0: i32) -> (i32, i32) {
    %c0_i32 = arith.constant 0 : i32
    %c0_i32_0 = arith.constant 0 : i32
    %c0_i32_1 = arith.constant 0 : i32
    return %c0_i32, %c0_i32_0 : i32, i32
  }
  func.func @transform_4(%arg0: i32) -> (i32, i32, i32, i32, i32) {
    %c0_i32 = arith.constant 0 : i32
    %c0_i32_0 = arith.constant 0 : i32
    %c0_i32_1 = arith.constant 0 : i32
    %c0_i32_2 = arith.constant 0 : i32
    %c0_i32_3 = arith.constant 0 : i32
    return %arg0, %c0_i32, %c0_i32_0, %c0_i32_1, %c0_i32_2 : i32, i32, i32, i32, i32
  }
  func.func @transform_5(%arg0: i32) -> (i32, i32, i32) {
    %c0_i32 = arith.constant 0 : i32
    %c0_i32_0 = arith.constant 0 : i32
    %c0_i32_1 = arith.constant 0 : i32
    return %arg0, %c0_i32, %c0_i32_0 : i32, i32, i32
  }
}

module attributes {stable_mosaic.version = 11 : i64} {
  func.func @upconv_kernel(%arg0: i32, %arg1: memref<2x8x8x128xbf16, #tpu.memory_space<vmem>>, %arg2: memref<6x256x128xbf16, #tpu.memory_space<vmem>>, %arg3: memref<1x128xf32, #tpu.memory_space<vmem>>, %arg4: memref<1x128xf32, #tpu.memory_space<vmem>>, %arg5: memref<2x8x2x8x128xbf16, #tpu.memory_space<vmem>>, %arg6: memref<1x2x128xf32, #tpu.memory_space<vmem>>, %arg7: memref<2x10x10x128xbf16, #tpu.memory_space<vmem>>) attributes {dimension_semantics = [#tpu.dimension_semantics<parallel>], iteration_bounds = array<i64: 1>, scalar_prefetch = 0 : i64, scratch_operands = 1 : i64, tpu.core_type = #tpu.core_type<tc>, window_params = [{transform_indices = @transform_0, window_bounds = array<i64: 2, 8, 8, 128>}, {pipeline_mode = #tpu.pipeline_mode<synchronous>, transform_indices = @transform_1, window_bounds = array<i64: 6, 256, 128>}, {pipeline_mode = #tpu.pipeline_mode<synchronous>, transform_indices = @transform_2, window_bounds = array<i64: 1, 128>}, {pipeline_mode = #tpu.pipeline_mode<synchronous>, transform_indices = @transform_3, window_bounds = array<i64: 1, 128>}, {transform_indices = @transform_4, window_bounds = array<i64: 2, 8, 2, 8, 128>}, {transform_indices = @transform_5, window_bounds = array<i64: 1, 2, 128>}]} {
    %c0 = arith.constant 0 : index
    %c0_0 = arith.constant 0 : index
    %c0_1 = arith.constant 0 : index
    %c0_2 = arith.constant 0 : index
    %0 = vector.load %arg1[%c0, %c0_0, %c0_1, %c0_2] : memref<2x8x8x128xbf16, #tpu.memory_space<vmem>>, vector<2x8x8x128xbf16>
    %1 = arith.extf %0 : vector<2x8x8x128xbf16> to vector<2x8x8x128xf32>
    %c0_3 = arith.constant 0 : index
    %c0_4 = arith.constant 0 : index
    %2 = vector.load %arg3[%c0_3, %c0_4] : memref<1x128xf32, #tpu.memory_space<vmem>>, vector<1x128xf32>
    %3 = vector.shape_cast %2 : vector<1x128xf32> to vector<1x1x1x128xf32>
    %4 = vector.broadcast %3 : vector<1x1x1x128xf32> to vector<2x8x8x128xf32>
    %5 = arith.mulf %1, %4 : vector<2x8x8x128xf32>
    %c0_5 = arith.constant 0 : index
    %c0_6 = arith.constant 0 : index
    %6 = vector.load %arg4[%c0_5, %c0_6] : memref<1x128xf32, #tpu.memory_space<vmem>>, vector<1x128xf32>
    %7 = vector.shape_cast %6 : vector<1x128xf32> to vector<1x1x1x128xf32>
    %8 = vector.broadcast %7 : vector<1x1x1x128xf32> to vector<2x8x8x128xf32>
    %9 = arith.addf %5, %8 : vector<2x8x8x128xf32>
    %cst = arith.constant 0.000000e+00 : f32
    %10 = vector.broadcast %cst : f32 to vector<2x8x8x128xf32>
    %11 = arith.cmpf oge, %9, %10 : vector<2x8x8x128xf32>
    %cst_7 = arith.constant 2.000000e-01 : f32
    %12 = vector.broadcast %cst_7 : f32 to vector<2x8x8x128xf32>
    %13 = arith.mulf %12, %9 : vector<2x8x8x128xf32>
    %14 = arith.select %11, %9, %13 : vector<2x8x8x128xi1>, vector<2x8x8x128xf32>
    %15 = arith.truncf %14 : vector<2x8x8x128xf32> to vector<2x8x8x128xbf16>
    %cst_8 = arith.constant 0.000000e+00 : bf16
    %16 = vector.broadcast %cst_8 : bf16 to vector<2x1x10x128xbf16>
    %c0_9 = arith.constant 0 : index
    %c0_10 = arith.constant 0 : index
    %c0_11 = arith.constant 0 : index
    %c0_12 = arith.constant 0 : index
    %17 = vector.load %arg7[%c0_9, %c0_10, %c0_11, %c0_12] : memref<2x10x10x128xbf16, #tpu.memory_space<vmem>>, vector<2x1x10x128xbf16>
    tpu.vector_store %arg7[%c0_9, %c0_10, %c0_11, %c0_12], %16 {strides = array<i32>} : memref<2x10x10x128xbf16, #tpu.memory_space<vmem>>, vector<2x1x10x128xbf16>,
    %c0_13 = arith.constant 0 : index
    %c9 = arith.constant 9 : index
    %c0_14 = arith.constant 0 : index
    %c0_15 = arith.constant 0 : index
    %18 = vector.load %arg7[%c0_13, %c9, %c0_14, %c0_15] : memref<2x10x10x128xbf16, #tpu.memory_space<vmem>>, vector<2x1x10x128xbf16>
    tpu.vector_store %arg7[%c0_13, %c9, %c0_14, %c0_15], %16 {strides = array<i32>} : memref<2x10x10x128xbf16, #tpu.memory_space<vmem>>, vector<2x1x10x128xbf16>,
    %cst_16 = arith.constant 0.000000e+00 : bf16
    %19 = vector.broadcast %cst_16 : bf16 to vector<2x8x1x128xbf16>
    %c0_17 = arith.constant 0 : index
    %c1 = arith.constant 1 : index
    %c0_18 = arith.constant 0 : index
    %c0_19 = arith.constant 0 : index
    %20 = vector.load %arg7[%c0_17, %c1, %c0_18, %c0_19] : memref<2x10x10x128xbf16, #tpu.memory_space<vmem>>, vector<2x8x1x128xbf16>
    tpu.vector_store %arg7[%c0_17, %c1, %c0_18, %c0_19], %19 {strides = array<i32>} : memref<2x10x10x128xbf16, #tpu.memory_space<vmem>>, vector<2x8x1x128xbf16>,
    %c0_20 = arith.constant 0 : index
    %c1_21 = arith.constant 1 : index
    %c9_22 = arith.constant 9 : index
    %c0_23 = arith.constant 0 : index
    %21 = vector.load %arg7[%c0_20, %c1_21, %c9_22, %c0_23] : memref<2x10x10x128xbf16, #tpu.memory_space<vmem>>, vector<2x8x1x128xbf16>
    tpu.vector_store %arg7[%c0_20, %c1_21, %c9_22, %c0_23], %19 {strides = array<i32>} : memref<2x10x10x128xbf16, #tpu.memory_space<vmem>>, vector<2x8x1x128xbf16>,
    %c0_24 = arith.constant 0 : index
    %c1_25 = arith.constant 1 : index
    %c1_26 = arith.constant 1 : index
    %c0_27 = arith.constant 0 : index
    %22 = vector.load %arg7[%c0_24, %c1_25, %c1_26, %c0_27] : memref<2x10x10x128xbf16, #tpu.memory_space<vmem>>, vector<2x8x8x128xbf16>
    tpu.vector_store %arg7[%c0_24, %c1_25, %c1_26, %c0_27], %15 {strides = array<i32>} : memref<2x10x10x128xbf16, #tpu.memory_space<vmem>>, vector<2x8x8x128xbf16>,
    %c0_28 = arith.constant 0 : index
    %c0_29 = arith.constant 0 : index
    %c0_30 = arith.constant 0 : index
    %c0_31 = arith.constant 0 : index
    %23 = vector.load %arg7[%c0_28, %c0_29, %c0_30, %c0_31] : memref<2x10x10x128xbf16, #tpu.memory_space<vmem>>, vector<2x10x10x128xbf16>
    %cst_32 = arith.constant 0.000000e+00 : f32
    %24 = vector.broadcast %cst_32 : f32 to vector<1x128xf32>
    %cst_33 = arith.constant 0.000000e+00 : f32
    %25 = vector.broadcast %cst_33 : f32 to vector<1x128xf32>
    %26 = vector.extract_strided_slice %23 {offsets = [0, 0, 0, 0], sizes = [2, 8, 8, 128], strides = [1, 1, 1, 1]} : vector<2x10x10x128xbf16> to vector<2x8x8x128xbf16>
    %27 = vector.shape_cast %26 : vector<2x8x8x128xbf16> to vector<128x128xbf16>
    %28 = vector.extract_strided_slice %23 {offsets = [0, 1, 0, 0], sizes = [2, 8, 8, 128], strides = [1, 1, 1, 1]} : vector<2x10x10x128xbf16> to vector<2x8x8x128xbf16>
    %29 = vector.shape_cast %28 : vector<2x8x8x128xbf16> to vector<128x128xbf16>
    %30 = tpu.concatenate %27, %29 in 1 : vector<128x128xbf16>, vector<128x128xbf16> -> vector<128x256xbf16>
    %c0_34 = arith.constant 0 : index
    %c0_35 = arith.constant 0 : index
    %c0_36 = arith.constant 0 : index
    %31 = vector.load %arg2[%c0_34, %c0_35, %c0_36] : memref<6x256x128xbf16, #tpu.memory_space<vmem>>, vector<1x256x128xbf16>
    %32 = vector.shape_cast %31 : vector<1x256x128xbf16> to vector<256x128xbf16>
    %cst_37 = arith.constant dense<0.000000e+00> : vector<128x128xf32>
    %33 = tpu.matmul %30, %32, %cst_37 {dimension_numbers = #tpu.dot_dimension_numbers<[1], [0], [0], [1], [0, 0, 1, 1], [], []>} : vector<128x256xbf16>, vector<256x128xbf16>, vector<128x128xf32> -> vector<128x128xf32>
    %34 = vector.extract_strided_slice %23 {offsets = [0, 0, 1, 0], sizes = [2, 8, 8, 128], strides = [1, 1, 1, 1]} : vector<2x10x10x128xbf16> to vector<2x8x8x128xbf16>
    %35 = vector.shape_cast %34 : vector<2x8x8x128xbf16> to vector<128x128xbf16>
    %36 = vector.extract_strided_slice %23 {offsets = [0, 1, 1, 0], sizes = [2, 8, 8, 128], strides = [1, 1, 1, 1]} : vector<2x10x10x128xbf16> to vector<2x8x8x128xbf16>
    %37 = vector.shape_cast %36 : vector<2x8x8x128xbf16> to vector<128x128xbf16>
    %38 = tpu.concatenate %35, %37 in 1 : vector<128x128xbf16>, vector<128x128xbf16> -> vector<128x256xbf16>
    %c1_38 = arith.constant 1 : index
    %c0_39 = arith.constant 0 : index
    %c0_40 = arith.constant 0 : index
    %39 = vector.load %arg2[%c1_38, %c0_39, %c0_40] : memref<6x256x128xbf16, #tpu.memory_space<vmem>>, vector<1x256x128xbf16>
    %40 = vector.shape_cast %39 : vector<1x256x128xbf16> to vector<256x128xbf16>
    %cst_41 = arith.constant dense<0.000000e+00> : vector<128x128xf32>
    %41 = tpu.matmul %38, %40, %cst_41 {dimension_numbers = #tpu.dot_dimension_numbers<[1], [0], [0], [1], [0, 0, 1, 1], [], []>} : vector<128x256xbf16>, vector<256x128xbf16>, vector<128x128xf32> -> vector<128x128xf32>
    %42 = arith.addf %33, %41 : vector<128x128xf32>
    %43 = vector.extract_strided_slice %23 {offsets = [0, 0, 2, 0], sizes = [2, 8, 8, 128], strides = [1, 1, 1, 1]} : vector<2x10x10x128xbf16> to vector<2x8x8x128xbf16>
    %44 = vector.shape_cast %43 : vector<2x8x8x128xbf16> to vector<128x128xbf16>
    %45 = vector.extract_strided_slice %23 {offsets = [0, 1, 2, 0], sizes = [2, 8, 8, 128], strides = [1, 1, 1, 1]} : vector<2x10x10x128xbf16> to vector<2x8x8x128xbf16>
    %46 = vector.shape_cast %45 : vector<2x8x8x128xbf16> to vector<128x128xbf16>
    %47 = tpu.concatenate %44, %46 in 1 : vector<128x128xbf16>, vector<128x128xbf16> -> vector<128x256xbf16>
    %c2 = arith.constant 2 : index
    %c0_42 = arith.constant 0 : index
    %c0_43 = arith.constant 0 : index
    %48 = vector.load %arg2[%c2, %c0_42, %c0_43] : memref<6x256x128xbf16, #tpu.memory_space<vmem>>, vector<1x256x128xbf16>
    %49 = vector.shape_cast %48 : vector<1x256x128xbf16> to vector<256x128xbf16>
    %cst_44 = arith.constant dense<0.000000e+00> : vector<128x128xf32>
    %50 = tpu.matmul %47, %49, %cst_44 {dimension_numbers = #tpu.dot_dimension_numbers<[1], [0], [0], [1], [0, 0, 1, 1], [], []>} : vector<128x256xbf16>, vector<256x128xbf16>, vector<128x128xf32> -> vector<128x128xf32>
    %51 = arith.addf %42, %50 : vector<128x128xf32>
    %52 = vector.shape_cast %51 : vector<128x128xf32> to vector<2x8x8x128xf32>
    %53 = arith.truncf %52 : vector<2x8x8x128xf32> to vector<2x8x8x128xbf16>
    %c0_45 = arith.constant 0 : index
    %c0_46 = arith.constant 0 : index
    %c0_47 = arith.constant 0 : index
    %c0_48 = arith.constant 0 : index
    %c0_49 = arith.constant 0 : index
    %54 = vector.load %arg5[%c0_45, %c0_46, %c0_47, %c0_48, %c0_49] : memref<2x8x2x8x128xbf16, #tpu.memory_space<vmem>>, vector<2x8x1x8x128xbf16>
    %55 = vector.shape_cast %54 : vector<2x8x1x8x128xbf16> to vector<2x8x8x128xbf16>
    %56 = vector.shape_cast %53 : vector<2x8x8x128xbf16> to vector<2x8x1x8x128xbf16>
    tpu.vector_store %arg5[%c0_45, %c0_46, %c0_47, %c0_48, %c0_49], %56 {strides = array<i32>} : memref<2x8x2x8x128xbf16, #tpu.memory_space<vmem>>, vector<2x8x1x8x128xbf16>,
    %cst_50 = arith.constant dense<0.000000e+00> : vector<128xf32>
    %57 = vector.multi_reduction <add>, %51, %cst_50 [0] : vector<128x128xf32> to vector<128xf32>
    %58 = vector.shape_cast %57 : vector<128xf32> to vector<1x128xf32>
    %59 = arith.addf %24, %58 : vector<1x128xf32>
    %60 = arith.mulf %51, %51 : vector<128x128xf32>
    %cst_51 = arith.constant dense<0.000000e+00> : vector<128xf32>
    %61 = vector.multi_reduction <add>, %60, %cst_51 [0] : vector<128x128xf32> to vector<128xf32>
    %62 = vector.shape_cast %61 : vector<128xf32> to vector<1x128xf32>
    %63 = arith.addf %25, %62 : vector<1x128xf32>
    %64 = vector.extract_strided_slice %23 {offsets = [0, 1, 0, 0], sizes = [2, 8, 8, 128], strides = [1, 1, 1, 1]} : vector<2x10x10x128xbf16> to vector<2x8x8x128xbf16>
    %65 = vector.shape_cast %64 : vector<2x8x8x128xbf16> to vector<128x128xbf16>
    %66 = vector.extract_strided_slice %23 {offsets = [0, 2, 0, 0], sizes = [2, 8, 8, 128], strides = [1, 1, 1, 1]} : vector<2x10x10x128xbf16> to vector<2x8x8x128xbf16>
    %67 = vector.shape_cast %66 : vector<2x8x8x128xbf16> to vector<128x128xbf16>
    %68 = tpu.concatenate %65, %67 in 1 : vector<128x128xbf16>, vector<128x128xbf16> -> vector<128x256xbf16>
    %c3 = arith.constant 3 : index
    %c0_52 = arith.constant 0 : index
    %c0_53 = arith.constant 0 : index
    %69 = vector.load %arg2[%c3, %c0_52, %c0_53] : memref<6x256x128xbf16, #tpu.memory_space<vmem>>, vector<1x256x128xbf16>
    %70 = vector.shape_cast %69 : vector<1x256x128xbf16> to vector<256x128xbf16>
    %cst_54 = arith.constant dense<0.000000e+00> : vector<128x128xf32>
    %71 = tpu.matmul %68, %70, %cst_54 {dimension_numbers = #tpu.dot_dimension_numbers<[1], [0], [0], [1], [0, 0, 1, 1], [], []>} : vector<128x256xbf16>, vector<256x128xbf16>, vector<128x128xf32> -> vector<128x128xf32>
    %72 = vector.extract_strided_slice %23 {offsets = [0, 1, 1, 0], sizes = [2, 8, 8, 128], strides = [1, 1, 1, 1]} : vector<2x10x10x128xbf16> to vector<2x8x8x128xbf16>
    %73 = vector.shape_cast %72 : vector<2x8x8x128xbf16> to vector<128x128xbf16>
    %74 = vector.extract_strided_slice %23 {offsets = [0, 2, 1, 0], sizes = [2, 8, 8, 128], strides = [1, 1, 1, 1]} : vector<2x10x10x128xbf16> to vector<2x8x8x128xbf16>
    %75 = vector.shape_cast %74 : vector<2x8x8x128xbf16> to vector<128x128xbf16>
    %76 = tpu.concatenate %73, %75 in 1 : vector<128x128xbf16>, vector<128x128xbf16> -> vector<128x256xbf16>
    %c4 = arith.constant 4 : index
    %c0_55 = arith.constant 0 : index
    %c0_56 = arith.constant 0 : index
    %77 = vector.load %arg2[%c4, %c0_55, %c0_56] : memref<6x256x128xbf16, #tpu.memory_space<vmem>>, vector<1x256x128xbf16>
    %78 = vector.shape_cast %77 : vector<1x256x128xbf16> to vector<256x128xbf16>
    %cst_57 = arith.constant dense<0.000000e+00> : vector<128x128xf32>
    %79 = tpu.matmul %76, %78, %cst_57 {dimension_numbers = #tpu.dot_dimension_numbers<[1], [0], [0], [1], [0, 0, 1, 1], [], []>} : vector<128x256xbf16>, vector<256x128xbf16>, vector<128x128xf32> -> vector<128x128xf32>
    %80 = arith.addf %71, %79 : vector<128x128xf32>
    %81 = vector.extract_strided_slice %23 {offsets = [0, 1, 2, 0], sizes = [2, 8, 8, 128], strides = [1, 1, 1, 1]} : vector<2x10x10x128xbf16> to vector<2x8x8x128xbf16>
    %82 = vector.shape_cast %81 : vector<2x8x8x128xbf16> to vector<128x128xbf16>
    %83 = vector.extract_strided_slice %23 {offsets = [0, 2, 2, 0], sizes = [2, 8, 8, 128], strides = [1, 1, 1, 1]} : vector<2x10x10x128xbf16> to vector<2x8x8x128xbf16>
    %84 = vector.shape_cast %83 : vector<2x8x8x128xbf16> to vector<128x128xbf16>
    %85 = tpu.concatenate %82, %84 in 1 : vector<128x128xbf16>, vector<128x128xbf16> -> vector<128x256xbf16>
    %c5 = arith.constant 5 : index
    %c0_58 = arith.constant 0 : index
    %c0_59 = arith.constant 0 : index
    %86 = vector.load %arg2[%c5, %c0_58, %c0_59] : memref<6x256x128xbf16, #tpu.memory_space<vmem>>, vector<1x256x128xbf16>
    %87 = vector.shape_cast %86 : vector<1x256x128xbf16> to vector<256x128xbf16>
    %cst_60 = arith.constant dense<0.000000e+00> : vector<128x128xf32>
    %88 = tpu.matmul %85, %87, %cst_60 {dimension_numbers = #tpu.dot_dimension_numbers<[1], [0], [0], [1], [0, 0, 1, 1], [], []>} : vector<128x256xbf16>, vector<256x128xbf16>, vector<128x128xf32> -> vector<128x128xf32>
    %89 = arith.addf %80, %88 : vector<128x128xf32>
    %90 = vector.shape_cast %89 : vector<128x128xf32> to vector<2x8x8x128xf32>
    %91 = arith.truncf %90 : vector<2x8x8x128xf32> to vector<2x8x8x128xbf16>
    %c0_61 = arith.constant 0 : index
    %c0_62 = arith.constant 0 : index
    %c1_63 = arith.constant 1 : index
    %c0_64 = arith.constant 0 : index
    %c0_65 = arith.constant 0 : index
    %92 = vector.load %arg5[%c0_61, %c0_62, %c1_63, %c0_64, %c0_65] : memref<2x8x2x8x128xbf16, #tpu.memory_space<vmem>>, vector<2x8x1x8x128xbf16>
    %93 = vector.shape_cast %92 : vector<2x8x1x8x128xbf16> to vector<2x8x8x128xbf16>
    %94 = vector.shape_cast %91 : vector<2x8x8x128xbf16> to vector<2x8x1x8x128xbf16>
    tpu.vector_store %arg5[%c0_61, %c0_62, %c1_63, %c0_64, %c0_65], %94 {strides = array<i32>} : memref<2x8x2x8x128xbf16, #tpu.memory_space<vmem>>, vector<2x8x1x8x128xbf16>,
    %cst_66 = arith.constant dense<0.000000e+00> : vector<128xf32>
    %95 = vector.multi_reduction <add>, %89, %cst_66 [0] : vector<128x128xf32> to vector<128xf32>
    %96 = vector.shape_cast %95 : vector<128xf32> to vector<1x128xf32>
    %97 = arith.addf %59, %96 : vector<1x128xf32>
    %98 = arith.mulf %89, %89 : vector<128x128xf32>
    %cst_67 = arith.constant dense<0.000000e+00> : vector<128xf32>
    %99 = vector.multi_reduction <add>, %98, %cst_67 [0] : vector<128x128xf32> to vector<128xf32>
    %100 = vector.shape_cast %99 : vector<128xf32> to vector<1x128xf32>
    %101 = arith.addf %63, %100 : vector<1x128xf32>
    %102 = vector.shape_cast %97 : vector<1x128xf32> to vector<1x1x128xf32>
    %c0_68 = arith.constant 0 : index
    %c0_69 = arith.constant 0 : index
    %c0_70 = arith.constant 0 : index
    %103 = vector.load %arg6[%c0_68, %c0_69, %c0_70] : memref<1x2x128xf32, #tpu.memory_space<vmem>>, vector<1x1x128xf32>
    tpu.vector_store %arg6[%c0_68, %c0_69, %c0_70], %102 {strides = array<i32>} : memref<1x2x128xf32, #tpu.memory_space<vmem>>, vector<1x1x128xf32>,
    %104 = vector.shape_cast %101 : vector<1x128xf32> to vector<1x1x128xf32>
    %c0_71 = arith.constant 0 : index
    %c1_72 = arith.constant 1 : index
    %c0_73 = arith.constant 0 : index
    %105 = vector.load %arg6[%c0_71, %c1_72, %c0_73] : memref<1x2x128xf32, #tpu.memory_space<vmem>>, vector<1x1x128xf32>
    tpu.vector_store %arg6[%c0_71, %c1_72, %c0_73], %104 {strides = array<i32>} : memref<1x2x128xf32, #tpu.memory_space<vmem>>, vector<1x1x128xf32>,
    return
  }
  func.func @transform_0(%arg0: i32) -> (i32, i32, i32, i32) {
    %c0_i32 = arith.constant 0 : i32
    %c0_i32_0 = arith.constant 0 : i32
    %c0_i32_1 = arith.constant 0 : i32
    %c0_i32_2 = arith.constant 0 : i32
    return %arg0, %c0_i32, %c0_i32_0, %c0_i32_1 : i32, i32, i32, i32
  }
  func.func @transform_1(%arg0: i32) -> (i32, i32, i32) {
    %c0_i32 = arith.constant 0 : i32
    %c0_i32_0 = arith.constant 0 : i32
    %c0_i32_1 = arith.constant 0 : i32
    %c0_i32_2 = arith.constant 0 : i32
    return %c0_i32, %c0_i32_0, %c0_i32_1 : i32, i32, i32
  }
  func.func @transform_2(%arg0: i32) -> (i32, i32) {
    %c0_i32 = arith.constant 0 : i32
    %c0_i32_0 = arith.constant 0 : i32
    %c0_i32_1 = arith.constant 0 : i32
    return %c0_i32, %c0_i32_0 : i32, i32
  }
  func.func @transform_3(%arg0: i32) -> (i32, i32) {
    %c0_i32 = arith.constant 0 : i32
    %c0_i32_0 = arith.constant 0 : i32
    %c0_i32_1 = arith.constant 0 : i32
    return %c0_i32, %c0_i32_0 : i32, i32
  }
  func.func @transform_4(%arg0: i32) -> (i32, i32, i32, i32, i32) {
    %c0_i32 = arith.constant 0 : i32
    %c0_i32_0 = arith.constant 0 : i32
    %c0_i32_1 = arith.constant 0 : i32
    %c0_i32_2 = arith.constant 0 : i32
    %c0_i32_3 = arith.constant 0 : i32
    return %arg0, %c0_i32, %c0_i32_0, %c0_i32_1, %c0_i32_2 : i32, i32, i32, i32, i32
  }
  func.func @transform_5(%arg0: i32) -> (i32, i32, i32) {
    %c0_i32 = arith.constant 0 : i32
    %c0_i32_0 = arith.constant 0 : i32
    %c0_i32_1 = arith.constant 0 : i32
    return %arg0, %c0_i32, %c0_i32_0 : i32, i32, i32
  }
}

module attributes {stable_mosaic.version = 11 : i64} {
  func.func @conv_tanh_kernel(%arg0: i32, %arg1: memref<1x16x16x64xbf16, #tpu.memory_space<vmem>>, %arg2: memref<5x128x128xbf16, #tpu.memory_space<vmem>>, %arg3: memref<1x128xf32, #tpu.memory_space<vmem>>, %arg4: memref<1x64xf32, #tpu.memory_space<vmem>>, %arg5: memref<1x64xf32, #tpu.memory_space<vmem>>, %arg6: memref<1x16x16x128xbf16, #tpu.memory_space<vmem>>, %arg7: memref<1x18x18x64xbf16, #tpu.memory_space<vmem>>) attributes {dimension_semantics = [#tpu.dimension_semantics<parallel>], iteration_bounds = array<i64: 2>, scalar_prefetch = 0 : i64, scratch_operands = 1 : i64, tpu.core_type = #tpu.core_type<tc>, window_params = [{transform_indices = @transform_0, window_bounds = array<i64: 1, 16, 16, 64>}, {pipeline_mode = #tpu.pipeline_mode<synchronous>, transform_indices = @transform_1, window_bounds = array<i64: 5, 128, 128>}, {pipeline_mode = #tpu.pipeline_mode<synchronous>, transform_indices = @transform_2, window_bounds = array<i64: 1, 128>}, {pipeline_mode = #tpu.pipeline_mode<synchronous>, transform_indices = @transform_3, window_bounds = array<i64: 1, 64>}, {pipeline_mode = #tpu.pipeline_mode<synchronous>, transform_indices = @transform_4, window_bounds = array<i64: 1, 64>}, {transform_indices = @transform_5, window_bounds = array<i64: 1, 16, 16, 128>}]} {
    %c0 = arith.constant 0 : index
    %c0_0 = arith.constant 0 : index
    %c0_1 = arith.constant 0 : index
    %c0_2 = arith.constant 0 : index
    %0 = vector.load %arg1[%c0, %c0_0, %c0_1, %c0_2] : memref<1x16x16x64xbf16, #tpu.memory_space<vmem>>, vector<1x16x16x64xbf16>
    %1 = arith.extf %0 : vector<1x16x16x64xbf16> to vector<1x16x16x64xf32>
    %c0_3 = arith.constant 0 : index
    %c0_4 = arith.constant 0 : index
    %2 = vector.load %arg4[%c0_3, %c0_4] : memref<1x64xf32, #tpu.memory_space<vmem>>, vector<1x64xf32>
    %3 = vector.shape_cast %2 : vector<1x64xf32> to vector<1x1x1x64xf32>
    %4 = vector.broadcast %3 : vector<1x1x1x64xf32> to vector<1x16x16x64xf32>
    %5 = arith.mulf %1, %4 : vector<1x16x16x64xf32>
    %c0_5 = arith.constant 0 : index
    %c0_6 = arith.constant 0 : index
    %6 = vector.load %arg5[%c0_5, %c0_6] : memref<1x64xf32, #tpu.memory_space<vmem>>, vector<1x64xf32>
    %7 = vector.shape_cast %6 : vector<1x64xf32> to vector<1x1x1x64xf32>
    %8 = vector.broadcast %7 : vector<1x1x1x64xf32> to vector<1x16x16x64xf32>
    %9 = arith.addf %5, %8 : vector<1x16x16x64xf32>
    %cst = arith.constant 0.000000e+00 : f32
    %10 = vector.broadcast %cst : f32 to vector<1x16x16x64xf32>
    %11 = arith.cmpf oge, %9, %10 : vector<1x16x16x64xf32>
    %cst_7 = arith.constant 2.000000e-01 : f32
    %12 = vector.broadcast %cst_7 : f32 to vector<1x16x16x64xf32>
    %13 = arith.mulf %12, %9 : vector<1x16x16x64xf32>
    %14 = arith.select %11, %9, %13 : vector<1x16x16x64xi1>, vector<1x16x16x64xf32>
    %15 = arith.truncf %14 : vector<1x16x16x64xf32> to vector<1x16x16x64xbf16>
    %cst_8 = arith.constant 0.000000e+00 : bf16
    %16 = vector.broadcast %cst_8 : bf16 to vector<1x1x18x64xbf16>
    %c0_9 = arith.constant 0 : index
    %c0_10 = arith.constant 0 : index
    %c0_11 = arith.constant 0 : index
    %c0_12 = arith.constant 0 : index
    %17 = vector.load %arg7[%c0_9, %c0_10, %c0_11, %c0_12] : memref<1x18x18x64xbf16, #tpu.memory_space<vmem>>, vector<1x1x18x64xbf16>
    tpu.vector_store %arg7[%c0_9, %c0_10, %c0_11, %c0_12], %16 {strides = array<i32>} : memref<1x18x18x64xbf16, #tpu.memory_space<vmem>>, vector<1x1x18x64xbf16>,
    %c0_13 = arith.constant 0 : index
    %c17 = arith.constant 17 : index
    %c0_14 = arith.constant 0 : index
    %c0_15 = arith.constant 0 : index
    %18 = vector.load %arg7[%c0_13, %c17, %c0_14, %c0_15] : memref<1x18x18x64xbf16, #tpu.memory_space<vmem>>, vector<1x1x18x64xbf16>
    tpu.vector_store %arg7[%c0_13, %c17, %c0_14, %c0_15], %16 {strides = array<i32>} : memref<1x18x18x64xbf16, #tpu.memory_space<vmem>>, vector<1x1x18x64xbf16>,
    %cst_16 = arith.constant 0.000000e+00 : bf16
    %19 = vector.broadcast %cst_16 : bf16 to vector<1x16x1x64xbf16>
    %c0_17 = arith.constant 0 : index
    %c1 = arith.constant 1 : index
    %c0_18 = arith.constant 0 : index
    %c0_19 = arith.constant 0 : index
    %20 = vector.load %arg7[%c0_17, %c1, %c0_18, %c0_19] : memref<1x18x18x64xbf16, #tpu.memory_space<vmem>>, vector<1x16x1x64xbf16>
    tpu.vector_store %arg7[%c0_17, %c1, %c0_18, %c0_19], %19 {strides = array<i32>} : memref<1x18x18x64xbf16, #tpu.memory_space<vmem>>, vector<1x16x1x64xbf16>,
    %c0_20 = arith.constant 0 : index
    %c1_21 = arith.constant 1 : index
    %c17_22 = arith.constant 17 : index
    %c0_23 = arith.constant 0 : index
    %21 = vector.load %arg7[%c0_20, %c1_21, %c17_22, %c0_23] : memref<1x18x18x64xbf16, #tpu.memory_space<vmem>>, vector<1x16x1x64xbf16>
    tpu.vector_store %arg7[%c0_20, %c1_21, %c17_22, %c0_23], %19 {strides = array<i32>} : memref<1x18x18x64xbf16, #tpu.memory_space<vmem>>, vector<1x16x1x64xbf16>,
    %c0_24 = arith.constant 0 : index
    %c1_25 = arith.constant 1 : index
    %c1_26 = arith.constant 1 : index
    %c0_27 = arith.constant 0 : index
    %22 = vector.load %arg7[%c0_24, %c1_25, %c1_26, %c0_27] : memref<1x18x18x64xbf16, #tpu.memory_space<vmem>>, vector<1x16x16x64xbf16>
    tpu.vector_store %arg7[%c0_24, %c1_25, %c1_26, %c0_27], %15 {strides = array<i32>} : memref<1x18x18x64xbf16, #tpu.memory_space<vmem>>, vector<1x16x16x64xbf16>,
    %c0_28 = arith.constant 0 : index
    %c0_29 = arith.constant 0 : index
    %c0_30 = arith.constant 0 : index
    %c0_31 = arith.constant 0 : index
    %23 = vector.load %arg7[%c0_28, %c0_29, %c0_30, %c0_31] : memref<1x18x18x64xbf16, #tpu.memory_space<vmem>>, vector<1x18x18x64xbf16>
    %24 = vector.extract_strided_slice %23 {offsets = [0, 0, 0, 0], sizes = [1, 16, 16, 64], strides = [1, 1, 1, 1]} : vector<1x18x18x64xbf16> to vector<1x16x16x64xbf16>
    %25 = vector.shape_cast %24 : vector<1x16x16x64xbf16> to vector<256x64xbf16>
    %26 = vector.extract_strided_slice %23 {offsets = [0, 1, 0, 0], sizes = [1, 16, 16, 64], strides = [1, 1, 1, 1]} : vector<1x18x18x64xbf16> to vector<1x16x16x64xbf16>
    %27 = vector.shape_cast %26 : vector<1x16x16x64xbf16> to vector<256x64xbf16>
    %28 = tpu.concatenate %25, %27 in 1 : vector<256x64xbf16>, vector<256x64xbf16> -> vector<256x128xbf16>
    %c0_32 = arith.constant 0 : index
    %c0_33 = arith.constant 0 : index
    %c0_34 = arith.constant 0 : index
    %29 = vector.load %arg2[%c0_32, %c0_33, %c0_34] : memref<5x128x128xbf16, #tpu.memory_space<vmem>>, vector<1x128x128xbf16>
    %30 = vector.shape_cast %29 : vector<1x128x128xbf16> to vector<128x128xbf16>
    %cst_35 = arith.constant dense<0.000000e+00> : vector<256x128xf32>
    %31 = tpu.matmul %28, %30, %cst_35 {dimension_numbers = #tpu.dot_dimension_numbers<[1], [0], [0], [1], [0, 0, 1, 1], [], []>} : vector<256x128xbf16>, vector<128x128xbf16>, vector<256x128xf32> -> vector<256x128xf32>
    %32 = vector.extract_strided_slice %23 {offsets = [0, 0, 1, 0], sizes = [1, 16, 16, 64], strides = [1, 1, 1, 1]} : vector<1x18x18x64xbf16> to vector<1x16x16x64xbf16>
    %33 = vector.shape_cast %32 : vector<1x16x16x64xbf16> to vector<256x64xbf16>
    %34 = vector.extract_strided_slice %23 {offsets = [0, 1, 1, 0], sizes = [1, 16, 16, 64], strides = [1, 1, 1, 1]} : vector<1x18x18x64xbf16> to vector<1x16x16x64xbf16>
    %35 = vector.shape_cast %34 : vector<1x16x16x64xbf16> to vector<256x64xbf16>
    %36 = tpu.concatenate %33, %35 in 1 : vector<256x64xbf16>, vector<256x64xbf16> -> vector<256x128xbf16>
    %c1_36 = arith.constant 1 : index
    %c0_37 = arith.constant 0 : index
    %c0_38 = arith.constant 0 : index
    %37 = vector.load %arg2[%c1_36, %c0_37, %c0_38] : memref<5x128x128xbf16, #tpu.memory_space<vmem>>, vector<1x128x128xbf16>
    %38 = vector.shape_cast %37 : vector<1x128x128xbf16> to vector<128x128xbf16>
    %cst_39 = arith.constant dense<0.000000e+00> : vector<256x128xf32>
    %39 = tpu.matmul %36, %38, %cst_39 {dimension_numbers = #tpu.dot_dimension_numbers<[1], [0], [0], [1], [0, 0, 1, 1], [], []>} : vector<256x128xbf16>, vector<128x128xbf16>, vector<256x128xf32> -> vector<256x128xf32>
    %40 = arith.addf %31, %39 : vector<256x128xf32>
    %41 = vector.extract_strided_slice %23 {offsets = [0, 0, 2, 0], sizes = [1, 16, 16, 64], strides = [1, 1, 1, 1]} : vector<1x18x18x64xbf16> to vector<1x16x16x64xbf16>
    %42 = vector.shape_cast %41 : vector<1x16x16x64xbf16> to vector<256x64xbf16>
    %43 = vector.extract_strided_slice %23 {offsets = [0, 1, 2, 0], sizes = [1, 16, 16, 64], strides = [1, 1, 1, 1]} : vector<1x18x18x64xbf16> to vector<1x16x16x64xbf16>
    %44 = vector.shape_cast %43 : vector<1x16x16x64xbf16> to vector<256x64xbf16>
    %45 = tpu.concatenate %42, %44 in 1 : vector<256x64xbf16>, vector<256x64xbf16> -> vector<256x128xbf16>
    %c2 = arith.constant 2 : index
    %c0_40 = arith.constant 0 : index
    %c0_41 = arith.constant 0 : index
    %46 = vector.load %arg2[%c2, %c0_40, %c0_41] : memref<5x128x128xbf16, #tpu.memory_space<vmem>>, vector<1x128x128xbf16>
    %47 = vector.shape_cast %46 : vector<1x128x128xbf16> to vector<128x128xbf16>
    %cst_42 = arith.constant dense<0.000000e+00> : vector<256x128xf32>
    %48 = tpu.matmul %45, %47, %cst_42 {dimension_numbers = #tpu.dot_dimension_numbers<[1], [0], [0], [1], [0, 0, 1, 1], [], []>} : vector<256x128xbf16>, vector<128x128xbf16>, vector<256x128xf32> -> vector<256x128xf32>
    %49 = arith.addf %40, %48 : vector<256x128xf32>
    %50 = vector.extract_strided_slice %23 {offsets = [0, 2, 0, 0], sizes = [1, 16, 16, 64], strides = [1, 1, 1, 1]} : vector<1x18x18x64xbf16> to vector<1x16x16x64xbf16>
    %51 = vector.shape_cast %50 : vector<1x16x16x64xbf16> to vector<256x64xbf16>
    %52 = vector.extract_strided_slice %23 {offsets = [0, 2, 1, 0], sizes = [1, 16, 16, 64], strides = [1, 1, 1, 1]} : vector<1x18x18x64xbf16> to vector<1x16x16x64xbf16>
    %53 = vector.shape_cast %52 : vector<1x16x16x64xbf16> to vector<256x64xbf16>
    %54 = tpu.concatenate %51, %53 in 1 : vector<256x64xbf16>, vector<256x64xbf16> -> vector<256x128xbf16>
    %c3 = arith.constant 3 : index
    %c0_43 = arith.constant 0 : index
    %c0_44 = arith.constant 0 : index
    %55 = vector.load %arg2[%c3, %c0_43, %c0_44] : memref<5x128x128xbf16, #tpu.memory_space<vmem>>, vector<1x128x128xbf16>
    %56 = vector.shape_cast %55 : vector<1x128x128xbf16> to vector<128x128xbf16>
    %cst_45 = arith.constant dense<0.000000e+00> : vector<256x128xf32>
    %57 = tpu.matmul %54, %56, %cst_45 {dimension_numbers = #tpu.dot_dimension_numbers<[1], [0], [0], [1], [0, 0, 1, 1], [], []>} : vector<256x128xbf16>, vector<128x128xbf16>, vector<256x128xf32> -> vector<256x128xf32>
    %58 = arith.addf %49, %57 : vector<256x128xf32>
    %59 = vector.extract_strided_slice %23 {offsets = [0, 2, 2, 0], sizes = [1, 16, 16, 64], strides = [1, 1, 1, 1]} : vector<1x18x18x64xbf16> to vector<1x16x16x64xbf16>
    %60 = vector.shape_cast %59 : vector<1x16x16x64xbf16> to vector<256x64xbf16>
    %61 = vector.extract_strided_slice %23 {offsets = [0, 2, 2, 0], sizes = [1, 16, 16, 64], strides = [1, 1, 1, 1]} : vector<1x18x18x64xbf16> to vector<1x16x16x64xbf16>
    %62 = vector.shape_cast %61 : vector<1x16x16x64xbf16> to vector<256x64xbf16>
    %63 = tpu.concatenate %60, %62 in 1 : vector<256x64xbf16>, vector<256x64xbf16> -> vector<256x128xbf16>
    %c4 = arith.constant 4 : index
    %c0_46 = arith.constant 0 : index
    %c0_47 = arith.constant 0 : index
    %64 = vector.load %arg2[%c4, %c0_46, %c0_47] : memref<5x128x128xbf16, #tpu.memory_space<vmem>>, vector<1x128x128xbf16>
    %65 = vector.shape_cast %64 : vector<1x128x128xbf16> to vector<128x128xbf16>
    %cst_48 = arith.constant dense<0.000000e+00> : vector<256x128xf32>
    %66 = tpu.matmul %63, %65, %cst_48 {dimension_numbers = #tpu.dot_dimension_numbers<[1], [0], [0], [1], [0, 0, 1, 1], [], []>} : vector<256x128xbf16>, vector<128x128xbf16>, vector<256x128xf32> -> vector<256x128xf32>
    %67 = arith.addf %58, %66 : vector<256x128xf32>
    %c0_49 = arith.constant 0 : index
    %c0_50 = arith.constant 0 : index
    %68 = vector.load %arg3[%c0_49, %c0_50] : memref<1x128xf32, #tpu.memory_space<vmem>>, vector<1x128xf32>
    %69 = vector.broadcast %68 : vector<1x128xf32> to vector<256x128xf32>
    %70 = arith.addf %67, %69 : vector<256x128xf32>
    %71 = math.tanh %70 : vector<256x128xf32>
    %72 = vector.shape_cast %71 : vector<256x128xf32> to vector<1x16x16x128xf32>
    %73 = arith.truncf %72 : vector<1x16x16x128xf32> to vector<1x16x16x128xbf16>
    %c0_51 = arith.constant 0 : index
    %c0_52 = arith.constant 0 : index
    %c0_53 = arith.constant 0 : index
    %c0_54 = arith.constant 0 : index
    %74 = vector.load %arg6[%c0_51, %c0_52, %c0_53, %c0_54] : memref<1x16x16x128xbf16, #tpu.memory_space<vmem>>, vector<1x16x16x128xbf16>
    tpu.vector_store %arg6[%c0_51, %c0_52, %c0_53, %c0_54], %73 {strides = array<i32>} : memref<1x16x16x128xbf16, #tpu.memory_space<vmem>>, vector<1x16x16x128xbf16>,
    return
  }
  func.func @transform_0(%arg0: i32) -> (i32, i32, i32, i32) {
    %c0_i32 = arith.constant 0 : i32
    %c0_i32_0 = arith.constant 0 : i32
    %c0_i32_1 = arith.constant 0 : i32
    %c0_i32_2 = arith.constant 0 : i32
    return %arg0, %c0_i32, %c0_i32_0, %c0_i32_1 : i32, i32, i32, i32
  }
  func.func @transform_1(%arg0: i32) -> (i32, i32, i32) {
    %c0_i32 = arith.constant 0 : i32
    %c0_i32_0 = arith.constant 0 : i32
    %c0_i32_1 = arith.constant 0 : i32
    %c0_i32_2 = arith.constant 0 : i32
    return %c0_i32, %c0_i32_0, %c0_i32_1 : i32, i32, i32
  }
  func.func @transform_2(%arg0: i32) -> (i32, i32) {
    %c0_i32 = arith.constant 0 : i32
    %c0_i32_0 = arith.constant 0 : i32
    %c0_i32_1 = arith.constant 0 : i32
    return %c0_i32, %c0_i32_0 : i32, i32
  }
  func.func @transform_3(%arg0: i32) -> (i32, i32) {
    %c0_i32 = arith.constant 0 : i32
    %c0_i32_0 = arith.constant 0 : i32
    %c0_i32_1 = arith.constant 0 : i32
    return %c0_i32, %c0_i32_0 : i32, i32
  }
  func.func @transform_4(%arg0: i32) -> (i32, i32) {
    %c0_i32 = arith.constant 0 : i32
    %c0_i32_0 = arith.constant 0 : i32
    %c0_i32_1 = arith.constant 0 : i32
    return %c0_i32, %c0_i32_0 : i32, i32
  }
  func.func @transform_5(%arg0: i32) -> (i32, i32, i32, i32) {
    %c0_i32 = arith.constant 0 : i32
    %c0_i32_0 = arith.constant 0 : i32
    %c0_i32_1 = arith.constant 0 : i32
    %c0_i32_2 = arith.constant 0 : i32
    return %arg0, %c0_i32, %c0_i32_0, %c0_i32_1 : i32, i32, i32, i32
  }
}

</mosaic_0001>

<bundles_post_ra>
// kernel: generator_forward.4
= control target key start
LH: loop header
LB: loop body
LE: loop exit
PB: predicated region body
PF: predicated region fallthrough
CT: control target
= control target key end

     0   :  { %vm121_vm0 = vcmask 261120   ;;  %vm445_vm1 = vcmask 1041408   ;;  %s1310_s1 = inlined_call_operand.vmem [shape: f32[32,2048], index: 1, kind: input, shape index: {}]   ;;  %s1311_s0 = inlined_call_operand.vmem [shape: f32[2,32], index: 0, kind: input, shape index: {}]   ;;  %s1312_s2 = inlined_call_operand.vmem [shape: f32[1,2048], index: 2, kind: input, shape index: {}]   ;;  %s1313_s3 = inlined_call_operand.vmem [shape: f32[1,128], index: 3, kind: input, shape index: {}]   ;;  %s1314_s4 = inlined_call_operand.vmem [shape: f32[1,128], index: 4, kind: input, shape index: {}]   ;;  %s1315_s5 = inlined_call_operand.vmem [shape: f32[2,2048], index: 5, kind: output, shape index: {}]  }
   0x1   :  { %v69_v0 = vld [vmem:[%s1310_s1 + $0x180] sm:$0xff]  ;;  %v70_v1 = vld [vmem:[%s1310_s1 + $0x188] sm:$0xff]  ;;  %v71_v2 = vld [vmem:[%s1310_s1 + $0x190] sm:$0xff] }
   0x2   :  { %137 = vmatpush.msra.mxu0 %v69_v0  ;;  %157 = vmatpush.msra.mxu1 %v70_v1  ;;  %v72_v3 = vld [vmem:[%s1310_s1 + $0x198] sm:$0xff]  ;;  %v53_v4 = vld [vmem:[%s1310_s1 + $0x100] sm:$0xff]  ;;  %v54_v5 = vld [vmem:[%s1310_s1 + $0x108] sm:$0xff] }
   0x3   :  { %177 = vmatpush.msra.mxu2 %v71_v2  ;;  %197 = vmatpush.msra.mxu3 %v72_v3  ;;  %v55_v6 = vld [vmem:[%s1310_s1 + $0x110] sm:$0xff]  ;;  %v56_v7 = vld [vmem:[%s1310_s1 + $0x118] sm:$0xff]  ;;  %v37_v8 = vld [vmem:[%s1310_s1 + $0x80] sm:$0xff] }
   0x4   :  { %138 = vmatpush.msra.mxu0 %v53_v4  ;;  %158 = vmatpush.msra.mxu1 %v54_v5  ;;  %v38_v9 = vld [vmem:[%s1310_s1 + $0x88] sm:$0xff]  ;;  %v39_v10 = vld [vmem:[%s1310_s1 + $0x90] sm:$0xff]  ;;  %v40_v11 = vld [vmem:[%s1310_s1 + $0x98] sm:$0xff] }
   0x5   :  { %178 = vmatpush.msra.mxu2 %v55_v6  ;;  %198 = vmatpush.msra.mxu3 %v56_v7  ;;  %v21_v12 = vld [vmem:[%s1310_s1] sm:$0xff]  ;;  %v22_v13 = vld [vmem:[%s1310_s1 + $0x8] sm:$0xff]  ;;  %v23_v14 = vld [vmem:[%s1310_s1 + $0x10] sm:$0xff] }
   0x6   :  { %139 = vmatpush.msra.mxu0 %v37_v8  ;;  %159 = vmatpush.msra.mxu1 %v38_v9  ;;  %v24_v15 = vld [vmem:[%s1310_s1 + $0x18] sm:$0xff]  ;;  %v920_v16 = vld [vmem:[%s1311_s0] sm:$0x3]  ;;  %v75_v17 = vld [vmem:[%s1310_s1 + $0x1b0] sm:$0xff] }
   0x7   :  { %179 = vmatpush.msra.mxu2 %v39_v10  ;;  %199 = vmatpush.msra.mxu3 %v40_v11  ;;  %v73_v18 = vld [vmem:[%s1310_s1 + $0x1a0] sm:$0xff]  ;;  %v74_v19 = vld [vmem:[%s1310_s1 + $0x1a8] sm:$0xff]  ;;  %v76_v20 = vld [vmem:[%s1310_s1 + $0x1b8] sm:$0xff] }
   0x8   :  { %140 = vmatpush.msra.mxu0 %v21_v12  ;;  %160 = vmatpush.msra.mxu1 %v22_v13  ;;  %v59_v21 = vld [vmem:[%s1310_s1 + $0x130] sm:$0xff]  ;;  %v57_v22 = vld [vmem:[%s1310_s1 + $0x120] sm:$0xff]  ;;  %v58_v23 = vld [vmem:[%s1310_s1 + $0x128] sm:$0xff] }
   0x9   :  { %180 = vmatpush.msra.mxu2 %v23_v14  ;;  %200 = vmatpush.msra.mxu3 %v24_v15  ;;  %v60_v24 = vld [vmem:[%s1310_s1 + $0x138] sm:$0xff]  ;;  %v43_v25 = vld [vmem:[%s1310_s1 + $0xb0] sm:$0xff]  ;;  %v41_v26 = vld [vmem:[%s1310_s1 + $0xa0] sm:$0xff] }
   0xa   :  { %817 = vmatmul.msk.f32.vlgmr.msra.gmra.mxu0 %vm121_vm0, %v920_v16  ;;  %818 = vmatmul.msk.f32.vlgmr.msra.gmra.mxu1 %vm121_vm0, %v920_v16  ;;  %v42_v27 = vld [vmem:[%s1310_s1 + $0xa8] sm:$0xff]  ;;  %v44_v28 = vld [vmem:[%s1310_s1 + $0xb8] sm:$0xff]  ;;  %v27_v29 = vld [vmem:[%s1310_s1 + $0x30] sm:$0xff] }
   0xb   :  { %819 = vmatmul.msk.f32.vlgmr.msra.gmra.mxu2 %vm121_vm0, %v920_v16  ;;  %820 = vmatmul.msk.f32.vlgmr.msra.gmra.mxu3 %vm121_vm0, %v920_v16  ;;  %v25_v30 = vld [vmem:[%s1310_s1 + $0x20] sm:$0xff]  ;;  %v26_v31 = vld [vmem:[%s1310_s1 + $0x28] sm:$0xff]  ;;  %v28_v32 = vld [vmem:[%s1310_s1 + $0x38] sm:$0xff] }
   0xc   :  { %257 = vmatpush.msrb.mxu2 %v75_v17  ;;  %217 = vmatpush.msrb.mxu0 %v73_v18  ;;  %v79_v33 = vld [vmem:[%s1310_s1 + $0x1d0] sm:$0xff]  ;;  %v77_v34 = vld [vmem:[%s1310_s1 + $0x1c0] sm:$0xff]  ;;  %v78_v35 = vld [vmem:[%s1310_s1 + $0x1c8] sm:$0xff] }
   0xd   :  { %237 = vmatpush.msrb.mxu1 %v74_v19  ;;  %277 = vmatpush.msrb.mxu3 %v76_v20  ;;  %v80_v36 = vld [vmem:[%s1310_s1 + $0x1d8] sm:$0xff]  ;;  %v63_v37 = vld [vmem:[%s1310_s1 + $0x150] sm:$0xff]  ;;  %v61_v38 = vld [vmem:[%s1310_s1 + $0x140] sm:$0xff] }
   0xe   :  { %258 = vmatpush.msrb.mxu2 %v59_v21  ;;  %218 = vmatpush.msrb.mxu0 %v57_v22  ;;  %v62_v39 = vld [vmem:[%s1310_s1 + $0x148] sm:$0xff]  ;;  %v64_v40 = vld [vmem:[%s1310_s1 + $0x158] sm:$0xff]  ;;  %v47_v41 = vld [vmem:[%s1310_s1 + $0xd0] sm:$0xff] }
   0xf   :  { %238 = vmatpush.msrb.mxu1 %v58_v23  ;;  %278 = vmatpush.msrb.mxu3 %v60_v24  ;;  %v45_v42 = vld [vmem:[%s1310_s1 + $0xc0] sm:$0xff]  ;;  %v46_v43 = vld [vmem:[%s1310_s1 + $0xc8] sm:$0xff]  ;;  %v48_v44 = vld [vmem:[%s1310_s1 + $0xd8] sm:$0xff] }
  0x10   :  { %259 = vmatpush.msrb.mxu2 %v43_v25  ;;  %219 = vmatpush.msrb.mxu0 %v41_v26  ;;  %v31_v45 = vld [vmem:[%s1310_s1 + $0x50] sm:$0xff]  ;;  %v29_v46 = vld [vmem:[%s1310_s1 + $0x40] sm:$0xff]  ;;  %v30_v47 = vld [vmem:[%s1310_s1 + $0x48] sm:$0xff] }
  0x11   :  { %239 = vmatpush.msrb.mxu1 %v42_v27  ;;  %279 = vmatpush.msrb.mxu3 %v44_v28  ;;  %v32_v48 = vld [vmem:[%s1310_s1 + $0x58] sm:$0xff]  ;;  %v83_v49 = vld [vmem:[%s1310_s1 + $0x1f0] sm:$0xff]  ;;  %v81_v50 = vld [vmem:[%s1310_s1 + $0x1e0] sm:$0xff] }
  0x12   :  { %260 = vmatpush.msrb.mxu2 %v27_v29  ;;  %220 = vmatpush.msrb.mxu0 %v25_v30  ;;  %v82_v51 = vld [vmem:[%s1310_s1 + $0x1e8] sm:$0xff]  ;;  %v84_v52 = vld [vmem:[%s1310_s1 + $0x1f8] sm:$0xff]  ;;  %v67_v53 = vld [vmem:[%s1310_s1 + $0x170] sm:$0xff] }
  0x13   :  { %240 = vmatpush.msrb.mxu1 %v26_v31  ;;  %280 = vmatpush.msrb.mxu3 %v28_v32  ;;  %v65_v54 = vld [vmem:[%s1310_s1 + $0x160] sm:$0xff]  ;;  %v66_v55 = vld [vmem:[%s1310_s1 + $0x168] sm:$0xff]  ;;  %v68_v56 = vld [vmem:[%s1310_s1 + $0x178] sm:$0xff] }
  0x14   :  { %821 = vmatmul.msk.f32.vlgmr.msrb.gmra.mxu0 %vm121_vm0, %v920_v16  ;;  %822 = vmatmul.msk.f32.vlgmr.msrb.gmra.mxu1 %vm121_vm0, %v920_v16  ;;  %v51_v57 = vld [vmem:[%s1310_s1 + $0xf0] sm:$0xff]  ;;  %v49_v58 = vld [vmem:[%s1310_s1 + $0xe0] sm:$0xff]  ;;  %v50_v59 = vld [vmem:[%s1310_s1 + $0xe8] sm:$0xff] }
  0x15   :  { %823 = vmatmul.msk.f32.vlgmr.msrb.gmra.mxu2 %vm121_vm0, %v920_v16  ;;  %824 = vmatmul.msk.f32.vlgmr.msrb.gmra.mxu3 %vm121_vm0, %v920_v16  ;;  %v52_v60 = vld [vmem:[%s1310_s1 + $0xf8] sm:$0xff]  ;;  %v35_v61 = vld [vmem:[%s1310_s1 + $0x70] sm:$0xff]  ;;  %v33_v62 = vld [vmem:[%s1310_s1 + $0x60] sm:$0xff] }
  0x16   :  { %337 = vmatpush.msra.mxu2 %v79_v33  ;;  %297 = vmatpush.msra.mxu0 %v77_v34  ;;  %v34_v63 = vld [vmem:[%s1310_s1 + $0x68] sm:$0xff]  ;;  %v36_v0 = vld [vmem:[%s1310_s1 + $0x78] sm:$0xff]  ;;  %v85_v1 = vld [vmem:[%s1312_s2] sm:$0xff] }
  0x17   :  { %317 = vmatpush.msra.mxu1 %v78_v35  ;;  %357 = vmatpush.msra.mxu3 %v80_v36  ;;  %v89_v2 = vperm.slane %v85_v1, 0  ;;  %v90_v3 = vperm.slane %v85_v1, 1  ;;  %v91_v12 = vperm.slane %v85_v1, 2  ;;  %v92_v13 = vperm.slane %v85_v1, 3 }
  0x18   :  { %338 = vmatpush.msra.mxu2 %v63_v37  ;;  %298 = vmatpush.msra.mxu0 %v61_v38  ;;  %v93_v18 = vperm.slane %v85_v1, 4  ;;  %v94_v19 = vperm.slane %v85_v1, 5 }
  0x19   :  { %318 = vmatpush.msra.mxu1 %v62_v39  ;;  %358 = vmatpush.msra.mxu3 %v64_v40  ;;  %v1128_v40 = vld [vmem:[%s1312_s2 + $0x8] sm:$0xff] }
  0x1a   :  { %339 = vmatpush.msra.mxu2 %v47_v41  ;;  %299 = vmatpush.msra.mxu0 %v45_v42 }
  0x1b   :  { %319 = vmatpush.msra.mxu1 %v46_v43  ;;  %359 = vmatpush.msra.mxu3 %v48_v44  ;;  %v95_v43 = vperm.slane %v85_v1, 6  ;;  %v96_v44 = vperm.slane %v85_v1, 7 }
  0x1c   :  { %340 = vmatpush.msra.mxu2 %v31_v45  ;;  %300 = vmatpush.msra.mxu0 %v29_v46 }
  0x1d   :  { %320 = vmatpush.msra.mxu1 %v30_v47  ;;  %360 = vmatpush.msra.mxu3 %v32_v48 }
  0x1e   :  { %825 = vmatmul.msk.f32.vlgmr.msra.gmra.mxu0 %vm121_vm0, %v920_v16  ;;  %826 = vmatmul.msk.f32.vlgmr.msra.gmra.mxu1 %vm121_vm0, %v920_v16 }
  0x1f   :  { %827 = vmatmul.msk.f32.vlgmr.msra.gmra.mxu2 %vm121_vm0, %v920_v16  ;;  %828 = vmatmul.msk.f32.vlgmr.msra.gmra.mxu3 %vm121_vm0, %v920_v16 }
  0x20   :  { %417 = vmatpush.msrb.mxu2 %v83_v49  ;;  %377 = vmatpush.msrb.mxu0 %v81_v50  ;;  %v97_v49 = vperm.slane %v1128_v40, 0  ;;  %v98_v50 = vperm.slane %v1128_v40, 1 }
  0x21   :  { %397 = vmatpush.msrb.mxu1 %v82_v51  ;;  %437 = vmatpush.msrb.mxu3 %v84_v52 }
  0x22   :  { %418 = vmatpush.msrb.mxu2 %v67_v53  ;;  %378 = vmatpush.msrb.mxu0 %v65_v54 }
  0x23   :  { %398 = vmatpush.msrb.mxu1 %v66_v55  ;;  %438 = vmatpush.msrb.mxu3 %v68_v56 }
  0x24   :  { %419 = vmatpush.msrb.mxu2 %v51_v57  ;;  %379 = vmatpush.msrb.mxu0 %v49_v58 }
  0x25   :  { %399 = vmatpush.msrb.mxu1 %v50_v59  ;;  %439 = vmatpush.msrb.mxu3 %v52_v60 }
  0x26   :  { %420 = vmatpush.msrb.mxu2 %v35_v61  ;;  %380 = vmatpush.msrb.mxu0 %v33_v62 }
  0x27   :  { %400 = vmatpush.msrb.mxu1 %v34_v63  ;;  %440 = vmatpush.msrb.mxu3 %v36_v0  ;;  %v99_v63 = vperm.slane %v1128_v40, 2 }
  0x28   :  { %829 = vmatmul.msk.f32.vlgmr.msrb.gmra.mxu0 %vm121_vm0, %v920_v16  ;;  %830 = vmatmul.msk.f32.vlgmr.msrb.gmra.mxu1 %vm121_vm0, %v920_v16 }
  0x29   :  { %831 = vmatmul.msk.f32.vlgmr.msrb.gmra.mxu2 %vm121_vm0, %v920_v16  ;;  %832 = vmatmul.msk.f32.vlgmr.msrb.gmra.mxu3 %vm121_vm0, %v920_v16 }
  0x87   :  { %v142_v4 = vpop.f32.mrf.mxu0  ;;  %v162_v5 = vpop.f32.mrf.mxu1 }
  0x88   :  { %v1101_v6 = vadd.f32 %v142_v4, %v89_v2  ;;  %v1103_v7 = vadd.f32 %v162_v5, %v90_v3 }
  0x8a   :  { %v446_v8 = vsel %vm445_vm1, %v1101_v6, 0.0  ;;  %v454_v9 = vsel %vm445_vm1, %v1103_v7, 0.0 }
  0x8b   :  { %v447_v10 = vrot.slane %v446_v8, 4  ;;  %v455_v11 = vrot.slane %v454_v9, 4 }
  0x8d   :  { %v448_v14 = vadd.f32 %v447_v10, %v446_v8  ;;  %v456_v15 = vadd.f32 %v455_v11, %v454_v9 }
  0x8e   :  { %v182_v16 = vpop.f32.mrf.mxu2  ;;  %v202_v17 = vpop.f32.mrf.mxu3 }
  0x8f   :  { %v449_v20 = vrot.slane %v448_v14, 2  ;;  %v457_v21 = vrot.slane %v456_v15, 2  ;;  %v1109_v22 = vadd.f32 %v182_v16, %v91_v12  ;;  %v1111_v23 = vadd.f32 %v202_v17, %v92_v13 }
  0x91   :  { %v450_v24 = vadd.f32 %v449_v20, %v448_v14  ;;  %v458_v25 = vadd.f32 %v457_v21, %v456_v15  ;;  %v462_v26 = vsel %vm445_vm1, %v1109_v22, 0.0  ;;  %v470_v27 = vsel %vm445_vm1, %v1111_v23, 0.0  ;;  %v222_v28 = vpop.f32.mrf.mxu0  ;;  %v242_v29 = vpop.f32.mrf.mxu1 }
  0x92   :  { %v463_v30 = vrot.slane %v462_v26, 4  ;;  %v471_v31 = vrot.slane %v470_v27, 4  ;;  %v1117_v32 = vadd.f32 %v222_v28, %v93_v18  ;;  %v1119_v33 = vadd.f32 %v242_v29, %v94_v19 }
  0x93   :  { %v451_v34 = vrot.slane %v450_v24, 1  ;;  %v459_v35 = vrot.slane %v458_v25, 1 }
  0x94   :  { %v464_v36 = vadd.f32 %v463_v30, %v462_v26  ;;  %v472_v37 = vadd.f32 %v471_v31, %v470_v27  ;;  %v478_v38 = vsel %vm445_vm1, %v1117_v32, 0.0  ;;  %v486_v39 = vsel %vm445_vm1, %v1119_v33, 0.0 }
  0x95   :  { %v479_v41 = vrot.slane %v478_v38, 4  ;;  %v487_v42 = vrot.slane %v486_v39, 4  ;;  %v452_v51 = vadd.f32 %v451_v34, %v450_v24  ;;  %v460_v52 = vadd.f32 %v459_v35, %v458_v25 }
  0x96   :  { %v465_v45 = vrot.slane %v464_v36, 2  ;;  %v473_v46 = vrot.slane %v472_v37, 2  ;;  %v100_v25 = vperm.slane %v1128_v40, 3  ;;  %v101_v34 = vperm.slane %v1128_v40, 4 }
  0x97   :  { %v480_v47 = vadd.f32 %v479_v41, %v478_v38  ;;  %v488_v48 = vadd.f32 %v487_v42, %v486_v39  ;;  %v461_v8 = vadd.f32 %v460_v52, %v452_v51  ;;  %v838_v35 = vmov 32.0  }
  0x98   :  { %v466_v53 = vadd.f32 %v465_v45, %v464_v36  ;;  %v474_v54 = vadd.f32 %v473_v46, %v472_v37  ;;  %v262_v55 = vpop.f32.mrf.mxu2  ;;  %v282_v56 = vpop.f32.mrf.mxu3  ;;  %834 = vrcp.f32 %v838_v35  ;;  %v102_v46 = vperm.slane %v1128_v40, 5 }
  0x99   :  { %v481_v57 = vrot.slane %v480_v47, 2  ;;  %v489_v58 = vrot.slane %v488_v48, 2  ;;  %v1132_v59 = vadd.f32 %v262_v55, %v95_v43  ;;  %v1134_v60 = vadd.f32 %v282_v56, %v96_v44 }
  0x9a   :  { %v467_v61 = vrot.slane %v466_v53, 1  ;;  %v475_v62 = vrot.slane %v474_v54, 1  ;;  %v103_v56 = vperm.slane %v1128_v40, 6 }
  0x9b   :  { %v482_v0 = vadd.f32 %v481_v57, %v480_v47  ;;  %v490_v1 = vadd.f32 %v489_v58, %v488_v48  ;;  %v494_v2 = vsel %vm445_vm1, %v1132_v59, 0.0  ;;  %v502_v3 = vsel %vm445_vm1, %v1134_v60, 0.0  ;;  %v302_v4 = vpop.f32.mrf.mxu0  ;;  %v322_v5 = vpop.f32.mrf.mxu1 }
  0x9c   :  { %v468_v9 = vadd.f32 %v467_v61, %v466_v53  ;;  %v495_v10 = vrot.slane %v494_v2, 4  ;;  %v503_v11 = vrot.slane %v502_v3, 4  ;;  %v1141_v14 = vadd.f32 %v302_v4, %v97_v49 }
  0x9d   :  { %v483_v12 = vrot.slane %v482_v0, 1  ;;  %v491_v13 = vrot.slane %v490_v1, 1  ;;  %v1143_v15 = vadd.f32 %v322_v5, %v98_v50  ;;  %v476_v17 = vadd.f32 %v475_v62, %v474_v54 }
  0x9e   :  { %v469_v16 = vadd.f32 %v468_v9, %v461_v8  ;;  %v496_v18 = vadd.f32 %v495_v10, %v494_v2  ;;  %v504_v19 = vadd.f32 %v503_v11, %v502_v3  ;;  %v510_v21 = vsel %vm445_vm1, %v1141_v14, 0.0 }
  0x9f   :  { %v484_v20 = vadd.f32 %v483_v12, %v482_v0  ;;  %v518_v24 = vsel %vm445_vm1, %v1143_v15, 0.0  ;;  %v511_v29 = vrot.slane %v510_v21, 4  ;;  %v492_v30 = vadd.f32 %v491_v13, %v490_v1 }
  0xa0   :  { %v477_v26 = vadd.f32 %v476_v17, %v469_v16  ;;  %v497_v27 = vrot.slane %v496_v18, 2  ;;  %v505_v28 = vrot.slane %v504_v19, 2  ;;  %v519_v31 = vrot.slane %v518_v24, 4 }
  0xa1   :  { %v512_v39 = vadd.f32 %v511_v29, %v510_v21  ;;  %v104_v62 = vperm.slane %v1128_v40, 7 }
  0xa2   :  { %v485_v36 = vadd.f32 %v484_v20, %v477_v26  ;;  %v498_v37 = vadd.f32 %v497_v27, %v496_v18  ;;  %v506_v38 = vadd.f32 %v505_v28, %v504_v19  ;;  %v342_v41 = vpop.f32.mrf.mxu2  ;;  %v362_v42 = vpop.f32.mrf.mxu3  ;;  %v520_v43 = vadd.f32 %v519_v31, %v518_v24 }
  0xa3   :  { %v1151_v44 = vadd.f32 %v342_v41, %v99_v63  ;;  %v1153_v45 = vadd.f32 %v362_v42, %v100_v25  ;;  %v513_v50 = vrot.slane %v512_v39, 2  ;;  %v1162_v63 = vpop.eup %834 }
  0xa4   :  { %v493_v47 = vadd.f32 %v492_v30, %v485_v36  ;;  %v499_v48 = vrot.slane %v498_v37, 1  ;;  %v507_v49 = vrot.slane %v506_v38, 1  ;;  %v521_v51 = vrot.slane %v520_v43, 2 }
  0xa5   :  { %v526_v52 = vsel %vm445_vm1, %v1151_v44, 0.0  ;;  %v534_v53 = vsel %vm445_vm1, %v1153_v45, 0.0  ;;  %v382_v54 = vpop.f32.mrf.mxu0  ;;  %v402_v55 = vpop.f32.mrf.mxu1  ;;  %v514_v58 = vadd.f32 %v513_v50, %v512_v39  ;;  %v575_v21 = vmul.f32 32.0, %v1162_v63 }
  0xa6   :  { %v500_v57 = vadd.f32 %v499_v48, %v498_v37  ;;  %v527_v61 = vrot.slane %v526_v52, 4  ;;  %v522_v0 = vadd.f32 %v521_v51, %v520_v43  ;;  %v535_v1 = vrot.slane %v534_v53, 4 }
  0xa7   :  { %v1164_v2 = vadd.f32 %v382_v54, %v101_v34  ;;  %v1166_v3 = vadd.f32 %v402_v55, %v102_v46  ;;  %v508_v5 = vadd.f32 %v507_v49, %v506_v38  ;;  %v515_v8 = vrot.slane %v514_v58, 1 }
  0xa8   :  { %v501_v4 = vadd.f32 %v500_v57, %v493_v47  ;;  %v528_v9 = vadd.f32 %v527_v61, %v526_v52  ;;  %v523_v10 = vrot.slane %v522_v0, 1  ;;  %v536_v11 = vadd.f32 %v535_v1, %v534_v53 }
  0xa9   :  { %v542_v12 = vsel %vm445_vm1, %v1164_v2, 0.0  ;;  %v550_v40 = vsel %vm445_vm1, %v1166_v3, 0.0  ;;  %v516_v16 = vadd.f32 %v515_v8, %v514_v58  ;;  %v576_v52 = vsub.f32 1.0, %v575_v21 }
  0xaa   :  { %v509_v13 = vadd.f32 %v508_v5, %v501_v4  ;;  %v529_v17 = vrot.slane %v528_v9, 2  ;;  %v543_v18 = vrot.slane %v542_v12, 4  ;;  %v537_v19 = vrot.slane %v536_v11, 2 }
  0xab   :  { %v551_v20 = vrot.slane %v550_v40, 4  ;;  %v524_v25 = vadd.f32 %v523_v10, %v522_v0  ;;  %v577_v1 = vmul.f32 %v1162_v63, %v576_v52  ;;  %vm579_vm2 = vweird.f32 %v1162_v63 }
  0xac   :  { %v517_v24 = vadd.f32 %v516_v16, %v509_v13  ;;  %v530_v26 = vadd.f32 %v529_v17, %v528_v9  ;;  %v544_v27 = vadd.f32 %v543_v18, %v542_v12  ;;  %v422_v28 = vpop.f32.mrf.mxu2  ;;  %v442_v29 = vpop.f32.mrf.mxu3  ;;  %v538_v30 = vadd.f32 %v537_v19, %v536_v11 }
  0xad   :  { %v552_v31 = vadd.f32 %v551_v20, %v550_v40  ;;  %v1173_v34 = vadd.f32 %v422_v28, %v103_v56  ;;  %v1175_v35 = vadd.f32 %v442_v29, %v104_v62  ;;  %v578_v40 = vadd.f32 %v1162_v63, %v577_v1 }
  0xae   :  { %v525_v36 = vadd.f32 %v524_v25, %v517_v24  ;;  %v531_v37 = vrot.slane %v530_v26, 1  ;;  %v545_v38 = vrot.slane %v544_v27, 2  ;;  %v539_v39 = vrot.slane %v538_v30, 1 }
  0xaf   :  { %v553_v41 = vrot.slane %v552_v31, 2  ;;  %v558_v42 = vsel %vm445_vm1, %v1173_v34, 0.0  ;;  %v566_v43 = vsel %vm445_vm1, %v1175_v35, 0.0  ;;  %v1185_v18 = vsel %vm579_vm2, %v1162_v63, %v578_v40 }
  0xb0   :  { %v532_v46 = vadd.f32 %v531_v37, %v530_v26  ;;  %v546_v47 = vadd.f32 %v545_v38, %v544_v27  ;;  %v559_v48 = vrot.slane %v558_v42, 4  ;;  %v567_v49 = vrot.slane %v566_v43, 4 }
  0xb1   :  { %v540_v50 = vadd.f32 %v539_v39, %v538_v30  ;;  %v554_v51 = vadd.f32 %v553_v41, %v552_v31 }
  0xb2   :  { %v533_v53 = vadd.f32 %v532_v46, %v525_v36  ;;  %v547_v54 = vrot.slane %v546_v47, 1  ;;  %v560_v55 = vadd.f32 %v559_v48, %v558_v42  ;;  %v568_v56 = vadd.f32 %v567_v49, %v566_v43 }
  0xb3   :  { %v555_v57 = vrot.slane %v554_v51, 1 }
  0xb4   :  { %v541_v58 = vadd.f32 %v540_v50, %v533_v53  ;;  %v548_v61 = vadd.f32 %v547_v54, %v546_v47  ;;  %v561_v62 = vrot.slane %v560_v55, 2  ;;  %v569_v0 = vrot.slane %v568_v56, 2 }
  0xb5   :  { %v556_v5 = vadd.f32 %v555_v57, %v554_v51 }
  0xb6   :  { %v549_v4 = vadd.f32 %v548_v61, %v541_v58  ;;  %v562_v8 = vadd.f32 %v561_v62, %v560_v55  ;;  %v570_v9 = vadd.f32 %v569_v0, %v568_v56 }
  0xb8   :  { %v557_v10 = vadd.f32 %v556_v5, %v549_v4  ;;  %v563_v11 = vrot.slane %v562_v8, 1  ;;  %v571_v12 = vrot.slane %v570_v9, 1 }
  0xba   :  { %v564_v13 = vadd.f32 %v563_v11, %v562_v8  ;;  %v572_v17 = vadd.f32 %v571_v12, %v570_v9 }
  0xbc   :  { %v565_v16 = vadd.f32 %v564_v13, %v557_v10 }
  0xbe   :  { %v573_v19 = vadd.f32 %v572_v17, %v565_v16 }
  0xc0   :  { %v1188_v20 = vmul.f32 %v1185_v18, %v573_v19 }
  0xc2   :  { %v582_v21 = vsub.f32 %v1101_v6, %v1188_v20  ;;  %v592_v24 = vsub.f32 %v1103_v7, %v1188_v20  ;;  %v602_v25 = vsub.f32 %v1109_v22, %v1188_v20  ;;  %v612_v26 = vsub.f32 %v1111_v23, %v1188_v20 }
  0xc3   :  { %v622_v63 = vsub.f32 %v1117_v32, %v1188_v20  ;;  %v632_v27 = vsub.f32 %v1119_v33, %v1188_v20  ;;  %v642_v28 = vsub.f32 %v1132_v59, %v1188_v20  ;;  %v652_v29 = vsub.f32 %v1134_v60, %v1188_v20 }
  0xc4   :  { %v583_v30 = vmul.f32 %v582_v21, %v582_v21  ;;  %v593_v31 = vmul.f32 %v592_v24, %v592_v24  ;;  %v603_v36 = vmul.f32 %v602_v25, %v602_v25  ;;  %v613_v37 = vmul.f32 %v612_v26, %v612_v26 }
  0xc5   :  { %v623_v38 = vmul.f32 %v622_v63, %v622_v63  ;;  %v633_v39 = vmul.f32 %v632_v27, %v632_v27  ;;  %v643_v41 = vmul.f32 %v642_v28, %v642_v28  ;;  %v653_v42 = vmul.f32 %v652_v29, %v652_v29 }
  0xc6   :  { %v584_v43 = vsel %vm445_vm1, %v583_v30, 0.0  ;;  %v594_v46 = vsel %vm445_vm1, %v593_v31, 0.0  ;;  %v604_v47 = vsel %vm445_vm1, %v603_v36, 0.0  ;;  %v614_v48 = vsel %vm445_vm1, %v613_v37, 0.0 }
  0xc7   :  { %v585_v49 = vrot.slane %v584_v43, 4  ;;  %v595_v50 = vrot.slane %v594_v46, 4  ;;  %v605_v51 = vrot.slane %v604_v47, 4  ;;  %v615_v52 = vrot.slane %v614_v48, 4 }
  0xc8   :  { %v624_v53 = vsel %vm445_vm1, %v623_v38, 0.0  ;;  %v634_v54 = vsel %vm445_vm1, %v633_v39, 0.0  ;;  %v644_v55 = vsel %vm445_vm1, %v643_v41, 0.0  ;;  %v654_v56 = vsel %vm445_vm1, %v653_v42, 0.0 }
  0xc9   :  { %v586_v57 = vadd.f32 %v585_v49, %v584_v43  ;;  %v596_v58 = vadd.f32 %v595_v50, %v594_v46  ;;  %v606_v61 = vadd.f32 %v605_v51, %v604_v47  ;;  %v616_v62 = vadd.f32 %v615_v52, %v614_v48 }
  0xca   :  { %v625_v0 = vrot.slane %v624_v53, 4  ;;  %v635_v1 = vrot.slane %v634_v54, 4  ;;  %v645_v4 = vrot.slane %v644_v55, 4  ;;  %v655_v5 = vrot.slane %v654_v56, 4 }
  0xcb   :  { %v587_v8 = vrot.slane %v586_v57, 2  ;;  %v597_v9 = vrot.slane %v596_v58, 2  ;;  %v607_v10 = vrot.slane %v606_v61, 2  ;;  %v617_v11 = vrot.slane %v616_v62, 2 }
  0xcc   :  { %v626_v12 = vadd.f32 %v625_v0, %v624_v53  ;;  %v636_v40 = vadd.f32 %v635_v1, %v634_v54  ;;  %v646_v13 = vadd.f32 %v645_v4, %v644_v55  ;;  %v656_v16 = vadd.f32 %v655_v5, %v654_v56 }
  0xcd   :  { %v588_v17 = vadd.f32 %v587_v8, %v586_v57  ;;  %v598_v19 = vadd.f32 %v597_v9, %v596_v58  ;;  %v608_v21 = vadd.f32 %v607_v10, %v606_v61  ;;  %v618_v24 = vadd.f32 %v617_v11, %v616_v62 }
  0xce   :  { %v627_v25 = vrot.slane %v626_v12, 2  ;;  %v637_v26 = vrot.slane %v636_v40, 2  ;;  %v647_v63 = vrot.slane %v646_v13, 2  ;;  %v657_v27 = vrot.slane %v656_v16, 2 }
  0xcf   :  { %v589_v28 = vrot.slane %v588_v17, 1  ;;  %v599_v29 = vrot.slane %v598_v19, 1  ;;  %v609_v30 = vrot.slane %v608_v21, 1  ;;  %v619_v31 = vrot.slane %v618_v24, 1 }
  0xd0   :  { %v628_v36 = vadd.f32 %v627_v25, %v626_v12  ;;  %v638_v37 = vadd.f32 %v637_v26, %v636_v40  ;;  %v648_v38 = vadd.f32 %v647_v63, %v646_v13  ;;  %v658_v39 = vadd.f32 %v657_v27, %v656_v16 }
  0xd1   :  { %v590_v41 = vadd.f32 %v589_v28, %v588_v17  ;;  %v600_v42 = vadd.f32 %v599_v29, %v598_v19  ;;  %v610_v43 = vadd.f32 %v609_v30, %v608_v21  ;;  %v620_v46 = vadd.f32 %v619_v31, %v618_v24 }
  0xd2   :  { %v629_v47 = vrot.slane %v628_v36, 1  ;;  %v639_v48 = vrot.slane %v638_v37, 1  ;;  %v649_v49 = vrot.slane %v648_v38, 1  ;;  %v659_v50 = vrot.slane %v658_v39, 1 }
  0xd3   :  { %v601_v51 = vadd.f32 %v600_v42, %v590_v41  ;;  %v662_v52 = vsub.f32 %v1141_v14, %v1188_v20  ;;  %v672_v53 = vsub.f32 %v1143_v15, %v1188_v20  ;;  %v682_v54 = vsub.f32 %v1151_v44, %v1188_v20 }
  0xd4   :  { %v630_v55 = vadd.f32 %v629_v47, %v628_v36  ;;  %v640_v56 = vadd.f32 %v639_v48, %v638_v37  ;;  %v650_v57 = vadd.f32 %v649_v49, %v648_v38  ;;  %v660_v58 = vadd.f32 %v659_v50, %v658_v39 }
  0xd5   :  { %v611_v61 = vadd.f32 %v610_v43, %v601_v51  ;;  %v663_v62 = vmul.f32 %v662_v52, %v662_v52  ;;  %v673_v0 = vmul.f32 %v672_v53, %v672_v53  ;;  %v683_v1 = vmul.f32 %v682_v54, %v682_v54 }
  0xd6   :  { %v692_v4 = vsub.f32 %v1153_v45, %v1188_v20  ;;  %v702_v5 = vsub.f32 %v1164_v2, %v1188_v20  ;;  %v712_v8 = vsub.f32 %v1166_v3, %v1188_v20  ;;  %v722_v9 = vsub.f32 %v1173_v34, %v1188_v20 }
  0xd7   :  { %v621_v10 = vadd.f32 %v620_v46, %v611_v61  ;;  %v664_v11 = vsel %vm445_vm1, %v663_v62, 0.0  ;;  %v674_v12 = vsel %vm445_vm1, %v673_v0, 0.0  ;;  %v684_v40 = vsel %vm445_vm1, %v683_v1, 0.0 }
  0xd8   :  { %v665_v13 = vrot.slane %v664_v11, 4  ;;  %v675_v16 = vrot.slane %v674_v12, 4  ;;  %v685_v17 = vrot.slane %v684_v40, 4  ;;  %v693_v19 = vmul.f32 %v692_v4, %v692_v4 }
  0xd9   :  { %v631_v21 = vadd.f32 %v630_v55, %v621_v10  ;;  %v703_v24 = vmul.f32 %v702_v5, %v702_v5  ;;  %v713_v25 = vmul.f32 %v712_v8, %v712_v8  ;;  %v723_v26 = vmul.f32 %v722_v9, %v722_v9 }
  0xda   :  { %v666_v63 = vadd.f32 %v665_v13, %v664_v11  ;;  %v676_v27 = vadd.f32 %v675_v16, %v674_v12  ;;  %v686_v28 = vadd.f32 %v685_v17, %v684_v40  ;;  %v694_v29 = vsel %vm445_vm1, %v693_v19, 0.0 }
  0xdb   :  { %v641_v30 = vadd.f32 %v640_v56, %v631_v21  ;;  %v695_v31 = vrot.slane %v694_v29, 4  ;;  %v704_v36 = vsel %vm445_vm1, %v703_v24, 0.0  ;;  %v714_v37 = vsel %vm445_vm1, %v713_v25, 0.0 }
  0xdc   :  { %v667_v38 = vrot.slane %v666_v63, 2  ;;  %v677_v39 = vrot.slane %v676_v27, 2  ;;  %v687_v41 = vrot.slane %v686_v28, 2  ;;  %v705_v42 = vrot.slane %v704_v36, 4 }
  0xdd   :  { %v651_v43 = vadd.f32 %v650_v57, %v641_v30  ;;  %v696_v46 = vadd.f32 %v695_v31, %v694_v29  ;;  %v715_v47 = vrot.slane %v714_v37, 4  ;;  %v724_v48 = vsel %vm445_vm1, %v723_v26, 0.0 }
  0xde   :  { %v668_v49 = vadd.f32 %v667_v38, %v666_v63  ;;  %v678_v50 = vadd.f32 %v677_v39, %v676_v27  ;;  %v688_v51 = vadd.f32 %v687_v41, %v686_v28  ;;  %v706_v52 = vadd.f32 %v705_v42, %v704_v36 }
  0xdf   :  { %v661_v53 = vadd.f32 %v660_v58, %v651_v43  ;;  %v697_v54 = vrot.slane %v696_v46, 2  ;;  %v716_v55 = vadd.f32 %v715_v47, %v714_v37  ;;  %v725_v56 = vrot.slane %v724_v48, 4 }
  0xe0   :  { %v669_v61 = vrot.slane %v668_v49, 1  ;;  %v679_v62 = vrot.slane %v678_v50, 1  ;;  %v689_v0 = vrot.slane %v688_v51, 1  ;;  %v707_v1 = vrot.slane %v706_v52, 2 }
  0xe1   :  { %v698_v4 = vadd.f32 %v697_v54, %v696_v46  ;;  %v717_v5 = vrot.slane %v716_v55, 2  ;;  %v726_v8 = vadd.f32 %v725_v56, %v724_v48  ;;  %v732_v57 = vsub.f32 %v1175_v35, %v1188_v20 }
  0xe2   :  { %v670_v9 = vadd.f32 %v669_v61, %v668_v49  ;;  %v708_v10 = vadd.f32 %v707_v1, %v706_v52  ;;  %v680_v13 = vadd.f32 %v679_v62, %v678_v50  ;;  %v690_v17 = vadd.f32 %v689_v0, %v688_v51  ;;  %v743_v61 = vld [vmem:[%s1313_s3] sm:$0x1] }
  0xe3   :  { %v727_v11 = vrot.slane %v726_v8, 2  ;;  %v733_v12 = vmul.f32 %v732_v57, %v732_v57  ;;  %v699_v58 = vrot.slane %v698_v4, 1  ;;  %v718_v16 = vadd.f32 %v717_v5, %v716_v55 }
  0xe4   :  { %v671_v40 = vadd.f32 %v670_v9, %v661_v53  ;;  %v709_v24 = vrot.slane %v708_v10, 1 }
  0xe5   :  { %v734_v19 = vsel %vm445_vm1, %v733_v12, 0.0  ;;  %v728_v25 = vadd.f32 %v727_v11, %v726_v8  ;;  %v700_v27 = vadd.f32 %v699_v58, %v698_v4  ;;  %v719_v28 = vrot.slane %v718_v16, 1 }
  0xe6   :  { %v681_v21 = vadd.f32 %v680_v13, %v671_v40  ;;  %v735_v26 = vrot.slane %v734_v19, 4  ;;  %v710_v31 = vadd.f32 %v709_v24, %v708_v10 }
  0xe7   :  { %v729_v36 = vrot.slane %v728_v25, 1  ;;  %v720_v39 = vadd.f32 %v719_v28, %v718_v16 }
  0xe8   :  { %v691_v63 = vadd.f32 %v690_v17, %v681_v21  ;;  %v736_v29 = vadd.f32 %v735_v26, %v734_v19 }
  0xe9   :  { %v730_v43 = vadd.f32 %v729_v36, %v728_v25 }
  0xea   :  { %v701_v30 = vadd.f32 %v700_v27, %v691_v63  ;;  %v737_v37 = vrot.slane %v736_v29, 2 }
  0xec   :  { %v711_v38 = vadd.f32 %v710_v31, %v701_v30  ;;  %v738_v41 = vadd.f32 %v737_v37, %v736_v29 }
  0xee   :  { %v721_v42 = vadd.f32 %v720_v39, %v711_v38  ;;  %v739_v46 = vrot.slane %v738_v41, 1 }
  0xf0   :  { %v731_v47 = vadd.f32 %v730_v43, %v721_v42  ;;  %v740_v48 = vadd.f32 %v739_v46, %v738_v41 }
  0xf2   :  { %v741_v49 = vadd.f32 %v740_v48, %v731_v47 }
  0xf4   :  { %v742_v50 = vmul.f32 %v741_v49, %v1185_v18  ;;  %v756_v18 = vld [vmem:[%s1314_s4] sm:$0x1] }
  0xf6   :  { %v744_v51 = vadd.f32 1e-05, %v742_v50 }
  0xf8   :  { %836 = vrsqrt.f32 %v744_v51  ;;  %vm751_vm4 = vweird.f32 %v744_v51 }
  0xfe   :  { %v837_v52 = vpop.eup %836 }
  0xff   :  { %v746_v53 = vmul.f32 %v837_v52, %v744_v51  ;;  %vm752_vm3 = vweird.f32 %v837_v52 }
 0x100   :  { %vm753_vm5 = vmor %vm751_vm4, %vm752_vm3 }
 0x101   :  { %v747_v54 = vmul.f32 %v837_v52, %v746_v53 }
 0x103   :  { %v748_v55 = vmul.f32 0.5, %v747_v54 }
 0x105   :  { %v749_v56 = vsub.f32 1.5, %v748_v55 }
 0x107   :  { %v750_v62 = vmul.f32 %v837_v52, %v749_v56 }
 0x109   :  { %v754_v0 = vsel %vm753_vm5, %v837_v52, %v750_v62 }
 0x10a   :  { %v755_v1 = vmul.f32 %v754_v0, %v743_v61 }
 0x10c   :  { %v757_v4 = vmul.f32 %v755_v1, %v1188_v20  ;;  %v760_v5 = vperm.slane %v755_v1, 0 }
 0x10e   :  { %v758_v8 = vsub.f32 %v756_v18, %v757_v4  ;;  %v762_v57 = vmul.f32 %v760_v5, %v1101_v6  ;;  %v768_v10 = vmul.f32 %v760_v5, %v1103_v7  ;;  %v771_v11 = vmul.f32 %v760_v5, %v1109_v22 }
 0x10f   :  { %v774_v12 = vmul.f32 %v760_v5, %v1111_v23  ;;  %v777_v16 = vmul.f32 %v760_v5, %v1117_v32  ;;  %v780_v19 = vmul.f32 %v760_v5, %v1119_v33  ;;  %v783_v20 = vmul.f32 %v760_v5, %v1132_v59 }
 0x110   :  { %v764_v9 = vperm.slane %v758_v8, 0  ;;  %v786_v22 = vmul.f32 %v760_v5, %v1134_v60  ;;  %v789_v32 = vmul.f32 %v760_v5, %v1141_v14  ;;  %v792_v59 = vmul.f32 %v760_v5, %v1143_v15 }
 0x111   :  { %v795_v60 = vmul.f32 %v760_v5, %v1151_v44  ;;  %v798_v14 = vmul.f32 %v760_v5, %v1153_v45  ;;  %v801_v15 = vmul.f32 %v760_v5, %v1164_v2  ;;  %v804_v44 = vmul.f32 %v760_v5, %v1166_v3 }
 0x112   :  { %v766_v40 = vadd.f32 %v764_v9, %v762_v57  ;;  %v769_v13 = vadd.f32 %v768_v10, %v764_v9  ;;  %v772_v58 = vadd.f32 %v771_v11, %v764_v9  ;;  %v775_v17 = vadd.f32 %v774_v12, %v764_v9 }
 0x113   :  { %v778_v6 = vadd.f32 %v777_v16, %v764_v9  ;;  %v781_v7 = vadd.f32 %v780_v19, %v764_v9  ;;  %v784_v23 = vadd.f32 %v783_v20, %v764_v9  ;;  %v787_v33 = vadd.f32 %v786_v22, %v764_v9 }
 0x114   :  { %767 = vst [vmem:[%s1315_s5] sm:$0x3] %v766_v40  ;;  %v790_v21 = vadd.f32 %v789_v32, %v764_v9  ;;  %v793_v24 = vadd.f32 %v792_v59, %v764_v9  ;;  %v796_v25 = vadd.f32 %v795_v60, %v764_v9  ;;  %v799_v26 = vadd.f32 %v798_v14, %v764_v9 }
 0x115   :  { %770 = vst [vmem:[%s1315_s5 + $0x2] sm:$0x3] %v769_v13  ;;  %v802_v63 = vadd.f32 %v801_v15, %v764_v9  ;;  %v807_v45 = vmul.f32 %v760_v5, %v1173_v34  ;;  %v805_v27 = vadd.f32 %v804_v44, %v764_v9  ;;  %v810_v2 = vmul.f32 %v760_v5, %v1175_v35 }
 0x116   :  { %773 = vst [vmem:[%s1315_s5 + $0x4] sm:$0x3] %v772_v58 }
 0x117   :  { %776 = vst [vmem:[%s1315_s5 + $0x6] sm:$0x3] %v775_v17  ;;  %v808_v28 = vadd.f32 %v807_v45, %v764_v9  ;;  %v811_v3 = vadd.f32 %v810_v2, %v764_v9 }
 0x118   :  { %779 = vst [vmem:[%s1315_s5 + $0x8] sm:$0x3] %v778_v6 }
 0x119   :  { %782 = vst [vmem:[%s1315_s5 + $0xa] sm:$0x3] %v781_v7 }
 0x11a   :  { %785 = vst [vmem:[%s1315_s5 + $0xc] sm:$0x3] %v784_v23 }
 0x11b   :  { %788 = vst [vmem:[%s1315_s5 + $0xe] sm:$0x3] %v787_v33 }
 0x11c   :  { %791 = vst [vmem:[%s1315_s5 + $0x10] sm:$0x3] %v790_v21 }
 0x11d   :  { %794 = vst [vmem:[%s1315_s5 + $0x12] sm:$0x3] %v793_v24 }
 0x11e   :  { %797 = vst [vmem:[%s1315_s5 + $0x14] sm:$0x3] %v796_v25 }
 0x11f   :  { %800 = vst [vmem:[%s1315_s5 + $0x16] sm:$0x3] %v799_v26 }
 0x120   :  { %803 = vst [vmem:[%s1315_s5 + $0x18] sm:$0x3] %v802_v63 }
 0x121   :  { %806 = vst [vmem:[%s1315_s5 + $0x1a] sm:$0x3] %v805_v27 }
 0x122   :  { %809 = vst [vmem:[%s1315_s5 + $0x1c] sm:$0x3] %v808_v28 }
 0x123   :  { %812 = vst [vmem:[%s1315_s5 + $0x1e] sm:$0x3] %v811_v3 }

// kernel: squeeze.160
= control target key start
LH: loop header
LB: loop body
LE: loop exit
PB: predicated region body
PF: predicated region fallthrough
CT: control target
= control target key end

     0   :  { %vm7_vm0 = vcmask 523264   ;;  %s39_s0 = inlined_call_operand.vmem [shape: f32[128], index: 0, kind: input, shape index: {}]   ;;  %s40_s1 = inlined_call_operand.vmem [shape: f32[2,64], index: 1, kind: output, shape index: {}]  }
   0x1   :  { %v4_v0 = vld [vmem:[%s39_s0] sm:$0x1]  ;;  %s22_s0 = smov 64  }
   0x2   :  { %5 = vst [vmem:[#allocation1] sm:$0x1] %v4_v0 }
   0x9   :  { %v9_v1 = vld [vmem:[#allocation1] sm:$0x1]  }
   0xa   :  { %v6_v2 = vld [vmem:[#allocation1] sm:$0x1]   ;;  %10 = vrot.lane.b32.xlu0 %v9_v1, %s22_s0 }
   0xb   :  { %8 = vst.msk [vmem:[#allocation0] sm:$0x1] %vm7_vm0, %v6_v2  }
  0x7c   :  { %v11_v3 = vpop.permute.xlu0 %10  }
  0x7d   :  { %14 = vst.msk [vmem:[#allocation0 + $0x1] sm:$0x1] %vm7_vm0, %v11_v3  }
  0x84   :  { %v17_v4 = vld [vmem:[#allocation0] sm:$0x3] }
  0x85   :  { %20 = vst [vmem:[%s40_s1] sm:$0x3] %v17_v4 }

// kernel: generator_forward.5
= control target key start
LH: loop header
LB: loop body
LE: loop exit
PB: predicated region body
PF: predicated region fallthrough
CT: control target
= control target key end

     0   :  { %vm42_vm0 = vcmask 1040384   ;;  %vm43_vm1 = vsmask.f32 256  ;;  %v45_v61 = vld [vmem:[#allocation2 + $0x4] sm:$0x1]  ;;  %vm69_vm3 = vcmask 1042434   ;;  %s6038_s1 = inlined_call_operand.vmem [shape: bf16[6,256,256], index: 1, kind: input, shape index: {}]   ;;  %s6039_s2 = inlined_call_operand.vmem [shape: f32[1,128], index: 2, kind: input, shape index: {}]   ;;  %s6040_s3 = inlined_call_operand.vmem [shape: f32[1,128], index: 3, kind: input, shape index: {}]   ;;  %s6041_s0 = inlined_call_operand.vmem [shape: f32[2,4,4,128], index: 0, kind: input, shape index: {}]   ;;  %s6042_s4 = inlined_call_operand.vmem [shape: bf16[2,4,2,4,256], index: 4, kind: output, shape index: {0}]   ;;  %s6043_s5 = inlined_call_operand.vmem [shape: f32[1,2,256], index: 5, kind: output, shape index: {1}]  }
   0x1   :  { %v2882_v0 = vld [vmem:[%s6038_s1 + $0x170] sm:$0xf]  ;;  %v3788_v1 = vld [vmem:[%s6038_s1 + $0x174] sm:$0xf0]  ;;  %v3787_v2 = vld [vmem:[%s6038_s1 + $0x174] sm:$0xf] }
   0x2   :  { %v2883_v3 = vor.u32 %v3788_v1, %v2882_v0  ;;  %v2884_v4 = vld [vmem:[%s6038_s1 + $0x178] sm:$0xf0]  ;;  %v2874_v5 = vld [vmem:[%s6038_s1 + $0x160] sm:$0xf]  ;;  %v3786_v6 = vld [vmem:[%s6038_s1 + $0x164] sm:$0xf0] }
   0x3   :  { %v2887_v7 = vor.u32 %v3787_v2, %v2884_v4  ;;  %v3785_v8 = vld [vmem:[%s6038_s1 + $0x164] sm:$0xf]  ;;  %v2876_v9 = vld [vmem:[%s6038_s1 + $0x168] sm:$0xf0]  ;;  %v2875_v10 = vor.u32 %v3786_v6, %v2874_v5  ;;  %v2946_v11 = vld [vmem:[%s6038_s1 + $0x1f0] sm:$0xf] }
   0x4   :  { %729 = vmatpush.bf16.msra.mxu0 %v2883_v3  ;;  %v3804_v12 = vld [vmem:[%s6038_s1 + $0x1f4] sm:$0xf0]  ;;  %v2879_v13 = vor.u32 %v3785_v8, %v2876_v9  ;;  %v2866_v14 = vld [vmem:[%s6038_s1 + $0x150] sm:$0xf]  ;;  %v3803_v17 = vld [vmem:[%s6038_s1 + $0x1f4] sm:$0xf] }
   0x5   :  { %767 = vmatpush.bf16.msra.mxu2 %v2887_v7  ;;  %v3784_v15 = vld [vmem:[%s6038_s1 + $0x154] sm:$0xf0]  ;;  %v2947_v16 = vor.u32 %v3804_v12, %v2946_v11  ;;  %v3783_v18 = vld [vmem:[%s6038_s1 + $0x154] sm:$0xf]  ;;  %v2868_v19 = vld [vmem:[%s6038_s1 + $0x158] sm:$0xf0] }
   0x6   :  { %v2948_v20 = vld [vmem:[%s6038_s1 + $0x1f8] sm:$0xf0]  ;;  %v2938_v22 = vld [vmem:[%s6038_s1 + $0x1e0] sm:$0xf]  ;;  %v3802_v23 = vld [vmem:[%s6038_s1 + $0x1e4] sm:$0xf0]  ;;  %v2867_v24 = vor.u32 %v3784_v15, %v2866_v14  ;;  %v2871_v28 = vor.u32 %v3783_v18, %v2868_v19 }
   0x7   :  { %748 = vmatpush.bf16.msra.mxu1 %v2947_v16  ;;  %v2951_v21 = vor.u32 %v3803_v17, %v2948_v20  ;;  %v2939_v25 = vor.u32 %v3802_v23, %v2938_v22  ;;  %v3801_v26 = vld [vmem:[%s6038_s1 + $0x1e4] sm:$0xf]  ;;  %v2940_v27 = vld [vmem:[%s6038_s1 + $0x1e8] sm:$0xf0]  ;;  %v2858_v29 = vld [vmem:[%s6038_s1 + $0x140] sm:$0xf] }
   0x8   :  { %730 = vmatpush.bf16.msra.mxu0 %v2875_v10  ;;  %v3782_v30 = vld [vmem:[%s6038_s1 + $0x144] sm:$0xf0]  ;;  %v2943_v31 = vor.u32 %v3801_v26, %v2940_v27  ;;  %v2930_v32 = vld [vmem:[%s6038_s1 + $0x1d0] sm:$0xf]  ;;  %v3781_v33 = vld [vmem:[%s6038_s1 + $0x144] sm:$0xf] }
   0x9   :  { %768 = vmatpush.bf16.msra.mxu2 %v2879_v13  ;;  %786 = vmatpush.bf16.msra.mxu3 %v2951_v21  ;;  %v2860_v34 = vld [vmem:[%s6038_s1 + $0x148] sm:$0xf0]  ;;  %v3800_v35 = vld [vmem:[%s6038_s1 + $0x1d4] sm:$0xf0]  ;;  %v3799_v37 = vld [vmem:[%s6038_s1 + $0x1d4] sm:$0xf]  ;;  %v2859_v39 = vor.u32 %v3782_v30, %v2858_v29 }
   0xa   :  { %v2931_v36 = vor.u32 %v3800_v35, %v2930_v32  ;;  %v2932_v38 = vld [vmem:[%s6038_s1 + $0x1d8] sm:$0xf0]  ;;  %v2922_v40 = vld [vmem:[%s6038_s1 + $0x1c0] sm:$0xf]  ;;  %v3798_v41 = vld [vmem:[%s6038_s1 + $0x1c4] sm:$0xf0]  ;;  %v2863_v42 = vor.u32 %v3781_v33, %v2860_v34 }
   0xb   :  { %749 = vmatpush.bf16.msra.mxu1 %v2939_v25  ;;  %v2850_v43 = vld [vmem:[%s6038_s1 + $0x130] sm:$0xf]  ;;  %v3780_v44 = vld [vmem:[%s6038_s1 + $0x134] sm:$0xf0]  ;;  %v3779_v45 = vld [vmem:[%s6038_s1 + $0x134] sm:$0xf]  ;;  %v2935_v46 = vor.u32 %v3799_v37, %v2932_v38  ;;  %v2923_v51 = vor.u32 %v3798_v41, %v2922_v40 }
   0xc   :  { %731 = vmatpush.bf16.msra.mxu0 %v2867_v24  ;;  %v2852_v47 = vld [vmem:[%s6038_s1 + $0x138] sm:$0xf0]  ;;  %v3797_v48 = vld [vmem:[%s6038_s1 + $0x1c4] sm:$0xf]  ;;  %v2924_v49 = vld [vmem:[%s6038_s1 + $0x1c8] sm:$0xf0]  ;;  %v2851_v52 = vor.u32 %v3780_v44, %v2850_v43 }
   0xd   :  { %769 = vmatpush.bf16.msra.mxu2 %v2871_v28  ;;  %787 = vmatpush.bf16.msra.mxu3 %v2943_v31  ;;  %v2842_v50 = vld [vmem:[%s6038_s1 + $0x120] sm:$0xf]  ;;  %v3778_v53 = vld [vmem:[%s6038_s1 + $0x124] sm:$0xf0]  ;;  %v2914_v54 = vld [vmem:[%s6038_s1 + $0x1b0] sm:$0xf]  ;;  %v2855_v56 = vor.u32 %v3779_v45, %v2852_v47  ;;  %v2927_v59 = vor.u32 %v3797_v48, %v2924_v49 }
   0xe   :  { %v3796_v55 = vld [vmem:[%s6038_s1 + $0x1b4] sm:$0xf0]  ;;  %v3777_v57 = vld [vmem:[%s6038_s1 + $0x124] sm:$0xf]  ;;  %v2844_v58 = vld [vmem:[%s6038_s1 + $0x128] sm:$0xf0]  ;;  %v2843_v5 = vor.u32 %v3778_v53, %v2842_v50 }
   0xf   :  { %750 = vmatpush.bf16.msra.mxu1 %v2931_v36  ;;  %v3795_v60 = vld [vmem:[%s6038_s1 + $0x1b4] sm:$0xf]  ;;  %v2916_v62 = vld [vmem:[%s6038_s1 + $0x1b8] sm:$0xf0]  ;;  %v4100_v63 = vld [vmem:[%s6038_s1 + $0x1a0] sm:$0xf]  ;;  %v2915_v3 = vor.u32 %v3796_v55, %v2914_v54  ;;  %v2847_v14 = vor.u32 %v3777_v57, %v2844_v58 }
  0x10   :  { %732 = vmatpush.bf16.msra.mxu0 %v2859_v39  ;;  %v3794_v0 = vld [vmem:[%s6038_s1 + $0x1a4] sm:$0xf0]  ;;  %v4108_v1 = vld [vmem:[%s6038_s1 + $0x110] sm:$0xf]  ;;  %v4113_v2 = vld [vmem:[%s6038_s1 + $0x114] sm:$0xf0]  ;;  %v2919_v15 = vor.u32 %v3795_v60, %v2916_v62 }
  0x11   :  { %770 = vmatpush.bf16.msra.mxu2 %v2863_v42  ;;  %788 = vmatpush.bf16.msra.mxu3 %v2935_v46  ;;  %v20_v4 = vld [vmem:[%s6041_s0] sm:$0xf]  ;;  %v4121_v6 = vld [vmem:[%s6038_s1 + $0x114] sm:$0xf]  ;;  %v4126_v7 = vld [vmem:[%s6038_s1 + $0x118] sm:$0xf0]  ;;  %v2907_v18 = vor.u32 %v3794_v0, %v4100_v63  ;;  %v2835_v30 = vor.u32 %v4113_v2, %v4108_v1 }
  0x12   :  { %v4131_v8 = vld [vmem:[%s6038_s1 + $0x1a4] sm:$0xf]  ;;  %v4136_v9 = vld [vmem:[%s6038_s1 + $0x1a8] sm:$0xf0]  ;;  %v22_v11 = vld [vmem:[%s6041_s0 + $0x8] sm:$0xf]  ;;  %v4147_v13 = vpack.c.bf16 %v20_v4, %v20_v4  ;;  %v2839_v38 = vor.u32 %v4121_v6, %v4126_v7 }
  0x13   :  { %751 = vmatpush.bf16.msra.mxu1 %v2923_v51  ;;  %v21_v10 = vld [vmem:[%s6041_s0 + $0x4] sm:$0xf]  ;;  %v23_v12 = vld [vmem:[%s6041_s0 + $0xc] sm:$0xf]  ;;  %v4152_v16 = vld [vmem:[%s6038_s1 + $0x100] sm:$0xf]  ;;  %v30_v33 = vpack.c.bf16 %v22_v11, %v22_v11  ;;  %v2911_v39 = vor.u32 %v4131_v8, %v4136_v9 }
  0x14   :  { %733 = vmatpush.bf16.msra.mxu0 %v2851_v52  ;;  %v4157_v17 = vld [vmem:[%s6038_s1 + $0x104] sm:$0xf0]  ;;  %v3934_v19 = vmov 0   ;;  %vm4163_vm2 = vmand %vm42_vm0, %vm43_vm1  ;;  %v48_v21 = vld [vmem:[#allocation2 + $0x8] sm:$0x1]  ;;  %v29_v27 = vpack.c.bf16 %v21_v10, %v21_v10  ;;  %v97_v29 = vshrl.u32 %v4147_v13, 16  ;;  %v31_v34 = vpack.c.bf16 %v23_v12, %v23_v12 }
  0x15   :  { %771 = vmatpush.bf16.msra.mxu2 %v2855_v56  ;;  %789 = vmatpush.bf16.msra.mxu3 %v2927_v59  ;;  %36 = vst [vmem:[#allocation2] sm:$0x7] %v3934_v19  ;;  %v51_v22 = vld [vmem:[#allocation2 + $0xc] sm:$0x1]  ;;  %v46_v23 = vsel %vm4163_vm2, 0, %v45_v61  ;;  %v49_v24 = vsel %vm4163_vm2, 0, %v48_v21  ;;  %v2827_v43 = vor.u32 %v4157_v17, %v4152_v16 }
  0x16   :  { %v52_v25 = vsel %vm4163_vm2, 0, %v51_v22  ;;  %v54_v26 = vld [vmem:[#allocation2 + $0x10] sm:$0x1]  ;;  %47 = vst [vmem:[#allocation2 + $0x4] sm:$0x1] %v46_v23  ;;  %v99_v46 = vrot.slane %v97_v29, 7 }
  0x17   :  { %752 = vmatpush.bf16.msra.mxu1 %v2915_v3  ;;  %v55_v28 = vsel %vm4163_vm2, 0, %v54_v26  ;;  %vm70_vm4 = vsmask.f32 7946  ;;  %v3773_v31 = vld [vmem:[%s6038_s1 + $0x104] sm:$0xf]  ;;  %v100_v48 = vshll.u32 %v4147_v13, 16 }
  0x18   :  { %734 = vmatpush.bf16.msra.mxu0 %v2843_v5  ;;  %v2828_v32 = vld [vmem:[%s6038_s1 + $0x108] sm:$0xf0]  ;;  %50 = vst [vmem:[#allocation2 + $0x8] sm:$0x1] %v49_v24  ;;  %vm4185_vm5 = vmand %vm69_vm3, %vm70_vm4  ;;  %v75_v37 = vld [vmem:[#allocation2 + $0x8] sm:$0x4] }
  0x19   :  { %v72_v36 = vld [vmem:[#allocation2 + $0x4] sm:$0x4]  ;;  %772 = vmatpush.bf16.msra.mxu2 %v2847_v14  ;;  %790 = vmatpush.bf16.msra.mxu3 %v2919_v15  ;;  %53 = vst [vmem:[#allocation2 + $0xc] sm:$0x1] %v52_v25  ;;  %v76_v41 = vsel %vm4185_vm5, 0, %v75_v37  ;;  %v104_v49 = vshrl.u32 %v29_v27, 16  ;;  %v2831_v55 = vor.u32 %v3773_v31, %v2828_v32  ;;  %v102_v60 = vor.u32 %v100_v48, %v99_v46 }
  0x1a   :  { %v73_v40 = vsel %vm4185_vm5, 0, %v72_v36  ;;  %v78_v42 = vld [vmem:[#allocation2 + $0xc] sm:$0x4]  ;;  %56 = vst [vmem:[#allocation2 + $0x10] sm:$0x1] %v55_v28  ;;  %v107_v50 = vshll.u32 %v29_v27, 16 }
  0x1b   :  { %v79_v44 = vsel %vm4185_vm5, 0, %v78_v42  ;;  %v81_v45 = vld [vmem:[#allocation2 + $0x10] sm:$0x4]  ;;  %753 = vmatpush.bf16.msra.mxu1 %v2907_v18  ;;  %74 = vst [vmem:[#allocation2 + $0x4] sm:$0x4] %v73_v40  ;;  %v111_v51 = vshrl.u32 %v30_v33, 16 }
  0x1c   :  { %v82_v47 = vsel %vm4185_vm5, 0, %v81_v45  ;;  %735 = vmatpush.bf16.msra.mxu0 %v2835_v30  ;;  %77 = vst [vmem:[#allocation2 + $0x8] sm:$0x4] %v76_v41  ;;  %v114_v52 = vshll.u32 %v30_v33, 16  ;;  %v118_v53 = vshrl.u32 %v31_v34, 16  ;;  %v121_v54 = vshll.u32 %v31_v34, 16 }
  0x1d   :  { %773 = vmatpush.bf16.msra.mxu2 %v2839_v38  ;;  %791 = vmatpush.bf16.msra.mxu3 %v2911_v39  ;;  %80 = vst [vmem:[#allocation2 + $0xc] sm:$0x4] %v79_v44  ;;  %v106_v56 = vrot.slane %v104_v49, 7  ;;  %vm160_vm6 = vcmask 1042432   ;;  %vm161_vm7 = vsmask.f32 2306 }
  0x1e   :  { %83 = vst [vmem:[#allocation2 + $0x10] sm:$0x4] %v82_v47  ;;  %v113_v57 = vrot.slane %v111_v51, 7  ;;  %v120_v58 = vrot.slane %v118_v53, 7  ;;  %v187_v59 = vld [vmem:[#allocation2] sm:$0x7]  ;;  %vm4204_vm10 = vmand %vm160_vm6, %vm161_vm7 }
  0x1f   :  { %200 = vst [vmem:[#allocation1] ss:$4 sm:$0xff] %v187_v59  ;;  %v287_v61 = vrot.slane %v187_v59, 2  ;;  %vm295_vm8 = vcmask 1041408   ;;  %vm298_vm9 = vcmask 1043458   ;;  %v109_v62 = vor.u32 %v107_v50, %v106_v56 }
  0x20   :  { %736 = vmatpush.bf16.msra.mxu0 %v2827_v43  ;;  %37 = vst [vmem:[#allocation2 + $0x18] sm:$0x7] %v3934_v19  ;;  %v116_v0 = vor.u32 %v114_v52, %v113_v57  ;;  %v123_v3 = vor.u32 %v121_v54, %v120_v58  ;;  %v57_v18 = vld [vmem:[#allocation2 + $0x1c] sm:$0x1]  ;;  %vm337_vm11 = vsmask.f32 1280 }
  0x21   :  { %774 = vmatpush.bf16.msra.mxu2 %v2831_v55  ;;  %v4210_v1 = vsel %vm295_vm8, %v187_v59, %v287_v61  ;;  %v4213_v2 = vsel %vm298_vm9, %v187_v59, %v287_v61  ;;  %39 = vst [vmem:[#allocation2 + $0x14] sm:$0x7] %v3934_v19  ;;  %v58_v22 = vsel %vm4163_vm2, 0, %v57_v18  ;;  %vm338_vm12 = vsmask.f32 3336 }
  0x22   :  { %v163_v4 = vld [vmem:[#allocation2 + $0x4] sm:$0x7]  ;;  %v344_v5 = vshrl.u32 %v4210_v1, 16  ;;  %v347_v6 = vshll.u32 %v4210_v1, 16  ;;  %40 = vst [vmem:[#allocation2 + $0x2c] sm:$0x7] %v3934_v19  ;;  %vm4329_vm15 = vmor %vm337_vm11, %vm338_vm12 }
  0x23   :  { %v164_v7 = vsel %vm4204_vm10, %v102_v60, %v163_v4  ;;  %v166_v8 = vld [vmem:[#allocation2 + $0x8] sm:$0x7]  ;;  %v6053_v11 = vrot.slane %v4213_v2, 2  ;;  %v60_v19 = vld [vmem:[#allocation2 + $0x20] sm:$0x1]  ;;  %vm1052_vm6 = vcmask 1046534  }
  0x24   :  { %165 = vst [vmem:[#allocation2 + $0x4] sm:$0x7] %v164_v7  ;;  %v167_v9 = vsel %vm4204_vm10, %v109_v62, %v166_v8  ;;  %v169_v10 = vld [vmem:[#allocation2 + $0xc] sm:$0x7]  ;;  %v346_v14 = vrot.slane %v344_v5, 6  ;;  %v349_v15 = vrot.slane %v347_v6, 7 }
  0x25   :  { %168 = vst [vmem:[#allocation2 + $0x8] sm:$0x7] %v167_v9  ;;  %v170_v12 = vsel %vm4204_vm10, %v116_v0, %v169_v10  ;;  %v172_v13 = vld [vmem:[#allocation2 + $0x10] sm:$0x7]  ;;  %v4230_v17 = vshll.u32 %v6053_v11, 16  ;;  %v61_v23 = vsel %vm4163_vm2, 0, %v60_v19 }
  0x26   :  { %171 = vst [vmem:[#allocation2 + $0xc] sm:$0x7] %v170_v12  ;;  %v173_v16 = vsel %vm4204_vm10, %v123_v3, %v172_v13  ;;  %v350_v21 = vor.u32 %v349_v15, %v346_v14  ;;  %v4238_v25 = vld [vmem:[#allocation2 + $0x24] sm:$0x1]  ;;  %vm340_vm13 = vsmask.f32 5392 }
  0x27   :  { %174 = vst [vmem:[#allocation2 + $0x10] sm:$0x7] %v173_v16  ;;  %v355_v28 = vrot.slane %v4230_v17, 7  ;;  %v64_v36 = vsel %vm4163_vm2, 0, %v4238_v25  ;;  %vm342_vm14 = vsmask.f32 7448  ;;  %vm4355_vm1 = vmor %vm4329_vm15, %vm340_vm13 }
  0x28   :  { %59 = vst [vmem:[#allocation2 + $0x1c] sm:$0x1] %v58_v22  ;;  %v4249_v31 = vrot.slane %v350_v21, 2  ;;  %v2898_v44 = vld [vmem:[%s6038_s1 + $0x190] sm:$0xf]  ;;  %vm4395_vm4 = vmor %vm4355_vm1, %vm342_vm14 }
  0x29   :  { %62 = vst [vmem:[#allocation2 + $0x20] sm:$0x1] %v61_v23  ;;  %v3792_v45 = vld [vmem:[%s6038_s1 + $0x194] sm:$0xf0]  ;;  %v3791_v49 = vld [vmem:[%s6038_s1 + $0x194] sm:$0xf] }
  0x2a   :  { %v2900_v50 = vld [vmem:[%s6038_s1 + $0x198] sm:$0xf0]  ;;  %v4297_v51 = vld [vmem:[#allocation2 + $0x1c] sm:$0x4]  ;;  %v3010_v56 = vld [vmem:[%s6038_s1 + $0x70] sm:$0xf]  ;;  %v2899_v10 = vor.u32 %v3792_v45, %v2898_v44 }
  0x2b   :  { %v4236_v24 = vld [vmem:[#allocation2 + $0x4] sm:$0x7]  ;;  %v3756_v59 = vld [vmem:[%s6038_s1 + $0x74] sm:$0xf0]  ;;  %v3755_v60 = vld [vmem:[%s6038_s1 + $0x74] sm:$0xf]  ;;  %v2903_v12 = vor.u32 %v3791_v49, %v2900_v50 }
  0x2c   :  { %v4240_v26 = vld [vmem:[#allocation2 + $0x8] sm:$0x7]  ;;  %203 = vst [vmem:[#allocation1 + $0x1] ss:$4 sm:$0xff] %v4236_v24  ;;  %v288_v27 = vrot.slane %v4236_v24, 2  ;;  %v3011_v15 = vor.u32 %v3756_v59, %v3010_v56  ;;  %v85_v19 = vsel %vm4185_vm5, 0, %v4297_v51  ;;  %754 = vmatpush.bf16.msra.mxu1 %v2899_v10 }
  0x2d   :  { %v4245_v29 = vld [vmem:[#allocation2 + $0xc] sm:$0x7]  ;;  %206 = vst [vmem:[#allocation1 + $0x2] ss:$4 sm:$0xff] %v4240_v26  ;;  %v289_v30 = vrot.slane %v4240_v26, 2  ;;  %792 = vmatpush.bf16.msra.mxu3 %v2903_v12 }
  0x2e   :  { %209 = vst [vmem:[#allocation1 + $0x3] ss:$4 sm:$0xff] %v4245_v29  ;;  %v290_v32 = vrot.slane %v4245_v29, 2  ;;  %v4255_v33 = vsel %vm295_vm8, %v4236_v24, %v288_v27  ;;  %v4259_v34 = vsel %vm298_vm9, %v4236_v24, %v288_v27  ;;  %v4315_v61 = vld [vmem:[#allocation2 + $0x10] sm:$0x7]  ;;  %965 = vmatpush.bf16.msrb.mxu0 %v3011_v15 }
  0x2f   :  { %v6051_v37 = vrot.slane %v4259_v34, 2  ;;  %v4267_v38 = vsel %vm295_vm8, %v4240_v26, %v289_v30  ;;  %v4271_v39 = vsel %vm298_vm9, %v4240_v26, %v289_v30  ;;  %v357_v40 = vshrl.u32 %v4255_v33, 16  ;;  %v3012_v5 = vld [vmem:[%s6038_s1 + $0x78] sm:$0xf0]  ;;  %v24_v13 = vld [vmem:[%s6041_s0 + $0x10] sm:$0xf] }
  0x30   :  { %v6048_v41 = vrot.slane %v4271_v39, 2  ;;  %v4277_v42 = vsel %vm295_vm8, %v4245_v29, %v290_v32  ;;  %v360_v43 = vshll.u32 %v4255_v33, 16  ;;  %v4288_v46 = vsel %vm298_vm9, %v4245_v29, %v290_v32  ;;  %v2890_v18 = vld [vmem:[%s6038_s1 + $0x180] sm:$0xf]  ;;  %v3790_v22 = vld [vmem:[%s6038_s1 + $0x184] sm:$0xf0] }
  0x31   :  { %v359_v47 = vrot.slane %v357_v40, 6  ;;  %v370_v48 = vshrl.u32 %v4267_v38, 16  ;;  %v4301_v53 = vshll.u32 %v6051_v37, 16  ;;  %v373_v54 = vshll.u32 %v4267_v38, 16  ;;  %v3789_v23 = vld [vmem:[%s6038_s1 + $0x184] sm:$0xf] }
  0x32   :  { %v362_v52 = vrot.slane %v360_v43, 7  ;;  %v383_v55 = vshrl.u32 %v4277_v42, 16  ;;  %v386_v58 = vshll.u32 %v4277_v42, 16  ;;  %v6047_v62 = vrot.slane %v4288_v46, 2  ;;  %v2892_v40 = vld [vmem:[%s6038_s1 + $0x188] sm:$0xf0] }
  0x33   :  { %v372_v57 = vrot.slane %v370_v48, 6  ;;  %v375_v3 = vrot.slane %v373_v54, 7  ;;  %v4320_v4 = vshll.u32 %v6048_v41, 16  ;;  %v368_v14 = vrot.slane %v4301_v53, 7  ;;  %v25_v44 = vld [vmem:[%s6041_s0 + $0x14] sm:$0xf] }
  0x34   :  { %v363_v0 = vor.u32 %v362_v52, %v359_v47  ;;  %v385_v8 = vrot.slane %v383_v55, 6  ;;  %v388_v9 = vrot.slane %v386_v58, 7  ;;  %v3015_v16 = vor.u32 %v3755_v60, %v3012_v5  ;;  %v3002_v50 = vld [vmem:[%s6038_s1 + $0x60] sm:$0xf]  ;;  %v4375_v52 = vld [vmem:[#allocation2 + $0x28] sm:$0x1] }
  0x35   :  { %v4325_v6 = vld.sshfl [vmem:[#allocation1] sm:$0xff pattern:$0x73625140]  ;;  %v376_v21 = vor.u32 %v375_v3, %v372_v57  ;;  %v4361_v30 = vshll.u32 %v6047_v62, 16  ;;  %v2891_v32 = vor.u32 %v3790_v22, %v2890_v18  ;;  %v450_v43 = vrot.slane %v4315_v61, 2 }
  0x36   :  { %226 = vst [vmem:[#allocation1] ss:$4 sm:$0xff] %v4236_v24  ;;  %1003 = vmatpush.bf16.msrb.mxu2 %v3015_v16  ;;  %v364_v45 = vrot.slane %v363_v0, 2  ;;  %v381_v47 = vrot.slane %v4320_v4, 7  ;;  %v389_v48 = vor.u32 %v388_v9, %v385_v8  ;;  %v2895_v49 = vor.u32 %v3789_v23, %v2892_v40  ;;  %v3754_v54 = vld [vmem:[%s6038_s1 + $0x64] sm:$0xf0] }
  0x37   :  { %228 = vst [vmem:[#allocation1 + $0x1] ss:$4 sm:$0xff] %v4240_v26  ;;  %v3753_v55 = vld [vmem:[%s6038_s1 + $0x64] sm:$0xf]  ;;  %v3004_v56 = vld [vmem:[%s6038_s1 + $0x68] sm:$0xf0]  ;;  %v4388_v57 = vsel %vm295_vm8, %v4315_v61, %v450_v43  ;;  %v4390_v58 = vpack.c.bf16 %v24_v13, %v24_v13  ;;  %755 = vmatpush.bf16.msra.mxu1 %v2891_v32  ;;  %v3003_v0 = vor.u32 %v3754_v54, %v3002_v50 }
  0x38   :  { %230 = vst [vmem:[#allocation1 + $0x2] ss:$4 sm:$0xff] %v4245_v29  ;;  %v377_v60 = vrot.slane %v376_v21, 2  ;;  %793 = vmatpush.bf16.msra.mxu3 %v2895_v49  ;;  %v3007_v3 = vor.u32 %v3753_v55, %v3004_v56  ;;  %v4401_v4 = vsel %vm298_vm9, %v4315_v61, %v450_v43  ;;  %v3771_v5 = vld [vmem:[%s6038_s1 + $0xf4] sm:$0xf]  ;;  %v462_v8 = vshrl.u32 %v4388_v57, 16 }
  0x39   :  { %233 = vst [vmem:[#allocation1 + $0x3] ss:$4 sm:$0xff] %v4315_v61  ;;  %v3076_v7 = vld [vmem:[%s6038_s1 + $0xf8] sm:$0xf0]  ;;  %v465_v9 = vshll.u32 %v4388_v57, 16  ;;  %v390_v16 = vrot.slane %v389_v48, 2  ;;  %966 = vmatpush.bf16.msrb.mxu0 %v3003_v0  ;;  %v4430_v32 = vpack.c.bf16 %v25_v44, %v25_v44 }
  0x3a   :  { %v3079_v10 = vor.u32 %v3771_v5, %v3076_v7  ;;  %v2994_v12 = vld [vmem:[%s6038_s1 + $0x50] sm:$0xf]  ;;  %v3752_v13 = vld [vmem:[%s6038_s1 + $0x54] sm:$0xf0]  ;;  %v394_v18 = vrot.slane %v4361_v30, 7  ;;  %1004 = vmatpush.bf16.msrb.mxu2 %v3007_v3  ;;  %v356_v30 = vsel %vm4395_vm4, %v4249_v31, %v355_v28  ;;  %v6044_v40 = vrot.slane %v4401_v4, 2 }
  0x3b   :  { %v26_v15 = vld [vmem:[%s6041_s0 + $0x18] sm:$0xf]  ;;  %v2995_v21 = vor.u32 %v3752_v13, %v2994_v12  ;;  %v3074_v22 = vld [vmem:[%s6038_s1 + $0xf0] sm:$0xf]  ;;  %v27_v27 = vld [vmem:[%s6041_s0 + $0x1c] sm:$0xf]  ;;  %v4451_v28 = vsel %vm4395_vm4, %v364_v45, %v368_v14  ;;  %v4464_v53 = vsel %vm4395_vm4, %v377_v60, %v381_v47 }
  0x3c   :  { %v3772_v23 = vld [vmem:[%s6038_s1 + $0xf4] sm:$0xf0]  ;;  %1022 = vmatpush.bf16.msrb.mxu3 %v3079_v10  ;;  %v3751_v48 = vld [vmem:[%s6038_s1 + $0x54] sm:$0xf]  ;;  %v2996_v49 = vld [vmem:[%s6038_s1 + $0x58] sm:$0xf0]  ;;  %v4471_v3 = vsel %vm4395_vm4, %v390_v16, %v394_v18  ;;  %v34_v5 = vpack.c.bf16 %v26_v15, %v26_v15  ;;  %v35_v10 = vpack.c.bf16 %v27_v27, %v27_v27 }
  0x3d   :  { %v3075_v43 = vor.u32 %v3772_v23, %v3074_v22  ;;  %v67_v17 = vsel %vm4163_vm2, 0, %v4375_v52  ;;  %v464_v31 = vrot.slane %v462_v8, 6  ;;  %v2999_v44 = vor.u32 %v3751_v48, %v2996_v49  ;;  %v3769_v50 = vld [vmem:[%s6038_s1 + $0xe4] sm:$0xf]  ;;  %v3068_v54 = vld [vmem:[%s6038_s1 + $0xe8] sm:$0xf0]  ;;  %967 = vmatpush.bf16.msrb.mxu0 %v2995_v21  ;;  %vm4899_vm2 = vmor %vm42_vm0, %vm69_vm3 }
  0x3e   :  { %v125_v55 = vshrl.u32 %v4390_v58, 16  ;;  %v467_v14 = vrot.slane %v465_v9, 7  ;;  %v3071_v45 = vor.u32 %v3769_v50, %v3068_v54  ;;  %v2986_v52 = vld [vmem:[%s6038_s1 + $0x40] sm:$0xf]  ;;  %v87_v0 = vld [vmem:[#allocation2 + $0x20] sm:$0x4] }
  0x3f   :  { %984 = vmatpush.bf16.msrb.mxu1 %v3075_v43  ;;  %1005 = vmatpush.bf16.msrb.mxu2 %v2999_v44  ;;  %v3750_v47 = vld [vmem:[%s6038_s1 + $0x44] sm:$0xf0]  ;;  %v3066_v60 = vld [vmem:[%s6038_s1 + $0xe0] sm:$0xf]  ;;  %v471_v7 = vshll.u32 %v6044_v40, 16  ;;  %v132_v12 = vshrl.u32 %v4430_v32, 16 }
  0x40   :  { %v4460_v56 = vld.sshfl [vmem:[#allocation1] sm:$0xff pattern:$0x73625140]  ;;  %1023 = vmatpush.bf16.msrb.mxu3 %v3071_v45  ;;  %v2987_v8 = vor.u32 %v3750_v47, %v2986_v52  ;;  %v3770_v9 = vld [vmem:[%s6038_s1 + $0xe4] sm:$0xf0]  ;;  %v468_v18 = vor.u32 %v467_v14, %v464_v31  ;;  %v88_v27 = vsel %vm4185_vm5, 0, %v87_v0 }
  0x41   :  { %489 = vst [vmem:[#allocation1] ss:$4 sm:$0xff] %v356_v30  ;;  %v3067_v13 = vor.u32 %v3770_v9, %v3066_v60  ;;  %v3749_v15 = vld [vmem:[%s6038_s1 + $0x44] sm:$0xf]  ;;  %v2988_v16 = vld [vmem:[%s6038_s1 + $0x48] sm:$0xf0] }
  0x42   :  { %492 = vst [vmem:[#allocation1 + $0x1] ss:$4 sm:$0xff] %v4451_v28  ;;  %v2991_v21 = vor.u32 %v3749_v15, %v2988_v16  ;;  %v90_v22 = vld [vmem:[#allocation2 + $0x24] sm:$0x4]  ;;  %v93_v23 = vld [vmem:[#allocation2 + $0x28] sm:$0x4]  ;;  %968 = vmatpush.bf16.msrb.mxu0 %v2987_v8 }
  0x43   :  { %495 = vst [vmem:[#allocation1 + $0x2] ss:$4 sm:$0xff] %v4464_v53  ;;  %985 = vmatpush.bf16.msrb.mxu1 %v3067_v13  ;;  %v139_v30 = vshrl.u32 %v34_v5, 16  ;;  %v91_v43 = vsel %vm4185_vm5, 0, %v90_v22  ;;  %v127_v48 = vrot.slane %v125_v55, 7  ;;  %v146_v49 = vshrl.u32 %v35_v10, 16 }
  0x44   :  { %498 = vst [vmem:[#allocation1 + $0x3] ss:$4 sm:$0xff] %v4471_v3  ;;  %1006 = vmatpush.bf16.msrb.mxu2 %v2991_v21  ;;  %v473_v31 = vrot.slane %v471_v7, 7  ;;  %v94_v20 = vsel %vm4185_vm5, 0, %v93_v23  ;;  %v128_v25 = vshll.u32 %v4390_v58, 16  ;;  %v469_v44 = vrot.slane %v468_v18, 2 }
  0x45   :  { %65 = vst [vmem:[#allocation2 + $0x24] sm:$0x1] %v64_v36  ;;  %v135_v36 = vshll.u32 %v4430_v32, 16  ;;  %v193_v50 = vld [vmem:[#allocation2 + $0x18] sm:$0x7]  ;;  %v141_v54 = vrot.slane %v139_v30, 7 }
  0x46   :  { %68 = vst [vmem:[#allocation2 + $0x28] sm:$0x1] %v67_v17  ;;  %v134_v17 = vrot.slane %v132_v12, 7  ;;  %v142_v55 = vshll.u32 %v34_v5, 16  ;;  %v148_v14 = vrot.slane %v146_v49, 7  ;;  %v149_v45 = vshll.u32 %v35_v10, 16 }
  0x47   :  { %86 = vst [vmem:[#allocation2 + $0x1c] sm:$0x4] %v85_v19  ;;  %v130_v51 = vor.u32 %v128_v25, %v127_v48  ;;  %v291_v19 = vrot.slane %v193_v50, 2  ;;  %v4513_v35 = vsel %vm4395_vm4, %v469_v44, %v473_v31  ;;  %vm1050_vm5 = vcmask 1044484   ;;  %v3718_v59 = vld [vmem:[%s6038_s1 + $0x5e0] sm:$0xf] }
  0x48   :  { %89 = vst [vmem:[#allocation2 + $0x20] sm:$0x4] %v88_v27  ;;  %v137_v58 = vor.u32 %v135_v36, %v134_v17  ;;  %v144_v32 = vor.u32 %v142_v55, %v141_v54  ;;  %v151_v0 = vor.u32 %v149_v45, %v148_v14  ;;  %vm1051_vm3 = vmor %vm4899_vm2, %vm1050_vm5 }
  0x49   :  { %92 = vst [vmem:[#allocation2 + $0x24] sm:$0x4] %v91_v43  ;;  %v4521_v7 = vsel %vm295_vm8, %v193_v50, %v291_v19  ;;  %v4530_v15 = vsel %vm298_vm9, %v193_v50, %v291_v19  ;;  %v3767_v19 = vld [vmem:[%s6038_s1 + $0xd4] sm:$0xf]  ;;  %vm4936_vm7 = vmor %vm1051_vm3, %vm1052_vm6 }
  0x4a   :  { %95 = vst [vmem:[#allocation2 + $0x28] sm:$0x4] %v94_v20  ;;  %v396_v16 = vshrl.u32 %v4521_v7, 16  ;;  %v399_v18 = vshll.u32 %v4521_v7, 16  ;;  %v6046_v21 = vrot.slane %v4530_v15, 2 }
  0x4b   :  { %v511_v52 = vld.sshfl [vmem:[#allocation1] sm:$0xff pattern:$0x73625140]  ;;  %212 = vst [vmem:[#allocation1 + $0x20] ss:$4 sm:$0xff] %v193_v50 }
  0x4c   :  { %737 = vmatmul.bf16.vlgmr.msra.gmra.mxu0 %v511_v52  ;;  %515 = vst [vmem:[#allocation1] ss:$4 sm:$0xff] %v4451_v28  ;;  %775 = vmatmul.bf16.vlgmr.msra.gmra.mxu2 %v511_v52  ;;  %v398_v23 = vrot.slane %v396_v16, 6  ;;  %v401_v27 = vrot.slane %v399_v18, 7  ;;  %v4547_v31 = vshll.u32 %v6046_v21, 16 }
  0x4d   :  { %517 = vst [vmem:[#allocation1 + $0x1] ss:$4 sm:$0xff] %v4464_v53  ;;  %v3058_v16 = vld [vmem:[%s6038_s1 + $0xd0] sm:$0xf] }
  0x4e   :  { %519 = vst [vmem:[#allocation1 + $0x2] ss:$4 sm:$0xff] %v4471_v3  ;;  %v175_v47 = vld [vmem:[#allocation2 + $0x1c] sm:$0x7]  ;;  %v402_v44 = vor.u32 %v401_v27, %v398_v23  ;;  %v3768_v23 = vld [vmem:[%s6038_s1 + $0xd4] sm:$0xf0] }
  0x4f   :  { %522 = vst [vmem:[#allocation1 + $0x3] ss:$4 sm:$0xff] %v4513_v35  ;;  %v176_v60 = vsel %vm4204_vm10, %v130_v51, %v175_v47  ;;  %v178_v5 = vld [vmem:[#allocation2 + $0x20] sm:$0x7]  ;;  %v407_v47 = vrot.slane %v4547_v31, 7 }
  0x50   :  { %177 = vst [vmem:[#allocation2 + $0x1c] sm:$0x7] %v176_v60  ;;  %v179_v8 = vsel %vm4204_vm10, %v137_v58, %v178_v5  ;;  %v181_v9 = vld [vmem:[#allocation2 + $0x24] sm:$0x7]  ;;  %v3060_v58 = vld [vmem:[%s6038_s1 + $0xd8] sm:$0xf0] }
  0x51   :  { %180 = vst [vmem:[#allocation2 + $0x20] sm:$0x7] %v179_v8  ;;  %v182_v10 = vsel %vm4204_vm10, %v144_v32, %v181_v9  ;;  %v184_v12 = vld [vmem:[#allocation2 + $0x28] sm:$0x7]  ;;  %v3748_v8 = vld [vmem:[%s6038_s1 + $0x34] sm:$0xf0]  ;;  %v3063_v62 = vor.u32 %v3767_v19, %v3060_v58 }
  0x52   :  { %183 = vst [vmem:[#allocation2 + $0x24] sm:$0x7] %v182_v10  ;;  %v185_v13 = vsel %vm4204_vm10, %v151_v0, %v184_v12  ;;  %v2978_v32 = vld [vmem:[%s6038_s1 + $0x30] sm:$0xf]  ;;  %v3747_v27 = vld [vmem:[%s6038_s1 + $0x34] sm:$0xf] }
  0x53   :  { %186 = vst [vmem:[#allocation2 + $0x28] sm:$0x7] %v185_v13  ;;  %v2979_v41 = vor.u32 %v3748_v8, %v2978_v32  ;;  %1024 = vmatpush.bf16.msrb.mxu3 %v3063_v62  ;;  %v3052_v19 = vld [vmem:[%s6038_s1 + $0xc8] sm:$0xf0]  ;;  %v3746_v62 = vld [vmem:[%s6038_s1 + $0x24] sm:$0xf0] }
  0x54   :  { %vm1433_vm10 = vcmask 1043456  }
  0x55   :  { %969 = vmatpush.bf16.msrb.mxu0 %v2979_v41 }
  0x56   :  { %v532_v22 = vld.sshfl [vmem:[#allocation1] sm:$0xff pattern:$0x73625140] }
  0x57   :  { %756 = vmatmul.bf16.vlgmr.msra.gmra.mxu1 %v532_v22  ;;  %794 = vmatmul.bf16.vlgmr.msra.gmra.mxu3 %v532_v22  ;;  %v4535_v30 = vld [vmem:[#allocation2 + $0x1c] sm:$0x7] }
  0x58   :  { %v4537_v43 = vld [vmem:[#allocation2 + $0x20] sm:$0x7]  ;;  %215 = vst [vmem:[#allocation1 + $0x21] ss:$4 sm:$0xff] %v4535_v30  ;;  %v292_v63 = vrot.slane %v4535_v30, 2 }
  0x59   :  { %v4541_v48 = vld [vmem:[#allocation2 + $0x24] sm:$0x7]  ;;  %218 = vst [vmem:[#allocation1 + $0x22] ss:$4 sm:$0xff] %v4537_v43  ;;  %v293_v49 = vrot.slane %v4537_v43, 2 }
  0x5a   :  { %221 = vst [vmem:[#allocation1 + $0x23] ss:$4 sm:$0xff] %v4541_v48  ;;  %v294_v20 = vrot.slane %v4541_v48, 2  ;;  %v4553_v25 = vsel %vm295_vm8, %v4535_v30, %v292_v63  ;;  %v4557_v36 = vsel %vm298_vm9, %v4535_v30, %v292_v63  ;;  %v4610_v63 = vld [vmem:[#allocation2 + $0x28] sm:$0x7] }
  0x5b   :  { %v6045_v17 = vrot.slane %v4557_v36, 2  ;;  %v4562_v50 = vsel %vm295_vm8, %v4537_v43, %v293_v49  ;;  %v4566_v54 = vsel %vm298_vm9, %v4537_v43, %v293_v49  ;;  %v409_v55 = vshrl.u32 %v4553_v25, 16 }
  0x5c   :  { %v6049_v14 = vrot.slane %v4566_v54, 2  ;;  %v4572_v45 = vsel %vm295_vm8, %v4541_v48, %v294_v20  ;;  %v4576_v52 = vsel %vm298_vm9, %v4541_v48, %v294_v20  ;;  %v412_v51 = vshll.u32 %v4553_v25, 16 }
  0x5d   :  { %v6050_v0 = vrot.slane %v4576_v52, 2  ;;  %v411_v60 = vrot.slane %v409_v55, 6  ;;  %v422_v5 = vshrl.u32 %v4562_v50, 16  ;;  %v4596_v10 = vshll.u32 %v6045_v17, 16 }
  0x5e   :  { %v414_v9 = vrot.slane %v412_v51, 7  ;;  %v425_v12 = vshll.u32 %v4562_v50, 16  ;;  %v435_v13 = vshrl.u32 %v4572_v45, 16  ;;  %v438_v22 = vshll.u32 %v4572_v45, 16 }
  0x5f   :  { %v424_v18 = vrot.slane %v422_v5, 6  ;;  %v4614_v55 = vshll.u32 %v6049_v14, 16  ;;  %v4618_v51 = vshll.u32 %v6050_v0, 16  ;;  %v2980_v5 = vld [vmem:[%s6038_s1 + $0x38] sm:$0xf0]  ;;  %v451_v41 = vrot.slane %v4610_v63, 2 }
  0x60   :  { %v415_v49 = vor.u32 %v414_v9, %v411_v60  ;;  %v427_v20 = vrot.slane %v425_v12, 7  ;;  %v437_v17 = vrot.slane %v435_v13, 6  ;;  %v440_v21 = vrot.slane %v438_v22, 7  ;;  %v3765_v0 = vld [vmem:[%s6038_s1 + $0xc4] sm:$0xf] }
  0x61   :  { %v4623_v40 = vld.sshfl [vmem:[#allocation1 + $0x20] sm:$0xff pattern:$0x73625140]  ;;  %v403_v60 = vrot.slane %v402_v44, 2  ;;  %v420_v9 = vrot.slane %v4596_v10, 7  ;;  %v3059_v12 = vor.u32 %v3768_v23, %v3058_v16  ;;  %v2983_v14 = vor.u32 %v3747_v27, %v2980_v5 }
  0x62   :  { %235 = vst [vmem:[#allocation1 + $0x20] ss:$4 sm:$0xff] %v4535_v30  ;;  %v428_v37 = vor.u32 %v427_v20, %v424_v18  ;;  %v2970_v44 = vld [vmem:[%s6038_s1 + $0x20] sm:$0xf]  ;;  %v433_v58 = vrot.slane %v4614_v55, 7  ;;  %v3055_v32 = vor.u32 %v3765_v0, %v3052_v19  ;;  %v416_v8 = vrot.slane %v415_v49, 2 }
  0x63   :  { %237 = vst [vmem:[#allocation1 + $0x21] ss:$4 sm:$0xff] %v4537_v43  ;;  %986 = vmatpush.bf16.msrb.mxu1 %v3059_v12  ;;  %1007 = vmatpush.bf16.msrb.mxu2 %v2983_v14  ;;  %v441_v10 = vor.u32 %v440_v21, %v437_v17  ;;  %v446_v13 = vrot.slane %v4618_v51, 7  ;;  %v2971_v16 = vor.u32 %v3746_v62, %v2970_v44  ;;  %v3050_v18 = vld [vmem:[%s6038_s1 + $0xc0] sm:$0xf] }
  0x64   :  { %239 = vst [vmem:[#allocation1 + $0x22] ss:$4 sm:$0xff] %v4541_v48  ;;  %v3766_v14 = vld [vmem:[%s6038_s1 + $0xc4] sm:$0xf0]  ;;  %v3745_v0 = vld [vmem:[%s6038_s1 + $0x24] sm:$0xf]  ;;  %v4659_v21 = vsel %vm295_vm8, %v4610_v63, %v451_v41  ;;  %v4663_v17 = vsel %vm298_vm9, %v4610_v63, %v451_v41  ;;  %1025 = vmatpush.bf16.msrb.mxu3 %v3055_v32 }
  0x65   :  { %242 = vst [vmem:[#allocation1 + $0x23] ss:$4 sm:$0xff] %v4610_v63  ;;  %v2972_v22 = vld [vmem:[%s6038_s1 + $0x28] sm:$0xf0]  ;;  %v429_v23 = vrot.slane %v428_v37, 2  ;;  %970 = vmatpush.bf16.msrb.mxu0 %v2971_v16  ;;  %v3051_v27 = vor.u32 %v3766_v14, %v3050_v18  ;;  %v6052_v20 = vrot.slane %v4663_v17, 2 }
  0x66   :  { %v2975_v49 = vor.u32 %v3745_v0, %v2972_v22  ;;  %v3763_v55 = vld [vmem:[%s6038_s1 + $0xb4] sm:$0xf]  ;;  %v3044_v51 = vld [vmem:[%s6038_s1 + $0xb8] sm:$0xf0]  ;;  %v475_v5 = vshrl.u32 %v4659_v21, 16  ;;  %v478_v12 = vshll.u32 %v4659_v21, 16 }
  0x67   :  { %v3047_v19 = vor.u32 %v3763_v55, %v3044_v51  ;;  %v2962_v37 = vld [vmem:[%s6038_s1 + $0x10] sm:$0xf]  ;;  %v3744_v44 = vld [vmem:[%s6038_s1 + $0x14] sm:$0xf0]  ;;  %v442_v32 = vrot.slane %v441_v10, 2  ;;  %987 = vmatpush.bf16.msrb.mxu1 %v3051_v27  ;;  %v4682_v62 = vshll.u32 %v6052_v20, 16  ;;  %v408_v10 = vsel %vm4395_vm4, %v403_v60, %v407_v47 }
  0x68   :  { %1008 = vmatpush.bf16.msrb.mxu2 %v2975_v49  ;;  %v2963_v41 = vor.u32 %v3744_v44, %v2962_v37  ;;  %v3042_v16 = vld [vmem:[%s6038_s1 + $0xb0] sm:$0xf]  ;;  %v3764_v18 = vld [vmem:[%s6038_s1 + $0xb4] sm:$0xf0]  ;;  %v477_v14 = vrot.slane %v475_v5, 6  ;;  %v480_v0 = vrot.slane %v478_v12, 7  ;;  %v4702_v55 = vsel %vm4395_vm4, %v416_v8, %v420_v9 }
  0x69   :  { %v3043_v22 = vor.u32 %v3764_v18, %v3042_v16  ;;  %v3743_v27 = vld [vmem:[%s6038_s1 + $0x14] sm:$0xf]  ;;  %v2964_v49 = vld [vmem:[%s6038_s1 + $0x18] sm:$0xf0]  ;;  %1026 = vmatpush.bf16.msrb.mxu3 %v3047_v19  ;;  %v3761_v47 = vld [vmem:[%s6038_s1 + $0xa4] sm:$0xf]  ;;  %v4714_v5 = vsel %vm4395_vm4, %v429_v23, %v433_v58  ;;  %v4721_v19 = vsel %vm4395_vm4, %v442_v32, %v446_v13 }
  0x6a   :  { %971 = vmatpush.bf16.msrb.mxu0 %v2963_v41  ;;  %v2967_v31 = vor.u32 %v3743_v27, %v2964_v49  ;;  %v3036_v60 = vld [vmem:[%s6038_s1 + $0xa8] sm:$0xf0]  ;;  %v481_v12 = vor.u32 %v480_v0, %v477_v14  ;;  %v2954_v8 = vld [vmem:[%s6038_s1] sm:$0xf]  ;;  %6086 = vst [vmem:[#allocation3_spill] sm:$0xff] %v4721_v19  ;;  %v486_v44 = vrot.slane %v4682_v62, 7 }
  0x6b   :  { %v3039_v9 = vor.u32 %v3761_v47, %v3036_v60  ;;  %988 = vmatpush.bf16.msrb.mxu1 %v3043_v22  ;;  %v3742_v37 = vld [vmem:[%s6038_s1 + $0x4] sm:$0xf0]  ;;  %v3034_v58 = vld [vmem:[%s6038_s1 + $0xa0] sm:$0xf]  ;;  %v3741_v16 = vld [vmem:[%s6038_s1 + $0x4] sm:$0xf] }
  0x6c   :  { %v4710_v51 = vld.sshfl [vmem:[#allocation1 + $0x20] sm:$0xff pattern:$0x73625140]  ;;  %1009 = vmatpush.bf16.msrb.mxu2 %v2967_v31  ;;  %v482_v23 = vrot.slane %v481_v12, 2  ;;  %v2955_v41 = vor.u32 %v3742_v37, %v2954_v8  ;;  %v3762_v13 = vld [vmem:[%s6038_s1 + $0xa4] sm:$0xf0] }
  0x6d   :  { %501 = vst [vmem:[#allocation1 + $0x20] ss:$4 sm:$0xff] %v408_v10  ;;  %1027 = vmatpush.bf16.msrb.mxu3 %v3039_v9  ;;  %v3035_v32 = vor.u32 %v3762_v13, %v3034_v58  ;;  %v2956_v18 = vld [vmem:[%s6038_s1 + $0x8] sm:$0xf0]  ;;  %v3759_v10 = vld [vmem:[%s6038_s1 + $0x94] sm:$0xf] }
  0x6e   :  { %504 = vst [vmem:[#allocation1 + $0x21] ss:$4 sm:$0xff] %v4702_v55  ;;  %972 = vmatpush.bf16.msrb.mxu0 %v2955_v41  ;;  %v2959_v62 = vor.u32 %v3741_v16, %v2956_v18  ;;  %v3028_v14 = vld [vmem:[%s6038_s1 + $0x98] sm:$0xf0]  ;;  %v3026_v22 = vld [vmem:[%s6038_s1 + $0x90] sm:$0xf] }
  0x6f   :  { %507 = vst [vmem:[#allocation1 + $0x22] ss:$4 sm:$0xff] %v4714_v5  ;;  %989 = vmatpush.bf16.msrb.mxu1 %v3035_v32  ;;  %v3031_v0 = vor.u32 %v3759_v10, %v3028_v14  ;;  %v3760_v27 = vld [vmem:[%s6038_s1 + $0x94] sm:$0xf0]  ;;  %v3819_v49 = vld [vmem:[%s6038_s1 + $0x274] sm:$0xf] }
  0x70   :  { %510 = vst [vmem:[#allocation1 + $0x23] ss:$4 sm:$0xff] %v4721_v19  ;;  %1010 = vmatpush.bf16.msrb.mxu2 %v2959_v62  ;;  %v3027_v31 = vor.u32 %v3760_v27, %v3026_v22  ;;  %v3182_v47 = vld [vmem:[%s6038_s1 + $0x278] sm:$0xf0]  ;;  %v3757_v60 = vld [vmem:[%s6038_s1 + $0x84] sm:$0xf] }
  0x71   :  { %v3020_v12 = vld [vmem:[%s6038_s1 + $0x88] sm:$0xf0]  ;;  %1028 = vmatpush.bf16.msrb.mxu3 %v3031_v0  ;;  %v3185_v9 = vor.u32 %v3819_v49, %v3182_v47  ;;  %v3018_v37 = vld [vmem:[%s6038_s1 + $0x80] sm:$0xf]  ;;  %v3758_v58 = vld [vmem:[%s6038_s1 + $0x84] sm:$0xf0] }
  0x72   :  { %v3023_v8 = vor.u32 %v3757_v60, %v3020_v12  ;;  %v3817_v41 = vld [vmem:[%s6038_s1 + $0x264] sm:$0xf]  ;;  %v3174_v13 = vld [vmem:[%s6038_s1 + $0x268] sm:$0xf0]  ;;  %v3835_v32 = vld [vmem:[%s6038_s1 + $0x2f4] sm:$0xf]  ;;  %v3019_v18 = vor.u32 %v3758_v58, %v3018_v37  ;;  %v4808_v37 = vsel %vm4395_vm4, %v482_v23, %v486_v44 }
  0x73   :  { %v3246_v16 = vld [vmem:[%s6038_s1 + $0x2f8] sm:$0xf0]  ;;  %990 = vmatpush.bf16.msrb.mxu1 %v3027_v31  ;;  %v3177_v62 = vor.u32 %v3817_v41, %v3174_v13  ;;  %v3180_v10 = vld [vmem:[%s6038_s1 + $0x270] sm:$0xf]  ;;  %v3820_v14 = vld [vmem:[%s6038_s1 + $0x274] sm:$0xf0] }
  0x74   :  { %1375 = vmatpush.bf16.msra.mxu2 %v3185_v9  ;;  %v3244_v0 = vld [vmem:[%s6038_s1 + $0x2f0] sm:$0xf]  ;;  %v3249_v22 = vor.u32 %v3835_v32, %v3246_v16  ;;  %v3181_v27 = vor.u32 %v3820_v14, %v3180_v10  ;;  %v3836_v49 = vld [vmem:[%s6038_s1 + $0x2f4] sm:$0xf0]  ;;  %v3815_v31 = vld [vmem:[%s6038_s1 + $0x254] sm:$0xf] }
  0x75   :  { %v3166_v47 = vld [vmem:[%s6038_s1 + $0x258] sm:$0xf0]  ;;  %1029 = vmatpush.bf16.msrb.mxu3 %v3023_v8  ;;  %v3245_v12 = vor.u32 %v3836_v49, %v3244_v0  ;;  %v3833_v9 = vld [vmem:[%s6038_s1 + $0x2e4] sm:$0xf]  ;;  %6087 = vst [vmem:[#allocation4_spill] sm:$0xff] %v4808_v37 }
  0x76   :  { %v3238_v58 = vld [vmem:[%s6038_s1 + $0x2e8] sm:$0xf0]  ;;  %v3172_v8 = vld [vmem:[%s6038_s1 + $0x260] sm:$0xf]  ;;  %v3169_v41 = vor.u32 %v3815_v31, %v3166_v47  ;;  %v3818_v13 = vld [vmem:[%s6038_s1 + $0x264] sm:$0xf0]  ;;  %1337 = vmatpush.bf16.msra.mxu0 %v3181_v27 }
  0x77   :  { %v512_v60 = vld.sshfl [vmem:[#allocation1 + $0x20] sm:$0xff pattern:$0x73625140]  ;;  %991 = vmatpush.bf16.msrb.mxu1 %v3019_v18  ;;  %v3241_v44 = vor.u32 %v3833_v9, %v3238_v58  ;;  %v3173_v32 = vor.u32 %v3818_v13, %v3172_v8  ;;  %v3834_v16 = vld [vmem:[%s6038_s1 + $0x2e4] sm:$0xf0] }
  0x78   :  { %742 = vmatmul.bf16.gmra.mxu0 %v512_v60  ;;  %524 = vst [vmem:[#allocation1 + $0x20] ss:$4 sm:$0xff] %v4702_v55  ;;  %780 = vmatmul.bf16.gmra.mxu2 %v512_v60  ;;  %v3236_v23 = vld [vmem:[%s6038_s1 + $0x2e0] sm:$0xf]  ;;  %v3813_v18 = vld [vmem:[%s6038_s1 + $0x244] sm:$0xf] }
  0x79   :  { %526 = vst [vmem:[#allocation1 + $0x21] ss:$4 sm:$0xff] %v4714_v5  ;;  %1376 = vmatpush.bf16.msra.mxu2 %v3177_v62  ;;  %1394 = vmatpush.bf16.msra.mxu3 %v3249_v22  ;;  %v3237_v62 = vor.u32 %v3834_v16, %v3236_v23  ;;  %v3158_v10 = vld [vmem:[%s6038_s1 + $0x248] sm:$0xf0]  ;;  %v3831_v14 = vld [vmem:[%s6038_s1 + $0x2d4] sm:$0xf] }
  0x7a   :  { %528 = vst [vmem:[#allocation1 + $0x22] ss:$4 sm:$0xff] %v4721_v19  ;;  %v3230_v0 = vld [vmem:[%s6038_s1 + $0x2d8] sm:$0xf0]  ;;  %v3164_v22 = vld [vmem:[%s6038_s1 + $0x250] sm:$0xf]  ;;  %v3161_v49 = vor.u32 %v3813_v18, %v3158_v10  ;;  %1338 = vmatpush.bf16.msra.mxu0 %v3173_v32 }
  0x7b   :  { %531 = vst [vmem:[#allocation1 + $0x23] ss:$4 sm:$0xff] %v4808_v37  ;;  %1356 = vmatpush.bf16.msra.mxu1 %v3245_v12  ;;  %v3816_v27 = vld [vmem:[%s6038_s1 + $0x254] sm:$0xf0]  ;;  %v3228_v31 = vld [vmem:[%s6038_s1 + $0x2d0] sm:$0xf]  ;;  %v3233_v60 = vor.u32 %v3831_v14, %v3230_v0 }
  0x7c   :  { %v3832_v47 = vld [vmem:[%s6038_s1 + $0x2d4] sm:$0xf0]  ;;  %v3165_v12 = vor.u32 %v3816_v27, %v3164_v22  ;;  %v3811_v9 = vld [vmem:[%s6038_s1 + $0x234] sm:$0xf]  ;;  %v3150_v58 = vld [vmem:[%s6038_s1 + $0x238] sm:$0xf0] }
  0x7d   :  { %1377 = vmatpush.bf16.msra.mxu2 %v3169_v41  ;;  %1395 = vmatpush.bf16.msra.mxu3 %v3241_v44  ;;  %v3829_v8 = vld [vmem:[%s6038_s1 + $0x2c4] sm:$0xf]  ;;  %v3222_v41 = vld [vmem:[%s6038_s1 + $0x2c8] sm:$0xf0]  ;;  %v3156_v13 = vld [vmem:[%s6038_s1 + $0x240] sm:$0xf]  ;;  %v3229_v44 = vor.u32 %v3832_v47, %v3228_v31 }
  0x7e   :  { %v3814_v23 = vld [vmem:[%s6038_s1 + $0x244] sm:$0xf0]  ;;  %v3220_v32 = vld [vmem:[%s6038_s1 + $0x2c0] sm:$0xf]  ;;  %v3809_v18 = vld [vmem:[%s6038_s1 + $0x224] sm:$0xf]  ;;  %1339 = vmatpush.bf16.msra.mxu0 %v3165_v12  ;;  %v3225_v27 = vor.u32 %v3829_v8, %v3222_v41 }
  0x7f   :  { %1357 = vmatpush.bf16.msra.mxu1 %v3237_v62  ;;  %v3830_v16 = vld [vmem:[%s6038_s1 + $0x2c4] sm:$0xf0]  ;;  %v3153_v62 = vor.u32 %v3811_v9, %v3150_v58  ;;  %v3142_v10 = vld [vmem:[%s6038_s1 + $0x228] sm:$0xf0]  ;;  %v3827_v14 = vld [vmem:[%s6038_s1 + $0x2b4] sm:$0xf]  ;;  %v3157_v31 = vor.u32 %v3814_v23, %v3156_v13 }
  0x80   :  { %v3214_v0 = vld [vmem:[%s6038_s1 + $0x2b8] sm:$0xf0]  ;;  %v3812_v47 = vld [vmem:[%s6038_s1 + $0x234] sm:$0xf0]  ;;  %v3212_v9 = vld [vmem:[%s6038_s1 + $0x2b0] sm:$0xf]  ;;  %v3221_v41 = vor.u32 %v3830_v16, %v3220_v32  ;;  %v3145_v13 = vor.u32 %v3809_v18, %v3142_v10 }
  0x81   :  { %1378 = vmatpush.bf16.msra.mxu2 %v3161_v49  ;;  %1396 = vmatpush.bf16.msra.mxu3 %v3233_v60  ;;  %v3148_v49 = vld [vmem:[%s6038_s1 + $0x230] sm:$0xf]  ;;  %v3828_v12 = vld [vmem:[%s6038_s1 + $0x2b4] sm:$0xf0]  ;;  %v3807_v58 = vld [vmem:[%s6038_s1 + $0x214] sm:$0xf]  ;;  %v3217_v23 = vor.u32 %v3827_v14, %v3214_v0 }
  0x82   :  { %v533_v22 = vld.sshfl [vmem:[#allocation1 + $0x20] sm:$0xff pattern:$0x73625140]  ;;  %v3134_v8 = vld [vmem:[%s6038_s1 + $0x218] sm:$0xf0]  ;;  %1340 = vmatpush.bf16.msra.mxu0 %v3157_v31  ;;  %v3213_v11 = vor.u32 %v3828_v12, %v3212_v9  ;;  %v3080_v16 = vrot.slane %v4210_v1, 9 }
  0x83   :  { %761 = vmatmul.bf16.gmra.mxu1 %v533_v22  ;;  %799 = vmatmul.bf16.gmra.mxu3 %v533_v22  ;;  %v3149_v22 = vor.u32 %v3812_v47, %v3148_v49  ;;  %v3206_v20 = vld [vmem:[%s6038_s1 + $0x2a8] sm:$0xf0]  ;;  %v3137_v37 = vor.u32 %v3807_v58, %v3134_v8  ;;  %v3810_v32 = vld [vmem:[%s6038_s1 + $0x224] sm:$0xf0]  ;;  %v3204_v18 = vld [vmem:[%s6038_s1 + $0x2a0] sm:$0xf] }
  0x84   :  { %1358 = vmatpush.bf16.msra.mxu1 %v3229_v44  ;;  %v3825_v44 = vld [vmem:[%s6038_s1 + $0x2a4] sm:$0xf]  ;;  %v3826_v10 = vld [vmem:[%s6038_s1 + $0x2a4] sm:$0xf0]  ;;  %v6090_v14 = vmov 0  ;;  %v6093_v0 = vrot.slane %v4213_v2, 2 }
  0x85   :  { %1379 = vmatpush.bf16.msra.mxu2 %v3153_v62  ;;  %1397 = vmatpush.bf16.msra.mxu3 %v3225_v27  ;;  %v3140_v62 = vld [vmem:[%s6038_s1 + $0x220] sm:$0xf]  ;;  %v6091_v14 = vsel %vm4936_vm7, 4294967295, %v6090_v14  ;;  %v3081_v1 = vrot.slane %v4255_v33, 9  ;;  %v6094_v31 = vrot.slane %v4259_v34, 2  ;;  %v3082_v49 = vrot.slane %v4267_v38, 9 }
  0x86   :  { %6092 = vst [vmem:[#allocation5_spill] sm:$0xff] %v6091_v14  ;;  %v1056_v27 = vrot.slane %v6093_v0, 7  ;;  %v3209_v47 = vor.u32 %v3825_v44, %v3206_v20  ;;  %v3805_v9 = vld [vmem:[%s6038_s1 + $0x204] sm:$0xf]  ;;  %v6095_v60 = vrot.slane %v4271_v39, 2  ;;  %v3083_v2 = vrot.slane %v4277_v42, 9  ;;  %1341 = vmatpush.bf16.msra.mxu0 %v3149_v22 }
  0x87   :  { %v6096_v58 = vrot.slane %v4288_v46, 2  ;;  %v3141_v34 = vor.u32 %v3810_v32, %v3140_v62  ;;  %v3126_v38 = vld [vmem:[%s6038_s1 + $0x208] sm:$0xf0]  ;;  %v3823_v39 = vld [vmem:[%s6038_s1 + $0x294] sm:$0xf]  ;;  %v3205_v22 = vor.u32 %v3826_v10, %v3204_v18 }
  0x88   :  { %973 = vmatmul.bf16.vlgmr.msrb.gmra.mxu0 %v4325_v6  ;;  %1011 = vmatmul.bf16.vlgmr.msrb.gmra.mxu2 %v4325_v6  ;;  %v1060_v6 = vrot.slane %v6094_v31, 7  ;;  %v1064_v12 = vrot.slane %v6095_v60, 7  ;;  %v1057_v20 = vsel %vm4936_vm7, %v3080_v16, %v1056_v27  ;;  %v3198_v42 = vld [vmem:[%s6038_s1 + $0x298] sm:$0xf0]  ;;  %v3129_v44 = vor.u32 %v3805_v9, %v3126_v38  ;;  %v3196_v62 = vld [vmem:[%s6038_s1 + $0x290] sm:$0xf] }
  0x89   :  { %1359 = vmatpush.bf16.msra.mxu1 %v3221_v41  ;;  %1380 = vmatpush.bf16.msra.mxu2 %v3145_v13  ;;  %v1068_v33 = vrot.slane %v6096_v58, 7  ;;  %1097 = vst [vmem:[#allocation1] ss:$4 sm:$0xff] %v1057_v20  ;;  %v3132_v13 = vld [vmem:[%s6038_s1 + $0x210] sm:$0xf]  ;;  %v3201_v32 = vor.u32 %v3823_v39, %v3198_v42  ;;  %v3088_v27 = vrot.slane %v4388_v57, 9 }
  0x8a   :  { %1398 = vmatpush.bf16.msra.mxu3 %v3217_v23  ;;  %v4961_v8 = vsel %vm4936_vm7, %v3081_v1, %v1060_v6  ;;  %v4971_v46 = vsel %vm4936_vm7, %v3082_v49, %v1064_v12  ;;  %v3808_v23 = vld [vmem:[%s6038_s1 + $0x214] sm:$0xf0]  ;;  %1342 = vmatpush.bf16.msra.mxu0 %v3141_v34  ;;  %v3124_v18 = vld [vmem:[%s6038_s1 + $0x200] sm:$0xf]  ;;  %v3806_v10 = vld [vmem:[%s6038_s1 + $0x204] sm:$0xf0] }
  0x8b   :  { %6097 = vst [vmem:[#allocation6_spill] sm:$0xff] %v4961_v8  ;;  %v4975_v41 = vsel %vm4936_vm7, %v3083_v2, %v1068_v33  ;;  %v3133_v16 = vor.u32 %v3808_v23, %v3132_v13  ;;  %v3824_v0 = vld [vmem:[%s6038_s1 + $0x294] sm:$0xf0]  ;;  %v3084_v1 = vrot.slane %v4521_v7, 9  ;;  %v6100_v31 = vrot.slane %v4530_v15, 2 }
  0x8c   :  { %6098 = vst [vmem:[#allocation7_spill] sm:$0xff] %v4971_v46  ;;  %v3085_v49 = vrot.slane %v4553_v25, 9  ;;  %v6101_v9 = vrot.slane %v4557_v36, 2  ;;  %v3086_v12 = vrot.slane %v4562_v50, 9  ;;  %v6102_v2 = vrot.slane %v4566_v54, 2 }
  0x8d   :  { %6099 = vst [vmem:[#allocation8_spill] sm:$0xff] %v4975_v41  ;;  %1360 = vmatpush.bf16.msra.mxu1 %v3213_v11  ;;  %1381 = vmatpush.bf16.msra.mxu2 %v3137_v37  ;;  %v3821_v11 = vld [vmem:[%s6038_s1 + $0x284] sm:$0xf]  ;;  %v3190_v37 = vld [vmem:[%s6038_s1 + $0x288] sm:$0xf0]  ;;  %v1072_v6 = vrot.slane %v6100_v31, 7  ;;  %v3125_v7 = vor.u32 %v3806_v10, %v3124_v18 }
  0x8e   :  { %1100 = vst [vmem:[#allocation1 + $0x1] ss:$4 sm:$0xff] %v4961_v8  ;;  %1399 = vmatpush.bf16.msra.mxu3 %v3209_v47  ;;  %v3197_v47 = vor.u32 %v3824_v0, %v3196_v62  ;;  %v1076_v60 = vrot.slane %v6101_v9, 7  ;;  %v1080_v58 = vrot.slane %v6102_v2, 7  ;;  %1343 = vmatpush.bf16.msra.mxu0 %v3133_v16  ;;  %v3193_v57 = vor.u32 %v3821_v11, %v3190_v37  ;;  %v3188_v15 = vld [vmem:[%s6038_s1 + $0x280] sm:$0xf] }
  0x8f   :  { %1103 = vst [vmem:[#allocation1 + $0x2] ss:$4 sm:$0xff] %v4971_v46  ;;  %v3822_v25 = vld [vmem:[%s6038_s1 + $0x284] sm:$0xf0]  ;;  %v6103_v36 = vrot.slane %v4401_v4, 2  ;;  %v1073_v50 = vsel %vm4936_vm7, %v3084_v1, %v1072_v6  ;;  %v3087_v38 = vrot.slane %v4572_v45, 9 }
  0x90   :  { %1106 = vst [vmem:[#allocation1 + $0x3] ss:$4 sm:$0xff] %v4975_v41  ;;  %v5028_v54 = vsel %vm4936_vm7, %v3085_v49, %v1076_v60  ;;  %v5032_v34 = vsel %vm4936_vm7, %v3086_v12, %v1080_v58  ;;  %v6106_v4 = vrot.slane %v4576_v52, 2  ;;  %v3189_v42 = vor.u32 %v3822_v25, %v3188_v15  ;;  %v3884_v14 = vld [vmem:[%s6038_s1 + $0x474] sm:$0xf0] }
  0x91   :  { %1361 = vmatpush.bf16.msra.mxu1 %v3205_v22  ;;  %1382 = vmatpush.bf16.msra.mxu2 %v3129_v44  ;;  %v1090_v33 = vrot.slane %v6103_v36, 7  ;;  %6104 = vst [vmem:[#allocation9_spill] sm:$0xff] %v5028_v54  ;;  %v3089_v52 = vrot.slane %v4659_v21, 9  ;;  %v6109_v13 = vrot.slane %v4663_v17, 2 }
  0x92   :  { %1400 = vmatpush.bf16.msra.mxu3 %v3201_v32  ;;  %6105 = vst [vmem:[#allocation10_spill] sm:$0xff] %v5032_v34  ;;  %v1084_v20 = vrot.slane %v6106_v4, 7  ;;  %1344 = vmatpush.bf16.msra.mxu0 %v3125_v7 }
  0x93   :  { %992 = vmatmul.bf16.vlgmr.msrb.gmra.mxu1 %v4460_v56  ;;  %1030 = vmatmul.bf16.vlgmr.msrb.gmra.mxu3 %v4460_v56  ;;  %1109 = vst [vmem:[#allocation1 + $0x20] ss:$4 sm:$0xff] %v1073_v50  ;;  %v5042_v56 = vsel %vm4936_vm7, %v3088_v27, %v1090_v33  ;;  %v1094_v23 = vrot.slane %v6109_v13, 7 }
  0x94   :  { %1112 = vst [vmem:[#allocation1 + $0x21] ss:$4 sm:$0xff] %v5028_v54  ;;  %v5047_v45 = vsel %vm4936_vm7, %v3087_v38, %v1084_v20 }
  0x95   :  { %1362 = vmatpush.bf16.msra.mxu1 %v3197_v47  ;;  %1115 = vst [vmem:[#allocation1 + $0x22] ss:$4 sm:$0xff] %v5032_v34  ;;  %v5060_v44 = vsel %vm4936_vm7, %v3089_v52, %v1094_v23 }
  0x96   :  { %1401 = vmatpush.bf16.msra.mxu3 %v3193_v57  ;;  %6107 = vst [vmem:[#allocation11_spill] sm:$0xff] %v5042_v56 }
  0x97   :  { %v1119_v39 = vld.sshfl [vmem:[#allocation1] sm:$0xff pattern:$0x73625140]  ;;  %6108 = vst [vmem:[#allocation12_spill] sm:$0xff] %v5047_v45 }
  0x98   :  { %1123 = vst [vmem:[#allocation1] ss:$4 sm:$0xff] %v4961_v8  ;;  %978 = vmatmul.bf16.gmra.mxu0 %v4623_v40  ;;  %1016 = vmatmul.bf16.gmra.mxu2 %v4623_v40 }
  0x99   :  { %1125 = vst [vmem:[#allocation1 + $0x1] ss:$4 sm:$0xff] %v4971_v46  ;;  %1363 = vmatpush.bf16.msra.mxu1 %v3189_v42 }
  0x9a   :  { %1127 = vst [vmem:[#allocation1 + $0x2] ss:$4 sm:$0xff] %v4975_v41 }
  0x9b   :  { %1130 = vst [vmem:[#allocation1 + $0x3] ss:$4 sm:$0xff] %v5042_v56 }
  0x9c   :  { %1118 = vst [vmem:[#allocation1 + $0x23] ss:$4 sm:$0xff] %v5047_v45 }
  0x9d   :  { %6110 = vst [vmem:[#allocation13_spill] sm:$0xff] %v5060_v44 }
  0xa2   :  { %v1140_v40 = vld.sshfl [vmem:[#allocation1] sm:$0xff pattern:$0x73625140] }
  0xa3   :  { %v1120_v22 = vld.sshfl [vmem:[#allocation1 + $0x20] sm:$0xff pattern:$0x73625140]  ;;  %997 = vmatmul.bf16.gmra.mxu1 %v4710_v51  ;;  %1035 = vmatmul.bf16.gmra.mxu3 %v4710_v51 }
  0xa4   :  { %1132 = vst [vmem:[#allocation1 + $0x20] ss:$4 sm:$0xff] %v5028_v54 }
  0xa5   :  { %1134 = vst [vmem:[#allocation1 + $0x21] ss:$4 sm:$0xff] %v5032_v34 }
  0xa6   :  { %1136 = vst [vmem:[#allocation1 + $0x22] ss:$4 sm:$0xff] %v5047_v45 }
  0xa7   :  { %1139 = vst [vmem:[#allocation1 + $0x23] ss:$4 sm:$0xff] %v5060_v44  ;;  %v3883_v44 = vld [vmem:[%s6038_s1 + $0x474] sm:$0xf] }
  0xa8   :  { %1383 = vmatmul.bf16.vlgmr.msra.gmra.mxu2 %v1119_v39  ;;  %1345 = vmatmul.bf16.vlgmr.msra.gmra.mxu0 %v1119_v39 }
  0xae   :  { %v1141_v21 = vld.sshfl [vmem:[#allocation1 + $0x20] sm:$0xff pattern:$0x73625140] }
  0xb3   :  { %1364 = vmatmul.bf16.vlgmr.msra.gmra.mxu1 %v1140_v40  ;;  %1402 = vmatmul.bf16.vlgmr.msra.gmra.mxu3 %v1140_v40 }
  0xb8   :  { %1388 = vmatmul.bf16.gmra.mxu2 %v1120_v22  ;;  %1350 = vmatmul.bf16.gmra.mxu0 %v1120_v22 }
  0xc3   :  { %1369 = vmatmul.bf16.gmra.mxu1 %v1141_v21  ;;  %1407 = vmatmul.bf16.gmra.mxu3 %v1141_v21  ;;  %v3372_v21 = vld [vmem:[%s6038_s1 + $0x470] sm:$0xf] }
  0xc4   :  { %v3373_v54 = vor.u32 %v3884_v14, %v3372_v21  ;;  %v3882_v14 = vld [vmem:[%s6038_s1 + $0x464] sm:$0xf0]  ;;  %v3900_v21 = vld [vmem:[%s6038_s1 + $0x4f4] sm:$0xf0] }
  0xc6   :  { %1947 = vmatpush.bf16.msrb.mxu0 %v3373_v54 }
  0xc9   :  { %v738_v17 = vpop.f32.mrf.mxu0 }
  0xcf   :  { %v776_v62 = vpop.f32.mrf.mxu2 }
  0xd1   :  { %v740_v32 = vpop.f32.mrf.mxu0 }
  0xd4   :  { %v757_v51 = vpop.f32.mrf.mxu1 }
  0xd5   :  { %v758_v23 = vadd.f32 %v757_v51, %v738_v17  ;;  %v3374_v17 = vld [vmem:[%s6038_s1 + $0x478] sm:$0xf0] }
  0xd7   :  { %v778_v16 = vpop.f32.mrf.mxu2 }
  0xda   :  { %v795_v0 = vpop.f32.mrf.mxu3 }
  0xdb   :  { %v796_v40 = vadd.f32 %v795_v0, %v776_v62  ;;  %v3377_v0 = vor.u32 %v3883_v44, %v3374_v17  ;;  %v3879_v17 = vld [vmem:[%s6038_s1 + $0x454] sm:$0xf] }
  0xdc   :  { %v759_v37 = vpop.f32.mrf.mxu1 }
  0xdd   :  { %v760_v62 = vadd.f32 %v759_v37, %v740_v32  ;;  %1985 = vmatpush.bf16.msrb.mxu2 %v3377_v0  ;;  %v3881_v32 = vld [vmem:[%s6038_s1 + $0x464] sm:$0xf] }
  0xe2   :  { %v797_v10 = vpop.f32.mrf.mxu3 }
  0xf5   :  { %v5067_v11 = vpop.f32.mrf.mxu0 }
  0xfb   :  { %v5069_v18 = vpop.f32.mrf.mxu2 }
  0xfd   :  { %v5071_v27 = vpop.f32.mrf.mxu0 }
 0x100   :  { %v5073_v1 = vpop.f32.mrf.mxu1 }
 0x103   :  { %v5075_v31 = vpop.f32.mrf.mxu2 }
 0x105   :  { %v974_v6 = vpop.f32.mrf.mxu0 }
 0x106   :  { %v5077_v49 = vpop.f32.mrf.mxu3  ;;  %v975_v45 = vadd.f32 %v974_v6, %v758_v23  ;;  %v3364_v6 = vld [vmem:[%s6038_s1 + $0x460] sm:$0xf]  ;;  %v3880_v23 = vld [vmem:[%s6038_s1 + $0x454] sm:$0xf0] }
 0x107   :  { %v3365_v37 = vor.u32 %v3882_v14, %v3364_v6 }
 0x108   :  { %v5079_v47 = vpop.f32.mrf.mxu1 }
 0x109   :  { %1948 = vmatpush.bf16.msrb.mxu0 %v3365_v37 }
 0x10b   :  { %v1012_v9 = vpop.f32.mrf.mxu2 }
 0x10c   :  { %v1013_v51 = vadd.f32 %v1012_v9, %v796_v40 }
 0x10d   :  { %v976_v60 = vpop.f32.mrf.mxu0 }
 0x10e   :  { %v5081_v12 = vpop.f32.mrf.mxu3  ;;  %v977_v46 = vadd.f32 %v976_v60, %v760_v62  ;;  %v3358_v62 = vld [vmem:[%s6038_s1 + $0x458] sm:$0xf0] }
 0x110   :  { %v993_v2 = vpop.f32.mrf.mxu1 }
 0x111   :  { %v994_v56 = vadd.f32 %v993_v2, %v975_v45 }
 0x113   :  { %v1014_v58 = vpop.f32.mrf.mxu2 }
 0x115   :  { %v5083_v7 = vpop.f32.mrf.mxu0 }
 0x116   :  { %v1031_v57 = vpop.f32.mrf.mxu3 }
 0x117   :  { %v1032_v8 = vadd.f32 %v1031_v57, %v1013_v51  ;;  %v798_v57 = vadd.f32 %v797_v10, %v778_v16 }
 0x118   :  { %v995_v15 = vpop.f32.mrf.mxu1 }
 0x119   :  { %v996_v54 = vadd.f32 %v995_v15, %v977_v46  ;;  %v3356_v15 = vld [vmem:[%s6038_s1 + $0x450] sm:$0xf] }
 0x11a   :  { %v3357_v6 = vor.u32 %v3880_v23, %v3356_v15  ;;  %v801_v15 = vadd.f32 %v5077_v49, %v5069_v18  ;;  %v765_v18 = vadd.f32 %v5079_v47, %v5071_v27 }
 0x11b   :  { %v5085_v25 = vpop.f32.mrf.mxu2 }
 0x11c   :  { %1949 = vmatpush.bf16.msrb.mxu0 %v3357_v6  ;;  %v1018_v49 = vadd.f32 %v5085_v25, %v801_v15  ;;  %v3420_v6 = vld [vmem:[%s6038_s1 + $0x4d0] sm:$0xf]  ;;  %v803_v15 = vadd.f32 %v5081_v12, %v5075_v31  ;;  %v3873_v31 = vld [vmem:[%s6038_s1 + $0x424] sm:$0xf]  ;;  %v3334_v12 = vld [vmem:[%s6038_s1 + $0x428] sm:$0xf0] }
 0x11d   :  { %v5089_v33 = vpop.f32.mrf.mxu0 }
 0x11e   :  { %v5087_v36 = vpop.f32.mrf.mxu3 }
 0x120   :  { %v5091_v50 = vpop.f32.mrf.mxu1 }
 0x123   :  { %v5093_v38 = vpop.f32.mrf.mxu2 }
 0x125   :  { %v1346_v39 = vpop.f32.mrf.mxu0 }
 0x126   :  { %v5095_v4 = vpop.f32.mrf.mxu3 }
 0x128   :  { %v5097_v20 = vpop.f32.mrf.mxu1 }
 0x12b   :  { %v1384_v52 = vpop.f32.mrf.mxu2 }
 0x12d   :  { %v1348_v22 = vpop.f32.mrf.mxu0 }
 0x12e   :  { %v5099_v42 = vpop.f32.mrf.mxu3 }
 0x130   :  { %v1365_v13 = vpop.f32.mrf.mxu1 }
 0x131   :  { %v1366_v34 = vadd.f32 %v1365_v13, %v1346_v39 }
 0x133   :  { %v1413_v44 = vadd.f32 %v1366_v34, %v994_v56  ;;  %v1386_v39 = vpop.f32.mrf.mxu2  ;;  %v3899_v34 = vld [vmem:[%s6038_s1 + $0x4f4] sm:$0xf]  ;;  %v3438_v56 = vld [vmem:[%s6038_s1 + $0x4f8] sm:$0xf0] }
 0x134   :  { %v3441_v10 = vor.u32 %v3899_v34, %v3438_v56 }
 0x135   :  { %v1573_v46 = vmul.f32 %v1413_v44, %v1413_v44  ;;  %v1351_v16 = vpop.f32.mrf.mxu0 }
 0x136   :  { %v1403_v41 = vpop.f32.mrf.mxu3  ;;  %2004 = vmatpush.bf16.msrb.mxu3 %v3441_v10  ;;  %v3350_v10 = vld [vmem:[%s6038_s1 + $0x448] sm:$0xf0] }
 0x137   :  { %v1404_v19 = vadd.f32 %v1403_v41, %v1384_v52  ;;  %v3366_v41 = vld [vmem:[%s6038_s1 + $0x468] sm:$0xf0] }
 0x138   :  { %v1367_v45 = vpop.f32.mrf.mxu1  ;;  %v3369_v2 = vor.u32 %v3881_v32, %v3366_v41  ;;  %v3361_v32 = vor.u32 %v3879_v17, %v3358_v62  ;;  %v3422_v17 = vld [vmem:[%s6038_s1 + $0x4d8] sm:$0xf0] }
 0x139   :  { %v1414_v9 = vadd.f32 %v1404_v19, %v1032_v8  ;;  %v1368_v60 = vadd.f32 %v1367_v45, %v1348_v22  ;;  %v763_v19 = vadd.f32 %v5073_v1, %v5067_v11  ;;  %v1015_v8 = vadd.f32 %v1014_v58, %v798_v57  ;;  %v3436_v22 = vld [vmem:[%s6038_s1 + $0x4f0] sm:$0xf] }
 0x13a   :  { %1986 = vmatpush.bf16.msrb.mxu2 %v3369_v2  ;;  %v3437_v14 = vor.u32 %v3900_v21, %v3436_v22  ;;  %v3348_v2 = vld [vmem:[%s6038_s1 + $0x440] sm:$0xf]  ;;  %v3895_v21 = vld [vmem:[%s6038_s1 + $0x4d4] sm:$0xf] }
 0x13b   :  { %v1429_v52 = vrot.slane %v1414_v9, 4  ;;  %v5125_v13 = vadd.f32 %v1368_v60, %v996_v54  ;;  %v1034_v45 = vadd.f32 %v5087_v36, %v1015_v8  ;;  %v3897_v54 = vld [vmem:[%s6038_s1 + $0x4e4] sm:$0xf]  ;;  %v3430_v60 = vld [vmem:[%s6038_s1 + $0x4e8] sm:$0xf0]  ;;  %v1389_v62 = vpop.f32.mrf.mxu2 }
 0x13c   :  { %1966 = vmatpush.bf16.msrb.mxu1 %v3437_v14  ;;  %v3878_v36 = vld [vmem:[%s6038_s1 + $0x444] sm:$0xf0] }
 0x13d   :  { %v1434_v40 = vsel %vm1433_vm10, %v1413_v44, %v1429_v52  ;;  %v1435_v11 = vsel %vm1433_vm10, %v1429_v52, %v1413_v44  ;;  %v1553_v1 = vadd.f32 %v5125_v13, %v1413_v44  ;;  %v1575_v58 = vmul.f32 %v5125_v13, %v5125_v13  ;;  %v3898_v8 = vld [vmem:[%s6038_s1 + $0x4e4] sm:$0xf0] }
 0x13e   :  { %v1436_v51 = vrot.slane %v1435_v11, 4  ;;  %1446 = vst [vmem:[#allocation1] ss:$2 sm:$0xff] %v1434_v40  ;;  %v1405_v0 = vpop.f32.mrf.mxu3  ;;  %v980_v44 = vadd.f32 %v5083_v7, %v763_v19  ;;  %v3433_v7 = vor.u32 %v3897_v54, %v3430_v60  ;;  %1987 = vmatpush.bf16.msrb.mxu2 %v3361_v32  ;;  %v3349_v19 = vor.u32 %v3878_v36, %v3348_v2  ;;  %v3896_v60 = vld [vmem:[%s6038_s1 + $0x4d4] sm:$0xf0] }
 0x13f   :  { %v1581_v37 = vadd.f32 %v1575_v58, %v1573_v46  ;;  %v1406_v41 = vadd.f32 %v1405_v0, %v1386_v39  ;;  %v3428_v39 = vld [vmem:[%s6038_s1 + $0x4e0] sm:$0xf]  ;;  %v3877_v46 = vld [vmem:[%s6038_s1 + $0x444] sm:$0xf]  ;;  %v3876_v0 = vld [vmem:[%s6038_s1 + $0x434] sm:$0xf0]  ;;  %v982_v2 = vadd.f32 %v5089_v33, %v765_v18  ;;  %v3421_v36 = vor.u32 %v3896_v60, %v3420_v6 }
 0x140   :  { %1450 = vst [vmem:[#allocation1 + $0x10] ss:$2 sm:$0xff] %v1436_v51  ;;  %v1370_v57 = vpop.f32.mrf.mxu1  ;;  %v999_v52 = vadd.f32 %v5091_v50, %v980_v44  ;;  %v1574_v50 = vmul.f32 %v1414_v9, %v1414_v9  ;;  %2005 = vmatpush.bf16.msrb.mxu3 %v3433_v7  ;;  %v3353_v23 = vor.u32 %v3877_v46, %v3350_v10  ;;  %v3340_v51 = vld [vmem:[%s6038_s1 + $0x430] sm:$0xf]  ;;  %v3414_v46 = vld [vmem:[%s6038_s1 + $0x4c8] sm:$0xf0] }
 0x141   :  { %v1416_v34 = vadd.f32 %v1406_v41, %v1034_v45  ;;  %v1371_v56 = vadd.f32 %v1370_v57, %v1351_v16  ;;  %v3429_v16 = vor.u32 %v3898_v8, %v3428_v39  ;;  %1950 = vmatpush.bf16.msrb.mxu0 %v3349_v19  ;;  %v1353_v41 = vpop.f32.mrf.mxu0  ;;  %v3341_v54 = vor.u32 %v3876_v0, %v3340_v51  ;;  %v3332_v10 = vld [vmem:[%s6038_s1 + $0x420] sm:$0xf]  ;;  %v3406_v0 = vld [vmem:[%s6038_s1 + $0x4b8] sm:$0xf0]  ;;  %v3324_v6 = vld [vmem:[%s6038_s1 + $0x410] sm:$0xf] }
 0x142   :  { %1988 = vmatpush.bf16.msrb.mxu2 %v3353_v23  ;;  %v1001_v33 = vadd.f32 %v5097_v20, %v982_v2  ;;  %v3894_v23 = vld [vmem:[%s6038_s1 + $0x4c4] sm:$0xf0]  ;;  %v3337_v51 = vor.u32 %v3873_v31, %v3334_v12  ;;  %v3872_v2 = vld [vmem:[%s6038_s1 + $0x414] sm:$0xf0] }
 0x143   :  { %v1430_v22 = vrot.slane %v1416_v34, 4  ;;  %v1562_v40 = vadd.f32 %v1416_v34, %v1414_v9  ;;  %v1576_v11 = vmul.f32 %v1416_v34, %v1416_v34  ;;  %v5187_v58 = vadd.f32 %v1371_v56, %v999_v52  ;;  %1967 = vmatpush.bf16.msrb.mxu1 %v3429_v16  ;;  %v3875_v34 = vld [vmem:[%s6038_s1 + $0x434] sm:$0xf]  ;;  %v3342_v56 = vld [vmem:[%s6038_s1 + $0x438] sm:$0xf0] }
 0x144   :  { %v3425_v9 = vor.u32 %v3895_v21, %v3422_v17  ;;  %v3345_v8 = vor.u32 %v3875_v34, %v3342_v56  ;;  %v3412_v16 = vld [vmem:[%s6038_s1 + $0x4c0] sm:$0xf]  ;;  %v3892_v34 = vld [vmem:[%s6038_s1 + $0x4b4] sm:$0xf0]  ;;  %v3326_v56 = vld [vmem:[%s6038_s1 + $0x418] sm:$0xf0] }
 0x145   :  { %v1437_v27 = vsel %vm1433_vm10, %v5125_v13, %v1430_v22  ;;  %v1438_v47 = vsel %vm1433_vm10, %v1430_v22, %v5125_v13  ;;  %v1590_v25 = vadd.f32 %v1576_v11, %v1574_v50  ;;  %v1554_v14 = vadd.f32 %v1553_v1, %v5187_v58  ;;  %v1447_v57 = vld.sshfl [vmem:[#allocation1] sm:$0xff pattern:$0x75316420]  ;;  %v1448_v1 = vld.sshfl [vmem:[#allocation1 + $0x8] sm:$0xff pattern:$0x75316420]  ;;  %1951 = vmatpush.bf16.msrb.mxu0 %v3341_v54 }
 0x146   :  { %v1439_v32 = vrot.slane %v1438_v47, 4  ;;  %1454 = vst [vmem:[#allocation1 + $0x20] ss:$2 sm:$0xff] %v1437_v27  ;;  %v1577_v44 = vmul.f32 %v5187_v58, %v5187_v58  ;;  %v1408_v45 = vpop.f32.mrf.mxu3  ;;  %2006 = vmatpush.bf16.msrb.mxu3 %v3425_v9  ;;  %v1037_v13 = vadd.f32 %v5095_v4, %v1018_v49  ;;  %v3874_v50 = vld [vmem:[%s6038_s1 + $0x424] sm:$0xf0]  ;;  %v1489_v22 = vpack.c.bf16 %v1448_v1, %v1447_v57 }
 0x147   :  { %v1409_v7 = vadd.f32 %v1408_v45, %v1389_v62  ;;  %1968 = vmatpush.bf16.msrb.mxu1 %v3421_v36  ;;  %1989 = vmatpush.bf16.msrb.mxu2 %v3345_v8  ;;  %v1020_v49 = vadd.f32 %v5093_v38, %v803_v15  ;;  %v3333_v62 = vor.u32 %v3874_v50, %v3332_v10  ;;  %v3404_v36 = vld [vmem:[%s6038_s1 + $0x4b0] sm:$0xf]  ;;  %v3398_v8 = vld [vmem:[%s6038_s1 + $0x4a8] sm:$0xf0] }
 0x148   :  { %1458 = vst [vmem:[#allocation1 + $0x30] ss:$2 sm:$0xff] %v1439_v32  ;;  %v1582_v39 = vadd.f32 %v1581_v37, %v1577_v44  ;;  %v1372_v52 = vpop.f32.mrf.mxu1  ;;  %v3893_v37 = vld [vmem:[%s6038_s1 + $0x4c4] sm:$0xf]  ;;  %v3413_v9 = vor.u32 %v3894_v23, %v3412_v16  ;;  %v1391_v44 = vpop.f32.mrf.mxu2  ;;  %v3325_v1 = vor.u32 %v3872_v2, %v3324_v6  ;;  %v3316_v16 = vld [vmem:[%s6038_s1 + $0x400] sm:$0xf] }
 0x149   :  { %v1418_v19 = vadd.f32 %v1409_v7, %v1037_v13  ;;  %v1373_v4 = vadd.f32 %v1372_v52, %v1353_v41  ;;  %v3417_v20 = vor.u32 %v3893_v37, %v3414_v46  ;;  %1952 = vmatpush.bf16.msrb.mxu0 %v3333_v62  ;;  %v1505_v13 = vrot.slane %v1489_v22, 2  ;;  %v3870_v23 = vld [vmem:[%s6038_s1 + $0x404] sm:$0xf0]  ;;  %v3390_v2 = vld [vmem:[%s6038_s1 + $0x498] sm:$0xf0] }
 0x14b   :  { %v1431_v11 = vrot.slane %v1418_v19, 4  ;;  %v1563_v21 = vadd.f32 %v1562_v40, %v1418_v19  ;;  %v1578_v17 = vmul.f32 %v1418_v19, %v1418_v19  ;;  %v5246_v18 = vadd.f32 %v1373_v4, %v1001_v33  ;;  %2007 = vmatpush.bf16.msrb.mxu3 %v3417_v20  ;;  %v3891_v40 = vld [vmem:[%s6038_s1 + $0x4b4] sm:$0xf]  ;;  %1969 = vmatpush.bf16.msrb.mxu1 %v3413_v9  ;;  %v3889_v4 = vld [vmem:[%s6038_s1 + $0x4a4] sm:$0xf] }
 0x14c   :  { %v3409_v60 = vor.u32 %v3891_v40, %v3406_v0  ;;  %1990 = vmatpush.bf16.msrb.mxu2 %v3337_v51  ;;  %v3405_v33 = vor.u32 %v3892_v34, %v3404_v36  ;;  %v3401_v50 = vor.u32 %v3889_v4, %v3398_v8  ;;  %v3852_v36 = vld [vmem:[%s6038_s1 + $0x374] sm:$0xf0]  ;;  %v3502_v34 = vld [vmem:[%s6038_s1 + $0x378] sm:$0xf0] }
 0x14d   :  { %v1440_v27 = vsel %vm1433_vm10, %v5187_v58, %v1431_v11  ;;  %v1441_v38 = vsel %vm1433_vm10, %v1431_v11, %v5187_v58  ;;  %v1591_v47 = vadd.f32 %v1590_v25, %v1578_v17  ;;  %v5269_v32 = vadd.f32 %v1554_v14, %v5246_v18  ;;  %v1451_v25 = vld.sshfl [vmem:[#allocation1 + $0x10] sm:$0xff pattern:$0x75316420]  ;;  %v1452_v14 = vld.sshfl [vmem:[#allocation1 + $0x18] sm:$0xff pattern:$0x75316420]  ;;  %1953 = vmatpush.bf16.msrb.mxu0 %v3325_v1 }
 0x14e   :  { %v1442_v45 = vrot.slane %v1441_v38, 4  ;;  %1461 = vst [vmem:[#allocation1] ss:$2 sm:$0xff] %v1440_v27  ;;  %v1579_v41 = vmul.f32 %v5246_v18, %v5246_v18  ;;  %v1410_v54 = vpop.f32.mrf.mxu3  ;;  %v1039_v58 = vadd.f32 %v5099_v42, %v1020_v49  ;;  %v3871_v42 = vld [vmem:[%s6038_s1 + $0x414] sm:$0xf]  ;;  %v1490_v37 = vpack.c.bf16 %v1452_v14, %v1451_v25 }
 0x14f   :  { %v1411_v57 = vadd.f32 %v1410_v54, %v1391_v44  ;;  %2008 = vmatpush.bf16.msrb.mxu3 %v3409_v60  ;;  %v3329_v19 = vor.u32 %v3871_v42, %v3326_v56  ;;  %v1455_v46 = vld.sshfl [vmem:[#allocation1 + $0x20] sm:$0xff pattern:$0x75316420]  ;;  %1970 = vmatpush.bf16.msrb.mxu1 %v3405_v33  ;;  %v1456_v17 = vld.sshfl [vmem:[#allocation1 + $0x28] sm:$0xff pattern:$0x75316420] }
 0x150   :  { %1464 = vst [vmem:[#allocation1 + $0x10] ss:$2 sm:$0xff] %v1442_v45  ;;  %v5277_v7 = vadd.f32 %v1582_v39, %v1579_v41  ;;  %v1515_v39 = vsel %vm295_vm8, %v1489_v22, %v1505_v13  ;;  %v3317_v22 = vor.u32 %v3870_v23, %v3316_v16  ;;  %v3396_v11 = vld [vmem:[%s6038_s1 + $0x4a0] sm:$0xf]  ;;  %v1506_v40 = vrot.slane %v1490_v37, 2 }
 0x151   :  { %v1420_v52 = vadd.f32 %v1411_v57, %v1039_v58  ;;  %1545 = vst [vmem:[%s6042_s4] sm:$0xf] %v1515_v39  ;;  %1991 = vmatpush.bf16.msrb.mxu2 %v3329_v19  ;;  %v3318_v38 = vld [vmem:[%s6038_s1 + $0x408] sm:$0xf0]  ;;  %v5340_v44 = vld.sshfl [vmem:[#allocation1 + $0x38] sm:$0xff pattern:$0x75316420]  ;;  %v5356_v58 = vpack.c.bf16 %v1456_v17, %v1455_v46 }
 0x152   :  { %1954 = vmatpush.bf16.msrb.mxu0 %v3317_v22  ;;  %v1518_v45 = vsel %vm295_vm8, %v1490_v37, %v1506_v40  ;;  %v192_v41 = vld [vmem:[#allocation2 + $0x14] sm:$0x7]  ;;  %v3887_v60 = vld [vmem:[%s6038_s1 + $0x494] sm:$0xf]  ;;  %v3388_v13 = vld [vmem:[%s6038_s1 + $0x490] sm:$0xf] }
 0x153   :  { %v1432_v10 = vrot.slane %v1420_v52, 4  ;;  %v5301_v15 = vadd.f32 %v1563_v21, %v1420_v52  ;;  %v1580_v20 = vmul.f32 %v1420_v52, %v1420_v52  ;;  %v3890_v21 = vld [vmem:[%s6038_s1 + $0x4a4] sm:$0xf0]  ;;  %2009 = vmatpush.bf16.msrb.mxu3 %v3401_v50  ;;  %v1676_v54 = vrot.slane %v192_v41, 2  ;;  %1546 = vst [vmem:[%s6042_s4 + $0x8] sm:$0xf] %v1518_v45 }
 0x154   :  { %v3397_v9 = vor.u32 %v3890_v21, %v3396_v11  ;;  %v3393_v25 = vor.u32 %v3887_v60, %v3390_v2  ;;  %v3888_v14 = vld [vmem:[%s6038_s1 + $0x494] sm:$0xf0]  ;;  %v3500_v57 = vld [vmem:[%s6038_s1 + $0x370] sm:$0xf]  ;;  %v3851_v52 = vld [vmem:[%s6038_s1 + $0x374] sm:$0xf] }
 0x155   :  { %v5315_v31 = vld.sshfl [vmem:[#allocation1] sm:$0xff pattern:$0x75316420]  ;;  %v1443_v12 = vsel %vm1433_vm10, %v5246_v18, %v1432_v10  ;;  %v1444_v49 = vsel %vm1433_vm10, %v1432_v10, %v5246_v18  ;;  %v5321_v62 = vadd.f32 %v1591_v47, %v1580_v20  ;;  %v5323_v51 = vld.sshfl [vmem:[#allocation1 + $0x8] sm:$0xff pattern:$0x75316420]  ;;  %v3389_v1 = vor.u32 %v3888_v14, %v3388_v13 }
 0x156   :  { %1467 = vst [vmem:[#allocation1 + $0x20] ss:$2 sm:$0xff] %v1443_v12  ;;  %v1445_v27 = vrot.slane %v1444_v49, 4  ;;  %1971 = vmatpush.bf16.msrb.mxu1 %v3397_v9  ;;  %v3869_v18 = vld [vmem:[%s6038_s1 + $0x404] sm:$0xf]  ;;  %v5374_v42 = vsel %vm298_vm9, %v192_v41, %v1676_v54  ;;  %v3501_v39 = vor.u32 %v3852_v36, %v3500_v57  ;;  %v3505_v33 = vor.u32 %v3851_v52, %v3502_v34 }
 0x157   :  { %v5325_v0 = vld.sshfl [vmem:[#allocation1 + $0x10] sm:$0xff pattern:$0x75316420]  ;;  %v5327_v6 = vld.sshfl [vmem:[#allocation1 + $0x18] sm:$0xff pattern:$0x75316420]  ;;  %2010 = vmatpush.bf16.msrb.mxu3 %v3393_v25  ;;  %v5401_v16 = vsel %vm295_vm8, %v192_v41, %v1676_v54 }
 0x158   :  { %1601 = vst [vmem:[#allocation1] ss:$4 sm:$0xff] %v4236_v24  ;;  %v5337_v47 = vld.sshfl [vmem:[#allocation1 + $0x30] sm:$0xff pattern:$0x75316420]  ;;  %v3321_v24 = vor.u32 %v3869_v18, %v3318_v38  ;;  %v1507_v46 = vrot.slane %v5356_v58, 2  ;;  %2183 = vmatpush.bf16.msra.mxu0 %v3501_v39 }
 0x159   :  { %1603 = vst [vmem:[#allocation1 + $0x1] ss:$4 sm:$0xff] %v4240_v26  ;;  %v3885_v19 = vld [vmem:[%s6038_s1 + $0x484] sm:$0xf]  ;;  %v1682_v20 = vrot.slane %v5374_v42, 2  ;;  %v1688_v12 = vshrl.u32 %v5401_v16, 16 }
 0x15a   :  { %1605 = vst [vmem:[#allocation1 + $0x2] ss:$4 sm:$0xff] %v4245_v29  ;;  %1992 = vmatpush.bf16.msrb.mxu2 %v3321_v24  ;;  %1972 = vmatpush.bf16.msrb.mxu1 %v3389_v1  ;;  %v3380_v50 = vld [vmem:[%s6038_s1 + $0x480] sm:$0xf]  ;;  %v3886_v23 = vld [vmem:[%s6038_s1 + $0x484] sm:$0xf0]  ;;  %v1521_v57 = vsel %vm295_vm8, %v5356_v58, %v1507_v46 }
 0x15b   :  { %1607 = vst [vmem:[#allocation1 + $0x3] ss:$4 sm:$0xff] %v4315_v61  ;;  %v3381_v22 = vor.u32 %v3886_v23, %v3380_v50  ;;  %v3850_v11 = vld [vmem:[%s6038_s1 + $0x364] sm:$0xf0]  ;;  %v3494_v17 = vld [vmem:[%s6038_s1 + $0x368] sm:$0xf0] }
 0x15c   :  { %1470 = vst [vmem:[#allocation1 + $0x30] ss:$2 sm:$0xff] %v1445_v27  ;;  %v1691_v49 = vshll.u32 %v5401_v16, 16  ;;  %v3867_v40 = vld [vmem:[%s6038_s1 + $0x3f4] sm:$0xf]  ;;  %v5476_v50 = vshll.u32 %v1682_v20, 16 }
 0x15d   :  { %v5382_v4 = vld.sshfl [vmem:[#allocation1 + $0x20] sm:$0xff pattern:$0x75316420]  ;;  %v5384_v8 = vld.sshfl [vmem:[#allocation1 + $0x28] sm:$0xff pattern:$0x75316420] }
 0x15e   :  { %2221 = vmatpush.bf16.msra.mxu2 %v3505_v33  ;;  %1973 = vmatpush.bf16.msrb.mxu1 %v3381_v22  ;;  %v3566_v27 = vld [vmem:[%s6038_s1 + $0x3f8] sm:$0xf0]  ;;  %v3484_v38 = vld [vmem:[%s6038_s1 + $0x350] sm:$0xf]  ;;  %v3848_v24 = vld [vmem:[%s6038_s1 + $0x354] sm:$0xf0] }
 0x15f   :  { %v3569_v18 = vor.u32 %v3867_v40, %v3566_v27  ;;  %v3485_v45 = vor.u32 %v3848_v24, %v3484_v38  ;;  %v3564_v54 = vld [vmem:[%s6038_s1 + $0x3f0] sm:$0xf]  ;;  %v3847_v60 = vld [vmem:[%s6038_s1 + $0x354] sm:$0xf]  ;;  %v3486_v13 = vld [vmem:[%s6038_s1 + $0x358] sm:$0xf0] }
 0x160   :  { %v3865_v25 = vld [vmem:[%s6038_s1 + $0x3e4] sm:$0xf]  ;;  %v3558_v14 = vld [vmem:[%s6038_s1 + $0x3e8] sm:$0xf0]  ;;  %v3489_v1 = vor.u32 %v3847_v60, %v3486_v13  ;;  %v3476_v52 = vld [vmem:[%s6038_s1 + $0x340] sm:$0xf] }
 0x161   :  { %v3561_v36 = vor.u32 %v3865_v25, %v3558_v14  ;;  %v3846_v34 = vld [vmem:[%s6038_s1 + $0x344] sm:$0xf0]  ;;  %v3556_v39 = vld [vmem:[%s6038_s1 + $0x3e0] sm:$0xf]  ;;  %v3478_v46 = vld [vmem:[%s6038_s1 + $0x348] sm:$0xf0] }
 0x162   :  { %v5376_v56 = vld.sshfl [vmem:[#allocation1] sm:$0xff pattern:$0x73625140]  ;;  %v3477_v33 = vor.u32 %v3846_v34, %v3476_v52  ;;  %v3866_v58 = vld [vmem:[%s6038_s1 + $0x3e4] sm:$0xf0] }
 0x163   :  { %1620 = vst [vmem:[#allocation1] ss:$4 sm:$0xff] %v4240_v26  ;;  %v5386_v37 = vld.sshfl [vmem:[#allocation1 + $0x30] sm:$0xff pattern:$0x75316420] }
 0x164   :  { %1624 = vst [vmem:[#allocation1 + $0x2] ss:$4 sm:$0xff] %v4315_v61  ;;  %v5390_v10 = vld.sshfl [vmem:[#allocation1 + $0x38] sm:$0xff pattern:$0x75316420] }
 0x165   :  { %1622 = vst [vmem:[#allocation1 + $0x1] ss:$4 sm:$0xff] %v4245_v29  ;;  %v3382_v26 = vld [vmem:[%s6038_s1 + $0x488] sm:$0xf0]  ;;  %v3492_v29 = vld [vmem:[%s6038_s1 + $0x360] sm:$0xf] }
 0x166   :  { %1609 = vst [vmem:[#allocation1 + $0x20] ss:$4 sm:$0xff] %v4535_v30  ;;  %v3385_v61 = vor.u32 %v3885_v19, %v3382_v26  ;;  %v3849_v30 = vld [vmem:[%s6038_s1 + $0x364] sm:$0xf]  ;;  %v3493_v21 = vor.u32 %v3850_v11, %v3492_v29  ;;  %v1690_v26 = vrot.slane %v1688_v12, 6  ;;  %v1693_v11 = vrot.slane %v1691_v49, 7 }
 0x167   :  { %1611 = vst [vmem:[#allocation1 + $0x21] ss:$4 sm:$0xff] %v4537_v43  ;;  %v3497_v9 = vor.u32 %v3849_v30, %v3494_v17  ;;  %v3845_v19 = vld [vmem:[%s6038_s1 + $0x344] sm:$0xf]  ;;  %v198_v29 = vld [vmem:[#allocation2 + $0x2c] sm:$0x7] }
 0x168   :  { %1613 = vst [vmem:[#allocation1 + $0x22] ss:$4 sm:$0xff] %v4541_v48  ;;  %2011 = vmatpush.bf16.msrb.mxu3 %v3385_v61  ;;  %2184 = vmatpush.bf16.msra.mxu0 %v3493_v21  ;;  %v3557_v61 = vor.u32 %v3866_v58, %v3556_v39  ;;  %v3481_v23 = vor.u32 %v3845_v19, %v3478_v46  ;;  %v3863_v30 = vld [vmem:[%s6038_s1 + $0x3d4] sm:$0xf]  ;;  %v1677_v17 = vrot.slane %v198_v29, 2 }
 0x169   :  { %1615 = vst [vmem:[#allocation1 + $0x23] ss:$4 sm:$0xff] %v4610_v63  ;;  %2222 = vmatpush.bf16.msra.mxu2 %v3497_v9  ;;  %v3550_v12 = vld [vmem:[%s6038_s1 + $0x3d8] sm:$0xf0]  ;;  %v3468_v49 = vld [vmem:[%s6038_s1 + $0x330] sm:$0xf] }
 0x16a   :  { %1627 = vst [vmem:[#allocation1 + $0x3] ss:$4 sm:$0xff] %v192_v41  ;;  %v3868_v41 = vld [vmem:[%s6038_s1 + $0x3f4] sm:$0xf0]  ;;  %v3553_v9 = vor.u32 %v3863_v30, %v3550_v12  ;;  %v3470_v38 = vld [vmem:[%s6038_s1 + $0x338] sm:$0xf0]  ;;  %v5528_v60 = vsel %vm298_vm9, %v198_v29, %v1677_v17 }
 0x16b   :  { %v3565_v2 = vor.u32 %v3868_v41, %v3564_v54  ;;  %1547 = vst [vmem:[%s6042_s4 + $0x10] sm:$0xf] %v1521_v57  ;;  %v3864_v27 = vld [vmem:[%s6038_s1 + $0x3d4] sm:$0xf0]  ;;  %v3460_v54 = vld [vmem:[%s6038_s1 + $0x320] sm:$0xf]  ;;  %v5525_v41 = vsel %vm295_vm8, %v198_v29, %v1677_v17 }
 0x16c   :  { %2240 = vmatpush.bf16.msra.mxu3 %v3569_v18  ;;  %2185 = vmatpush.bf16.msra.mxu0 %v3485_v45  ;;  %v3542_v45 = vld [vmem:[%s6038_s1 + $0x3c8] sm:$0xf0]  ;;  %v3842_v25 = vld [vmem:[%s6038_s1 + $0x324] sm:$0xf0]  ;;  %v3540_v14 = vld [vmem:[%s6038_s1 + $0x3c0] sm:$0xf] }
 0x16d   :  { %2202 = vmatpush.bf16.msra.mxu1 %v3565_v2  ;;  %2223 = vmatpush.bf16.msra.mxu2 %v3489_v1  ;;  %v1694_v2 = vor.u32 %v1693_v11, %v1690_v26  ;;  %v3461_v57 = vor.u32 %v3842_v25, %v3460_v54  ;;  %v3862_v1 = vld [vmem:[%s6038_s1 + $0x3c4] sm:$0xf0]  ;;  %v3462_v34 = vld [vmem:[%s6038_s1 + $0x328] sm:$0xf0]  ;;  %v1687_v39 = vrot.slane %v5528_v60, 2  ;;  %v1704_v58 = vshll.u32 %v5525_v41, 16 }
 0x16e   :  { %v3541_v52 = vor.u32 %v3862_v1, %v3540_v14  ;;  %v3859_v46 = vld [vmem:[%s6038_s1 + $0x3b4] sm:$0xf]  ;;  %v3534_v26 = vld [vmem:[%s6038_s1 + $0x3b8] sm:$0xf0]  ;;  %v3840_v17 = vld [vmem:[%s6038_s1 + $0x314] sm:$0xf0] }
 0x16f   :  { %v5561_v11 = vshll.u32 %v1687_v39, 16  ;;  %v3537_v30 = vor.u32 %v3859_v46, %v3534_v26  ;;  %v3524_v14 = vld [vmem:[%s6038_s1 + $0x3a0] sm:$0xf]  ;;  %v3837_v1 = vld [vmem:[%s6038_s1 + $0x304] sm:$0xf] }
 0x170   :  { %v5481_v22 = vld.sshfl [vmem:[#allocation1 + $0x20] sm:$0xff pattern:$0x73625140]  ;;  %2241 = vmatpush.bf16.msra.mxu3 %v3561_v36  ;;  %2186 = vmatpush.bf16.msra.mxu0 %v3477_v33  ;;  %v1701_v33 = vshrl.u32 %v5525_v41, 16 }
 0x171   :  { %1629 = vst [vmem:[#allocation1 + $0x20] ss:$4 sm:$0xff] %v4537_v43  ;;  %v5487_v21 = vld.sshfl [vmem:[#allocation1] sm:$0xff pattern:$0x73625140]  ;;  %2203 = vmatpush.bf16.msra.mxu1 %v3557_v61  ;;  %2224 = vmatpush.bf16.msra.mxu2 %v3481_v23  ;;  %v1695_v23 = vrot.slane %v1694_v2, 2 }
 0x172   :  { %1633 = vst [vmem:[#allocation1 + $0x22] ss:$4 sm:$0xff] %v4610_v63  ;;  %v3844_v43 = vld [vmem:[%s6038_s1 + $0x334] sm:$0xf0]  ;;  %v3548_v63 = vld [vmem:[%s6038_s1 + $0x3d0] sm:$0xf] }
 0x173   :  { %1631 = vst [vmem:[#allocation1 + $0x21] ss:$4 sm:$0xff] %v4541_v48  ;;  %v3469_v40 = vor.u32 %v3844_v43, %v3468_v49  ;;  %v3843_v48 = vld [vmem:[%s6038_s1 + $0x334] sm:$0xf]  ;;  %v3549_v18 = vor.u32 %v3864_v27, %v3548_v63  ;;  %v3841_v36 = vld [vmem:[%s6038_s1 + $0x324] sm:$0xf] }
 0x174   :  { %1714 = vst [vmem:[#allocation1] ss:$4 sm:$0xff] %v4451_v28  ;;  %2242 = vmatpush.bf16.msra.mxu3 %v3553_v9  ;;  %v3861_v28 = vld [vmem:[%s6038_s1 + $0x3c4] sm:$0xf]  ;;  %v3473_v24 = vor.u32 %v3843_v48, %v3470_v38  ;;  %v3465_v19 = vor.u32 %v3841_v36, %v3462_v34  ;;  %v3452_v61 = vld [vmem:[%s6038_s1 + $0x310] sm:$0xf] }
 0x175   :  { %1716 = vst [vmem:[#allocation1 + $0x1] ss:$4 sm:$0xff] %v4464_v53  ;;  %2187 = vmatpush.bf16.msra.mxu0 %v3469_v40  ;;  %2204 = vmatpush.bf16.msra.mxu1 %v3549_v18  ;;  %v3545_v13 = vor.u32 %v3861_v28, %v3542_v45  ;;  %v3453_v12 = vor.u32 %v3840_v17, %v3452_v61  ;;  %v3532_v49 = vld [vmem:[%s6038_s1 + $0x3b0] sm:$0xf]  ;;  %v3839_v9 = vld [vmem:[%s6038_s1 + $0x314] sm:$0xf] }
 0x176   :  { %1718 = vst [vmem:[#allocation1 + $0x2] ss:$4 sm:$0xff] %v4471_v3  ;;  %2225 = vmatpush.bf16.msra.mxu2 %v3473_v24  ;;  %v5575_v43 = vrot.slane %v1701_v33, 6  ;;  %v3454_v40 = vld [vmem:[%s6038_s1 + $0x318] sm:$0xf0]  ;;  %v1706_v18 = vrot.slane %v1704_v58, 7 }
 0x177   :  { %1720 = vst [vmem:[#allocation1 + $0x3] ss:$4 sm:$0xff] %v4513_v35  ;;  %v3857_v27 = vld [vmem:[%s6038_s1 + $0x3a4] sm:$0xf]  ;;  %v3457_v38 = vor.u32 %v3839_v9, %v3454_v40  ;;  %v3526_v28 = vld [vmem:[%s6038_s1 + $0x3a8] sm:$0xf0] }
 0x178   :  { %1636 = vst [vmem:[#allocation1 + $0x23] ss:$4 sm:$0xff] %v198_v29  ;;  %2243 = vmatpush.bf16.msra.mxu3 %v3545_v13  ;;  %v1699_v29 = vrot.slane %v5476_v50, 7  ;;  %v3860_v50 = vld [vmem:[%s6038_s1 + $0x3b4] sm:$0xf0]  ;;  %v1712_v54 = vrot.slane %v5561_v11, 7  ;;  %v3529_v2 = vor.u32 %v3857_v27, %v3526_v28  ;;  %v1707_v46 = vor.u32 %v1706_v18, %v5575_v43 }
 0x179   :  { %2188 = vmatpush.bf16.msra.mxu0 %v3461_v57  ;;  %2205 = vmatpush.bf16.msra.mxu1 %v3541_v52  ;;  %v3533_v63 = vor.u32 %v3860_v50, %v3532_v49  ;;  %v3444_v13 = vld [vmem:[%s6038_s1 + $0x300] sm:$0xf]  ;;  %v3855_v52 = vld [vmem:[%s6038_s1 + $0x394] sm:$0xf]  ;;  %v3518_v34 = vld [vmem:[%s6038_s1 + $0x398] sm:$0xf0] }
 0x17a   :  { %2226 = vmatpush.bf16.msra.mxu2 %v3465_v19  ;;  %v1700_v24 = vsel %vm4395_vm4, %v1695_v23, %v1699_v29  ;;  %v3521_v33 = vor.u32 %v3855_v52, %v3518_v34  ;;  %v3516_v58 = vld [vmem:[%s6038_s1 + $0x390] sm:$0xf]  ;;  %v6111_v19 = vld [vmem:[#allocation3_spill] sm:$0xff]  ;;  %v3915_v61 = vld [vmem:[%s6038_s1 + $0x574] sm:$0xf] }
 0x17b   :  { %v3664_v23 = vld [vmem:[%s6038_s1 + $0x578] sm:$0xf0]  ;;  %v6112_v29 = vld [vmem:[#allocation4_spill] sm:$0xff]  ;;  %v3854_v9 = vld [vmem:[%s6038_s1 + $0x384] sm:$0xf0] }
 0x17c   :  { %2244 = vmatpush.bf16.msra.mxu3 %v3537_v30  ;;  %v3667_v30 = vor.u32 %v3915_v61, %v3664_v23  ;;  %v3853_v17 = vld [vmem:[%s6038_s1 + $0x384] sm:$0xf]  ;;  %v3508_v50 = vld [vmem:[%s6038_s1 + $0x380] sm:$0xf]  ;;  %v3656_v40 = vld [vmem:[%s6038_s1 + $0x568] sm:$0xf0] }
 0x17d   :  { %2189 = vmatpush.bf16.msra.mxu0 %v3453_v12  ;;  %2206 = vmatpush.bf16.msra.mxu1 %v3533_v63  ;;  %v3510_v12 = vld [vmem:[%s6038_s1 + $0x388] sm:$0xf0]  ;;  %v3913_v43 = vld [vmem:[%s6038_s1 + $0x564] sm:$0xf]  ;;  %v3509_v63 = vor.u32 %v3854_v9, %v3508_v50  ;;  %v3931_v27 = vld [vmem:[%s6038_s1 + $0x5f4] sm:$0xf] }
 0x17e   :  { %v1729_v48 = vld.sshfl [vmem:[#allocation1] sm:$0xff pattern:$0x73625140]  ;;  %2227 = vmatpush.bf16.msra.mxu2 %v3457_v38  ;;  %v3513_v49 = vor.u32 %v3853_v17, %v3510_v12  ;;  %v1708_v38 = vrot.slane %v1707_v46, 2  ;;  %v3659_v28 = vor.u32 %v3913_v43, %v3656_v40  ;;  %v6116_v34 = vld [vmem:[#allocation11_spill] sm:$0xff] }
 0x17f   :  { %1955 = vmatmul.bf16.vlgmr.msrb.gmra.mxu0 %v1729_v48  ;;  %1733 = vst [vmem:[#allocation1] ss:$4 sm:$0xff] %v4464_v53  ;;  %1993 = vmatmul.bf16.vlgmr.msrb.gmra.mxu2 %v1729_v48  ;;  %v5589_v45 = vld.sshfl [vmem:[#allocation1 + $0x20] sm:$0xff pattern:$0x73625140] }
 0x180   :  { %1735 = vst [vmem:[#allocation1 + $0x1] ss:$4 sm:$0xff] %v4471_v3  ;;  %v3838_v53 = vld [vmem:[%s6038_s1 + $0x304] sm:$0xf0]  ;;  %2245 = vmatpush.bf16.msra.mxu3 %v3529_v2  ;;  %v3728_v48 = vld [vmem:[%s6038_s1 + $0x5f8] sm:$0xf0]  ;;  %v1713_v46 = vsel %vm4395_vm4, %v1708_v38, %v1712_v54  ;;  %v5744_v38 = vpack.c.bf16 %v5327_v6, %v5325_v0 }
 0x181   :  { %1737 = vst [vmem:[#allocation1 + $0x2] ss:$4 sm:$0xff] %v4513_v35  ;;  %v3445_v25 = vor.u32 %v3838_v53, %v3444_v13  ;;  %v3858_v3 = vld [vmem:[%s6038_s1 + $0x3a4] sm:$0xf0]  ;;  %v3446_v35 = vld [vmem:[%s6038_s1 + $0x308] sm:$0xf0]  ;;  %v5664_v13 = vpack.c.bf16 %v5340_v44, %v5337_v47 }
 0x182   :  { %1740 = vst [vmem:[#allocation1 + $0x3] ss:$4 sm:$0xff] %v1700_v24  ;;  %v3525_v57 = vor.u32 %v3858_v3, %v3524_v14  ;;  %v3449_v36 = vor.u32 %v3837_v1, %v3446_v35  ;;  %v3731_v24 = vor.u32 %v3931_v27, %v3728_v48  ;;  %v3662_v2 = vld [vmem:[%s6038_s1 + $0x570] sm:$0xf]  ;;  %v6114_v3 = vld [vmem:[#allocation7_spill] sm:$0xff]  ;;  %v6115_v1 = vld [vmem:[#allocation8_spill] sm:$0xff] }
 0x183   :  { %1722 = vst [vmem:[#allocation1 + $0x20] ss:$4 sm:$0xff] %v4702_v55  ;;  %2190 = vmatpush.bf16.msra.mxu0 %v3445_v25  ;;  %v3856_v55 = vld [vmem:[%s6038_s1 + $0x394] sm:$0xf0]  ;;  %v6113_v53 = vld [vmem:[#allocation6_spill] sm:$0xff] }
 0x184   :  { %1724 = vst [vmem:[#allocation1 + $0x21] ss:$4 sm:$0xff] %v4714_v5  ;;  %2207 = vmatpush.bf16.msra.mxu1 %v3525_v57  ;;  %2228 = vmatpush.bf16.msra.mxu2 %v3449_v36  ;;  %v3517_v26 = vor.u32 %v3856_v55, %v3516_v58  ;;  %v3916_v25 = vld [vmem:[%s6038_s1 + $0x574] sm:$0xf0]  ;;  %v3726_v14 = vld [vmem:[%s6038_s1 + $0x5f0] sm:$0xf] }
 0x185   :  { %1726 = vst [vmem:[#allocation1 + $0x22] ss:$4 sm:$0xff] %v6111_v19  ;;  %2246 = vmatpush.bf16.msra.mxu3 %v3521_v33  ;;  %v3663_v57 = vor.u32 %v3916_v25, %v3662_v2  ;;  %v3932_v47 = vld [vmem:[%s6038_s1 + $0x5f4] sm:$0xf0]  ;;  %v3911_v44 = vld [vmem:[%s6038_s1 + $0x554] sm:$0xf] }
 0x186   :  { %1728 = vst [vmem:[#allocation1 + $0x23] ss:$4 sm:$0xff] %v6112_v29  ;;  %v3727_v35 = vor.u32 %v3932_v47, %v3726_v14  ;;  %v3648_v36 = vld [vmem:[%s6038_s1 + $0x558] sm:$0xf0]  ;;  %v3929_v52 = vld [vmem:[%s6038_s1 + $0x5e4] sm:$0xf] }
 0x187   :  { %2502 = vmatpush.bf16.msrb.mxu0 %v3663_v57  ;;  %v3651_v58 = vor.u32 %v3911_v44, %v3648_v36  ;;  %v1508_v55 = vrot.slane %v5664_v13, 2  ;;  %v3654_v61 = vld [vmem:[%s6038_s1 + $0x560] sm:$0xf]  ;;  %v3930_v54 = vld [vmem:[%s6038_s1 + $0x5e4] sm:$0xf0]  ;;  %v1510_v36 = vrot.slane %v5744_v38, 2 }
 0x188   :  { %2208 = vmatpush.bf16.msra.mxu1 %v3517_v26  ;;  %2540 = vmatpush.bf16.msrb.mxu2 %v3667_v30  ;;  %v3720_v26 = vld [vmem:[%s6038_s1 + $0x5e8] sm:$0xf0]  ;;  %v3719_v30 = vor.u32 %v3930_v54, %v3718_v59  ;;  %v3646_v50 = vld [vmem:[%s6038_s1 + $0x550] sm:$0xf]  ;;  %v3912_v9 = vld [vmem:[%s6038_s1 + $0x554] sm:$0xf0] }
 0x189   :  { %v1750_v18 = vld.sshfl [vmem:[#allocation1] sm:$0xff pattern:$0x73625140]  ;;  %2247 = vmatpush.bf16.msra.mxu3 %v3513_v49  ;;  %v3723_v23 = vor.u32 %v3929_v52, %v3720_v26  ;;  %v3640_v17 = vld [vmem:[%s6038_s1 + $0x548] sm:$0xf0] }
 0x18a   :  { %1974 = vmatmul.bf16.vlgmr.msrb.gmra.mxu1 %v1750_v18  ;;  %2269 = vst [vmem:[#allocation1] ss:$4 sm:$0xff] %v6113_v53  ;;  %2012 = vmatmul.bf16.vlgmr.msrb.gmra.mxu3 %v1750_v18  ;;  %v3712_v49 = vld [vmem:[%s6038_s1 + $0x5d8] sm:$0xf0]  ;;  %v3710_v40 = vld [vmem:[%s6038_s1 + $0x5d0] sm:$0xf]  ;;  %v5740_v18 = vpack.c.bf16 %v5323_v51, %v5315_v31  ;;  %v5757_v31 = vpack.c.bf16 %v5384_v8, %v5382_v4 }
 0x18b   :  { %2271 = vst [vmem:[#allocation1 + $0x1] ss:$4 sm:$0xff] %v6114_v3  ;;  %v3928_v27 = vld [vmem:[%s6038_s1 + $0x5d4] sm:$0xf0]  ;;  %v3907_v48 = vld [vmem:[%s6038_s1 + $0x534] sm:$0xf]  ;;  %v1524_v51 = vsel %vm295_vm8, %v5664_v13, %v1508_v55 }
 0x18c   :  { %2273 = vst [vmem:[#allocation1 + $0x2] ss:$4 sm:$0xff] %v6115_v1  ;;  %2209 = vmatpush.bf16.msra.mxu1 %v3509_v63  ;;  %2541 = vmatpush.bf16.msrb.mxu2 %v3659_v28  ;;  %v3647_v63 = vor.u32 %v3912_v9, %v3646_v50  ;;  %v3711_v28 = vor.u32 %v3928_v27, %v3710_v40  ;;  %v3925_v2 = vld [vmem:[%s6038_s1 + $0x5c4] sm:$0xf]  ;;  %v3704_v53 = vld [vmem:[%s6038_s1 + $0x5c8] sm:$0xf0] }
 0x18d   :  { %2275 = vst [vmem:[#allocation1 + $0x3] ss:$4 sm:$0xff] %v6116_v34  ;;  %v1730_v33 = vld.sshfl [vmem:[#allocation1 + $0x20] sm:$0xff pattern:$0x73625140]  ;;  %2559 = vmatpush.bf16.msrb.mxu3 %v3731_v24  ;;  %v3707_v6 = vor.u32 %v3925_v2, %v3704_v53  ;;  %v1511_v55 = vrot.slane %v5757_v31, 2 }
 0x18e   :  { %1742 = vst [vmem:[#allocation1 + $0x20] ss:$4 sm:$0xff] %v4714_v5  ;;  %v3914_v5 = vld [vmem:[%s6038_s1 + $0x564] sm:$0xf0]  ;;  %v3632_v24 = vld [vmem:[%s6038_s1 + $0x538] sm:$0xf0] }
 0x18f   :  { %1960 = vmatmul.bf16.gmra.mxu0 %v1730_v33  ;;  %1744 = vst [vmem:[#allocation1 + $0x21] ss:$4 sm:$0xff] %v6111_v19  ;;  %1998 = vmatmul.bf16.gmra.mxu2 %v1730_v33  ;;  %v3655_v11 = vor.u32 %v3914_v5, %v3654_v61  ;;  %v3909_v19 = vld [vmem:[%s6038_s1 + $0x544] sm:$0xf]  ;;  %v3635_v0 = vor.u32 %v3907_v48, %v3632_v24  ;;  %v3638_v25 = vld [vmem:[%s6038_s1 + $0x540] sm:$0xf] }
 0x190   :  { %2521 = vmatpush.bf16.msrb.mxu1 %v3727_v35  ;;  %1746 = vst [vmem:[#allocation1 + $0x22] ss:$4 sm:$0xff] %v6112_v29  ;;  %2542 = vmatpush.bf16.msrb.mxu2 %v3651_v58  ;;  %v3927_v29 = vld [vmem:[%s6038_s1 + $0x5d4] sm:$0xf]  ;;  %v3643_v12 = vor.u32 %v3909_v19, %v3640_v17  ;;  %v3910_v14 = vld [vmem:[%s6038_s1 + $0x544] sm:$0xf0]  ;;  %v1496_v17 = vpack.c.bf16 %v5390_v10, %v5386_v37 }
 0x191   :  { %1749 = vst [vmem:[#allocation1 + $0x23] ss:$4 sm:$0xff] %v1713_v46  ;;  %2560 = vmatpush.bf16.msrb.mxu3 %v3723_v23  ;;  %2503 = vmatpush.bf16.msrb.mxu0 %v3655_v11  ;;  %v3715_v43 = vor.u32 %v3927_v29, %v3712_v49  ;;  %v3702_v57 = vld [vmem:[%s6038_s1 + $0x5c0] sm:$0xf]  ;;  %v3926_v4 = vld [vmem:[%s6038_s1 + $0x5c4] sm:$0xf0]  ;;  %v3639_v47 = vor.u32 %v3910_v14, %v3638_v25 }
 0x192   :  { %v3905_v8 = vld [vmem:[%s6038_s1 + $0x524] sm:$0xf]  ;;  %v3624_v13 = vld [vmem:[%s6038_s1 + $0x528] sm:$0xf0]  ;;  %v3703_v44 = vor.u32 %v3926_v4, %v3702_v57  ;;  %v1509_v35 = vrot.slane %v5740_v18, 2  ;;  %v6118_v23 = vld [vmem:[#allocation10_spill] sm:$0xff] }
 0x193   :  { %1548 = vst [vmem:[%s6042_s4 + $0x18] sm:$0xf] %v1524_v51  ;;  %v3627_v33 = vor.u32 %v3905_v8, %v3624_v13  ;;  %v3923_v58 = vld [vmem:[%s6038_s1 + $0x5b4] sm:$0xf]  ;;  %v6117_v46 = vld [vmem:[#allocation9_spill] sm:$0xff]  ;;  %v6119_v54 = vld [vmem:[#allocation12_spill] sm:$0xff] }
 0x194   :  { %2522 = vmatpush.bf16.msrb.mxu1 %v3719_v30  ;;  %2543 = vmatpush.bf16.msrb.mxu2 %v3643_v12  ;;  %v3696_v26 = vld [vmem:[%s6038_s1 + $0x5b8] sm:$0xf0]  ;;  %v3630_v61 = vld [vmem:[%s6038_s1 + $0x530] sm:$0xf]  ;;  %v3908_v59 = vld [vmem:[%s6038_s1 + $0x534] sm:$0xf0] }
 0x195   :  { %2561 = vmatpush.bf16.msrb.mxu3 %v3715_v43  ;;  %2504 = vmatpush.bf16.msrb.mxu0 %v3647_v63  ;;  %v3699_v5 = vor.u32 %v3923_v58, %v3696_v26  ;;  %v3694_v11 = vld [vmem:[%s6038_s1 + $0x5b0] sm:$0xf]  ;;  %v3924_v19 = vld [vmem:[%s6038_s1 + $0x5b4] sm:$0xf0]  ;;  %v3903_v30 = vld [vmem:[%s6038_s1 + $0x514] sm:$0xf]  ;;  %v3631_v12 = vor.u32 %v3908_v59, %v3630_v61 }
 0x196   :  { %v6120_v29 = vld [vmem:[#allocation13_spill] sm:$0xff]  ;;  %v3695_v49 = vor.u32 %v3924_v19, %v3694_v11  ;;  %v3616_v50 = vld [vmem:[%s6038_s1 + $0x518] sm:$0xf0]  ;;  %v3921_v9 = vld [vmem:[%s6038_s1 + $0x5a4] sm:$0xf]  ;;  %v1512_v53 = vrot.slane %v1496_v17, 2 }
 0x197   :  { %v3619_v43 = vor.u32 %v3903_v30, %v3616_v50  ;;  %v3688_v63 = vld [vmem:[%s6038_s1 + $0x5a8] sm:$0xf0]  ;;  %v3622_v37 = vld [vmem:[%s6038_s1 + $0x520] sm:$0xf]  ;;  %v3906_v10 = vld [vmem:[%s6038_s1 + $0x524] sm:$0xf0] }
 0x198   :  { %2523 = vmatpush.bf16.msrb.mxu1 %v3711_v28  ;;  %v1751_v52 = vld.sshfl [vmem:[#allocation1 + $0x20] sm:$0xff pattern:$0x73625140]  ;;  %2544 = vmatpush.bf16.msrb.mxu2 %v3635_v0  ;;  %v3691_v40 = vor.u32 %v3921_v9, %v3688_v63  ;;  %v3922_v48 = vld [vmem:[%s6038_s1 + $0x5a4] sm:$0xf0]  ;;  %v3623_v51 = vor.u32 %v3906_v10, %v3622_v37  ;;  %v1536_v26 = vsel %vm295_vm8, %v1496_v17, %v1512_v53  ;;  %v2267_v59 = vrot.slane %v1687_v39, 7 }
 0x199   :  { %2277 = vst [vmem:[#allocation1 + $0x20] ss:$4 sm:$0xff] %v6117_v46  ;;  %2562 = vmatpush.bf16.msrb.mxu3 %v3707_v6  ;;  %2505 = vmatpush.bf16.msrb.mxu0 %v3639_v47  ;;  %v3686_v27 = vld [vmem:[%s6038_s1 + $0x5a0] sm:$0xf]  ;;  %v3901_v28 = vld [vmem:[%s6038_s1 + $0x504] sm:$0xf] }
 0x19a   :  { %1979 = vmatmul.bf16.gmra.mxu1 %v1751_v52  ;;  %2279 = vst [vmem:[#allocation1 + $0x21] ss:$4 sm:$0xff] %v6118_v23  ;;  %2017 = vmatmul.bf16.gmra.mxu3 %v1751_v52  ;;  %v3608_v24 = vld [vmem:[%s6038_s1 + $0x508] sm:$0xf0]  ;;  %v3687_v0 = vor.u32 %v3922_v48, %v3686_v27  ;;  %v3919_v6 = vld [vmem:[%s6038_s1 + $0x594] sm:$0xf] }
 0x19b   :  { %2281 = vst [vmem:[#allocation1 + $0x22] ss:$4 sm:$0xff] %v6119_v54  ;;  %v5841_v2 = vld.sshfl [vmem:[#allocation1] sm:$0xff pattern:$0x73625140]  ;;  %v3611_v25 = vor.u32 %v3901_v28, %v3608_v24  ;;  %v2263_v46 = vrot.slane %v1682_v20, 7 }
 0x19c   :  { %2524 = vmatpush.bf16.msrb.mxu1 %v3703_v44  ;;  %2283 = vst [vmem:[#allocation1 + $0x23] ss:$4 sm:$0xff] %v6120_v29  ;;  %2545 = vmatpush.bf16.msrb.mxu2 %v3627_v33  ;;  %v3614_v57 = vld [vmem:[%s6038_s1 + $0x510] sm:$0xf]  ;;  %v3920_v8 = vld [vmem:[%s6038_s1 + $0x594] sm:$0xf0]  ;;  %v1530_v44 = vsel %vm295_vm8, %v5744_v38, %v1510_v36  ;;  %v1533_v38 = vsel %vm295_vm8, %v5757_v31, %v1511_v55 }
 0x19d   :  { %2563 = vmatpush.bf16.msrb.mxu3 %v3699_v5  ;;  %2506 = vmatpush.bf16.msrb.mxu0 %v3631_v12  ;;  %2288 = vst [vmem:[#allocation1] ss:$4 sm:$0xff] %v6114_v3  ;;  %v3904_v3 = vld [vmem:[%s6038_s1 + $0x514] sm:$0xf0]  ;;  %v3678_v4 = vld [vmem:[%s6038_s1 + $0x590] sm:$0xf] }
 0x19e   :  { %2290 = vst [vmem:[#allocation1 + $0x1] ss:$4 sm:$0xff] %v6115_v1  ;;  %v1527_v1 = vsel %vm295_vm8, %v5740_v18, %v1509_v35  ;;  %v3917_v13 = vld [vmem:[%s6038_s1 + $0x584] sm:$0xf]  ;;  %v3672_v47 = vld [vmem:[%s6038_s1 + $0x588] sm:$0xf0]  ;;  %v3615_v52 = vor.u32 %v3904_v3, %v3614_v57  ;;  %v3679_v33 = vor.u32 %v3920_v8, %v3678_v4 }
 0x19f   :  { %2191 = vmatmul.bf16.vlgmr.msra.gmra.mxu0 %v5376_v56  ;;  %2229 = vmatmul.bf16.vlgmr.msra.gmra.mxu2 %v5376_v56  ;;  %v3680_v56 = vld [vmem:[%s6038_s1 + $0x598] sm:$0xf0]  ;;  %2292 = vst [vmem:[#allocation1 + $0x2] ss:$4 sm:$0xff] %v6116_v34  ;;  %v3570_v34 = vrot.slane %v5401_v16, 9  ;;  %v3675_v36 = vor.u32 %v3917_v13, %v3672_v47  ;;  %v3571_v5 = vrot.slane %v5525_v41, 9 }
 0x1a0   :  { %2525 = vmatpush.bf16.msrb.mxu1 %v3695_v49  ;;  %2546 = vmatpush.bf16.msrb.mxu2 %v3619_v43  ;;  %v3683_v14 = vor.u32 %v3919_v6, %v3680_v56  ;;  %v3606_v18 = vld [vmem:[%s6038_s1 + $0x500] sm:$0xf]  ;;  %v3902_v35 = vld [vmem:[%s6038_s1 + $0x504] sm:$0xf0]  ;;  %1549 = vst [vmem:[%s6042_s4 + $0x20] sm:$0xf] %v1527_v1 }
 0x1a1   :  { %2564 = vmatpush.bf16.msrb.mxu3 %v3691_v40  ;;  %2507 = vmatpush.bf16.msrb.mxu0 %v3623_v51  ;;  %v3670_v16 = vld [vmem:[%s6038_s1 + $0x580] sm:$0xf]  ;;  %v3918_v58 = vld [vmem:[%s6038_s1 + $0x584] sm:$0xf0]  ;;  %1550 = vst [vmem:[%s6042_s4 + $0x28] sm:$0xf] %v1530_v44  ;;  %v2264_v55 = vsel %vm4936_vm7, %v3570_v34, %v2263_v46  ;;  %v3607_v42 = vor.u32 %v3902_v35, %v3606_v18 }
 0x1a2   :  { %1551 = vst [vmem:[%s6042_s4 + $0x30] sm:$0xf] %v1533_v38  ;;  %v3671_v20 = vor.u32 %v3918_v58, %v3670_v16 }
 0x1a3   :  { %2295 = vst [vmem:[#allocation1 + $0x3] ss:$4 sm:$0xff] %v2264_v55  ;;  %v2285_v61 = vld.sshfl [vmem:[#allocation1 + $0x20] sm:$0xff pattern:$0x73625140] }
 0x1a4   :  { %2526 = vmatpush.bf16.msrb.mxu1 %v3687_v0  ;;  %2547 = vmatpush.bf16.msrb.mxu2 %v3611_v25  ;;  %1552 = vst [vmem:[%s6042_s4 + $0x38] sm:$0xf] %v1536_v26 }
 0x1a5   :  { %2565 = vmatpush.bf16.msrb.mxu3 %v3683_v14  ;;  %2508 = vmatpush.bf16.msrb.mxu0 %v3615_v52  ;;  %2297 = vst [vmem:[#allocation1 + $0x20] ss:$4 sm:$0xff] %v6118_v23 }
 0x1a6   :  { %2299 = vst [vmem:[#allocation1 + $0x21] ss:$4 sm:$0xff] %v6119_v54 }
 0x1a7   :  { %2301 = vst [vmem:[#allocation1 + $0x22] ss:$4 sm:$0xff] %v6120_v29 }
 0x1a8   :  { %2527 = vmatpush.bf16.msrb.mxu1 %v3679_v33 }
 0x1a9   :  { %2566 = vmatpush.bf16.msrb.mxu3 %v3675_v36  ;;  %2509 = vmatpush.bf16.msrb.mxu0 %v3607_v42 }
 0x1aa   :  { %2210 = vmatmul.bf16.vlgmr.msra.gmra.mxu1 %v5487_v21  ;;  %2248 = vmatmul.bf16.vlgmr.msra.gmra.mxu3 %v5487_v21  ;;  %v2268_v21 = vsel %vm4936_vm7, %v3571_v5, %v2267_v59  ;;  %v2305_v23 = vld.sshfl [vmem:[#allocation1] sm:$0xff pattern:$0x73625140] }
 0x1ab   :  { %2304 = vst [vmem:[#allocation1 + $0x23] ss:$4 sm:$0xff] %v2268_v21 }
 0x1ac   :  { %2528 = vmatpush.bf16.msrb.mxu1 %v3671_v20 }
 0x1af   :  { %2196 = vmatmul.bf16.gmra.mxu0 %v5481_v22  ;;  %2234 = vmatmul.bf16.gmra.mxu2 %v5481_v22 }
 0x1b2   :  { %v2306_v22 = vld.sshfl [vmem:[#allocation1 + $0x20] sm:$0xff pattern:$0x73625140] }
 0x1ba   :  { %2215 = vmatmul.bf16.gmra.mxu1 %v5589_v45  ;;  %2253 = vmatmul.bf16.gmra.mxu3 %v5589_v45 }
 0x1bf   :  { %2548 = vmatmul.bf16.vlgmr.msrb.gmra.mxu2 %v5841_v2  ;;  %2510 = vmatmul.bf16.vlgmr.msrb.gmra.mxu0 %v5841_v2 }
 0x1ca   :  { %2529 = vmatmul.bf16.vlgmr.msrb.gmra.mxu1 %v2305_v23  ;;  %2567 = vmatmul.bf16.vlgmr.msrb.gmra.mxu3 %v2305_v23 }
 0x1cf   :  { %2553 = vmatmul.bf16.gmra.mxu2 %v2285_v61  ;;  %2515 = vmatmul.bf16.gmra.mxu0 %v2285_v61 }
 0x1da   :  { %2534 = vmatmul.bf16.gmra.mxu1 %v2306_v22  ;;  %2572 = vmatmul.bf16.gmra.mxu3 %v2306_v22 }
 0x1fc   :  { %v1956_v41 = vpop.f32.mrf.mxu0 }
 0x202   :  { %v1994_v60 = vpop.f32.mrf.mxu2 }
 0x204   :  { %v1958_v39 = vpop.f32.mrf.mxu0 }
 0x207   :  { %v1975_v11 = vpop.f32.mrf.mxu1 }
 0x208   :  { %v1976_v47 = vadd.f32 %v1975_v11, %v1956_v41 }
 0x20a   :  { %v1996_v54 = vpop.f32.mrf.mxu2 }
 0x20c   :  { %v1961_v19 = vpop.f32.mrf.mxu0 }
 0x20d   :  { %v2013_v30 = vpop.f32.mrf.mxu3 }
 0x20e   :  { %v2014_v13 = vadd.f32 %v2013_v30, %v1994_v60 }
 0x20f   :  { %v1977_v45 = vpop.f32.mrf.mxu1 }
 0x210   :  { %v1978_v42 = vadd.f32 %v1977_v45, %v1958_v39  ;;  %v1556_v45 = vrot.slane %v5269_v32, 4 }
 0x212   :  { %v5926_v17 = vpop.f32.mrf.mxu2 }
 0x214   :  { %v5928_v29 = vpop.f32.mrf.mxu0 }
 0x215   :  { %v2015_v12 = vpop.f32.mrf.mxu3 }
 0x216   :  { %v2016_v46 = vadd.f32 %v2015_v12, %v1996_v54 }
 0x217   :  { %v1980_v49 = vpop.f32.mrf.mxu1 }
 0x218   :  { %v1981_v11 = vadd.f32 %v1980_v49, %v1961_v19 }
 0x21a   :  { %v5930_v50 = vpop.f32.mrf.mxu2 }
 0x21c   :  { %v2192_v9 = vpop.f32.mrf.mxu0 }
 0x21d   :  { %v2018_v43 = vpop.f32.mrf.mxu3  ;;  %v2193_v52 = vadd.f32 %v2192_v9, %v1976_v47 }
 0x21f   :  { %v5932_v63 = vpop.f32.mrf.mxu1 }
 0x220   :  { %v1983_v49 = vadd.f32 %v5932_v63, %v5928_v29 }
 0x222   :  { %v2230_v37 = vpop.f32.mrf.mxu2 }
 0x223   :  { %v2231_v34 = vadd.f32 %v2230_v37, %v2014_v13  ;;  %v2019_v37 = vadd.f32 %v2018_v43, %v5926_v17  ;;  %v1593_v17 = vrot.slane %v5321_v62, 4 }
 0x224   :  { %v2194_v10 = vpop.f32.mrf.mxu0 }
 0x225   :  { %v5934_v40 = vpop.f32.mrf.mxu3  ;;  %v2195_v23 = vadd.f32 %v2194_v10, %v1978_v42  ;;  %v1584_v10 = vrot.slane %v5277_v7, 4 }
 0x227   :  { %v2211_v27 = vpop.f32.mrf.mxu1 }
 0x228   :  { %v2212_v38 = vadd.f32 %v2211_v27, %v2193_v52 }
 0x22a   :  { %v2232_v48 = vpop.f32.mrf.mxu2 }
 0x22b   :  { %v2233_v20 = vadd.f32 %v2232_v48, %v2016_v46 }
 0x22c   :  { %v2197_v24 = vpop.f32.mrf.mxu0 }
 0x22d   :  { %v2249_v28 = vpop.f32.mrf.mxu3  ;;  %v2198_v9 = vadd.f32 %v2197_v24, %v1981_v11 }
 0x22e   :  { %v2250_v33 = vadd.f32 %v2249_v28, %v2231_v34  ;;  %v1565_v28 = vrot.slane %v5301_v15, 4 }
 0x22f   :  { %v2213_v2 = vpop.f32.mrf.mxu1 }
 0x230   :  { %v2214_v30 = vadd.f32 %v2213_v2, %v2195_v23 }
 0x232   :  { %v2235_v53 = vpop.f32.mrf.mxu2 }
 0x233   :  { %v2236_v2 = vadd.f32 %v2235_v53, %v2019_v37 }
 0x234   :  { %v5936_v0 = vpop.f32.mrf.mxu0 }
 0x235   :  { %v2251_v51 = vpop.f32.mrf.mxu3  ;;  %v2200_v29 = vadd.f32 %v5936_v0, %v1983_v49 }
 0x236   :  { %v2252_v22 = vadd.f32 %v2251_v51, %v2233_v20  ;;  %v5973_v20 = vadd.f32 %v1565_v28, %v5301_v15 }
 0x237   :  { %v2216_v6 = vpop.f32.mrf.mxu1 }
 0x238   :  { %v2217_v51 = vadd.f32 %v2216_v6, %v2198_v9  ;;  %v5964_v6 = vadd.f32 %v1556_v45, %v5269_v32 }
 0x23a   :  { %v5938_v56 = vpop.f32.mrf.mxu2 }
 0x23c   :  { %v2511_v57 = vpop.f32.mrf.mxu0 }
 0x23d   :  { %v5940_v25 = vpop.f32.mrf.mxu3 }
 0x23e   :  { %v2255_v63 = vadd.f32 %v5940_v25, %v2236_v2 }
 0x23f   :  { %v5942_v14 = vpop.f32.mrf.mxu1 }
 0x242   :  { %v2549_v4 = vpop.f32.mrf.mxu2 }
 0x244   :  { %v2513_v1 = vpop.f32.mrf.mxu0 }
 0x245   :  { %v5944_v3 = vpop.f32.mrf.mxu3 }
 0x247   :  { %v2530_v8 = vpop.f32.mrf.mxu1 }
 0x248   :  { %v2531_v18 = vadd.f32 %v2530_v8, %v2511_v57 }
 0x24a   :  { %v2551_v58 = vpop.f32.mrf.mxu2  ;;  %v2578_v26 = vadd.f32 %v2531_v18, %v2212_v38 }
 0x24c   :  { %v2516_v55 = vpop.f32.mrf.mxu0 }
 0x24d   :  { %v2568_v44 = vpop.f32.mrf.mxu3 }
 0x24e   :  { %v2569_v35 = vadd.f32 %v2568_v44, %v2549_v4 }
 0x24f   :  { %v2532_v16 = vpop.f32.mrf.mxu1 }
 0x250   :  { %v5946_v36 = vadd.f32 %v2569_v35, %v2250_v33  ;;  %v2533_v41 = vadd.f32 %v2532_v16, %v2513_v1  ;;  %v2021_v33 = vadd.f32 %v5934_v40, %v5930_v50 }
 0x252   :  { %v2594_v31 = vrot.slane %v5946_v36, 4  ;;  %v2580_v27 = vadd.f32 %v2533_v41, %v2214_v30  ;;  %v2554_v19 = vpop.f32.mrf.mxu2  ;;  %v2739_v28 = vmul.f32 %v5946_v36, %v5946_v36 }
 0x254   :  { %v2598_v61 = vsel %vm1433_vm10, %v2578_v26, %v2594_v31  ;;  %v2599_v5 = vsel %vm1433_vm10, %v2594_v31, %v2578_v26  ;;  %v2518_v34 = vpop.f32.mrf.mxu0  ;;  %v2740_v35 = vmul.f32 %v2580_v27, %v2580_v27  ;;  %v2718_v46 = vadd.f32 %v2580_v27, %v2578_v26 }
 0x255   :  { %v2600_v59 = vrot.slane %v2599_v5, 4  ;;  %2610 = vst [vmem:[#allocation1] ss:$2 sm:$0xff] %v2598_v61  ;;  %v2570_v21 = vpop.f32.mrf.mxu3  ;;  %v2238_v5 = vadd.f32 %v5938_v56, %v2021_v33 }
 0x256   :  { %v2571_v60 = vadd.f32 %v2570_v21, %v2551_v58  ;;  %v2219_v58 = vadd.f32 %v5942_v14, %v2200_v29  ;;  %v5979_v14 = vadd.f32 %v1593_v17, %v5321_v62 }
 0x257   :  { %2614 = vst [vmem:[#allocation1 + $0x10] ss:$2 sm:$0xff] %v2600_v59  ;;  %v2535_v54 = vpop.f32.mrf.mxu1 }
 0x258   :  { %v5951_v12 = vadd.f32 %v2571_v60, %v2252_v22  ;;  %v2536_v39 = vadd.f32 %v2535_v54, %v2516_v55  ;;  %v2738_v55 = vmul.f32 %v2578_v26, %v2578_v26 }
 0x25a   :  { %v2595_v48 = vrot.slane %v5951_v12, 4  ;;  %v2582_v13 = vadd.f32 %v2536_v39, %v2217_v51  ;;  %v2746_v26 = vadd.f32 %v2740_v35, %v2738_v55  ;;  %v2727_v15 = vadd.f32 %v5951_v12, %v5946_v36  ;;  %v2556_v30 = vpop.f32.mrf.mxu2 }
 0x25b   :  { %v2257_v39 = vadd.f32 %v5944_v3, %v2238_v5  ;;  %v2741_v45 = vmul.f32 %v5951_v12, %v5951_v12  ;;  %v1585_v12 = vadd.f32 %v1584_v10, %v5277_v7  ;;  %v1558_v55 = vrot.slane %v5964_v6, 2 }
 0x25c   :  { %v2611_v57 = vld.sshfl [vmem:[#allocation1] sm:$0xff pattern:$0x75316420]  ;;  %v2612_v24 = vld.sshfl [vmem:[#allocation1 + $0x8] sm:$0xff pattern:$0x75316420]  ;;  %v2601_v4 = vsel %vm1433_vm10, %v2580_v27, %v2595_v48  ;;  %v2602_v8 = vsel %vm1433_vm10, %v2595_v48, %v2580_v27  ;;  %v2742_v25 = vmul.f32 %v2582_v13, %v2582_v13  ;;  %v2719_v61 = vadd.f32 %v2718_v46, %v2582_v13 }
 0x25d   :  { %v2653_v43 = vpack.c.bf16 %v2612_v24, %v2611_v57  ;;  %v2603_v1 = vrot.slane %v2602_v8, 4  ;;  %2618 = vst [vmem:[#allocation1 + $0x20] ss:$2 sm:$0xff] %v2601_v4  ;;  %v2573_v47 = vpop.f32.mrf.mxu3  ;;  %v1567_v8 = vrot.slane %v5973_v20, 2 }
 0x25e   :  { %v2574_v53 = vadd.f32 %v2573_v47, %v2554_v19  ;;  %v2615_v44 = vld.sshfl [vmem:[#allocation1 + $0x10] sm:$0xff pattern:$0x75316420]  ;;  %v2616_v52 = vld.sshfl [vmem:[#allocation1 + $0x18] sm:$0xff pattern:$0x75316420]  ;;  %v2747_v54 = vadd.f32 %v2746_v26, %v2742_v25 }
 0x25f   :  { %v2669_v18 = vrot.slane %v2653_v43, 2  ;;  %2622 = vst [vmem:[#allocation1 + $0x30] ss:$2 sm:$0xff] %v2603_v1  ;;  %v2654_v16 = vpack.c.bf16 %v2616_v52, %v2615_v44  ;;  %v2537_v38 = vpop.f32.mrf.mxu1  ;;  %v2755_v1 = vadd.f32 %v2741_v45, %v2739_v28 }
 0x260   :  { %v2583_v32 = vadd.f32 %v2574_v53, %v2255_v63  ;;  %v2538_v31 = vadd.f32 %v2537_v38, %v2518_v34  ;;  %v1595_v34 = vrot.slane %v5979_v14, 2 }
 0x261   :  { %v2679_v0 = vsel %vm295_vm8, %v2653_v43, %v2669_v18  ;;  %v2670_v42 = vrot.slane %v2654_v16, 2 }
 0x262   :  { %v2596_v50 = vrot.slane %v2583_v32, 4  ;;  %3732 = vst [vmem:[%s6042_s4 + $0x4] sm:$0xf] %v2679_v0  ;;  %v2584_v40 = vadd.f32 %v2538_v31, %v2219_v58  ;;  %v2728_v19 = vadd.f32 %v2727_v15, %v2583_v32  ;;  %v2743_v57 = vmul.f32 %v2583_v32, %v2583_v32 }
 0x263   :  { %v2682_v59 = vsel %vm295_vm8, %v2654_v16, %v2670_v42  ;;  %v1568_v0 = vadd.f32 %v1567_v8, %v5973_v20 }
 0x264   :  { %v2619_v21 = vld.sshfl [vmem:[#allocation1 + $0x20] sm:$0xff pattern:$0x75316420]  ;;  %v2620_v23 = vld.sshfl [vmem:[#allocation1 + $0x28] sm:$0xff pattern:$0x75316420]  ;;  %v2604_v22 = vsel %vm1433_vm10, %v2582_v13, %v2596_v50  ;;  %v2605_v41 = vsel %vm1433_vm10, %v2596_v50, %v2582_v13  ;;  %v2720_v60 = vadd.f32 %v2719_v61, %v2584_v40  ;;  %v2744_v9 = vmul.f32 %v2584_v40, %v2584_v40 }
 0x265   :  { %v2655_v11 = vpack.c.bf16 %v2620_v23, %v2619_v21  ;;  %v2606_v62 = vrot.slane %v2605_v41, 4  ;;  %2625 = vst [vmem:[#allocation1] ss:$2 sm:$0xff] %v2604_v22  ;;  %v2575_v56 = vpop.f32.mrf.mxu3  ;;  %v2756_v10 = vadd.f32 %v2755_v1, %v2743_v57  ;;  %v1586_v61 = vrot.slane %v1585_v12, 2 }
 0x266   :  { %3733 = vst [vmem:[%s6042_s4 + $0xc] sm:$0xf] %v2682_v59  ;;  %v2721_v37 = vrot.slane %v2720_v60, 4  ;;  %v2576_v27 = vadd.f32 %v2575_v56, %v2556_v30  ;;  %v2623_v48 = vld.sshfl [vmem:[#allocation1 + $0x30] sm:$0xff pattern:$0x75316420]  ;;  %v2748_v49 = vadd.f32 %v2747_v54, %v2744_v9  ;;  %v1596_v50 = vadd.f32 %v1595_v34, %v5979_v14 }
 0x267   :  { %v2671_v51 = vrot.slane %v2655_v11, 2  ;;  %2628 = vst [vmem:[#allocation1 + $0x10] ss:$2 sm:$0xff] %v2606_v62  ;;  %v2624_v2 = vld.sshfl [vmem:[#allocation1 + $0x38] sm:$0xff pattern:$0x75316420]  ;;  %v1559_v22 = vadd.f32 %v1558_v55, %v5964_v6 }
 0x268   :  { %v2722_v3 = vadd.f32 %v2721_v37, %v2720_v60  ;;  %v2585_v24 = vadd.f32 %v2576_v27, %v2257_v39  ;;  %v2656_v4 = vpack.c.bf16 %v2624_v2, %v2623_v48  ;;  %v2749_v43 = vrot.slane %v2748_v49, 4 }
 0x269   :  { %v2685_v17 = vsel %vm295_vm8, %v2655_v11, %v2671_v51  ;;  %v1569_v14 = vrot.slane %v1568_v0, 1  ;;  %v1587_v60 = vadd.f32 %v1586_v61, %v1585_v12  ;;  %v1597_v62 = vrot.slane %v1596_v50, 1 }
 0x26a   :  { %3734 = vst [vmem:[%s6042_s4 + $0x14] sm:$0xf] %v2685_v17  ;;  %v2597_v36 = vrot.slane %v2585_v24, 4  ;;  %v2672_v13 = vrot.slane %v2656_v4, 2  ;;  %v2729_v47 = vadd.f32 %v2728_v19, %v2585_v24  ;;  %v2723_v29 = vrot.slane %v2722_v3, 2 }
 0x26b   :  { %v2750_v63 = vadd.f32 %v2749_v43, %v2748_v49  ;;  %v2745_v53 = vmul.f32 %v2585_v24, %v2585_v24  ;;  %v1560_v6 = vrot.slane %v1559_v22, 1  ;;  %v1588_v19 = vrot.slane %v1587_v60, 1 }
 0x26c   :  { %v2626_v44 = vld.sshfl [vmem:[#allocation1] sm:$0xff pattern:$0x75316420]  ;;  %v2627_v7 = vld.sshfl [vmem:[#allocation1 + $0x8] sm:$0xff pattern:$0x75316420]  ;;  %v2607_v52 = vsel %vm1433_vm10, %v2584_v40, %v2597_v36  ;;  %v2608_v33 = vsel %vm1433_vm10, %v2597_v36, %v2584_v40  ;;  %v2688_v18 = vsel %vm295_vm8, %v2656_v4, %v2672_v13  ;;  %v2724_v21 = vadd.f32 %v2723_v29, %v2722_v3 }
 0x26d   :  { %v2657_v35 = vpack.c.bf16 %v2627_v7, %v2626_v44  ;;  %v2751_v16 = vrot.slane %v2750_v63, 2  ;;  %v2609_v38 = vrot.slane %v2608_v33, 4  ;;  %2631 = vst [vmem:[#allocation1 + $0x20] ss:$2 sm:$0xff] %v2607_v52  ;;  %v2730_v58 = vrot.slane %v2729_v47, 4 }
 0x26e   :  { %v2629_v46 = vld.sshfl [vmem:[#allocation1 + $0x10] sm:$0xff pattern:$0x75316420]  ;;  %v2630_v32 = vld.sshfl [vmem:[#allocation1 + $0x18] sm:$0xff pattern:$0x75316420]  ;;  %v2757_v31 = vadd.f32 %v2756_v10, %v2745_v53  ;;  %v1570_v49 = vadd.f32 %v1569_v14, %v1568_v0  ;;  %v2772_v12 = vlaneseq  ;;  %v1598_v8 = vadd.f32 %v1597_v62, %v1596_v50 }
 0x26f   :  { %v2658_v25 = vpack.c.bf16 %v2630_v32, %v2629_v46  ;;  %v2673_v42 = vrot.slane %v2657_v35, 2  ;;  %2634 = vst [vmem:[#allocation1 + $0x30] ss:$2 sm:$0xff] %v2609_v38  ;;  %v2731_v40 = vadd.f32 %v2730_v58, %v2729_v47  ;;  %v2752_v23 = vadd.f32 %v2751_v16, %v2750_v63 }
 0x270   :  { %3735 = vst [vmem:[%s6042_s4 + $0x1c] sm:$0xf] %v2688_v18  ;;  %v2758_v5 = vrot.slane %v2757_v31, 4  ;;  %v2725_v9 = vrot.slane %v2724_v21, 1  ;;  %v1561_v36 = vadd.f32 %v1560_v6, %v1559_v22  ;;  %v1589_v34 = vadd.f32 %v1588_v19, %v1587_v60 }
 0x271   :  { %v2674_v26 = vrot.slane %v2658_v25, 2  ;;  %v2691_v59 = vsel %vm295_vm8, %v2657_v35, %v2673_v42  ;;  %v2732_v20 = vrot.slane %v2731_v40, 2  ;;  %v2753_v56 = vrot.slane %v2752_v23, 1 }
 0x272   :  { %3736 = vst [vmem:[%s6042_s4 + $0x24] sm:$0xf] %v2691_v59  ;;  %v2759_v15 = vadd.f32 %v2758_v5, %v2757_v31  ;;  %v2726_v3 = vadd.f32 %v2725_v9, %v2724_v21  ;;  %vm2774_vm9 = vcmp.lt.s32.totalorder %v2772_v12, 256 }
 0x273   :  { %v2694_v41 = vsel %vm295_vm8, %v2658_v25, %v2674_v26  ;;  %v2733_v54 = vadd.f32 %v2732_v20, %v2731_v40  ;;  %v2754_v17 = vadd.f32 %v2753_v56, %v2752_v23 }
 0x274   :  { %3737 = vst [vmem:[%s6042_s4 + $0x2c] sm:$0xf] %v2694_v41  ;;  %v2632_v11 = vld.sshfl [vmem:[#allocation1 + $0x20] sm:$0xff pattern:$0x75316420]  ;;  %v2760_v30 = vrot.slane %v2759_v15, 2  ;;  %v2736_v63 = vadd.f32 %v2726_v3, %v1561_v36 }
 0x275   :  { %v2633_v39 = vld.sshfl [vmem:[#allocation1 + $0x28] sm:$0xff pattern:$0x75316420]  ;;  %v2734_v51 = vrot.slane %v2733_v54, 1  ;;  %v2764_v44 = vadd.f32 %v2754_v17, %v1589_v34 }
 0x276   :  { %v2635_v45 = vld.sshfl [vmem:[#allocation1 + $0x30] sm:$0xff pattern:$0x75316420]  ;;  %v2636_v37 = vld.sshfl [vmem:[#allocation1 + $0x38] sm:$0xff pattern:$0x75316420]  ;;  %v2659_v27 = vpack.c.bf16 %v2633_v39, %v2632_v11  ;;  %v2761_v48 = vadd.f32 %v2760_v30, %v2759_v15 }
 0x277   :  { %v2660_v28 = vpack.c.bf16 %v2636_v37, %v2635_v45  ;;  %v2735_v4 = vadd.f32 %v2734_v51, %v2733_v54 }
 0x278   :  { %v2675_v2 = vrot.slane %v2659_v27, 2  ;;  %v2762_v57 = vrot.slane %v2761_v48, 1 }
 0x279   :  { %v2676_v24 = vrot.slane %v2660_v28, 2  ;;  %v2737_v47 = vadd.f32 %v2735_v4, %v1570_v49 }
 0x27a   :  { %v2697_v43 = vsel %vm295_vm8, %v2659_v27, %v2675_v2  ;;  %v2763_v1 = vadd.f32 %v2762_v57, %v2761_v48 }
 0x27b   :  { %v2700_v13 = vsel %vm295_vm8, %v2660_v28, %v2676_v24  ;;  %3738 = vst [vmem:[%s6042_s4 + $0x34] sm:$0xf] %v2697_v43  ;;  %v2768_v53 = vrot.slane %v2737_v47, 7 }
 0x27c   :  { %3739 = vst [vmem:[%s6042_s4 + $0x3c] sm:$0xf] %v2700_v13  ;;  %v2765_v29 = vadd.f32 %v2763_v1, %v1598_v8 }
 0x27d   :  { %v2770_v10 = vsel %vm42_vm0, %v2736_v63, %v2768_v53 }
 0x27e   :  { %v2779_v7 = vrot.slane %v2765_v29, 7  ;;  %2776 = vst.msk [vmem:[%s6043_s5] ss:$2 sm:$0x3] %vm2774_vm9, %v2770_v10 }
 0x280   :  { %v2780_v52 = vsel %vm42_vm0, %v2764_v44, %v2779_v7 }
 0x281   :  { %3740 = vst.msk [vmem:[%s6043_s5 + $0x1] ss:$2 sm:$0x3] %vm2774_vm9, %v2780_v52 }

// kernel: generator_forward.6
= control target key start
LH: loop header
LB: loop body
LE: loop exit
PB: predicated region body
PF: predicated region fallthrough
CT: control target
= control target key end

     0   :  { %v3463_v2 = vmov 0   ;;  %vm167_vm0 = vsmask.f32 256  ;;  %vm166_vm1 = vcmask 1040384   ;;  %v169_v14 = vld [vmem:[#allocation2 + $0x8] sm:$0x1]  ;;  %s4761_s1 = inlined_call_operand.vmem [shape: bf16[6,256,128], index: 1, kind: input, shape index: {}]   ;;  %s4762_s0 = inlined_call_operand.vmem [shape: bf16[2,8,8,128], index: 0, kind: input, shape index: {}]   ;;  %s4763_s2 = inlined_call_operand.vmem [shape: f32[1,128], index: 2, kind: input, shape index: {}]   ;;  %s4764_s3 = inlined_call_operand.vmem [shape: f32[1,128], index: 3, kind: input, shape index: {}]   ;;  %s4765_s4 = inlined_call_operand.vmem [shape: bf16[2,8,2,8,128], index: 4, kind: output, shape index: {0}]   ;;  %s4766_s5 = inlined_call_operand.vmem [shape: f32[1,2,128], index: 5, kind: output, shape index: {1}]  }
   0x1   :  { %v3314_v0 = vld [vmem:[%s4761_s1 + $0x38] sm:$0xff]  ;;  %156 = vst [vmem:[#allocation2] sm:$0xf] %v3463_v2  ;;  %v3313_v5 = vld [vmem:[%s4761_s1 + $0x30] sm:$0xff]  ;;  %v3312_v9 = vld [vmem:[%s4761_s1 + $0x28] sm:$0xff]  ;;  %vm427_vm5 = vcmask 1043456  }
   0x2   :  { %v3322_v1 = vld [vmem:[%s4761_s1 + $0x78] sm:$0xff]  ;;  %1293 = vmatpush.bf16.msra.mxu2 %v3314_v0  ;;  %v3321_v6 = vld [vmem:[%s4761_s1 + $0x70] sm:$0xff]  ;;  %157 = vst [vmem:[#allocation2 + $0x4] sm:$0x1] %v3463_v2  ;;  %v3320_v10 = vld [vmem:[%s4761_s1 + $0x68] sm:$0xff] }
   0x3   :  { %v3330_v3 = vld [vmem:[%s4761_s1 + $0xb8] sm:$0xff]  ;;  %1342 = vmatpush.bf16.msra.mxu3 %v3322_v1  ;;  %v3329_v7 = vld [vmem:[%s4761_s1 + $0xb0] sm:$0xff]  ;;  %158 = vst [vmem:[#allocation2 + $0x50] sm:$0xf] %v3463_v2  ;;  %v3328_v11 = vld [vmem:[%s4761_s1 + $0xa8] sm:$0xff] }
   0x4   :  { %v3338_v4 = vld [vmem:[%s4761_s1 + $0xf8] sm:$0xff]  ;;  %1099 = vmatpush.bf16.msra.mxu0 %v3330_v3  ;;  %v3337_v8 = vld [vmem:[%s4761_s1 + $0xf0] sm:$0xff]  ;;  %159 = vst [vmem:[#allocation2 + $0x54] sm:$0x1] %v3463_v2  ;;  %v3336_v12 = vld [vmem:[%s4761_s1 + $0xe8] sm:$0xff] }
   0x5   :  { %1148 = vmatpush.bf16.msra.mxu1 %v3338_v4  ;;  %161 = vst [vmem:[#allocation2 + $0x48] sm:$0xf] %v3463_v2  ;;  %v3311_v13 = vld [vmem:[%s4761_s1 + $0x20] sm:$0xff]  ;;  %vm217_vm2 = vsmask.f32 7938  ;;  %vm3557_vm3 = vmand %vm166_vm1, %vm167_vm0  ;;  %v3310_v27 = vld [vmem:[%s4761_s1 + $0x18] sm:$0xff] }
   0x6   :  { %1294 = vmatpush.bf16.msra.mxu2 %v3313_v5  ;;  %162 = vst [vmem:[#allocation2 + $0x4c] sm:$0x1] %v3463_v2  ;;  %v3319_v15 = vld [vmem:[%s4761_s1 + $0x60] sm:$0xff]  ;;  %v170_v24 = vsel %vm3557_vm3, 0, %v169_v14  ;;  %vm3565_vm4 = vmand %vm166_vm1, %vm217_vm2  ;;  %v172_v26 = vld [vmem:[#allocation2 + $0x10] sm:$0x1] }
   0x7   :  { %1343 = vmatpush.bf16.msra.mxu3 %v3321_v6  ;;  %163 = vst [vmem:[#allocation2 + $0x98] sm:$0xf] %v3463_v2  ;;  %v3327_v16 = vld [vmem:[%s4761_s1 + $0xa0] sm:$0xff]  ;;  %v173_v31 = vsel %vm3557_vm3, 0, %v172_v26  ;;  %v3318_v32 = vld [vmem:[%s4761_s1 + $0x58] sm:$0xff]  ;;  %v3435_v40 = vld [vmem:[%s4762_s0 + $0x8] sm:$0xff]  }
   0x8   :  { %1100 = vmatpush.bf16.msra.mxu0 %v3329_v7  ;;  %164 = vst [vmem:[#allocation2 + $0x9c] sm:$0x1] %v3463_v2  ;;  %v3335_v17 = vld [vmem:[%s4761_s1 + $0xe0] sm:$0xff]  ;;  %v3326_v33 = vld [vmem:[%s4761_s1 + $0x98] sm:$0xff]  ;;  %v219_v34 = vld [vmem:[#allocation2 + $0xc] sm:$0x1]  ;;  %v3409_v45 = vunpack.c.l.bf16 %v3435_v40  ;;  %v3410_v60 = vunpack.c.h.bf16 %v3435_v40 }
   0x9   :  { %1149 = vmatpush.bf16.msra.mxu1 %v3337_v8  ;;  %v3404_v18 = vld [vmem:[%s4762_s0] sm:$0xff]   ;;  %171 = vst [vmem:[#allocation2 + $0x8] sm:$0x1] %v170_v24  ;;  %v3334_v35 = vld [vmem:[%s4761_s1 + $0xd8] sm:$0xff]  ;;  %v220_v38 = vsel %vm3565_vm4, 0, %v219_v34  ;;  %v3309_v41 = vld [vmem:[%s4761_s1 + $0x10] sm:$0xff] }
   0xa   :  { %1295 = vmatpush.bf16.msra.mxu2 %v3312_v9  ;;  %v3548_v19 = vld [vmem:[%s4763_s2] ss:$0 sm:$0xff]  ;;  %v3405_v20 = vunpack.c.l.bf16 %v3404_v18  ;;  %v3406_v23 = vunpack.c.h.bf16 %v3404_v18  ;;  %174 = vst [vmem:[#allocation2 + $0x10] sm:$0x1] %v173_v31  ;;  %v3591_v39 = vld [vmem:[#allocation2 + $0x4] sm:$0x1]  ;;  %vm3658_vm11 = vmand %vm427_vm5, %vm217_vm2 }
   0xb   :  { %1344 = vmatpush.bf16.msra.mxu3 %v3320_v10  ;;  %v3553_v21 = vld [vmem:[%s4764_s3] ss:$0 sm:$0xff]  ;;  %v3317_v42 = vld [vmem:[%s4761_s1 + $0x50] sm:$0xff]  ;;  %221 = vst [vmem:[#allocation2 + $0xc] sm:$0x1] %v220_v38  ;;  %v678_v50 = vshll.u32 %v3591_v39, 16  ;;  %v58_v52 = vmul.f32 %v3548_v19, %v3409_v45  ;;  %v59_v6 = vmul.f32 %v3548_v19, %v3410_v60 }
   0xc   :  { %1101 = vmatpush.bf16.msra.mxu0 %v3328_v11  ;;  %v56_v28 = vmul.f32 %v3548_v19, %v3405_v20  ;;  %v3573_v29 = vld [vmem:[#allocation2] sm:$0xf]  ;;  %v57_v30 = vmul.f32 %v3548_v19, %v3406_v23  ;;  %vm665_vm6 = vsmask.f32 3328  ;;  %vm666_vm7 = vsmask.f32 7440 }
   0xd   :  { %1150 = vmatpush.bf16.msra.mxu1 %v3336_v12  ;;  %v669_v43 = vshrl.u32 %v3573_v29, 16  ;;  %v672_v44 = vshll.u32 %v3573_v29, 16  ;;  %v222_v51 = vld [vmem:[#allocation2 + $0x14] sm:$0x1]  ;;  %v175_v59 = vld [vmem:[#allocation2 + $0x18] sm:$0x1]  ;;  %v78_v1 = vadd.f32 %v3553_v21, %v58_v52  ;;  %v79_v20 = vadd.f32 %v3553_v21, %v59_v6  ;;  %vm3679_vm13 = vmor %vm665_vm6, %vm666_vm7 }
   0xe   :  { %1296 = vmatpush.bf16.msra.mxu2 %v3311_v13  ;;  %v76_v36 = vadd.f32 %v3553_v21, %v56_v28  ;;  %v77_v37 = vadd.f32 %v3553_v21, %v57_v30  ;;  %v3613_v53 = vld [vmem:[%s4762_s0 + $0x10] sm:$0xff]   ;;  %v223_v58 = vsel %vm3565_vm4, 0, %v222_v51  ;;  %v3308_v61 = vld [vmem:[%s4761_s1 + $0x8] sm:$0xff]  ;;  %v178_v2 = vld [vmem:[#allocation2 + $0x20] sm:$0x1]  ;;  %v176_v5 = vsel %vm3557_vm3, 0, %v175_v59 }
   0xf   :  { %1345 = vmatpush.bf16.msra.mxu3 %v3319_v15  ;;  %v3604_v48 = vrot.slane %v669_v43, 4  ;;  %v3606_v49 = vrot.slane %v672_v44, 5  ;;  %v3325_v54 = vld [vmem:[%s4761_s1 + $0x90] sm:$0xff]  ;;  %224 = vst [vmem:[#allocation2 + $0x14] sm:$0x1] %v223_v58  ;;  %v3316_v3 = vld [vmem:[%s4761_s1 + $0x48] sm:$0xff]  ;;  %v3413_v9 = vunpack.c.l.bf16 %v3613_v53  ;;  %v3414_v6 = vunpack.c.h.bf16 %v3613_v53 }
  0x10   :  { %1102 = vmatpush.bf16.msra.mxu0 %v3327_v16  ;;  %vm92_vm8 = vcmp.ge.f32.partialorder %v76_v36, 0.0  ;;  %v108_v46 = vmul.f32 0.2, %v76_v36  ;;  %vm93_vm9 = vcmp.ge.f32.partialorder %v77_v37, 0.0  ;;  %v109_v47 = vmul.f32 0.2, %v77_v37 }
  0x11   :  { %1151 = vmatpush.bf16.msra.mxu1 %v3335_v17  ;;  %v3333_v55 = vld [vmem:[%s4761_s1 + $0xd0] sm:$0xff]  ;;  %v675_v0 = vor.u32 %v3606_v49, %v3604_v48  ;;  %v3324_v4 = vld [vmem:[%s4761_s1 + $0x88] sm:$0xff]  ;;  %v179_v7 = vsel %vm3557_vm3, 0, %v178_v2  ;;  %v225_v8 = vld [vmem:[#allocation2 + $0x1c] sm:$0x1]  ;;  %vm94_vm10 = vcmp.ge.f32.partialorder %v78_v1, 0.0 }
  0x12   :  { %1297 = vmatpush.bf16.msra.mxu2 %v3310_v27  ;;  %v124_v56 = vsel %vm92_vm8, %v76_v36, %v108_v46  ;;  %v125_v57 = vsel %vm93_vm9, %v77_v37, %v109_v47  ;;  %177 = vst [vmem:[#allocation2 + $0x18] sm:$0x1] %v176_v5  ;;  %v3332_v14 = vld [vmem:[%s4761_s1 + $0xc8] sm:$0xff]  ;;  %v435_v16 = vld [vmem:[#allocation2 + $0x10] sm:$0xf]  ;;  %v3307_v23 = vld [vmem:[%s4761_s1] sm:$0xff]  ;;  %v60_v36 = vmul.f32 %v3548_v19, %v3413_v9 }
  0x13   :  { %1346 = vmatpush.bf16.msra.mxu3 %v3318_v32  ;;  %v140_v62 = vpack.c.bf16 %v124_v56, %v124_v56  ;;  %v141_v63 = vpack.c.bf16 %v125_v57, %v125_v57  ;;  %v429_v15 = vld [vmem:[#allocation2 + $0x8] sm:$0xf]  ;;  %v432_v17 = vld [vmem:[#allocation2 + $0xc] sm:$0x1]  ;;  %v110_v18 = vmul.f32 0.2, %v78_v1 }
  0x14   :  { %1103 = vmatpush.bf16.msra.mxu0 %v3326_v33  ;;  %v3315_v24 = vld [vmem:[%s4761_s1 + $0x40] sm:$0xff]  ;;  %v3652_v28 = vrot.slane %v678_v50, 5  ;;  %180 = vst [vmem:[#allocation2 + $0x20] sm:$0x1] %v179_v7  ;;  %v226_v30 = vsel %vm3565_vm4, 0, %v225_v8  ;;  %v3378_v32 = vld [vmem:[%s4761_s1 + $0x238] sm:$0xff]  ;;  %v581_v8 = vunpack.c.l.b16 %v3573_v29 }
  0x15   :  { %1152 = vmatpush.bf16.msra.mxu1 %v3334_v35  ;;  %v268_v10 = vshrl.u32 %v140_v62, 16  ;;  %v271_v11 = vshll.u32 %v140_v62, 16  ;;  %v276_v12 = vshrl.u32 %v141_v63, 16  ;;  %v279_v13 = vshll.u32 %v141_v63, 16  ;;  %v3386_v33 = vld [vmem:[%s4761_s1 + $0x278] sm:$0xff]  ;;  %v3323_v39 = vld [vmem:[%s4761_s1 + $0x80] sm:$0xff] }
  0x16   :  { %1298 = vmatpush.bf16.msra.mxu2 %v3309_v41  ;;  %v126_v34 = vsel %vm94_vm10, %v78_v1, %v110_v18  ;;  %vm95_vm12 = vcmp.ge.f32.partialorder %v79_v20, 0.0  ;;  %v111_v35 = vmul.f32 0.2, %v79_v20  ;;  %227 = vst [vmem:[#allocation2 + $0x1c] sm:$0x1] %v226_v30  ;;  %v3331_v40 = vld [vmem:[%s4761_s1 + $0xc0] sm:$0xff] }
  0x17   :  { %1347 = vmatpush.bf16.msra.mxu3 %v3317_v42  ;;  %v270_v26 = vrot.slane %v268_v10, 7  ;;  %v278_v27 = vrot.slane %v276_v12, 7  ;;  %v3675_v42 = vrot.slane %v675_v0, 4  ;;  %v228_v43 = vld [vmem:[#allocation2 + $0x24] sm:$0x1]  ;;  %v142_v47 = vpack.c.bf16 %v126_v34, %v126_v34  ;;  %v3354_v56 = vld [vmem:[%s4761_s1 + $0x178] sm:$0xff] }
  0x18   :  { %1104 = vmatpush.bf16.msra.mxu0 %v3325_v54  ;;  %v438_v46 = vld [vmem:[#allocation2 + $0x14] sm:$0x1]  ;;  %v127_v48 = vsel %vm95_vm12, %v79_v20, %v111_v35  ;;  %v229_v49 = vsel %vm3565_vm4, 0, %v228_v43  ;;  %v181_v50 = vld [vmem:[#allocation2 + $0x28] sm:$0x1]  ;;  %v80_v0 = vadd.f32 %v3553_v21, %v60_v36  ;;  %v3437_v7 = vld [vmem:[%s4762_s0 + $0x18] sm:$0xff]  }
  0x19   :  { %1153 = vmatpush.bf16.msra.mxu1 %v3333_v55  ;;  %v273_v37 = vor.u32 %v271_v11, %v270_v26  ;;  %v281_v38 = vor.u32 %v279_v13, %v278_v27  ;;  %v274_v41 = vrot.slane %v270_v26, 4  ;;  %v282_v45 = vrot.slane %v278_v27, 4  ;;  %v3346_v55 = vld [vmem:[%s4761_s1 + $0x138] sm:$0xff]  ;;  %230 = vst [vmem:[#allocation2 + $0x24] sm:$0x1] %v229_v49  ;;  %v3377_v62 = vld [vmem:[%s4761_s1 + $0x230] sm:$0xff] }
  0x1a   :  { %1299 = vmatpush.bf16.msra.mxu2 %v3308_v61  ;;  %v143_v57 = vpack.c.bf16 %v127_v48, %v127_v48  ;;  %v184_v58 = vld [vmem:[#allocation2 + $0x30] sm:$0x1]  ;;  %v284_v60 = vshrl.u32 %v142_v47, 16  ;;  %v287_v61 = vshll.u32 %v142_v47, 16  ;;  %v231_v1 = vld [vmem:[#allocation2 + $0x2c] sm:$0x1]  ;;  %v681_v9 = vsel %vm3679_vm13, %v3675_v42, %v3652_v28 }
  0x1b   :  { %1348 = vmatpush.bf16.msra.mxu3 %v3316_v3  ;;  %v430_v51 = vsel %vm3658_vm11, %v273_v37, %v429_v15  ;;  %v436_v52 = vsel %vm3658_vm11, %v281_v38, %v435_v16  ;;  %v433_v54 = vsel %vm3557_vm3, %v274_v41, %v432_v17  ;;  %v439_v59 = vsel %vm3557_vm3, %v282_v45, %v438_v46  ;;  %v3385_v63 = vld [vmem:[%s4761_s1 + $0x270] sm:$0xff]  ;;  %v441_v2 = vld [vmem:[#allocation2 + $0x18] sm:$0xf]  ;;  %v447_v11 = vld [vmem:[#allocation2 + $0x20] sm:$0xf] }
  0x1c   :  { %1105 = vmatpush.bf16.msra.mxu0 %v3324_v4  ;;  %431 = vst [vmem:[#allocation2 + $0x8] sm:$0xf] %v430_v51  ;;  %v292_v3 = vshrl.u32 %v143_v57, 16  ;;  %v295_v4 = vshll.u32 %v143_v57, 16  ;;  %v182_v5 = vsel %vm3557_vm3, 0, %v181_v50  ;;  %v286_v10 = vrot.slane %v284_v60, 7 }
  0x1d   :  { %1154 = vmatpush.bf16.msra.mxu1 %v3332_v14  ;;  %437 = vst [vmem:[#allocation2 + $0x10] sm:$0xf] %v436_v52  ;;  %vm96_vm14 = vcmp.ge.f32.partialorder %v80_v0, 0.0  ;;  %v444_v12 = vld [vmem:[#allocation2 + $0x1c] sm:$0x1]  ;;  %v61_v13 = vmul.f32 %v3548_v19, %v3414_v6  ;;  %v185_v29 = vsel %vm3557_vm3, 0, %v184_v58  ;;  %v3417_v14 = vunpack.c.l.bf16 %v3437_v7 }
  0x1e   :  { %1300 = vmatpush.bf16.msra.mxu2 %v3307_v23  ;;  %434 = vst [vmem:[#allocation2 + $0xc] sm:$0x1] %v433_v54  ;;  %v294_v53 = vrot.slane %v292_v3, 7  ;;  %v289_v15 = vor.u32 %v287_v61, %v286_v10  ;;  %v290_v16 = vrot.slane %v286_v10, 4  ;;  %v112_v17 = vmul.f32 0.2, %v80_v0 }
  0x1f   :  { %1349 = vmatpush.bf16.msra.mxu3 %v3315_v24  ;;  %440 = vst [vmem:[#allocation2 + $0x14] sm:$0x1] %v439_v59  ;;  %v232_v18 = vsel %vm3565_vm4, 0, %v231_v1  ;;  %v3724_v24 = vadd.f32 %v3553_v21, %v61_v13  ;;  %v3418_v26 = vunpack.c.h.bf16 %v3437_v7  ;;  %v3737_v36 = vunpack.c.l.b16 %v681_v9  ;;  %v234_v50 = vld [vmem:[#allocation2 + $0x34] sm:$0x1]  ;;  %v3376_v6 = vld [vmem:[%s4761_s1 + $0x228] sm:$0xff] }
  0x20   :  { %1106 = vmatpush.bf16.msra.mxu0 %v3323_v39  ;;  %183 = vst [vmem:[#allocation2 + $0x28] sm:$0x1] %v182_v5  ;;  %v297_v20 = vor.u32 %v295_v4, %v294_v53  ;;  %v298_v23 = vrot.slane %v294_v53, 4  ;;  %v442_v27 = vsel %vm3658_vm11, %v289_v15, %v441_v2  ;;  %v445_v28 = vsel %vm3557_vm3, %v290_v16, %v444_v12  ;;  %v450_v30 = vld [vmem:[#allocation2 + $0x24] sm:$0x1]  ;;  %v3384_v10 = vld [vmem:[%s4761_s1 + $0x268] sm:$0xff] }
  0x21   :  { %1155 = vmatpush.bf16.msra.mxu1 %v3331_v40  ;;  %186 = vst [vmem:[#allocation2 + $0x30] sm:$0x1] %v185_v29  ;;  %v128_v34 = vsel %vm96_vm14, %v80_v0, %v112_v17  ;;  %v62_v39 = vmul.f32 %v3548_v19, %v3417_v14  ;;  %v63_v51 = vmul.f32 %v3548_v19, %v3418_v26  ;;  %vm97_vm15 = vcmp.ge.f32.partialorder %v3724_v24, 0.0 }
  0x22   :  { %2073 = vmatpush.bf16.msrb.mxu2 %v3378_v32  ;;  %v3345_v32 = vld [vmem:[%s4761_s1 + $0x130] sm:$0xff]  ;;  %233 = vst [vmem:[#allocation2 + $0x2c] sm:$0x1] %v232_v18  ;;  %v448_v37 = vsel %vm3658_vm11, %v297_v20, %v447_v11  ;;  %v451_v38 = vsel %vm3557_vm3, %v298_v23, %v450_v30  ;;  %v3744_v45 = vpack.c.bf16 %v128_v34, %v128_v34  ;;  %v113_v5 = vmul.f32 0.2, %v3724_v24 }
  0x23   :  { %2122 = vmatpush.bf16.msrb.mxu3 %v3386_v33  ;;  %v3353_v33 = vld [vmem:[%s4761_s1 + $0x170] sm:$0xff]  ;;  %v527_v35 = vld [vmem:[#allocation2 + $0x8] sm:$0xf]  ;;  %443 = vst [vmem:[#allocation2 + $0x18] sm:$0xf] %v442_v27  ;;  %v3752_v1 = vadd.f32 %v3553_v21, %v62_v39  ;;  %v235_v11 = vsel %vm3565_vm4, 0, %v234_v50  ;;  %v3766_v53 = vadd.f32 %v3553_v21, %v63_v51 }
  0x24   :  { %1663 = vmatpush.bf16.msrb.mxu0 %v3346_v55  ;;  %v582_v40 = vunpack.c.l.b16 %v527_v35  ;;  %v529_v41 = vld [vmem:[#allocation2 + $0x10] sm:$0xf]  ;;  %v683_v42 = vshrl.u32 %v527_v35, 16  ;;  %v686_v43 = vshll.u32 %v527_v35, 16  ;;  %449 = vst [vmem:[#allocation2 + $0x20] sm:$0xf] %v448_v37 }
  0x25   :  { %1712 = vmatpush.bf16.msrb.mxu1 %v3354_v56  ;;  %v583_v46 = vunpack.c.l.b16 %v529_v41  ;;  %v528_v47 = vld [vmem:[#allocation2 + $0xc] sm:$0x1]  ;;  %v697_v48 = vshrl.u32 %v529_v41, 16  ;;  %v700_v49 = vshll.u32 %v529_v41, 16  ;;  %446 = vst [vmem:[#allocation2 + $0x1c] sm:$0x1] %v445_v28 }
  0x26   :  { %2074 = vmatpush.bf16.msrb.mxu2 %v3377_v62  ;;  %v597_v52 = vpack.c.b16 %v582_v40, %v581_v8  ;;  %v685_v54 = vrot.slane %v683_v42, 4  ;;  %v688_v55 = vrot.slane %v686_v43, 5  ;;  %v692_v56 = vshll.u32 %v528_v47, 16  ;;  %v530_v57 = vld [vmem:[#allocation2 + $0x14] sm:$0x1] }
  0x27   :  { %2123 = vmatpush.bf16.msrb.mxu3 %v3385_v63  ;;  %v3748_v58 = vpack.c.b16 %v583_v46, %v582_v40  ;;  %v699_v59 = vrot.slane %v697_v48, 4  ;;  %v702_v60 = vrot.slane %v700_v49, 5  ;;  %v706_v61 = vshll.u32 %v530_v57, 16  ;;  %452 = vst [vmem:[#allocation2 + $0x24] sm:$0x1] %v451_v38 }
  0x28   :  { %1664 = vmatpush.bf16.msrb.mxu0 %v3345_v32  ;;  %1301 = vmatmul.bf16.vlgmr.msra.gmra.mxu2 %v597_v52  ;;  %v689_v62 = vor.u32 %v688_v55, %v685_v54  ;;  %v694_v63 = vrot.slane %v692_v56, 5  ;;  %v300_v0 = vshrl.u32 %v3744_v45, 16  ;;  %v303_v4 = vshll.u32 %v3744_v45, 16  ;;  %236 = vst [vmem:[#allocation2 + $0x34] sm:$0x1] %v235_v11 }
  0x29   :  { %1713 = vmatpush.bf16.msrb.mxu1 %v3353_v33  ;;  %1350 = vmatmul.bf16.vlgmr.msra.gmra.mxu3 %v3748_v58  ;;  %v703_v2 = vor.u32 %v702_v60, %v699_v59  ;;  %v708_v3 = vrot.slane %v706_v61, 5  ;;  %v453_v42 = vld [vmem:[#allocation2 + $0x28] sm:$0xf]  ;;  %v456_v48 = vld [vmem:[#allocation2 + $0x2c] sm:$0x1]  ;;  %v129_v52 = vsel %vm97_vm15, %v3724_v24, %v113_v5  ;;  %vm98_vm0 = vcmp.ge.f32.partialorder %v3752_v1, 0.0 }
  0x2a   :  { %v690_v7 = vrot.slane %v689_v62, 4  ;;  %v531_v8 = vld [vmem:[#allocation2 + $0x18] sm:$0xf]  ;;  %v302_v9 = vrot.slane %v300_v0, 7  ;;  %2075 = vmatpush.bf16.msrb.mxu2 %v3376_v6  ;;  %v145_v57 = vpack.c.bf16 %v129_v52, %v129_v52  ;;  %v3344_v59 = vld [vmem:[%s4761_s1 + $0x128] sm:$0xff]  ;;  %vm99_vm1 = vcmp.ge.f32.partialorder %v3766_v53, 0.0 }
  0x2b   :  { %v704_v12 = vrot.slane %v703_v2, 4  ;;  %v584_v13 = vunpack.c.l.b16 %v531_v8  ;;  %v3768_v29 = vld [vmem:[#allocation2 + $0x20] sm:$0xf]  ;;  %v711_v14 = vshrl.u32 %v531_v8, 16  ;;  %v714_v15 = vshll.u32 %v531_v8, 16  ;;  %2124 = vmatpush.bf16.msrb.mxu3 %v3384_v10  ;;  %v3352_v24 = vld [vmem:[%s4761_s1 + $0x168] sm:$0xff] }
  0x2c   :  { %v695_v16 = vsel %vm3679_vm13, %v690_v7, %v694_v63  ;;  %v585_v17 = vunpack.c.l.b16 %v3768_v29  ;;  %v532_v18 = vld [vmem:[#allocation2 + $0x1c] sm:$0x1]  ;;  %v725_v20 = vshrl.u32 %v3768_v29, 16  ;;  %v728_v23 = vshll.u32 %v3768_v29, 16  ;;  %v187_v49 = vld [vmem:[#allocation2 + $0x38] sm:$0x1]  ;;  %1665 = vmatpush.bf16.msrb.mxu0 %v3344_v59 }
  0x2d   :  { %v921_v26 = vunpack.c.l.b16 %v695_v16  ;;  %v709_v27 = vsel %vm3679_vm13, %v704_v12, %v708_v3  ;;  %v3777_v28 = vpack.c.b16 %v584_v13, %v583_v46  ;;  %v713_v30 = vrot.slane %v711_v14, 4  ;;  %v190_v60 = vld [vmem:[#allocation2 + $0x40] sm:$0x1]  ;;  %v237_v61 = vld [vmem:[#allocation2 + $0x3c] sm:$0x1]  ;;  %1714 = vmatpush.bf16.msrb.mxu1 %v3352_v24 }
  0x2e   :  { %v922_v32 = vunpack.c.l.b16 %v709_v27  ;;  %v3781_v33 = vpack.c.b16 %v585_v17, %v584_v13  ;;  %v716_v34 = vrot.slane %v714_v15, 5  ;;  %v720_v35 = vshll.u32 %v532_v18, 16  ;;  %v534_v37 = vld [vmem:[#allocation2 + $0x24] sm:$0x1]  ;;  %v459_v10 = vld [vmem:[#allocation2 + $0x30] sm:$0xf] }
  0x2f   :  { %v936_v38 = vpack.c.b16 %v921_v26, %v3737_v36  ;;  %v727_v39 = vrot.slane %v725_v20, 4  ;;  %v730_v40 = vrot.slane %v728_v23, 5  ;;  %v734_v41 = vshll.u32 %v534_v37, 16  ;;  %v3792_v36 = vld [vmem:[%s4762_s0 + $0x20] sm:$0xff]   ;;  %v193_v16 = vld [vmem:[#allocation2 + $0x58] sm:$0x1] }
  0x30   :  { %4793 = vst [vmem:[#allocation3_spill] sm:$0xff] %v3781_v33  ;;  %v3784_v43 = vpack.c.b16 %v922_v32, %v921_v26  ;;  %v717_v45 = vor.u32 %v716_v34, %v713_v30  ;;  %v722_v46 = vrot.slane %v720_v35, 5  ;;  %v305_v47 = vor.u32 %v303_v4, %v302_v9  ;;  %v240_v6 = vld [vmem:[#allocation2 + $0x44] sm:$0x1]  ;;  %v462_v20 = vld [vmem:[#allocation2 + $0x34] sm:$0x1] }
  0x31   :  { %1107 = vmatmul.bf16.vlgmr.msra.gmra.mxu0 %v936_v38  ;;  %v731_v50 = vor.u32 %v730_v40, %v727_v39  ;;  %v736_v51 = vrot.slane %v734_v41, 5  ;;  %v306_v54 = vrot.slane %v302_v9, 4  ;;  %v114_v0 = vmul.f32 0.2, %v3752_v1  ;;  %v3375_v38 = vld [vmem:[%s4761_s1 + $0x220] sm:$0xff] }
  0x32   :  { %1156 = vmatmul.bf16.vlgmr.msra.gmra.mxu1 %v3784_v43  ;;  %v718_v55 = vrot.slane %v717_v45, 4  ;;  %v454_v56 = vsel %vm3658_vm11, %v305_v47, %v453_v42  ;;  %v188_v2 = vsel %vm3557_vm3, 0, %v187_v49  ;;  %v308_v4 = vshrl.u32 %v145_v57, 16  ;;  %v3383_v39 = vld [vmem:[%s4761_s1 + $0x260] sm:$0xff]  ;;  %2076 = vmatpush.bf16.msrb.mxu2 %v3375_v38 }
  0x33   :  { %v732_v62 = vrot.slane %v731_v50, 4  ;;  %455 = vst [vmem:[#allocation2 + $0x28] sm:$0xf] %v454_v56  ;;  %v457_v63 = vsel %vm3557_vm3, %v306_v54, %v456_v48  ;;  %v311_v5 = vshll.u32 %v145_v57, 16  ;;  %v3421_v7 = vunpack.c.l.bf16 %v3792_v36  ;;  %v196_v48 = vld [vmem:[#allocation2 + $0x60] sm:$0x1]  ;;  %2125 = vmatpush.bf16.msrb.mxu3 %v3383_v39 }
  0x34   :  { %v723_v3 = vsel %vm3679_vm13, %v718_v55, %v722_v46  ;;  %458 = vst [vmem:[#allocation2 + $0x2c] sm:$0x1] %v457_v63  ;;  %v130_v11 = vsel %vm98_vm0, %v3752_v1, %v114_v0  ;;  %v310_v13 = vrot.slane %v308_v4, 7  ;;  %v115_v15 = vmul.f32 0.2, %v3766_v53 }
  0x35   :  { %v923_v8 = vunpack.c.l.b16 %v723_v3  ;;  %v737_v9 = vsel %vm3679_vm13, %v732_v62, %v736_v51  ;;  %189 = vst [vmem:[#allocation2 + $0x38] sm:$0x1] %v188_v2  ;;  %v146_v14 = vpack.c.bf16 %v130_v11, %v130_v11  ;;  %v191_v23 = vsel %vm3557_vm3, 0, %v190_v60  ;;  %v3856_v55 = vld [vmem:[#allocation2 + $0x5c] sm:$0x1] }
  0x36   :  { %v3818_v12 = vunpack.c.l.b16 %v737_v9  ;;  %v238_v26 = vsel %vm3565_vm4, 0, %v237_v61  ;;  %v241_v1 = vsel %vm3565_vm4, 0, %v240_v6  ;;  %v313_v30 = vor.u32 %v311_v5, %v310_v13  ;;  %192 = vst [vmem:[#allocation2 + $0x40] sm:$0x1] %v191_v23  ;;  %v3867_v6 = vld [vmem:[#allocation2 + $0x64] sm:$0x1] }
  0x37   :  { %v3821_v18 = vpack.c.b16 %v923_v8, %v922_v32  ;;  %v314_v34 = vrot.slane %v310_v13, 4  ;;  %v316_v35 = vshrl.u32 %v146_v14, 16  ;;  %v319_v32 = vshll.u32 %v146_v14, 16  ;;  %239 = vst [vmem:[#allocation2 + $0x3c] sm:$0x1] %v238_v26  ;;  %v3885_v26 = vld [vmem:[%s4762_s0 + $0x28] sm:$0xff]  }
  0x38   :  { %1306 = vmatmul.bf16.gmra.mxu2 %v3777_v28  ;;  %v3831_v27 = vpack.c.b16 %v3818_v12, %v923_v8  ;;  %v131_v37 = vsel %vm99_vm1, %v3766_v53, %v115_v15  ;;  %v64_v40 = vmul.f32 %v3548_v19, %v3421_v7  ;;  %v194_v41 = vsel %vm3557_vm3, 0, %v193_v16  ;;  %242 = vst [vmem:[#allocation2 + $0x44] sm:$0x1] %v241_v1 }
  0x39   :  { %1355 = vmatmul.bf16.gmra.mxu3 %v3781_v33  ;;  %v460_v45 = vsel %vm3658_vm11, %v313_v30, %v459_v10  ;;  %v463_v53 = vsel %vm3557_vm3, %v314_v34, %v462_v20  ;;  %v318_v46 = vrot.slane %v316_v35, 7  ;;  %v147_v47 = vpack.c.bf16 %v131_v37, %v131_v37  ;;  %195 = vst [vmem:[#allocation2 + $0x58] sm:$0x1] %v194_v41  ;;  %v3343_v35 = vld [vmem:[%s4761_s1 + $0x120] sm:$0xff] }
  0x3a   :  { %v3846_v42 = vld [vmem:[#allocation2 + $0x28] sm:$0xf]  ;;  %461 = vst [vmem:[#allocation2 + $0x30] sm:$0xf] %v460_v45  ;;  %v84_v54 = vadd.f32 %v3553_v21, %v64_v40  ;;  %v3422_v60 = vunpack.c.h.bf16 %v3792_v36  ;;  %v244_v13 = vsel %vm3565_vm4, 0, %v3856_v55  ;;  %v247_v23 = vsel %vm3565_vm4, 0, %v3867_v6  ;;  %1666 = vmatpush.bf16.msrb.mxu0 %v3343_v35 }
  0x3b   :  { %v586_v49 = vunpack.c.l.b16 %v3846_v42  ;;  %v536_v50 = vld [vmem:[#allocation2 + $0x2c] sm:$0x1]  ;;  %v739_v51 = vshrl.u32 %v3846_v42, 16  ;;  %v742_v52 = vshll.u32 %v3846_v42, 16  ;;  %464 = vst [vmem:[#allocation2 + $0x34] sm:$0x1] %v463_v53  ;;  %v321_v57 = vor.u32 %v319_v32, %v318_v46 }
  0x3c   :  { %v748_v56 = vshll.u32 %v536_v50, 16  ;;  %v465_v59 = vld [vmem:[#allocation2 + $0x38] sm:$0xf]  ;;  %v324_v24 = vshrl.u32 %v147_v47, 16  ;;  %v327_v0 = vshll.u32 %v147_v47, 16  ;;  %v322_v5 = vrot.slane %v318_v46, 4 }
  0x3d   :  { %v3863_v61 = vpack.c.b16 %v586_v49, %v585_v17  ;;  %v741_v62 = vrot.slane %v739_v51, 4  ;;  %v744_v63 = vrot.slane %v742_v52, 5  ;;  %v466_v3 = vsel %vm3658_vm11, %v321_v57, %v465_v59  ;;  %v471_v36 = vld [vmem:[#allocation2 + $0x40] sm:$0xf]  ;;  %v3913_v52 = vld [vmem:[#allocation2 + $0x50] sm:$0xf] }
  0x3e   :  { %v750_v2 = vrot.slane %v748_v56, 5  ;;  %v326_v4 = vrot.slane %v324_v24, 7  ;;  %467 = vst [vmem:[#allocation2 + $0x38] sm:$0xf] %v466_v3  ;;  %vm100_vm2 = vcmp.ge.f32.partialorder %v84_v54, 0.0  ;;  %v65_v29 = vmul.f32 %v3548_v19, %v3422_v60  ;;  %v3351_v32 = vld [vmem:[%s4761_s1 + $0x160] sm:$0xff] }
  0x3f   :  { %4794 = vst [vmem:[#allocation4_spill] sm:$0xff] %v3863_v61  ;;  %v745_v7 = vor.u32 %v744_v63, %v741_v62  ;;  %v197_v17 = vsel %vm3557_vm3, 0, %v196_v48  ;;  %v468_v9 = vld [vmem:[#allocation2 + $0x3c] sm:$0x1]  ;;  %v116_v11 = vmul.f32 0.2, %v84_v54  ;;  %1715 = vmatpush.bf16.msrb.mxu1 %v3351_v32  ;;  %v3425_v24 = vunpack.c.l.bf16 %v3885_v26 }
  0x40   :  { %v329_v8 = vor.u32 %v327_v0, %v326_v4  ;;  %v330_v10 = vrot.slane %v326_v4, 4  ;;  %v469_v15 = vsel %vm3557_vm3, %v322_v5, %v468_v9  ;;  %v474_v16 = vld [vmem:[#allocation2 + $0x44] sm:$0x1]  ;;  %v85_v20 = vadd.f32 %v3553_v21, %v65_v29  ;;  %198 = vst [vmem:[#allocation2 + $0x60] sm:$0x1] %v197_v17  ;;  %v3374_v29 = vld [vmem:[%s4761_s1 + $0x218] sm:$0xff] }
  0x41   :  { %1112 = vmatmul.bf16.gmra.mxu0 %v3821_v18  ;;  %v746_v14 = vrot.slane %v745_v7, 4  ;;  %v3888_v1 = vld [vmem:[#allocation2 + $0x30] sm:$0xf]  ;;  %470 = vst [vmem:[#allocation2 + $0x3c] sm:$0x1] %v469_v15  ;;  %v132_v37 = vsel %vm100_vm2, %v84_v54, %v116_v11  ;;  %v3382_v11 = vld [vmem:[%s4761_s1 + $0x258] sm:$0xff]  ;;  %2077 = vmatpush.bf16.msrb.mxu2 %v3374_v29 }
  0x42   :  { %1161 = vmatmul.bf16.gmra.mxu1 %v3831_v27  ;;  %v472_v30 = vsel %vm3658_vm11, %v329_v8, %v471_v36  ;;  %v475_v34 = vsel %vm3557_vm3, %v330_v10, %v474_v16  ;;  %v587_v38 = vunpack.c.l.b16 %v3888_v1  ;;  %v3904_v40 = vld [vmem:[#allocation2 + $0x34] sm:$0x1]  ;;  %v753_v41 = vshrl.u32 %v3888_v1, 16  ;;  %245 = vst [vmem:[#allocation2 + $0x5c] sm:$0x1] %v244_v13  ;;  %2126 = vmatpush.bf16.msrb.mxu3 %v3382_v11  ;;  %v3350_v11 = vld [vmem:[%s4761_s1 + $0x158] sm:$0xff] }
  0x43   :  { %v751_v39 = vsel %vm3679_vm13, %v746_v14, %v750_v2  ;;  %v756_v45 = vshll.u32 %v3888_v1, 16  ;;  %473 = vst [vmem:[#allocation2 + $0x40] sm:$0xf] %v472_v30  ;;  %v762_v46 = vshll.u32 %v3904_v40, 16  ;;  %v148_v47 = vpack.c.bf16 %v132_v37, %v132_v37  ;;  %v477_v2 = vld [vmem:[#allocation2 + $0x58] sm:$0xf]  ;;  %1716 = vmatpush.bf16.msrb.mxu1 %v3350_v11 }
  0x44   :  { %v925_v53 = vunpack.c.l.b16 %v751_v39  ;;  %476 = vst [vmem:[#allocation2 + $0x44] sm:$0x1] %v475_v34  ;;  %vm101_vm5 = vcmp.ge.f32.partialorder %v85_v20, 0.0  ;;  %v3911_v48 = vpack.c.b16 %v587_v38, %v586_v49  ;;  %v755_v50 = vrot.slane %v753_v41, 4 }
  0x45   :  { %v758_v51 = vrot.slane %v756_v45, 5  ;;  %v117_v54 = vmul.f32 0.2, %v85_v20  ;;  %v539_v56 = vld [vmem:[#allocation2 + $0x38] sm:$0xf]  ;;  %v332_v57 = vshrl.u32 %v148_v47, 16  ;;  %v589_v36 = vunpack.c.l.b16 %v3913_v52 }
  0x46   :  { %4795 = vst [vmem:[#allocation5_spill] sm:$0xff] %v3911_v48  ;;  %v3916_v55 = vpack.c.b16 %v925_v53, %v3818_v12  ;;  %v335_v59 = vshll.u32 %v148_v47, 16  ;;  %v764_v62 = vrot.slane %v762_v46, 5  ;;  %v767_v63 = vshrl.u32 %v539_v56, 16  ;;  %v199_v46 = vld [vmem:[#allocation2 + $0x68] sm:$0x1] }
  0x47   :  { %v759_v60 = vor.u32 %v758_v51, %v755_v50  ;;  %v770_v0 = vshll.u32 %v539_v56, 16  ;;  %v588_v42 = vunpack.c.l.b16 %v539_v56  ;;  %v334_v49 = vrot.slane %v332_v57, 7  ;;  %248 = vst [vmem:[#allocation2 + $0x64] sm:$0x1] %v247_v23 }
  0x48   :  { %1311 = vmatmul.bf16.gmra.mxu2 %v3863_v61  ;;  %v133_v3 = vsel %vm101_vm5, %v85_v20, %v117_v54  ;;  %v781_v12 = vshrl.u32 %v3913_v52, 16  ;;  %v3923_v5 = vld [vmem:[#allocation2 + $0x3c] sm:$0x1]  ;;  %v769_v6 = vrot.slane %v767_v63, 4  ;;  %v546_v54 = vld [vmem:[#allocation2 + $0x54] sm:$0x1] }
  0x49   :  { %1360 = vmatmul.bf16.gmra.mxu3 %v3911_v48  ;;  %v760_v4 = vrot.slane %v759_v60, 4  ;;  %v772_v7 = vrot.slane %v770_v0, 5  ;;  %v776_v8 = vshll.u32 %v3923_v5, 16  ;;  %v337_v9 = vor.u32 %v335_v59, %v334_v49  ;;  %v480_v57 = vld [vmem:[#allocation2 + $0x5c] sm:$0x1] }
  0x4a   :  { %v3929_v17 = vld [vmem:[#allocation2 + $0x40] sm:$0xf]  ;;  %v149_v10 = vpack.c.bf16 %v133_v3, %v133_v3  ;;  %v338_v13 = vrot.slane %v334_v49, 4  ;;  %v3945_v37 = vpack.c.b16 %v588_v42, %v587_v38  ;;  %v783_v59 = vrot.slane %v781_v12, 4  ;;  %v202_v49 = vld [vmem:[#allocation2 + $0x70] sm:$0x1] }
  0x4b   :  { %v765_v14 = vsel %vm3679_vm13, %v760_v4, %v764_v62  ;;  %v4767_v15 = vunpack.c.l.b16 %v3929_v17  ;;  %v773_v16 = vor.u32 %v772_v7, %v769_v6  ;;  %v3938_v20 = vld [vmem:[#allocation2 + $0x44] sm:$0x1]  ;;  %v893_v1 = vshrl.u32 %v3929_v17, 16  ;;  %v483_v0 = vld [vmem:[#allocation2 + $0x60] sm:$0xf] }
  0x4c   :  { %v3941_v30 = vunpack.c.l.b16 %v765_v14  ;;  %v778_v34 = vrot.slane %v776_v8, 5  ;;  %v896_v35 = vshll.u32 %v3929_v17, 16  ;;  %v902_v32 = vshll.u32 %v3938_v20, 16  ;;  %4796 = vst [vmem:[#allocation6_spill] sm:$0xff] %v3945_v37 }
  0x4d   :  { %v774_v39 = vrot.slane %v773_v16, 4  ;;  %v895_v41 = vrot.slane %v893_v1, 4  ;;  %v478_v45 = vsel %vm3658_vm11, %v337_v9, %v477_v2  ;;  %v3954_v23 = vpack.c.b16 %v4767_v15, %v588_v42 }
  0x4e   :  { %v3950_v47 = vpack.c.b16 %v3941_v30, %v925_v53  ;;  %v898_v50 = vrot.slane %v896_v35, 5  ;;  %479 = vst [vmem:[#allocation2 + $0x58] sm:$0xf] %v478_v45  ;;  %v340_v51 = vshrl.u32 %v149_v10, 16  ;;  %v343_v56 = vshll.u32 %v149_v10, 16  ;;  %v3342_v10 = vld [vmem:[%s4761_s1 + $0x118] sm:$0xff] }
  0x4f   :  { %4797 = vst [vmem:[#allocation7_spill] sm:$0xff] %v3954_v23  ;;  %v779_v38 = vsel %vm3679_vm13, %v774_v39, %v778_v34  ;;  %v784_v60 = vshll.u32 %v3913_v52, 16  ;;  %v904_v63 = vrot.slane %v902_v32, 5  ;;  %v481_v42 = vsel %vm3557_vm3, %v338_v13, %v480_v57  ;;  %v486_v9 = vld [vmem:[#allocation2 + $0x64] sm:$0x1]  ;;  %1667 = vmatpush.bf16.msrb.mxu0 %v3342_v10  ;;  %v3373_v52 = vld [vmem:[%s4761_s1 + $0x210] sm:$0xff] }
  0x50   :  { %v899_v62 = vor.u32 %v898_v50, %v895_v41  ;;  %v342_v53 = vrot.slane %v340_v51, 7  ;;  %482 = vst [vmem:[#allocation2 + $0x5c] sm:$0x1] %v481_v42  ;;  %v790_v3 = vshll.u32 %v546_v54, 16  ;;  %v66_v4 = vmul.f32 %v3548_v19, %v3425_v24  ;;  %v249_v39 = vld [vmem:[#allocation2 + $0x6c] sm:$0x1]  ;;  %2078 = vmatpush.bf16.msrb.mxu2 %v3373_v52 }
  0x51   :  { %1117 = vmatmul.bf16.gmra.mxu0 %v3916_v55  ;;  %v786_v2 = vrot.slane %v784_v60, 5  ;;  %v200_v12 = vsel %vm3557_vm3, 0, %v199_v46  ;;  %v927_v6 = vunpack.c.l.b16 %v779_v38  ;;  %v3426_v16 = vunpack.c.h.bf16 %v3885_v26  ;;  %v252_v50 = vld [vmem:[#allocation2 + $0x74] sm:$0x1]  ;;  %v208_v52 = vld [vmem:[#allocation2 + $0x80] sm:$0x1] }
  0x52   :  { %1166 = vmatmul.bf16.gmra.mxu1 %v3950_v47  ;;  %v900_v7 = vrot.slane %v899_v62, 4  ;;  %v345_v29 = vor.u32 %v343_v56, %v342_v53  ;;  %v346_v8 = vrot.slane %v342_v53, 4  ;;  %v3974_v24 = vrot.slane %v790_v3, 5  ;;  %201 = vst [vmem:[#allocation2 + $0x68] sm:$0x1] %v200_v12  ;;  %v4006_v62 = vld [vmem:[%s4762_s0 + $0x30] sm:$0xff]  }
  0x53   :  { %v787_v13 = vor.u32 %v786_v2, %v783_v59  ;;  %v86_v14 = vadd.f32 %v3553_v21, %v66_v4  ;;  %v203_v32 = vsel %vm3557_vm3, 0, %v202_v49  ;;  %v67_v46 = vmul.f32 %v3548_v19, %v3426_v16 }
  0x54   :  { %v905_v1 = vsel %vm3679_vm13, %v900_v7, %v904_v63  ;;  %v484_v34 = vsel %vm3658_vm11, %v345_v29, %v483_v0  ;;  %v487_v35 = vsel %vm3557_vm3, %v346_v8, %v486_v9  ;;  %v3995_v57 = vpack.c.b16 %v927_v6, %v3941_v30  ;;  %204 = vst [vmem:[#allocation2 + $0x70] sm:$0x1] %v203_v32  ;;  %v205_v63 = vld [vmem:[#allocation2 + $0x78] sm:$0x1] }
  0x55   :  { %v3986_v41 = vunpack.c.l.b16 %v905_v1  ;;  %v3988_v45 = vld [vmem:[#allocation2 + $0x58] sm:$0xf]  ;;  %485 = vst [vmem:[#allocation2 + $0x60] sm:$0xf] %v484_v34  ;;  %v788_v26 = vrot.slane %v787_v13, 4  ;;  %vm102_vm6 = vcmp.ge.f32.partialorder %v86_v14, 0.0  ;;  %v87_v60 = vadd.f32 %v3553_v21, %v67_v46 }
  0x56   :  { %v590_v51 = vunpack.c.l.b16 %v3988_v45  ;;  %v795_v54 = vshrl.u32 %v3988_v45, 16  ;;  %v798_v38 = vshll.u32 %v3988_v45, 16  ;;  %488 = vst [vmem:[#allocation2 + $0x64] sm:$0x1] %v487_v35  ;;  %v118_v56 = vmul.f32 0.2, %v86_v14 }
  0x57   :  { %v3998_v59 = vpack.c.b16 %v3986_v41, %v927_v6  ;;  %v250_v19 = vsel %vm3565_vm4, 0, %v249_v39  ;;  %v4013_v53 = vld [vmem:[#allocation2 + $0x5c] sm:$0x1]  ;;  %v793_v21 = vsel %vm3679_vm13, %v788_v26, %v3974_v24  ;;  %vm103_vm7 = vcmp.ge.f32.partialorder %v87_v60, 0.0  ;;  %v4043_v39 = vld [vmem:[%s4763_s2] ss:$0 sm:$0xff] }
  0x58   :  { %1316 = vmatmul.bf16.gmra.mxu2 %v3945_v37  ;;  %v4011_v30 = vpack.c.b16 %v590_v51, %v589_v36  ;;  %v797_v0 = vrot.slane %v795_v54, 4  ;;  %v800_v42 = vrot.slane %v798_v38, 5  ;;  %251 = vst [vmem:[#allocation2 + $0x6c] sm:$0x1] %v250_v19  ;;  %v804_v49 = vshll.u32 %v4013_v53, 16  ;;  %v3381_v36 = vld [vmem:[%s4761_s1 + $0x250] sm:$0xff] }
  0x59   :  { %1365 = vmatmul.bf16.gmra.mxu3 %v3954_v23  ;;  %v134_v2 = vsel %vm102_vm6, %v86_v14, %v118_v56  ;;  %v119_v3 = vmul.f32 0.2, %v87_v60  ;;  %v253_v6 = vsel %vm3565_vm4, 0, %v252_v50  ;;  %v3429_v7 = vunpack.c.l.bf16 %v4006_v62  ;;  %v3459_v37 = vld [vmem:[#allocation2 + $0x30] sm:$0xf] }
  0x5a   :  { %v801_v4 = vor.u32 %v800_v42, %v797_v0  ;;  %v150_v12 = vpack.c.bf16 %v134_v2, %v134_v2  ;;  %v806_v29 = vrot.slane %v804_v49, 5  ;;  %2127 = vmatpush.bf16.msrb.mxu3 %v3381_v36  ;;  %254 = vst [vmem:[#allocation2 + $0x74] sm:$0x1] %v253_v6  ;;  %v206_v9 = vsel %vm3557_vm3, 0, %v205_v63  ;;  %v489_v63 = vld [vmem:[#allocation2 + $0x68] sm:$0xf] }
  0x5b   :  { %v135_v8 = vsel %vm103_vm7, %v87_v60, %v119_v3  ;;  %v3430_v10 = vunpack.c.h.bf16 %v4006_v62  ;;  %v68_v26 = vmul.f32 %v4043_v39, %v3429_v7  ;;  %207 = vst [vmem:[#allocation2 + $0x78] sm:$0x1] %v206_v9  ;;  %v4053_v60 = vunpack.c.l.b16 %v793_v21  ;;  %v255_v7 = vld [vmem:[#allocation2 + $0x7c] sm:$0x1] }
  0x5c   :  { %v4033_v11 = vld [vmem:[#allocation2 + $0x60] sm:$0xf]  ;;  %v802_v13 = vrot.slane %v801_v4, 4  ;;  %v348_v24 = vshrl.u32 %v150_v12, 16  ;;  %v351_v14 = vshll.u32 %v150_v12, 16  ;;  %v151_v16 = vpack.c.bf16 %v135_v8, %v135_v8 }
  0x5d   :  { %v4768_v1 = vunpack.c.l.b16 %v4033_v11  ;;  %v4036_v34 = vld [vmem:[#allocation2 + $0x64] sm:$0x1]  ;;  %v809_v35 = vshrl.u32 %v4033_v11, 16  ;;  %v812_v32 = vshll.u32 %v4033_v11, 16  ;;  %v495_v12 = vld [vmem:[#allocation2 + $0x70] sm:$0xf] }
  0x5e   :  { %v807_v46 = vsel %vm3679_vm13, %v802_v13, %v806_v29  ;;  %v818_v50 = vshll.u32 %v4036_v34, 16  ;;  %v350_v54 = vrot.slane %v348_v24, 7  ;;  %v356_v38 = vshrl.u32 %v151_v16, 16  ;;  %v3341_v24 = vld [vmem:[%s4761_s1 + $0x110] sm:$0xff] }
  0x5f   :  { %v4051_v56 = vpack.c.b16 %v4768_v1, %v590_v51  ;;  %v811_v19 = vrot.slane %v809_v35, 4  ;;  %v814_v62 = vrot.slane %v812_v32, 5  ;;  %v4055_v0 = vunpack.c.l.b16 %v807_v46  ;;  %v492_v3 = vld [vmem:[#allocation2 + $0x6c] sm:$0x1]  ;;  %v4061_v51 = vld [vmem:[%s4764_s3] ss:$0 sm:$0xff]  ;;  %1668 = vmatpush.bf16.msrb.mxu0 %v3341_v24 }
  0x60   :  { %v353_v42 = vor.u32 %v351_v14, %v350_v54  ;;  %v358_v49 = vrot.slane %v356_v38, 7  ;;  %v359_v2 = vshll.u32 %v151_v16, 16  ;;  %v820_v4 = vrot.slane %v818_v50, 5  ;;  %v3349_v14 = vld [vmem:[%s4761_s1 + $0x150] sm:$0xff]  ;;  %v258_v38 = vld [vmem:[#allocation2 + $0x84] sm:$0x1] }
  0x61   :  { %4798 = vst [vmem:[#allocation8_spill] sm:$0xff] %v4051_v56  ;;  %1122 = vmatmul.bf16.gmra.mxu0 %v3995_v57  ;;  %v815_v36 = vor.u32 %v814_v62, %v811_v19  ;;  %v354_v6 = vrot.slane %v350_v54, 4  ;;  %v88_v21 = vadd.f32 %v4061_v51, %v68_v26  ;;  %v498_v13 = vld [vmem:[#allocation2 + $0x74] sm:$0x1]  ;;  %v69_v16 = vmul.f32 %v4043_v39, %v3430_v10  ;;  %v211_v10 = vld [vmem:[#allocation2 + $0x88] sm:$0x1] }
  0x62   :  { %1171 = vmatmul.bf16.gmra.mxu1 %v3998_v59  ;;  %v490_v29 = vsel %vm3658_vm11, %v353_v42, %v489_v63  ;;  %v361_v8 = vor.u32 %v359_v2, %v358_v49  ;;  %v362_v9 = vrot.slane %v358_v49, 4  ;;  %v209_v63 = vsel %vm3557_vm3, 0, %v208_v52 }
  0x63   :  { %v816_v35 = vrot.slane %v815_v36, 4  ;;  %491 = vst [vmem:[#allocation2 + $0x68] sm:$0xf] %v490_v29  ;;  %v493_v32 = vsel %vm3557_vm3, %v354_v6, %v492_v3  ;;  %vm104_vm8 = vcmp.ge.f32.partialorder %v88_v21, 0.0  ;;  %v120_v26 = vmul.f32 0.2, %v88_v21  ;;  %1717 = vmatpush.bf16.msrb.mxu1 %v3349_v14 }
  0x64   :  { %v496_v46 = vsel %vm3658_vm11, %v361_v8, %v495_v12  ;;  %494 = vst [vmem:[#allocation2 + $0x6c] sm:$0x1] %v493_v32  ;;  %v499_v50 = vsel %vm3557_vm3, %v362_v9, %v498_v13  ;;  %v89_v54 = vadd.f32 %v4061_v51, %v69_v16  ;;  %v256_v42 = vsel %vm3565_vm4, 0, %v255_v7  ;;  %v3441_v36 = vld [vmem:[%s4762_s0 + $0x38] sm:$0xff]   ;;  %v214_v12 = vld [vmem:[#allocation2 + $0x90] sm:$0x1] }
  0x65   :  { %v821_v19 = vsel %vm3679_vm13, %v816_v35, %v820_v4  ;;  %497 = vst [vmem:[#allocation2 + $0x70] sm:$0xf] %v496_v46  ;;  %v136_v62 = vsel %vm104_vm8, %v88_v21, %v120_v26  ;;  %v259_v4 = vsel %vm3565_vm4, 0, %v258_v38  ;;  %v212_v52 = vsel %vm3557_vm3, 0, %v211_v10  ;;  %v261_v29 = vld [vmem:[#allocation2 + $0x8c] sm:$0x1] }
  0x66   :  { %v4087_v49 = vunpack.c.l.b16 %v821_v19  ;;  %500 = vst [vmem:[#allocation2 + $0x74] sm:$0x1] %v499_v50  ;;  %v152_v2 = vpack.c.bf16 %v136_v62, %v136_v62  ;;  %vm105_vm9 = vcmp.ge.f32.partialorder %v89_v54, 0.0  ;;  %v121_v3 = vmul.f32 0.2, %v89_v54  ;;  %v3372_v9 = vld [vmem:[%s4761_s1 + $0x208] sm:$0xff] }
  0x67   :  { %210 = vst [vmem:[#allocation2 + $0x80] sm:$0x1] %v209_v63  ;;  %v3380_v13 = vld [vmem:[%s4761_s1 + $0x248] sm:$0xff]  ;;  %v3433_v24 = vunpack.c.l.bf16 %v3441_v36  ;;  %v3434_v14 = vunpack.c.h.bf16 %v3441_v36  ;;  %v501_v26 = vld [vmem:[#allocation2 + $0x78] sm:$0xf]  ;;  %v215_v46 = vsel %vm3557_vm3, 0, %v214_v12  ;;  %2079 = vmatpush.bf16.msrb.mxu2 %v3372_v9 }
  0x68   :  { %1321 = vmatmul.bf16.gmra.mxu2 %v4011_v30  ;;  %v364_v6 = vshrl.u32 %v152_v2, 16  ;;  %v367_v21 = vshll.u32 %v152_v2, 16  ;;  %v137_v7 = vsel %vm105_vm9, %v89_v54, %v121_v3  ;;  %257 = vst [vmem:[#allocation2 + $0x7c] sm:$0x1] %v256_v42  ;;  %v940_v30 = vpack.c.b16 %v4055_v0, %v4053_v60  ;;  %2128 = vmatpush.bf16.msrb.mxu3 %v3380_v13 }
  0x69   :  { %1370 = vmatmul.bf16.gmra.mxu3 %v4051_v56  ;;  %v153_v8 = vpack.c.bf16 %v137_v7, %v137_v7  ;;  %260 = vst [vmem:[#allocation2 + $0x84] sm:$0x1] %v259_v4  ;;  %v4108_v16 = vpack.c.b16 %v4087_v49, %v4055_v0  ;;  %v262_v60 = vsel %vm3565_vm4, 0, %v261_v29  ;;  %v70_v4 = vmul.f32 %v4043_v39, %v3433_v24  ;;  %v3456_v56 = vld [vmem:[#allocation2 + $0x24] sm:$0x1] }
  0x6a   :  { %v4110_v35 = vld [vmem:[#allocation2 + $0x68] sm:$0xf]  ;;  %v366_v32 = vrot.slane %v364_v6, 7  ;;  %213 = vst [vmem:[#allocation2 + $0x88] sm:$0x1] %v212_v52  ;;  %v71_v52 = vmul.f32 %v4043_v39, %v3434_v14  ;;  %v2893_v48 = vrot.slane %v3459_v37, 9 }
  0x6b   :  { %v4114_v50 = vld [vmem:[#allocation2 + $0x6c] sm:$0x1]  ;;  %v823_v54 = vshrl.u32 %v4110_v35, 16  ;;  %v826_v38 = vshll.u32 %v4110_v35, 16  ;;  %v372_v10 = vshrl.u32 %v153_v8, 16  ;;  %v375_v63 = vshll.u32 %v153_v8, 16 }
  0x6c   :  { %v4120_v0 = vld [vmem:[#allocation2 + $0x70] sm:$0xf]  ;;  %v832_v19 = vshll.u32 %v4114_v50, 16  ;;  %v369_v62 = vor.u32 %v367_v21, %v366_v32  ;;  %v370_v42 = vrot.slane %v366_v32, 4  ;;  %216 = vst [vmem:[#allocation2 + $0x90] sm:$0x1] %v215_v46  ;;  %v592_v12 = vunpack.c.l.b16 %v4110_v35 }
  0x6d   :  { %v825_v2 = vrot.slane %v823_v54, 4  ;;  %v828_v3 = vrot.slane %v826_v38, 5  ;;  %v4123_v36 = vld [vmem:[#allocation2 + $0x74] sm:$0x1]  ;;  %v837_v6 = vshrl.u32 %v4120_v0, 16  ;;  %v840_v7 = vshll.u32 %v4120_v0, 16 }
  0x6e   :  { %v846_v29 = vshll.u32 %v4123_v36, 16  ;;  %v264_v21 = vld [vmem:[#allocation2 + $0x94] sm:$0x1]  ;;  %v834_v9 = vrot.slane %v832_v19, 5  ;;  %v502_v13 = vsel %vm3658_vm11, %v369_v62, %v501_v26  ;;  %v374_v32 = vrot.slane %v372_v10, 7  ;;  %v3340_v62 = vld [vmem:[%s4761_s1 + $0x108] sm:$0xff] }
  0x6f   :  { %v829_v8 = vor.u32 %v828_v3, %v825_v2  ;;  %v504_v54 = vld [vmem:[#allocation2 + $0x7c] sm:$0x1]  ;;  %263 = vst [vmem:[#allocation2 + $0x8c] sm:$0x1] %v262_v60  ;;  %v4769_v39 = vunpack.c.l.b16 %v4120_v0  ;;  %v839_v24 = vrot.slane %v837_v6, 4  ;;  %v842_v14 = vrot.slane %v840_v7, 5  ;;  %1669 = vmatpush.bf16.msrb.mxu0 %v3340_v62 }
  0x70   :  { %503 = vst [vmem:[#allocation2 + $0x78] sm:$0xf] %v502_v13  ;;  %v507_v46 = vld [vmem:[#allocation2 + $0x80] sm:$0xf]  ;;  %v505_v38 = vsel %vm3557_vm3, %v370_v42, %v504_v54  ;;  %v377_v1 = vor.u32 %v375_v63, %v374_v32  ;;  %v378_v19 = vrot.slane %v374_v32, 4  ;;  %v90_v26 = vadd.f32 %v4061_v51, %v70_v4  ;;  %v3348_v42 = vld [vmem:[%s4761_s1 + $0x148] sm:$0xff] }
  0x71   :  { %1127 = vmatmul.bf16.gmra.mxu0 %v940_v30  ;;  %v830_v15 = vrot.slane %v829_v8, 4  ;;  %506 = vst [vmem:[#allocation2 + $0x7c] sm:$0x1] %v505_v38  ;;  %v510_v2 = vld [vmem:[#allocation2 + $0x84] sm:$0x1]  ;;  %v843_v10 = vor.u32 %v842_v14, %v839_v24  ;;  %v848_v60 = vrot.slane %v846_v29, 5  ;;  %v91_v30 = vadd.f32 %v4061_v51, %v71_v52  ;;  %1718 = vmatpush.bf16.msrb.mxu1 %v3348_v42 }
  0x72   :  { %1176 = vmatmul.bf16.gmra.mxu1 %v4108_v16  ;;  %v265_v63 = vsel %vm3565_vm4, 0, %v264_v21  ;;  %v508_v3 = vsel %vm3658_vm11, %v377_v1, %v507_v46  ;;  %v511_v4 = vsel %vm3557_vm3, %v378_v19, %v510_v2  ;;  %vm106_vm10 = vcmp.ge.f32.partialorder %v90_v26, 0.0  ;;  %v3371_v19 = vld [vmem:[%s4761_s1 + $0x200] sm:$0xff] }
  0x73   :  { %266 = vst [vmem:[#allocation2 + $0x94] sm:$0x1] %v265_v63  ;;  %v4799_v6 = vunpack.c.l.b16 %v4033_v11  ;;  %v844_v29 = vrot.slane %v843_v10, 4  ;;  %v122_v51 = vmul.f32 0.2, %v90_v26  ;;  %vm107_vm12 = vcmp.ge.f32.partialorder %v91_v30, 0.0  ;;  %2080 = vmatpush.bf16.msrb.mxu2 %v3371_v19 }
  0x74   :  { %509 = vst [vmem:[#allocation2 + $0x80] sm:$0xf] %v508_v3  ;;  %v4157_v25 = vpack.c.b16 %v4769_v39, %v592_v12  ;;  %v835_v1 = vsel %vm3679_vm13, %v830_v15, %v834_v9  ;;  %v123_v52 = vmul.f32 0.2, %v91_v30  ;;  %v3379_v2 = vld [vmem:[%s4761_s1 + $0x240] sm:$0xff]  ;;  %vm1408_vm4 = vcmask 1046532  }
  0x75   :  { %v4153_v7 = vpack.c.b16 %v592_v12, %v4799_v6  ;;  %512 = vst [vmem:[#allocation2 + $0x84] sm:$0x1] %v511_v4  ;;  %v849_v21 = vsel %vm3679_vm13, %v844_v29, %v848_v60  ;;  %v138_v8 = vsel %vm106_vm10, %v90_v26, %v122_v51  ;;  %v931_v24 = vunpack.c.l.b16 %v835_v1  ;;  %v513_v60 = vld [vmem:[#allocation2 + $0x88] sm:$0xf]  ;;  %2129 = vmatpush.bf16.msrb.mxu3 %v3379_v2 }
  0x76   :  { %4801 = vst [vmem:[#allocation10_spill] sm:$0xff] %v4157_v25  ;;  %v154_v32 = vpack.c.bf16 %v138_v8, %v138_v8  ;;  %v139_v54 = vsel %vm107_vm12, %v91_v30, %v123_v52  ;;  %v4169_v15 = vunpack.c.l.b16 %v849_v21  ;;  %v516_v1 = vld [vmem:[#allocation2 + $0x8c] sm:$0x1] }
  0x77   :  { %4800 = vst [vmem:[#allocation9_spill] sm:$0xff] %v4153_v7  ;;  %v4163_v13 = vld [vmem:[#allocation2 + $0x78] sm:$0xf]  ;;  %v155_v46 = vpack.c.bf16 %v139_v54, %v139_v54  ;;  %v4182_v4 = vpack.c.b16 %v931_v24, %v4087_v49  ;;  %v519_v49 = vld [vmem:[#allocation2 + $0x90] sm:$0xf] }
  0x78   :  { %1326 = vmatmul.bf16.gmra.mxu2 %v4153_v7  ;;  %v851_v14 = vshrl.u32 %v4163_v13, 16  ;;  %v854_v12 = vshll.u32 %v4163_v13, 16  ;;  %v380_v9 = vshrl.u32 %v154_v32, 16  ;;  %v383_v38 = vshll.u32 %v154_v32, 16  ;;  %v4179_v30 = vld [vmem:[#allocation2 + $0x7c] sm:$0x1] }
  0x79   :  { %1375 = vmatmul.bf16.gmra.mxu3 %v4157_v25  ;;  %v388_v62 = vshrl.u32 %v155_v46, 16  ;;  %v391_v3 = vshll.u32 %v155_v46, 16  ;;  %v4189_v52 = vpack.c.b16 %v4169_v15, %v931_v24  ;;  %v3455_v25 = vld [vmem:[#allocation2 + $0x20] sm:$0xf] }
  0x7a   :  { %v853_v26 = vrot.slane %v851_v14, 4  ;;  %v856_v10 = vrot.slane %v854_v12, 5  ;;  %v382_v63 = vrot.slane %v380_v9, 7  ;;  %v860_v14 = vshll.u32 %v4179_v30, 16  ;;  %v522_v24 = vld [vmem:[#allocation2 + $0x94] sm:$0x1] }
  0x7b   :  { %v4177_v42 = vld [vmem:[#allocation2 + $0x80] sm:$0xf]  ;;  %v390_v8 = vrot.slane %v388_v62, 7  ;;  %v2891_v7 = vrot.slane %v3455_v25, 9 }
  0x7c   :  { %v4184_v6 = vld [vmem:[#allocation2 + $0x84] sm:$0x1]  ;;  %v865_v29 = vshrl.u32 %v4177_v42, 16  ;;  %v868_v51 = vshll.u32 %v4177_v42, 16  ;;  %v385_v21 = vor.u32 %v383_v38, %v382_v63  ;;  %v386_v32 = vrot.slane %v382_v63, 4 }
  0x7d   :  { %v857_v54 = vor.u32 %v856_v10, %v853_v26  ;;  %v874_v9 = vshll.u32 %v4184_v6, 16  ;;  %v393_v2 = vor.u32 %v391_v3, %v390_v8  ;;  %v594_v38 = vunpack.c.l.b16 %v4163_v13 }
  0x7e   :  { %v867_v12 = vrot.slane %v865_v29, 4  ;;  %v870_v46 = vrot.slane %v868_v51, 5  ;;  %v514_v19 = vsel %vm3658_vm11, %v385_v21, %v513_v60  ;;  %v517_v39 = vsel %vm3557_vm3, %v386_v32, %v516_v1  ;;  %v3339_v51 = vld [vmem:[%s4761_s1 + $0x100] sm:$0xff] }
  0x7f   :  { %515 = vst [vmem:[#allocation2 + $0x88] sm:$0xf] %v514_v19  ;;  %v394_v26 = vrot.slane %v390_v8, 4  ;;  %v595_v10 = vunpack.c.l.b16 %v4177_v42  ;;  %v520_v63 = vsel %vm3658_vm11, %v393_v2, %v519_v49  ;;  %v858_v60 = vrot.slane %v857_v54, 4  ;;  %v3347_v1 = vld [vmem:[%s4761_s1 + $0x140] sm:$0xff]  ;;  %1670 = vmatpush.bf16.msrb.mxu0 %v3339_v51  ;;  %v3394_v19 = vld [vmem:[%s4761_s1 + $0x2b8] sm:$0xff] }
  0x80   :  { %v871_v62 = vor.u32 %v870_v46, %v867_v12  ;;  %518 = vst [vmem:[#allocation2 + $0x8c] sm:$0x1] %v517_v39  ;;  %v862_v3 = vrot.slane %v860_v14, 5  ;;  %v876_v31 = vrot.slane %v874_v9, 5  ;;  %v4802_v39 = vunpack.c.l.b16 %v4120_v0  ;;  %1719 = vmatpush.bf16.msrb.mxu1 %v3347_v1  ;;  %v3402_v2 = vld [vmem:[%s4761_s1 + $0x2f8] sm:$0xff]  ;;  %2510 = vmatpush.bf16.msra.mxu2 %v3394_v19 }
  0x81   :  { %1132 = vmatmul.bf16.gmra.mxu0 %v4182_v4  ;;  %521 = vst [vmem:[#allocation2 + $0x90] sm:$0xf] %v520_v63  ;;  %v523_v29 = vsel %vm3557_vm3, %v394_v26, %v522_v24  ;;  %v4215_v32 = vpack.c.b16 %v595_v10, %v594_v38  ;;  %2559 = vmatpush.bf16.msra.mxu3 %v3402_v2  ;;  %vm1407_vm3 = vcmask 1042432  }
  0x82   :  { %1181 = vmatmul.bf16.gmra.mxu1 %v4189_v52  ;;  %v872_v21 = vrot.slane %v871_v62, 4  ;;  %524 = vst [vmem:[#allocation2 + $0x94] sm:$0x1] %v523_v29  ;;  %v4213_v8 = vpack.c.b16 %v594_v38, %v4802_v39  ;;  %v863_v22 = vsel %vm3679_vm13, %v858_v60, %v862_v3  ;;  %vm4285_vm11 = vmor %vm1407_vm3, %vm1408_vm4 }
  0x83   :  { %4804 = vst [vmem:[#allocation12_spill] sm:$0xff] %v4215_v32  ;;  %v933_v49 = vunpack.c.l.b16 %v863_v22 }
  0x84   :  { %4803 = vst [vmem:[#allocation11_spill] sm:$0xff] %v4213_v8  ;;  %v877_v54 = vsel %vm3679_vm13, %v872_v21, %v876_v31 }
  0x85   :  { %v934_v24 = vunpack.c.l.b16 %v877_v54  ;;  %v4242_v29 = vpack.c.b16 %v933_v49, %v4169_v15 }
  0x86   :  { %v4221_v14 = vld [vmem:[#allocation2 + $0x88] sm:$0xf] }
  0x87   :  { %v879_v12 = vshrl.u32 %v4221_v14, 16  ;;  %v882_v46 = vshll.u32 %v4221_v14, 16  ;;  %v4235_v26 = vld [vmem:[#allocation2 + $0x8c] sm:$0x1]  ;;  %v4244_v21 = vpack.c.b16 %v934_v24, %v933_v49 }
  0x88   :  { %1331 = vmatmul.bf16.gmra.mxu2 %v4213_v8  ;;  %v4227_v9 = vld [vmem:[#allocation2 + $0x90] sm:$0xf]  ;;  %v888_v39 = vshll.u32 %v4235_v26, 16 }
  0x89   :  { %1380 = vmatmul.bf16.gmra.mxu3 %v4215_v32  ;;  %v881_v38 = vrot.slane %v879_v12, 4  ;;  %v884_v62 = vrot.slane %v882_v46, 5  ;;  %v907_v63 = vshrl.u32 %v4227_v9, 16  ;;  %v910_v60 = vshll.u32 %v4227_v9, 16  ;;  %v4239_v3 = vld [vmem:[#allocation2 + $0x94] sm:$0x1] }
  0x8a   :  { %v916_v54 = vshll.u32 %v4239_v3, 16  ;;  %v596_v12 = vunpack.c.l.b16 %v4221_v14  ;;  %v4770_v46 = vunpack.c.l.b16 %v4227_v9  ;;  %v890_v19 = vrot.slane %v888_v39, 5  ;;  %v3393_v39 = vld [vmem:[%s4761_s1 + $0x2b0] sm:$0xff] }
  0x8b   :  { %v909_v51 = vrot.slane %v907_v63, 4  ;;  %v912_v1 = vrot.slane %v910_v60, 5  ;;  %v885_v31 = vor.u32 %v884_v62, %v881_v38  ;;  %v3362_v38 = vld [vmem:[%s4761_s1 + $0x1b8] sm:$0xff]  ;;  %2511 = vmatpush.bf16.msra.mxu2 %v3393_v39 }
  0x8c   :  { %v918_v63 = vrot.slane %v916_v54, 5  ;;  %v4252_v49 = vpack.c.b16 %v596_v12, %v595_v10  ;;  %v3370_v62 = vld [vmem:[%s4761_s1 + $0x1f8] sm:$0xff]  ;;  %v4262_v60 = vpack.c.b16 %v4770_v46, %v596_v12  ;;  %2267 = vmatpush.bf16.msra.mxu0 %v3362_v38  ;;  %v3449_v38 = vld [vmem:[#allocation2 + $0x8] sm:$0xf] }
  0x8d   :  { %v913_v22 = vor.u32 %v912_v1, %v909_v51  ;;  %v886_v15 = vrot.slane %v885_v31, 4  ;;  %2316 = vmatpush.bf16.msra.mxu1 %v3370_v62  ;;  %v2888_v62 = vrot.slane %v3449_v38, 9 }
  0x8e   :  { %4805 = vst [vmem:[#allocation13_spill] sm:$0xff] %v4252_v49 }
  0x8f   :  { %v914_v2 = vrot.slane %v913_v22, 4  ;;  %4806 = vst [vmem:[#allocation14_spill] sm:$0xff] %v4262_v60  ;;  %v891_v51 = vsel %vm3679_vm13, %v886_v15, %v890_v19  ;;  %v3401_v22 = vld [vmem:[%s4761_s1 + $0x2f0] sm:$0xff]  ;;  %v3447_v15 = vld [vmem:[#allocation2] sm:$0xf] }
  0x90   :  { %v935_v1 = vunpack.c.l.b16 %v891_v51  ;;  %2560 = vmatpush.bf16.msra.mxu3 %v3401_v22  ;;  %v2887_v19 = vrot.slane %v3447_v15, 9  ;;  %v3450_v51 = vld [vmem:[#allocation2 + $0xc] sm:$0x1]  ;;  %v3452_v22 = vld [vmem:[#allocation2 + $0x14] sm:$0x1] }
  0x91   :  { %1137 = vmatmul.bf16.gmra.mxu0 %v4242_v29  ;;  %v919_v10 = vsel %vm3679_vm13, %v914_v2, %v918_v63  ;;  %v3448_v2 = vld [vmem:[#allocation2 + $0x4] sm:$0x1]  ;;  %v1420_v46 = vrot.slane %v3452_v22, 5  ;;  %v3369_v15 = vld [vmem:[%s4761_s1 + $0x1f0] sm:$0xff] }
  0x92   :  { %1186 = vmatmul.bf16.gmra.mxu1 %v4244_v21  ;;  %v4270_v31 = vunpack.c.l.b16 %v919_v10  ;;  %v4278_v54 = vpack.c.b16 %v935_v1, %v934_v24  ;;  %v1412_v63 = vrot.slane %v3448_v2, 5  ;;  %v1416_v24 = vrot.slane %v3450_v51, 5 }
  0x93   :  { %2317 = vmatpush.bf16.msra.mxu1 %v3369_v15 }
  0x94   :  { %v4281_v12 = vpack.c.b16 %v4270_v31, %v935_v1  ;;  %v3451_v1 = vld [vmem:[#allocation2 + $0x10] sm:$0xf]  ;;  %v1413_v2 = vsel %vm4285_vm11, %v2887_v19, %v1412_v63  ;;  %v1417_v38 = vsel %vm4285_vm11, %v2888_v62, %v1416_v24  ;;  %v3392_v19 = vld [vmem:[%s4761_s1 + $0x2a8] sm:$0xff] }
  0x95   :  { %v2889_v39 = vrot.slane %v3451_v1, 9  ;;  %v1484_v1 = vunpack.c.l.b16 %v1413_v2  ;;  %v1485_v22 = vunpack.c.l.b16 %v1417_v38  ;;  %2512 = vmatpush.bf16.msra.mxu2 %v3392_v19  ;;  %v3454_v2 = vld [vmem:[#allocation2 + $0x1c] sm:$0x1]  ;;  %v3360_v19 = vld [vmem:[%s4761_s1 + $0x1a8] sm:$0xff] }
  0x96   :  { %v1424_v38 = vrot.slane %v3454_v2, 5 }
  0x97   :  { %v1421_v51 = vsel %vm4285_vm11, %v2889_v39, %v1420_v46  ;;  %v1500_v63 = vpack.c.b16 %v1485_v22, %v1484_v1  ;;  %v3453_v39 = vld [vmem:[#allocation2 + $0x18] sm:$0xf]  ;;  %v1428_v1 = vrot.slane %v3456_v56, 5 }
  0x98   :  { %1336 = vmatmul.bf16.gmra.mxu2 %v4252_v49  ;;  %v1486_v49 = vunpack.c.l.b16 %v1421_v51  ;;  %v2890_v15 = vrot.slane %v3453_v39, 9  ;;  %v4326_v39 = vld [vmem:[#allocation2 + $0x48] sm:$0xf] }
  0x99   :  { %1385 = vmatmul.bf16.gmra.mxu3 %v4262_v60  ;;  %v3361_v60 = vld [vmem:[%s4761_s1 + $0x1b0] sm:$0xff]  ;;  %v1429_v56 = vsel %vm4285_vm11, %v2891_v7, %v1428_v1  ;;  %4809 = vst [vmem:[#allocation15_spill] sm:$0xff] %v4326_v39  ;;  %v3399_v7 = vld [vmem:[%s4761_s1 + $0x2e0] sm:$0xff] }
  0x9a   :  { %2268 = vmatpush.bf16.msra.mxu0 %v3361_v60  ;;  %v3400_v60 = vld [vmem:[%s4761_s1 + $0x2e8] sm:$0xff]  ;;  %v4309_v46 = vpack.c.b16 %v1486_v49, %v1485_v22 }
  0x9b   :  { %2561 = vmatpush.bf16.msra.mxu3 %v3400_v60 }
  0x9e   :  { %2269 = vmatpush.bf16.msra.mxu0 %v3360_v19  ;;  %v1914_v19 = vshll.u32 %v4326_v39, 16 }
  0x9f   :  { %2562 = vmatpush.bf16.msra.mxu3 %v3399_v7 }
  0xa1   :  { %1142 = vmatmul.bf16.gmra.mxu0 %v4278_v54 }
  0xa2   :  { %1191 = vmatmul.bf16.gmra.mxu1 %v4281_v12 }
  0xa8   :  { %2081 = vmatmul.bf16.vlgmr.msrb.gmra.mxu2 %v3784_v43 }
  0xa9   :  { %2130 = vmatmul.bf16.vlgmr.msrb.gmra.mxu3 %v3821_v18 }
  0xab   :  { %v1302_v32 = vpop.f32.mrf.mxu2 }
  0xac   :  { %v1351_v8 = vpop.f32.mrf.mxu3 }
  0xae   :  { %v1108_v62 = vpop.f32.mrf.mxu0 }
  0xaf   :  { %v1157_v43 = vpop.f32.mrf.mxu1 }
  0xb0   :  { %v1158_v18 = vadd.f32 %v1157_v43, %v1108_v62 }
  0xb1   :  { %1671 = vmatmul.bf16.vlgmr.msrb.gmra.mxu0 %v1500_v63  ;;  %v1425_v63 = vsel %vm4285_vm11, %v2890_v15, %v1424_v38  ;;  %v3391_v38 = vld [vmem:[%s4761_s1 + $0x2a0] sm:$0xff] }
  0xb2   :  { %v1303_v24 = vadd.f32 %v1302_v32, %v1158_v18  ;;  %1720 = vmatmul.bf16.vlgmr.msrb.gmra.mxu1 %v4309_v46  ;;  %v3368_v32 = vld [vmem:[%s4761_s1 + $0x1e8] sm:$0xff]  ;;  %v1487_v62 = vunpack.c.l.b16 %v1425_v63  ;;  %v1488_v18 = vunpack.c.l.b16 %v1429_v56  ;;  %2513 = vmatpush.bf16.msra.mxu2 %v3391_v38 }
  0xb3   :  { %v1304_v51 = vpop.f32.mrf.mxu2  ;;  %2318 = vmatpush.bf16.msra.mxu1 %v3368_v32  ;;  %v4345_v38 = vld [vmem:[#allocation2 + $0x4c] sm:$0x1] }
  0xb4   :  { %v4312_v23 = vadd.f32 %v1351_v8, %v1303_v24  ;;  %v1353_v22 = vpop.f32.mrf.mxu3  ;;  %v4338_v1 = vpack.c.b16 %v1488_v18, %v1487_v62 }
  0xb6   :  { %v1110_v60 = vpop.f32.mrf.mxu0 }
  0xb7   :  { %v1159_v25 = vpop.f32.mrf.mxu1 }
  0xb8   :  { %v1160_v8 = vadd.f32 %v1159_v25, %v1110_v60  ;;  %2086 = vmatmul.bf16.gmra.mxu2 %v3831_v27  ;;  %v4336_v27 = vpack.c.b16 %v1487_v62, %v1486_v49  ;;  %v3457_v60 = vld [vmem:[#allocation2 + $0x28] sm:$0xf]  ;;  %v3458_v49 = vld [vmem:[#allocation2 + $0x2c] sm:$0x1]  ;;  %v1916_v62 = vrot.slane %v1914_v19, 5 }
  0xb9   :  { %2135 = vmatmul.bf16.gmra.mxu3 %v3916_v55  ;;  %v2892_v63 = vrot.slane %v3457_v60, 9  ;;  %v1432_v56 = vrot.slane %v3458_v49, 5 }
  0xba   :  { %v1305_v43 = vadd.f32 %v1304_v51, %v1160_v8  ;;  %v1911_v51 = vshrl.u32 %v4326_v39, 16  ;;  %v1436_v39 = vrot.slane %v3904_v40, 5  ;;  %v1920_v40 = vshll.u32 %v4345_v38, 16 }
  0xbb   :  { %v1307_v24 = vpop.f32.mrf.mxu2  ;;  %v1433_v19 = vsel %vm4285_vm11, %v2892_v63, %v1432_v56 }
  0xbc   :  { %v4328_v2 = vadd.f32 %v1353_v22, %v1305_v43  ;;  %v1356_v15 = vpop.f32.mrf.mxu3  ;;  %v1913_v8 = vrot.slane %v1911_v51, 4  ;;  %v1922_v33 = vrot.slane %v1920_v40, 5 }
  0xbe   :  { %v1113_v55 = vpop.f32.mrf.mxu0  ;;  %v1917_v37 = vor.u32 %v1916_v62, %v1913_v8  ;;  %v3390_v62 = vld [vmem:[%s4761_s1 + $0x298] sm:$0xff] }
  0xbf   :  { %v1162_v22 = vpop.f32.mrf.mxu1  ;;  %2514 = vmatpush.bf16.msra.mxu2 %v3390_v62 }
  0xc0   :  { %v1163_v32 = vadd.f32 %v1162_v22, %v1113_v55  ;;  %v3367_v22 = vld [vmem:[%s4761_s1 + $0x1e0] sm:$0xff] }
  0xc1   :  { %1676 = vmatmul.bf16.gmra.mxu0 %v4336_v27  ;;  %2319 = vmatpush.bf16.msra.mxu1 %v3367_v22 }
  0xc2   :  { %v1308_v25 = vadd.f32 %v1307_v24, %v1163_v32  ;;  %1725 = vmatmul.bf16.gmra.mxu1 %v4338_v1  ;;  %v3359_v24 = vld [vmem:[%s4761_s1 + $0x1a0] sm:$0xff]  ;;  %v1437_v32 = vsel %vm4285_vm11, %v2893_v48, %v1436_v39  ;;  %v3398_v48 = vld [vmem:[%s4761_s1 + $0x2d8] sm:$0xff] }
  0xc3   :  { %v1309_v43 = vpop.f32.mrf.mxu2  ;;  %2270 = vmatpush.bf16.msra.mxu0 %v3359_v24  ;;  %v1490_v61 = vunpack.c.l.b16 %v1437_v32  ;;  %2563 = vmatpush.bf16.msra.mxu3 %v3398_v48  ;;  %v1478_v32 = vrot.slane %v3938_v20, 5 }
  0xc4   :  { %v4347_v7 = vadd.f32 %v1356_v15, %v1308_v25  ;;  %v1358_v55 = vpop.f32.mrf.mxu3  ;;  %v1489_v25 = vunpack.c.l.b16 %v1433_v19  ;;  %v3460_v19 = vld [vmem:[#allocation2 + $0x38] sm:$0xf] }
  0xc6   :  { %4810 = vst [vmem:[#allocation16_spill] sm:$0xff] %v4347_v7  ;;  %v1115_v51 = vpop.f32.mrf.mxu0  ;;  %v1918_v7 = vrot.slane %v1917_v37, 4  ;;  %v4372_v39 = vpack.c.b16 %v1490_v61, %v1489_v25  ;;  %v2894_v37 = vrot.slane %v3460_v19, 9 }
  0xc7   :  { %v1164_v15 = vpop.f32.mrf.mxu1 }
  0xc8   :  { %v1165_v60 = vadd.f32 %v1164_v15, %v1115_v51  ;;  %2091 = vmatmul.bf16.gmra.mxu2 %v3950_v47  ;;  %v4370_v47 = vpack.c.b16 %v1489_v25, %v1488_v18  ;;  %v1440_v18 = vrot.slane %v3923_v5, 5  ;;  %v2903_v15 = vrot.slane %v3929_v17, 9  ;;  %v3366_v25 = vld [vmem:[%s4761_s1 + $0x1d8] sm:$0xff] }
  0xc9   :  { %2140 = vmatmul.bf16.gmra.mxu3 %v3995_v57  ;;  %2320 = vmatpush.bf16.msra.mxu1 %v3366_v25 }
  0xca   :  { %v1310_v49 = vadd.f32 %v1309_v43, %v1165_v60  ;;  %v1923_v43 = vsel %vm3679_vm13, %v1918_v7, %v1922_v33  ;;  %v3358_v60 = vld [vmem:[%s4761_s1 + $0x198] sm:$0xff]  ;;  %v1441_v5 = vsel %vm4285_vm11, %v2894_v37, %v1440_v18 }
  0xcb   :  { %v1312_v63 = vpop.f32.mrf.mxu2  ;;  %v1938_v22 = vunpack.c.l.b16 %v1923_v43  ;;  %2271 = vmatpush.bf16.msra.mxu0 %v3358_v60  ;;  %v1491_v48 = vunpack.c.l.b16 %v1441_v5  ;;  %v3462_v60 = vld [vmem:[#allocation2 + $0x54] sm:$0x1]  ;;  %v2897_v5 = vrot.slane %v4033_v11, 9 }
  0xcc   :  { %v4362_v56 = vadd.f32 %v1358_v55, %v1310_v49  ;;  %v1361_v8 = vpop.f32.mrf.mxu3  ;;  %v1444_v25 = vrot.slane %v3462_v60, 5  ;;  %v3388_v60 = vld [vmem:[%s4761_s1 + $0x288] sm:$0xff] }
  0xcd   :  { %v1940_v49 = vpack.c.b16 %v1938_v22, %v3986_v41  ;;  %v3389_v22 = vld [vmem:[%s4761_s1 + $0x290] sm:$0xff]  ;;  %v4406_v19 = vpack.c.b16 %v1491_v48, %v1490_v61  ;;  %v2896_v61 = vrot.slane %v3988_v45, 9 }
  0xce   :  { %v1118_v57 = vpop.f32.mrf.mxu0  ;;  %2515 = vmatpush.bf16.msra.mxu2 %v3389_v22 }
  0xcf   :  { %v1167_v55 = vpop.f32.mrf.mxu1 }
  0xd0   :  { %v1168_v24 = vadd.f32 %v1167_v55, %v1118_v57 }
  0xd1   :  { %1681 = vmatmul.bf16.gmra.mxu0 %v4370_v47 }
  0xd2   :  { %v1313_v51 = vadd.f32 %v1312_v63, %v1168_v24  ;;  %1730 = vmatmul.bf16.gmra.mxu1 %v4372_v39  ;;  %2516 = vmatpush.bf16.msra.mxu2 %v3388_v60 }
  0xd3   :  { %v1314_v40 = vpop.f32.mrf.mxu2 }
  0xd4   :  { %v4381_v33 = vadd.f32 %v1361_v8, %v1313_v51  ;;  %v1363_v7 = vpop.f32.mrf.mxu3  ;;  %v4394_v8 = vsel %vm4285_vm11, %v2903_v15, %v1478_v32  ;;  %v3397_v51 = vld [vmem:[%s4761_s1 + $0x2d0] sm:$0xff] }
  0xd5   :  { %v1516_v43 = vunpack.c.l.b16 %v4394_v8  ;;  %2564 = vmatpush.bf16.msra.mxu3 %v3397_v51  ;;  %v3461_v15 = vld [vmem:[#allocation2 + $0x50] sm:$0xf] }
  0xd6   :  { %v1120_v63 = vpop.f32.mrf.mxu0  ;;  %v2895_v32 = vrot.slane %v3461_v15, 9 }
  0xd7   :  { %v1169_v20 = vpop.f32.mrf.mxu1  ;;  %v4410_v37 = vpack.c.b16 %v1516_v43, %v1491_v48 }
  0xd8   :  { %v1170_v62 = vadd.f32 %v1169_v20, %v1120_v63  ;;  %2096 = vmatmul.bf16.gmra.mxu2 %v3998_v59  ;;  %v1452_v20 = vrot.slane %v4036_v34, 5  ;;  %v1445_v45 = vsel %vm4285_vm11, %v2895_v32, %v1444_v25  ;;  %v3396_v25 = vld [vmem:[%s4761_s1 + $0x2c8] sm:$0xff] }
  0xd9   :  { %2145 = vmatmul.bf16.gmra.mxu3 %v1940_v49  ;;  %v1448_v49 = vrot.slane %v4013_v53, 5  ;;  %v1492_v51 = vunpack.c.l.b16 %v1445_v45 }
  0xda   :  { %v1315_v57 = vadd.f32 %v1314_v40, %v1170_v62  ;;  %v1453_v34 = vsel %vm4285_vm11, %v2897_v5, %v1452_v20  ;;  %2565 = vmatpush.bf16.msra.mxu3 %v3396_v25  ;;  %v2898_v20 = vrot.slane %v4110_v35, 9 }
  0xdb   :  { %v1317_v41 = vpop.f32.mrf.mxu2  ;;  %v1449_v53 = vsel %vm4285_vm11, %v2896_v61, %v1448_v49 }
  0xdc   :  { %v4398_v55 = vadd.f32 %v1363_v7, %v1315_v57  ;;  %v1366_v24 = vpop.f32.mrf.mxu3  ;;  %v3357_v57 = vld [vmem:[%s4761_s1 + $0x190] sm:$0xff] }
  0xdd   :  { %2272 = vmatpush.bf16.msra.mxu0 %v3357_v57 }
  0xde   :  { %v1123_v59 = vpop.f32.mrf.mxu0 }
  0xdf   :  { %v1172_v18 = vpop.f32.mrf.mxu1 }
  0xe0   :  { %v1173_v40 = vadd.f32 %v1172_v18, %v1123_v59  ;;  %v1493_v59 = vunpack.c.l.b16 %v1449_v53 }
  0xe1   :  { %1686 = vmatmul.bf16.gmra.mxu0 %v4406_v19 }
  0xe2   :  { %v1318_v7 = vadd.f32 %v1317_v41, %v1173_v40  ;;  %1735 = vmatmul.bf16.gmra.mxu1 %v4410_v37  ;;  %v3365_v41 = vld [vmem:[%s4761_s1 + $0x1d0] sm:$0xff]  ;;  %v1494_v40 = vunpack.c.l.b16 %v1453_v34  ;;  %v1504_v61 = vpack.c.b16 %v1493_v59, %v1492_v51  ;;  %v3364_v34 = vld [vmem:[%s4761_s1 + $0x1c8] sm:$0xff] }
  0xe3   :  { %v1319_v63 = vpop.f32.mrf.mxu2  ;;  %2321 = vmatpush.bf16.msra.mxu1 %v3365_v41  ;;  %v2899_v41 = vrot.slane %v4120_v0, 9 }
  0xe4   :  { %v4418_v62 = vadd.f32 %v1366_v24, %v1318_v7  ;;  %v1368_v48 = vpop.f32.mrf.mxu3  ;;  %v4442_v49 = vpack.c.b16 %v1494_v40, %v1493_v59 }
  0xe6   :  { %v1125_v22 = vpop.f32.mrf.mxu0 }
  0xe7   :  { %v1174_v11 = vpop.f32.mrf.mxu1  ;;  %2322 = vmatpush.bf16.msra.mxu1 %v3364_v34  ;;  %v2901_v34 = vrot.slane %v4177_v42, 9 }
  0xe8   :  { %v1175_v24 = vadd.f32 %v1174_v11, %v1125_v22  ;;  %2101 = vmatmul.bf16.gmra.mxu2 %v4108_v16  ;;  %v1460_v22 = vrot.slane %v4123_v36, 5  ;;  %v3356_v11 = vld [vmem:[%s4761_s1 + $0x188] sm:$0xff] }
  0xe9   :  { %2150 = vmatmul.bf16.gmra.mxu3 %v4182_v4  ;;  %2273 = vmatpush.bf16.msra.mxu0 %v3356_v11 }
  0xea   :  { %v1320_v18 = vadd.f32 %v1319_v63, %v1175_v24  ;;  %v1461_v0 = vsel %vm4285_vm11, %v2899_v41, %v1460_v22 }
  0xeb   :  { %v1322_v15 = vpop.f32.mrf.mxu2 }
  0xec   :  { %v4434_v32 = vadd.f32 %v1368_v48, %v1320_v18  ;;  %v1371_v7 = vpop.f32.mrf.mxu3  ;;  %v1456_v48 = vrot.slane %v4114_v50, 5  ;;  %v1496_v18 = vunpack.c.l.b16 %v1461_v0 }
  0xee   :  { %v1128_v16 = vpop.f32.mrf.mxu0  ;;  %v1457_v35 = vsel %vm4285_vm11, %v2898_v20, %v1456_v48 }
  0xef   :  { %v1177_v4 = vpop.f32.mrf.mxu1  ;;  %v1495_v51 = vunpack.c.l.b16 %v1457_v35  ;;  %v4485_v35 = vld [vmem:[#allocation2 + $0x9c] sm:$0x1] }
  0xf0   :  { %v1178_v63 = vadd.f32 %v1177_v4, %v1128_v16  ;;  %v3395_v16 = vld [vmem:[%s4761_s1 + $0x2c0] sm:$0xff] }
  0xf1   :  { %1691 = vmatmul.bf16.gmra.mxu0 %v1504_v61  ;;  %v3387_v61 = vld [vmem:[%s4761_s1 + $0x280] sm:$0xff]  ;;  %v4475_v4 = vpack.c.b16 %v1496_v18, %v1495_v51  ;;  %2566 = vmatpush.bf16.msra.mxu3 %v3395_v16 }
  0xf2   :  { %v1323_v5 = vadd.f32 %v1322_v15, %v1178_v63  ;;  %1740 = vmatmul.bf16.gmra.mxu1 %v4442_v49  ;;  %2517 = vmatpush.bf16.msra.mxu2 %v3387_v61 }
  0xf3   :  { %v1324_v57 = vpop.f32.mrf.mxu2 }
  0xf4   :  { %v4449_v45 = vadd.f32 %v1371_v7, %v1323_v5  ;;  %v1373_v53 = vpop.f32.mrf.mxu3  ;;  %v4463_v7 = vld [vmem:[#allocation2 + $0x98] sm:$0xf] }
  0xf5   :  { %v1925_v63 = vshrl.u32 %v4463_v7, 16  ;;  %v1928_v5 = vshll.u32 %v4463_v7, 16 }
  0xf6   :  { %v1130_v24 = vpop.f32.mrf.mxu0 }
  0xf7   :  { %v1179_v50 = vpop.f32.mrf.mxu1  ;;  %v1927_v22 = vrot.slane %v1925_v63, 4 }
  0xf8   :  { %v1180_v36 = vadd.f32 %v1179_v50, %v1130_v24  ;;  %2106 = vmatmul.bf16.gmra.mxu2 %v4189_v52  ;;  %v4473_v52 = vpack.c.b16 %v1495_v51, %v1494_v40  ;;  %v1464_v40 = vrot.slane %v4179_v30, 5  ;;  %v1468_v24 = vrot.slane %v4184_v6, 5  ;;  %v3363_v30 = vld [vmem:[%s4761_s1 + $0x1c0] sm:$0xff] }
  0xf9   :  { %2155 = vmatmul.bf16.gmra.mxu3 %v4242_v29  ;;  %v1934_v6 = vshll.u32 %v4485_v35, 16  ;;  %2323 = vmatpush.bf16.msra.mxu1 %v3363_v30  ;;  %v1482_v30 = vrot.slane %v4239_v3, 5 }
  0xfa   :  { %v1325_v59 = vadd.f32 %v1324_v57, %v1180_v36  ;;  %v2900_v57 = vrot.slane %v4163_v13, 9  ;;  %v3355_v13 = vld [vmem:[%s4761_s1 + $0x180] sm:$0xff] }
  0xfb   :  { %v1327_v15 = vpop.f32.mrf.mxu2  ;;  %2274 = vmatpush.bf16.msra.mxu0 %v3355_v13  ;;  %v2904_v13 = vrot.slane %v4227_v9, 9 }
  0xfc   :  { %v4465_v60 = vadd.f32 %v1373_v53, %v1325_v59  ;;  %v1376_v25 = vpop.f32.mrf.mxu3  ;;  %v1930_v53 = vrot.slane %v1928_v5, 5  ;;  %v1465_v51 = vsel %vm4285_vm11, %v2900_v57, %v1464_v40  ;;  %v1936_v5 = vrot.slane %v1934_v6, 5 }
  0xfd   :  { %v1497_v61 = vunpack.c.l.b16 %v1465_v51 }
  0xfe   :  { %v1133_v29 = vpop.f32.mrf.mxu0  ;;  %v1931_v42 = vor.u32 %v1930_v53, %v1927_v22 }
  0xff   :  { %v1182_v20 = vpop.f32.mrf.mxu1 }
 0x100   :  { %v1183_v48 = vadd.f32 %v1182_v20, %v1133_v29  ;;  %v1932_v63 = vrot.slane %v1931_v42, 4 }
 0x101   :  { %1696 = vmatmul.bf16.gmra.mxu0 %v4473_v52 }
 0x102   :  { %v1328_v41 = vadd.f32 %v1327_v15, %v1183_v48  ;;  %1745 = vmatmul.bf16.gmra.mxu1 %v4475_v4  ;;  %v1469_v15 = vsel %vm4285_vm11, %v2901_v34, %v1468_v24  ;;  %v1937_v53 = vsel %vm3679_vm13, %v1932_v63, %v1936_v5  ;;  %v2902_v24 = vrot.slane %v4221_v14, 9 }
 0x103   :  { %v1329_v11 = vpop.f32.mrf.mxu2  ;;  %v1498_v29 = vunpack.c.l.b16 %v1469_v15  ;;  %v4523_v14 = vsel %vm4285_vm11, %v2904_v13, %v1482_v30 }
 0x104   :  { %v4487_v50 = vadd.f32 %v1376_v25, %v1328_v41  ;;  %v1378_v0 = vpop.f32.mrf.mxu3  ;;  %v4504_v41 = vpack.c.b16 %v1497_v61, %v1496_v18 }
 0x105   :  { %v4506_v22 = vpack.c.b16 %v1498_v29, %v1497_v61 }
 0x106   :  { %v1135_v36 = vpop.f32.mrf.mxu0 }
 0x107   :  { %v1184_v59 = vpop.f32.mrf.mxu1 }
 0x108   :  { %v1185_v25 = vadd.f32 %v1184_v59, %v1135_v36  ;;  %2111 = vmatmul.bf16.gmra.mxu2 %v4244_v21 }
 0x109   :  { %2160 = vmatmul.bf16.gmra.mxu3 %v4278_v54  ;;  %v1939_v54 = vunpack.c.l.b16 %v1937_v53 }
 0x10a   :  { %v1330_v16 = vadd.f32 %v1329_v11, %v1185_v25  ;;  %v1517_v25 = vunpack.c.l.b16 %v4523_v14 }
 0x10b   :  { %v1332_v20 = vpop.f32.mrf.mxu2  ;;  %v1941_v51 = vpack.c.b16 %v1939_v54, %v4270_v31 }
 0x10c   :  { %v4502_v48 = vadd.f32 %v1378_v0, %v1330_v16  ;;  %v1381_v57 = vpop.f32.mrf.mxu3  ;;  %v1472_v0 = vrot.slane %v4235_v26, 5 }
 0x10e   :  { %v1138_v40 = vpop.f32.mrf.mxu0  ;;  %v1473_v6 = vsel %vm4285_vm11, %v2902_v24, %v1472_v0 }
 0x10f   :  { %v1187_v21 = vpop.f32.mrf.mxu1  ;;  %v1499_v15 = vunpack.c.l.b16 %v1473_v6 }
 0x110   :  { %v1188_v34 = vadd.f32 %v1187_v21, %v1138_v40 }
 0x111   :  { %1701 = vmatmul.bf16.gmra.mxu0 %v4504_v41  ;;  %v4529_v63 = vpack.c.b16 %v1499_v15, %v1498_v29 }
 0x112   :  { %v1333_v11 = vadd.f32 %v1332_v20, %v1188_v34  ;;  %1750 = vmatmul.bf16.gmra.mxu1 %v4506_v22  ;;  %v4533_v20 = vpack.c.b16 %v1517_v25, %v1499_v15 }
 0x113   :  { %v1334_v18 = vpop.f32.mrf.mxu2 }
 0x114   :  { %v4516_v36 = vadd.f32 %v1381_v57, %v1333_v11  ;;  %v1383_v44 = vpop.f32.mrf.mxu3 }
 0x116   :  { %v1140_v42 = vpop.f32.mrf.mxu0 }
 0x117   :  { %v1189_v59 = vpop.f32.mrf.mxu1 }
 0x118   :  { %v1190_v26 = vadd.f32 %v1189_v59, %v1140_v42  ;;  %2116 = vmatmul.bf16.gmra.mxu2 %v4281_v12 }
 0x119   :  { %2165 = vmatmul.bf16.gmra.mxu3 %v1941_v51 }
 0x11a   :  { %v1335_v3 = vadd.f32 %v1334_v18, %v1190_v26 }
 0x11b   :  { %v1337_v61 = vpop.f32.mrf.mxu2 }
 0x11c   :  { %v4527_v16 = vadd.f32 %v1383_v44, %v1335_v3  ;;  %v1386_v31 = vpop.f32.mrf.mxu3 }
 0x11e   :  { %v1143_v5 = vpop.f32.mrf.mxu0 }
 0x11f   :  { %v1192_v57 = vpop.f32.mrf.mxu1 }
 0x120   :  { %v1193_v40 = vadd.f32 %v1192_v57, %v1143_v5 }
 0x121   :  { %1706 = vmatmul.bf16.gmra.mxu0 %v4529_v63 }
 0x122   :  { %v1338_v12 = vadd.f32 %v1337_v61, %v1193_v40  ;;  %1755 = vmatmul.bf16.gmra.mxu1 %v4533_v20 }
 0x123   :  { %v1339_v53 = vpop.f32.mrf.mxu2 }
 0x124   :  { %v4537_v21 = vadd.f32 %v1386_v31, %v1338_v12  ;;  %v1388_v34 = vpop.f32.mrf.mxu3 }
 0x126   :  { %v1145_v54 = vpop.f32.mrf.mxu0 }
 0x127   :  { %v1194_v11 = vpop.f32.mrf.mxu1 }
 0x128   :  { %v1195_v29 = vadd.f32 %v1194_v11, %v1145_v54  ;;  %2518 = vmatmul.bf16.vlgmr.msra.gmra.mxu2 %v4309_v46  ;;  %v4811_v11 = vld [vmem:[#allocation3_spill] sm:$0xff] }
 0x129   :  { %2567 = vmatmul.bf16.vlgmr.msra.gmra.mxu3 %v4336_v27 }
 0x12a   :  { %v1340_v24 = vadd.f32 %v1339_v53, %v1195_v29  ;;  %v4813_v29 = vld [vmem:[#allocation4_spill] sm:$0xff] }
 0x12b   :  { %v2082_v0 = vpop.f32.mrf.mxu2 }
 0x12c   :  { %v4541_v18 = vadd.f32 %v1388_v34, %v1340_v24  ;;  %v2131_v13 = vpop.f32.mrf.mxu3 }
 0x12d   :  { %v4543_v30 = vadd.f32 %v2131_v13, %v2082_v0 }
 0x12e   :  { %v1672_v44 = vpop.f32.mrf.mxu0 }
 0x12f   :  { %v1721_v51 = vpop.f32.mrf.mxu1 }
 0x130   :  { %v1722_v42 = vadd.f32 %v1721_v51, %v1672_v44 }
 0x131   :  { %2275 = vmatmul.bf16.vlgmr.msra.gmra.mxu0 %v3748_v58 }
 0x132   :  { %v1761_v6 = vadd.f32 %v1722_v42, %v4312_v23  ;;  %2324 = vmatmul.bf16.vlgmr.msra.gmra.mxu1 %v3777_v28 }
 0x133   :  { %v2084_v59 = vpop.f32.mrf.mxu2 }
 0x134   :  { %v1777_v46 = vpack.c.bf16 %v1761_v6, %v1761_v6  ;;  %v2133_v26 = vpop.f32.mrf.mxu3  ;;  %v1831_v28 = vmul.f32 %v1761_v6, %v1761_v6 }
 0x135   :  { %v4548_v27 = vadd.f32 %v2133_v26, %v2084_v59 }
 0x136   :  { %1793 = vst [vmem:[%s4765_s4] sm:$0xf] %v1777_v46  ;;  %v1674_v15 = vpop.f32.mrf.mxu0 }
 0x137   :  { %v1723_v3 = vpop.f32.mrf.mxu1 }
 0x138   :  { %v1724_v61 = vadd.f32 %v1723_v3, %v1674_v15  ;;  %2523 = vmatmul.bf16.gmra.mxu2 %v4338_v1  ;;  %v4814_v3 = vld [vmem:[#allocation15_spill] sm:$0xff] }
 0x139   :  { %2572 = vmatmul.bf16.gmra.mxu3 %v4370_v47  ;;  %v4812_v47 = vld [vmem:[#allocation16_spill] sm:$0xff] }
 0x13a   :  { %v1762_v58 = vadd.f32 %v1724_v61, %v4328_v2  ;;  %v3193_v61 = vrot.slane %v4814_v3, 9 }
 0x13b   :  { %v2087_v23 = vpop.f32.mrf.mxu2 }
 0x13c   :  { %v1778_v31 = vpack.c.bf16 %v1762_v58, %v1762_v58  ;;  %v1809_v5 = vadd.f32 %v1762_v58, %v1761_v6  ;;  %v1832_v57 = vmul.f32 %v1762_v58, %v1762_v58  ;;  %v2136_v40 = vpop.f32.mrf.mxu3  ;;  %v2369_v58 = vrot.slane %v4345_v38, 5 }
 0x13d   :  { %v4556_v12 = vadd.f32 %v2136_v40, %v2087_v23 }
 0x13e   :  { %1794 = vst [vmem:[%s4765_s4 + $0x8] sm:$0xf] %v1778_v31  ;;  %v1847_v53 = vadd.f32 %v1832_v57, %v1831_v28  ;;  %v1677_v34 = vpop.f32.mrf.mxu0 }
 0x13f   :  { %v1726_v54 = vpop.f32.mrf.mxu1 }
 0x140   :  { %v1727_v1 = vadd.f32 %v1726_v54, %v1677_v34  ;;  %v4815_v54 = vld [vmem:[#allocation5_spill] sm:$0xff] }
 0x141   :  { %2280 = vmatmul.bf16.gmra.mxu0 %v4811_v11  ;;  %v4816_v11 = vld [vmem:[#allocation6_spill] sm:$0xff] }
 0x142   :  { %v1763_v2 = vadd.f32 %v1727_v1, %v4812_v47  ;;  %2329 = vmatmul.bf16.gmra.mxu1 %v4813_v29 }
 0x143   :  { %v2089_v24 = vpop.f32.mrf.mxu2 }
 0x144   :  { %v1779_v0 = vpack.c.bf16 %v1763_v2, %v1763_v2  ;;  %v1810_v13 = vadd.f32 %v1809_v5, %v1763_v2  ;;  %v1833_v44 = vmul.f32 %v1763_v2, %v1763_v2  ;;  %v2138_v51 = vpop.f32.mrf.mxu3 }
 0x145   :  { %v4564_v42 = vadd.f32 %v2138_v51, %v2089_v24 }
 0x146   :  { %1795 = vst [vmem:[%s4765_s4 + $0x10] sm:$0xf] %v1779_v0  ;;  %v1848_v6 = vadd.f32 %v1847_v53, %v1833_v44  ;;  %v1679_v59 = vpop.f32.mrf.mxu0 }
 0x147   :  { %v1728_v46 = vpop.f32.mrf.mxu1 }
 0x148   :  { %v1729_v26 = vadd.f32 %v1728_v46, %v1679_v59  ;;  %2528 = vmatmul.bf16.gmra.mxu2 %v4372_v39 }
 0x149   :  { %2577 = vmatmul.bf16.gmra.mxu3 %v4406_v19 }
 0x14a   :  { %v1764_v15 = vadd.f32 %v1729_v26, %v4362_v56  ;;  %v2370_v56 = vsel %vm4285_vm11, %v3193_v61, %v2369_v58  ;;  %v1871_v26 = vunpack.c.l.b16 %v4814_v3 }
 0x14b   :  { %v2092_v23 = vpop.f32.mrf.mxu2  ;;  %v2375_v38 = vunpack.c.l.b16 %v2370_v56 }
 0x14c   :  { %v1780_v28 = vpack.c.bf16 %v1764_v15, %v1764_v15  ;;  %v1811_v31 = vadd.f32 %v1810_v13, %v1764_v15  ;;  %v1834_v5 = vmul.f32 %v1764_v15, %v1764_v15  ;;  %v2141_v57 = vpop.f32.mrf.mxu3 }
 0x14d   :  { %v4574_v40 = vadd.f32 %v2141_v57, %v2092_v23  ;;  %v2377_v44 = vpack.c.b16 %v2375_v38, %v1516_v43 }
 0x14e   :  { %1796 = vst [vmem:[%s4765_s4 + $0x18] sm:$0xf] %v1780_v28  ;;  %v1849_v39 = vadd.f32 %v1848_v6, %v1834_v5  ;;  %v1682_v53 = vpop.f32.mrf.mxu0 }
 0x14f   :  { %v1731_v19 = vpop.f32.mrf.mxu1 }
 0x150   :  { %v1732_v34 = vadd.f32 %v1731_v19, %v1682_v53 }
 0x151   :  { %2285 = vmatmul.bf16.gmra.mxu0 %v4815_v54 }
 0x152   :  { %v1765_v1 = vadd.f32 %v1732_v34, %v4381_v33  ;;  %2334 = vmatmul.bf16.gmra.mxu1 %v4816_v11 }
 0x153   :  { %v2094_v47 = vpop.f32.mrf.mxu2 }
 0x154   :  { %v1781_v2 = vpack.c.bf16 %v1765_v1, %v1765_v1  ;;  %v1812_v29 = vadd.f32 %v1811_v31, %v1765_v1  ;;  %v1835_v24 = vmul.f32 %v1765_v1, %v1765_v1  ;;  %v2143_v0 = vpop.f32.mrf.mxu3 }
 0x155   :  { %v4584_v13 = vadd.f32 %v2143_v0, %v2094_v47 }
 0x156   :  { %1797 = vst [vmem:[%s4765_s4 + $0x20] sm:$0xf] %v1781_v2  ;;  %v1850_v51 = vadd.f32 %v1849_v39, %v1835_v24  ;;  %v1684_v6 = vpop.f32.mrf.mxu0  ;;  %v4818_v39 = vld [vmem:[#allocation7_spill] sm:$0xff] }
 0x157   :  { %v1733_v59 = vpop.f32.mrf.mxu1 }
 0x158   :  { %v1734_v33 = vadd.f32 %v1733_v59, %v1684_v6  ;;  %2533 = vmatmul.bf16.gmra.mxu2 %v4410_v37  ;;  %v4817_v37 = vunpack.c.l.b16 %v3929_v17 }
 0x159   :  { %2582 = vmatmul.bf16.gmra.mxu3 %v2377_v44 }
 0x15a   :  { %v1766_v46 = vadd.f32 %v1734_v33, %v4398_v55  ;;  %v1873_v5 = vpack.c.b16 %v1871_v26, %v4817_v37 }
 0x15b   :  { %v2097_v15 = vpop.f32.mrf.mxu2 }
 0x15c   :  { %v1782_v61 = vpack.c.bf16 %v1766_v46, %v1766_v46  ;;  %v1813_v58 = vadd.f32 %v1812_v29, %v1766_v46  ;;  %v1836_v8 = vmul.f32 %v1766_v46, %v1766_v46  ;;  %v2146_v43 = vpop.f32.mrf.mxu3 }
 0x15d   :  { %v4594_v23 = vadd.f32 %v2146_v43, %v2097_v15 }
 0x15e   :  { %1798 = vst [vmem:[%s4765_s4 + $0x28] sm:$0xf] %v1782_v61  ;;  %v1851_v28 = vadd.f32 %v1850_v51, %v1836_v8  ;;  %v1687_v31 = vpop.f32.mrf.mxu0 }
 0x15f   :  { %v1736_v57 = vpop.f32.mrf.mxu1 }
 0x160   :  { %v1737_v55 = vadd.f32 %v1736_v57, %v1687_v31 }
 0x161   :  { %2290 = vmatmul.bf16.gmra.mxu0 %v4818_v39 }
 0x162   :  { %v1767_v3 = vadd.f32 %v1737_v55, %v4418_v62  ;;  %2339 = vmatmul.bf16.gmra.mxu1 %v1873_v5 }
 0x163   :  { %v2099_v53 = vpop.f32.mrf.mxu2 }
 0x164   :  { %v1783_v56 = vpack.c.bf16 %v1767_v3, %v1767_v3  ;;  %v1814_v19 = vadd.f32 %v1813_v58, %v1767_v3  ;;  %v1837_v34 = vmul.f32 %v1767_v3, %v1767_v3  ;;  %v2148_v54 = vpop.f32.mrf.mxu3 }
 0x165   :  { %v4603_v38 = vadd.f32 %v2148_v54, %v2099_v53 }
 0x166   :  { %1799 = vst [vmem:[%s4765_s4 + $0x30] sm:$0xf] %v1783_v56  ;;  %v1852_v17 = vadd.f32 %v1851_v28, %v1837_v34  ;;  %v1689_v1 = vpop.f32.mrf.mxu0 }
 0x167   :  { %v1738_v11 = vpop.f32.mrf.mxu1 }
 0x168   :  { %v1739_v47 = vadd.f32 %v1738_v11, %v1689_v1  ;;  %2538 = vmatmul.bf16.gmra.mxu2 %v4442_v49  ;;  %v4819_v49 = vld [vmem:[#allocation8_spill] sm:$0xff] }
 0x169   :  { %2587 = vmatmul.bf16.gmra.mxu3 %v4473_v52 }
 0x16a   :  { %v1768_v62 = vadd.f32 %v1739_v47, %v4434_v32  ;;  %v4820_v32 = vld [vmem:[#allocation9_spill] sm:$0xff] }
 0x16b   :  { %v2102_v2 = vpop.f32.mrf.mxu2 }
 0x16c   :  { %v1784_v29 = vpack.c.bf16 %v1768_v62, %v1768_v62  ;;  %v1815_v24 = vadd.f32 %v1814_v19, %v1768_v62  ;;  %v1838_v0 = vmul.f32 %v1768_v62, %v1768_v62  ;;  %v2151_v44 = vpop.f32.mrf.mxu3 }
 0x16d   :  { %v4611_v51 = vadd.f32 %v2151_v44, %v2102_v2 }
 0x16e   :  { %1800 = vst [vmem:[%s4765_s4 + $0x38] sm:$0xf] %v1784_v29  ;;  %v1853_v6 = vadd.f32 %v1852_v17, %v1838_v0  ;;  %v1692_v59 = vpop.f32.mrf.mxu0 }
 0x16f   :  { %v1741_v33 = vpop.f32.mrf.mxu1 }
 0x170   :  { %v1742_v46 = vadd.f32 %v1741_v33, %v1692_v59  ;;  %v3194_v59 = vrot.slane %v4463_v7, 9  ;;  %v2373_v33 = vrot.slane %v4485_v35, 5 }
 0x171   :  { %2295 = vmatmul.bf16.gmra.mxu0 %v4819_v49 }
 0x172   :  { %v1769_v52 = vadd.f32 %v1742_v46, %v4449_v45  ;;  %2344 = vmatmul.bf16.gmra.mxu1 %v4820_v32 }
 0x173   :  { %v2104_v26 = vpop.f32.mrf.mxu2 }
 0x174   :  { %v1785_v15 = vpack.c.bf16 %v1769_v52, %v1769_v52  ;;  %v1816_v61 = vadd.f32 %v1815_v24, %v1769_v52  ;;  %v1839_v58 = vmul.f32 %v1769_v52, %v1769_v52  ;;  %v2153_v8 = vpop.f32.mrf.mxu3 }
 0x175   :  { %v4619_v43 = vadd.f32 %v2153_v8, %v2104_v26  ;;  %v4823_v8 = vld [vmem:[#allocation12_spill] sm:$0xff] }
 0x176   :  { %1801 = vst [vmem:[%s4765_s4 + $0x40] sm:$0xf] %v1785_v15  ;;  %v1854_v28 = vadd.f32 %v1853_v6, %v1839_v58  ;;  %v1694_v31 = vpop.f32.mrf.mxu0 }
 0x177   :  { %v1743_v37 = vpop.f32.mrf.mxu1 }
 0x178   :  { %v1744_v5 = vadd.f32 %v1743_v37, %v1694_v31  ;;  %2543 = vmatmul.bf16.gmra.mxu2 %v4475_v4  ;;  %v4821_v4 = vld [vmem:[#allocation10_spill] sm:$0xff]  ;;  %v4824_v31 = vld [vmem:[#allocation13_spill] sm:$0xff] }
 0x179   :  { %2592 = vmatmul.bf16.gmra.mxu3 %v4504_v41 }
 0x17a   :  { %v1770_v45 = vadd.f32 %v1744_v5, %v4465_v60  ;;  %v4822_v60 = vld [vmem:[#allocation11_spill] sm:$0xff] }
 0x17b   :  { %v2107_v57 = vpop.f32.mrf.mxu2 }
 0x17c   :  { %v1786_v55 = vpack.c.bf16 %v1770_v45, %v1770_v45  ;;  %v1817_v39 = vadd.f32 %v1816_v61, %v1770_v45  ;;  %v1840_v3 = vmul.f32 %v1770_v45, %v1770_v45  ;;  %v2156_v53 = vpop.f32.mrf.mxu3 }
 0x17d   :  { %v4627_v56 = vadd.f32 %v2156_v53, %v2107_v57 }
 0x17e   :  { %1802 = vst [vmem:[%s4765_s4 + $0x48] sm:$0xf] %v1786_v55  ;;  %v1855_v19 = vadd.f32 %v1854_v28, %v1840_v3  ;;  %v1697_v34 = vpop.f32.mrf.mxu0 }
 0x17f   :  { %v1746_v54 = vpop.f32.mrf.mxu1 }
 0x180   :  { %v1747_v17 = vadd.f32 %v1746_v54, %v1697_v34  ;;  %v1872_v54 = vunpack.c.l.b16 %v4463_v7 }
 0x181   :  { %2300 = vmatmul.bf16.gmra.mxu0 %v4821_v4 }
 0x182   :  { %v1771_v41 = vadd.f32 %v1747_v17, %v4487_v50  ;;  %2349 = vmatmul.bf16.gmra.mxu1 %v4822_v60 }
 0x183   :  { %v2109_v1 = vpop.f32.mrf.mxu2 }
 0x184   :  { %v1787_v11 = vpack.c.bf16 %v1771_v41, %v1771_v41  ;;  %v1818_v47 = vadd.f32 %v1817_v39, %v1771_v41  ;;  %v1841_v62 = vmul.f32 %v1771_v41, %v1771_v41  ;;  %v2158_v2 = vpop.f32.mrf.mxu3 }
 0x185   :  { %v4635_v29 = vadd.f32 %v2158_v2, %v2109_v1  ;;  %v4826_v2 = vld [vmem:[#allocation14_spill] sm:$0xff] }
 0x186   :  { %1803 = vst [vmem:[%s4765_s4 + $0x50] sm:$0xf] %v1787_v11  ;;  %v1856_v24 = vadd.f32 %v1855_v19, %v1841_v62  ;;  %v1699_v0 = vpop.f32.mrf.mxu0 }
 0x187   :  { %v1748_v44 = vpop.f32.mrf.mxu1 }
 0x188   :  { %v1749_v6 = vadd.f32 %v1748_v44, %v1699_v0  ;;  %2548 = vmatmul.bf16.gmra.mxu2 %v4506_v22 }
 0x189   :  { %2597 = vmatmul.bf16.gmra.mxu3 %v4529_v63 }
 0x18a   :  { %v1772_v50 = vadd.f32 %v1749_v6, %v4502_v48  ;;  %v2374_v48 = vsel %vm4285_vm11, %v3194_v59, %v2373_v33 }
 0x18b   :  { %v2112_v46 = vpop.f32.mrf.mxu2  ;;  %v2376_v35 = vunpack.c.l.b16 %v2374_v48 }
 0x18c   :  { %v1788_v49 = vpack.c.bf16 %v1772_v50, %v1772_v50  ;;  %v1819_v52 = vadd.f32 %v1818_v47, %v1772_v50  ;;  %v1842_v32 = vmul.f32 %v1772_v50, %v1772_v50  ;;  %v2161_v26 = vpop.f32.mrf.mxu3 }
 0x18d   :  { %v4645_v15 = vadd.f32 %v2161_v26, %v2112_v46  ;;  %v2378_v10 = vpack.c.b16 %v2376_v35, %v1517_v25 }
 0x18e   :  { %1804 = vst [vmem:[%s4765_s4 + $0x58] sm:$0xf] %v1788_v49  ;;  %v1857_v22 = vadd.f32 %v1856_v24, %v1842_v32  ;;  %v1702_v61 = vpop.f32.mrf.mxu0 }
 0x18f   :  { %v1751_v63 = vpop.f32.mrf.mxu1 }
 0x190   :  { %v1752_v58 = vadd.f32 %v1751_v63, %v1702_v61 }
 0x191   :  { %2305 = vmatmul.bf16.gmra.mxu0 %v4823_v8 }
 0x192   :  { %v1773_v28 = vadd.f32 %v1752_v58, %v4516_v36  ;;  %2354 = vmatmul.bf16.gmra.mxu1 %v4824_v31 }
 0x193   :  { %v2114_v37 = vpop.f32.mrf.mxu2 }
 0x194   :  { %v1789_v5 = vpack.c.bf16 %v1773_v28, %v1773_v28  ;;  %v1820_v45 = vadd.f32 %v1819_v52, %v1773_v28  ;;  %v1843_v57 = vmul.f32 %v1773_v28, %v1773_v28  ;;  %v2163_v55 = vpop.f32.mrf.mxu3 }
 0x195   :  { %v4655_v39 = vadd.f32 %v2163_v55, %v2114_v37 }
 0x196   :  { %1805 = vst [vmem:[%s4765_s4 + $0x60] sm:$0xf] %v1789_v5  ;;  %v1858_v3 = vadd.f32 %v1857_v22, %v1843_v57  ;;  %v1704_v53 = vpop.f32.mrf.mxu0 }
 0x197   :  { %v1753_v19 = vpop.f32.mrf.mxu1 }
 0x198   :  { %v1754_v36 = vadd.f32 %v1753_v19, %v1704_v53  ;;  %2553 = vmatmul.bf16.gmra.mxu2 %v4533_v20  ;;  %v4825_v20 = vunpack.c.l.b16 %v4227_v9 }
 0x199   :  { %2602 = vmatmul.bf16.gmra.mxu3 %v2378_v10 }
 0x19a   :  { %v1774_v34 = vadd.f32 %v1754_v36, %v4527_v16  ;;  %v1874_v47 = vpack.c.b16 %v1872_v54, %v4825_v20 }
 0x19b   :  { %v2117_v17 = vpop.f32.mrf.mxu2 }
 0x19c   :  { %v1790_v4 = vpack.c.bf16 %v1774_v34, %v1774_v34  ;;  %v1821_v41 = vadd.f32 %v1820_v45, %v1774_v34  ;;  %v1844_v14 = vmul.f32 %v1774_v34, %v1774_v34  ;;  %v2166_v25 = vpop.f32.mrf.mxu3 }
 0x19d   :  { %v4665_v60 = vadd.f32 %v2166_v25, %v2117_v17 }
 0x19e   :  { %1806 = vst [vmem:[%s4765_s4 + $0x68] sm:$0xf] %v1790_v4  ;;  %v1859_v1 = vadd.f32 %v1858_v3, %v1844_v14  ;;  %v1707_v11 = vpop.f32.mrf.mxu0 }
 0x19f   :  { %v1756_v62 = vpop.f32.mrf.mxu1 }
 0x1a0   :  { %v1757_v16 = vadd.f32 %v1756_v62, %v1707_v11 }
 0x1a1   :  { %2310 = vmatmul.bf16.gmra.mxu0 %v4826_v2 }
 0x1a2   :  { %v1775_v7 = vadd.f32 %v1757_v16, %v4537_v21  ;;  %2359 = vmatmul.bf16.gmra.mxu1 %v1874_v47 }
 0x1a3   :  { %v2119_v24 = vpop.f32.mrf.mxu2 }
 0x1a4   :  { %v1791_v0 = vpack.c.bf16 %v1775_v7, %v1775_v7  ;;  %v1822_v44 = vadd.f32 %v1821_v41, %v1775_v7  ;;  %v1845_v6 = vmul.f32 %v1775_v7, %v1775_v7  ;;  %v2168_v50 = vpop.f32.mrf.mxu3 }
 0x1a5   :  { %v4674_v59 = vadd.f32 %v2168_v50, %v2119_v24 }
 0x1a6   :  { %1807 = vst [vmem:[%s4765_s4 + $0x70] sm:$0xf] %v1791_v0  ;;  %v1860_v9 = vadd.f32 %v1859_v1, %v1845_v6  ;;  %v1709_v33 = vpop.f32.mrf.mxu0 }
 0x1a7   :  { %v1758_v46 = vpop.f32.mrf.mxu1 }
 0x1a8   :  { %v1759_v49 = vadd.f32 %v1758_v46, %v1709_v33 }
 0x1aa   :  { %v1776_v52 = vadd.f32 %v1759_v49, %v4541_v18 }
 0x1ab   :  { %v2519_v32 = vpop.f32.mrf.mxu2 }
 0x1ac   :  { %v1792_v21 = vpack.c.bf16 %v1776_v52, %v1776_v52  ;;  %v4680_v26 = vadd.f32 %v1822_v44, %v1776_v52  ;;  %v1846_v22 = vmul.f32 %v1776_v52, %v1776_v52  ;;  %v2568_v61 = vpop.f32.mrf.mxu3 }
 0x1ad   :  { %v2569_v35 = vadd.f32 %v2568_v61, %v2519_v32 }
 0x1ae   :  { %1808 = vst [vmem:[%s4765_s4 + $0x78] sm:$0xf] %v1792_v21  ;;  %v4685_v48 = vadd.f32 %v1860_v9, %v1846_v22  ;;  %v2276_v63 = vpop.f32.mrf.mxu0 }
 0x1af   :  { %v2277_v58 = vadd.f32 %v2276_v63, %v4543_v30  ;;  %v2325_v8 = vpop.f32.mrf.mxu1 }
 0x1b1   :  { %v2326_v28 = vadd.f32 %v2325_v8, %v2277_v58 }
 0x1b3   :  { %v2608_v31 = vadd.f32 %v2569_v35, %v2326_v28  ;;  %v2521_v18 = vpop.f32.mrf.mxu2 }
 0x1b4   :  { %v2570_v37 = vpop.f32.mrf.mxu3 }
 0x1b5   :  { %v2624_v5 = vpack.c.bf16 %v2608_v31, %v2608_v31  ;;  %v2571_v3 = vadd.f32 %v2570_v37, %v2521_v18  ;;  %v2679_v36 = vmul.f32 %v2608_v31, %v2608_v31 }
 0x1b6   :  { %v2278_v45 = vpop.f32.mrf.mxu0 }
 0x1b7   :  { %3291 = vst [vmem:[%s4765_s4 + $0x4] sm:$0xf] %v2624_v5  ;;  %v2279_v57 = vadd.f32 %v2278_v45, %v4548_v27  ;;  %v2327_v55 = vpop.f32.mrf.mxu1 }
 0x1b9   :  { %v2328_v10 = vadd.f32 %v2327_v55, %v2279_v57 }
 0x1bb   :  { %v2609_v53 = vadd.f32 %v2571_v3, %v2328_v10  ;;  %v2524_v19 = vpop.f32.mrf.mxu2 }
 0x1bc   :  { %v2573_v30 = vpop.f32.mrf.mxu3 }
 0x1bd   :  { %v2625_v34 = vpack.c.bf16 %v2609_v53, %v2609_v53  ;;  %v2657_v54 = vadd.f32 %v2609_v53, %v2608_v31  ;;  %v2680_v17 = vmul.f32 %v2609_v53, %v2609_v53  ;;  %v2574_v27 = vadd.f32 %v2573_v30, %v2524_v19 }
 0x1be   :  { %v2281_v4 = vpop.f32.mrf.mxu0 }
 0x1bf   :  { %3292 = vst [vmem:[%s4765_s4 + $0xc] sm:$0xf] %v2625_v34  ;;  %v2695_v41 = vadd.f32 %v2680_v17, %v2679_v36  ;;  %v2282_v14 = vadd.f32 %v2281_v4, %v4556_v12  ;;  %v2330_v25 = vpop.f32.mrf.mxu1 }
 0x1c1   :  { %v2331_v1 = vadd.f32 %v2330_v25, %v2282_v14 }
 0x1c3   :  { %v2610_v11 = vadd.f32 %v2574_v27, %v2331_v1  ;;  %v2526_v20 = vpop.f32.mrf.mxu2 }
 0x1c4   :  { %v2575_v47 = vpop.f32.mrf.mxu3 }
 0x1c5   :  { %v2626_v62 = vpack.c.bf16 %v2610_v11, %v2610_v11  ;;  %v2658_v16 = vadd.f32 %v2657_v54, %v2610_v11  ;;  %v2681_v2 = vmul.f32 %v2610_v11, %v2610_v11  ;;  %v2576_v12 = vadd.f32 %v2575_v47, %v2526_v20 }
 0x1c6   :  { %v2283_v7 = vpop.f32.mrf.mxu0 }
 0x1c7   :  { %3293 = vst [vmem:[%s4765_s4 + $0x14] sm:$0xf] %v2626_v62  ;;  %v2696_v24 = vadd.f32 %v2695_v41, %v2681_v2  ;;  %v2284_v0 = vadd.f32 %v2283_v7, %v4564_v42  ;;  %v2332_v44 = vpop.f32.mrf.mxu1 }
 0x1c9   :  { %v2333_v6 = vadd.f32 %v2332_v44, %v2284_v0 }
 0x1cb   :  { %v2611_v50 = vadd.f32 %v2576_v12, %v2333_v6  ;;  %v2529_v9 = vpop.f32.mrf.mxu2 }
 0x1cc   :  { %v2578_v33 = vpop.f32.mrf.mxu3 }
 0x1cd   :  { %v2627_v46 = vpack.c.bf16 %v2611_v50, %v2611_v50  ;;  %v2659_v49 = vadd.f32 %v2658_v16, %v2611_v50  ;;  %v2682_v52 = vmul.f32 %v2611_v50, %v2611_v50  ;;  %v2579_v63 = vadd.f32 %v2578_v33, %v2529_v9 }
 0x1ce   :  { %v2286_v32 = vpop.f32.mrf.mxu0 }
 0x1cf   :  { %3294 = vst [vmem:[%s4765_s4 + $0x1c] sm:$0xf] %v2627_v46  ;;  %v2697_v21 = vadd.f32 %v2696_v24, %v2682_v52  ;;  %v2287_v22 = vadd.f32 %v2286_v32, %v4574_v40  ;;  %v2335_v61 = vpop.f32.mrf.mxu1 }
 0x1d1   :  { %v2336_v42 = vadd.f32 %v2335_v61, %v2287_v22 }
 0x1d3   :  { %v2612_v58 = vadd.f32 %v2579_v63, %v2336_v42  ;;  %v2531_v8 = vpop.f32.mrf.mxu2 }
 0x1d4   :  { %v2580_v35 = vpop.f32.mrf.mxu3 }
 0x1d5   :  { %v2628_v28 = vpack.c.bf16 %v2612_v58, %v2612_v58  ;;  %v2660_v31 = vadd.f32 %v2659_v49, %v2612_v58  ;;  %v2683_v18 = vmul.f32 %v2612_v58, %v2612_v58  ;;  %v2581_v40 = vadd.f32 %v2580_v35, %v2531_v8 }
 0x1d6   :  { %v2288_v37 = vpop.f32.mrf.mxu0 }
 0x1d7   :  { %3295 = vst [vmem:[%s4765_s4 + $0x24] sm:$0xf] %v2628_v28  ;;  %v2698_v5 = vadd.f32 %v2697_v21, %v2683_v18  ;;  %v2289_v45 = vadd.f32 %v2288_v37, %v4584_v13  ;;  %v2337_v57 = vpop.f32.mrf.mxu1 }
 0x1d9   :  { %v2338_v55 = vadd.f32 %v2337_v57, %v2289_v45 }
 0x1db   :  { %v2613_v10 = vadd.f32 %v2581_v40, %v2338_v55  ;;  %v2534_v3 = vpop.f32.mrf.mxu2 }
 0x1dc   :  { %v2583_v53 = vpop.f32.mrf.mxu3 }
 0x1dd   :  { %v2629_v19 = vpack.c.bf16 %v2613_v10, %v2613_v10  ;;  %v2661_v30 = vadd.f32 %v2660_v31, %v2613_v10  ;;  %v2684_v36 = vmul.f32 %v2613_v10, %v2613_v10  ;;  %v2584_v41 = vadd.f32 %v2583_v53, %v2534_v3 }
 0x1de   :  { %v2291_v34 = vpop.f32.mrf.mxu0 }
 0x1df   :  { %3296 = vst [vmem:[%s4765_s4 + $0x2c] sm:$0xf] %v2629_v19  ;;  %v2699_v54 = vadd.f32 %v2698_v5, %v2684_v36  ;;  %v2292_v17 = vadd.f32 %v2291_v34, %v4594_v23  ;;  %v2340_v4 = vpop.f32.mrf.mxu1 }
 0x1e1   :  { %v2341_v13 = vadd.f32 %v2340_v4, %v2292_v17 }
 0x1e3   :  { %v2614_v14 = vadd.f32 %v2584_v41, %v2341_v13  ;;  %v2536_v25 = vpop.f32.mrf.mxu2 }
 0x1e4   :  { %v2585_v27 = vpop.f32.mrf.mxu3 }
 0x1e5   :  { %v2630_v1 = vpack.c.bf16 %v2614_v14, %v2614_v14  ;;  %v2662_v11 = vadd.f32 %v2661_v30, %v2614_v14  ;;  %v2685_v20 = vmul.f32 %v2614_v14, %v2614_v14  ;;  %v2586_v23 = vadd.f32 %v2585_v27, %v2536_v25 }
 0x1e6   :  { %v2293_v47 = vpop.f32.mrf.mxu0 }
 0x1e7   :  { %3297 = vst [vmem:[%s4765_s4 + $0x34] sm:$0xf] %v2630_v1  ;;  %v2700_v62 = vadd.f32 %v2699_v54, %v2685_v20  ;;  %v2294_v16 = vadd.f32 %v2293_v47, %v4603_v38  ;;  %v2342_v2 = vpop.f32.mrf.mxu1 }
 0x1e9   :  { %v2343_v7 = vadd.f32 %v2342_v2, %v2294_v16 }
 0x1eb   :  { %v2615_v24 = vadd.f32 %v2586_v23, %v2343_v7  ;;  %v2539_v0 = vpop.f32.mrf.mxu2 }
 0x1ec   :  { %v2588_v44 = vpop.f32.mrf.mxu3 }
 0x1ed   :  { %v2631_v6 = vpack.c.bf16 %v2615_v24, %v2615_v24  ;;  %v2663_v12 = vadd.f32 %v2662_v11, %v2615_v24  ;;  %v2686_v50 = vmul.f32 %v2615_v24, %v2615_v24  ;;  %v2589_v52 = vadd.f32 %v2588_v44, %v2539_v0 }
 0x1ee   :  { %v2296_v9 = vpop.f32.mrf.mxu0 }
 0x1ef   :  { %3298 = vst [vmem:[%s4765_s4 + $0x3c] sm:$0xf] %v2631_v6  ;;  %v2701_v33 = vadd.f32 %v2700_v62, %v2686_v50  ;;  %v2297_v46 = vadd.f32 %v2296_v9, %v4611_v51  ;;  %v2345_v49 = vpop.f32.mrf.mxu1 }
 0x1f1   :  { %v2346_v38 = vadd.f32 %v2345_v49, %v2297_v46 }
 0x1f3   :  { %v2616_v32 = vadd.f32 %v2589_v52, %v2346_v38  ;;  %v2541_v21 = vpop.f32.mrf.mxu2 }
 0x1f4   :  { %v2590_v22 = vpop.f32.mrf.mxu3 }
 0x1f5   :  { %v2632_v61 = vpack.c.bf16 %v2616_v32, %v2616_v32  ;;  %v2664_v63 = vadd.f32 %v2663_v12, %v2616_v32  ;;  %v2687_v42 = vmul.f32 %v2616_v32, %v2616_v32  ;;  %v2591_v51 = vadd.f32 %v2590_v22, %v2541_v21 }
 0x1f6   :  { %v2298_v58 = vpop.f32.mrf.mxu0 }
 0x1f7   :  { %3299 = vst [vmem:[%s4765_s4 + $0x44] sm:$0xf] %v2632_v61  ;;  %v2702_v8 = vadd.f32 %v2701_v33, %v2687_v42  ;;  %v2299_v35 = vadd.f32 %v2298_v58, %v4619_v43  ;;  %v2347_v28 = vpop.f32.mrf.mxu1 }
 0x1f9   :  { %v2348_v31 = vadd.f32 %v2347_v28, %v2299_v35 }
 0x1fb   :  { %v2617_v18 = vadd.f32 %v2591_v51, %v2348_v31  ;;  %v2544_v37 = vpop.f32.mrf.mxu2 }
 0x1fc   :  { %v2593_v5 = vpop.f32.mrf.mxu3 }
 0x1fd   :  { %v2633_v45 = vpack.c.bf16 %v2617_v18, %v2617_v18  ;;  %v2665_v57 = vadd.f32 %v2664_v63, %v2617_v18  ;;  %v2688_v55 = vmul.f32 %v2617_v18, %v2617_v18  ;;  %v2594_v19 = vadd.f32 %v2593_v5, %v2544_v37 }
 0x1fe   :  { %v2301_v40 = vpop.f32.mrf.mxu0  ;;  %v1824_v37 = vrot.slane %v4680_v26, 4 }
 0x1ff   :  { %3300 = vst [vmem:[%s4765_s4 + $0x4c] sm:$0xf] %v2633_v45  ;;  %v2703_v10 = vadd.f32 %v2702_v8, %v2688_v55  ;;  %v2302_v3 = vadd.f32 %v2301_v40, %v4627_v56  ;;  %v2350_v53 = vpop.f32.mrf.mxu1 }
 0x201   :  { %v2351_v43 = vadd.f32 %v2350_v53, %v2302_v3  ;;  %v1862_v3 = vrot.slane %v4685_v48, 4 }
 0x203   :  { %v2618_v30 = vadd.f32 %v2594_v19, %v2351_v43  ;;  %v2546_v36 = vpop.f32.mrf.mxu2  ;;  %v1825_v43 = vadd.f32 %v1824_v37, %v4680_v26 }
 0x204   :  { %v2595_v34 = vpop.f32.mrf.mxu3 }
 0x205   :  { %v2634_v54 = vpack.c.bf16 %v2618_v30, %v2618_v30  ;;  %v2666_v17 = vadd.f32 %v2665_v57, %v2618_v30  ;;  %v2689_v4 = vmul.f32 %v2618_v30, %v2618_v30  ;;  %v2596_v56 = vadd.f32 %v2595_v34, %v2546_v36 }
 0x206   :  { %v2303_v41 = vpop.f32.mrf.mxu0  ;;  %v1863_v34 = vadd.f32 %v1862_v3, %v4685_v48 }
 0x207   :  { %3301 = vst [vmem:[%s4765_s4 + $0x54] sm:$0xf] %v2634_v54  ;;  %v2704_v13 = vadd.f32 %v2703_v10, %v2689_v4  ;;  %v2304_v14 = vadd.f32 %v2303_v41, %v4635_v29  ;;  %v2352_v25 = vpop.f32.mrf.mxu1 }
 0x209   :  { %v2353_v27 = vadd.f32 %v2352_v25, %v2304_v14  ;;  %v1864_v14 = vrot.slane %v1863_v34, 2 }
 0x20b   :  { %v2619_v1 = vadd.f32 %v2596_v56, %v2353_v27  ;;  %v2549_v11 = vpop.f32.mrf.mxu2  ;;  %v1865_v26 = vadd.f32 %v1864_v14, %v1863_v34 }
 0x20c   :  { %v2598_v20 = vpop.f32.mrf.mxu3 }
 0x20d   :  { %v2635_v47 = vpack.c.bf16 %v2619_v1, %v2619_v1  ;;  %v2667_v62 = vadd.f32 %v2666_v17, %v2619_v1  ;;  %v2690_v16 = vmul.f32 %v2619_v1, %v2619_v1  ;;  %v2599_v0 = vadd.f32 %v2598_v20, %v2549_v11 }
 0x20e   :  { %v2306_v2 = vpop.f32.mrf.mxu0  ;;  %v1826_v17 = vrot.slane %v1825_v43, 2 }
 0x20f   :  { %3302 = vst [vmem:[%s4765_s4 + $0x5c] sm:$0xf] %v2635_v47  ;;  %v2705_v7 = vadd.f32 %v2704_v13, %v2690_v16  ;;  %v2307_v23 = vadd.f32 %v2306_v2, %v4645_v15  ;;  %v2355_v24 = vpop.f32.mrf.mxu1  ;;  %v1866_v16 = vrot.slane %v1865_v26, 1 }
 0x211   :  { %v2356_v29 = vadd.f32 %v2355_v24, %v2307_v23 }
 0x213   :  { %v2620_v44 = vadd.f32 %v2599_v0, %v2356_v29  ;;  %v2551_v6 = vpop.f32.mrf.mxu2  ;;  %v1867_v29 = vadd.f32 %v1866_v16, %v1865_v26 }
 0x214   :  { %v2600_v12 = vpop.f32.mrf.mxu3 }
 0x215   :  { %v2636_v50 = vpack.c.bf16 %v2620_v44, %v2620_v44  ;;  %v2668_v9 = vadd.f32 %v2667_v62, %v2620_v44  ;;  %v2691_v33 = vmul.f32 %v2620_v44, %v2620_v44  ;;  %v2601_v15 = vadd.f32 %v2600_v12, %v2551_v6 }
 0x216   :  { %v2308_v46 = vpop.f32.mrf.mxu0 }
 0x217   :  { %3303 = vst [vmem:[%s4765_s4 + $0x64] sm:$0xf] %v2636_v50  ;;  %v2706_v49 = vadd.f32 %v2705_v7, %v2691_v33  ;;  %v2309_v52 = vadd.f32 %v2308_v46, %v4655_v39  ;;  %v2357_v38 = vpop.f32.mrf.mxu1 }
 0x219   :  { %v2358_v32 = vadd.f32 %v2357_v38, %v2309_v52 }
 0x21b   :  { %v2621_v21 = vadd.f32 %v2601_v15, %v2358_v32  ;;  %v2554_v22 = vpop.f32.mrf.mxu2 }
 0x21c   :  { %v2603_v61 = vpop.f32.mrf.mxu3 }
 0x21d   :  { %v2637_v63 = vpack.c.bf16 %v2621_v21, %v2621_v21  ;;  %v2669_v42 = vadd.f32 %v2668_v9, %v2621_v21  ;;  %v2692_v58 = vmul.f32 %v2621_v21, %v2621_v21  ;;  %v2604_v51 = vadd.f32 %v2603_v61, %v2554_v22 }
 0x21e   :  { %v2311_v8 = vpop.f32.mrf.mxu0 }
 0x21f   :  { %3304 = vst [vmem:[%s4765_s4 + $0x6c] sm:$0xf] %v2637_v63  ;;  %v2707_v35 = vadd.f32 %v2706_v49, %v2692_v58  ;;  %v2312_v28 = vadd.f32 %v2311_v8, %v4665_v60  ;;  %v2360_v31 = vpop.f32.mrf.mxu1 }
 0x221   :  { %v2361_v39 = vadd.f32 %v2360_v31, %v2312_v28 }
 0x223   :  { %v2622_v18 = vadd.f32 %v2604_v51, %v2361_v39  ;;  %v2556_v55 = vpop.f32.mrf.mxu2 }
 0x224   :  { %v2605_v10 = vpop.f32.mrf.mxu3 }
 0x225   :  { %v2638_v5 = vpack.c.bf16 %v2622_v18, %v2622_v18  ;;  %v2670_v45 = vadd.f32 %v2669_v42, %v2622_v18  ;;  %v2693_v57 = vmul.f32 %v2622_v18, %v2622_v18  ;;  %v2606_v36 = vadd.f32 %v2605_v10, %v2556_v55 }
 0x226   :  { %v2313_v40 = vpop.f32.mrf.mxu0 }
 0x227   :  { %3305 = vst [vmem:[%s4765_s4 + $0x74] sm:$0xf] %v2638_v5  ;;  %v2708_v53 = vadd.f32 %v2707_v35, %v2693_v57  ;;  %v2314_v60 = vadd.f32 %v2313_v40, %v4674_v59  ;;  %v2362_v19 = vpop.f32.mrf.mxu1  ;;  %v1827_v59 = vadd.f32 %v1826_v17, %v1825_v43 }
 0x229   :  { %v2363_v30 = vadd.f32 %v2362_v19, %v2314_v60  ;;  %v1828_v47 = vrot.slane %v1827_v59, 1 }
 0x22b   :  { %v2623_v54 = vadd.f32 %v2606_v36, %v2363_v30  ;;  %v1829_v23 = vadd.f32 %v1828_v47, %v1827_v59 }
 0x22d   :  { %v2639_v4 = vpack.c.bf16 %v2623_v54, %v2623_v54  ;;  %v2671_v41 = vadd.f32 %v2670_v45, %v2623_v54  ;;  %v2694_v13 = vmul.f32 %v2623_v54, %v2623_v54 }
 0x22f   :  { %3306 = vst [vmem:[%s4765_s4 + $0x7c] sm:$0xf] %v2639_v4  ;;  %v2672_v25 = vrot.slane %v2671_v41, 4  ;;  %v2709_v27 = vadd.f32 %v2708_v53, %v2694_v13 }
 0x231   :  { %v2673_v56 = vadd.f32 %v2672_v25, %v2671_v41  ;;  %v2710_v1 = vrot.slane %v2709_v27, 4 }
 0x233   :  { %v2674_v11 = vrot.slane %v2673_v56, 2  ;;  %v2711_v20 = vadd.f32 %v2710_v1, %v2709_v27 }
 0x235   :  { %v2675_v48 = vadd.f32 %v2674_v11, %v2673_v56  ;;  %v2712_v62 = vrot.slane %v2711_v20, 2 }
 0x237   :  { %v2676_v2 = vrot.slane %v2675_v48, 1  ;;  %v2713_v7 = vadd.f32 %v2712_v62, %v2711_v20 }
 0x239   :  { %v2677_v24 = vadd.f32 %v2676_v2, %v2675_v48  ;;  %v2714_v0 = vrot.slane %v2713_v7, 1 }
 0x23b   :  { %v2678_v44 = vadd.f32 %v2677_v24, %v1829_v23  ;;  %v2715_v6 = vadd.f32 %v2714_v0, %v2713_v7 }
 0x23d   :  { %v2716_v12 = vadd.f32 %v2715_v6, %v1867_v29  ;;  %2717 = vst [vmem:[%s4766_s5] sm:$0x1] %v2678_v44 }
 0x23f   :  { %2718 = vst [vmem:[%s4766_s5 + $0x1] sm:$0x1] %v2716_v12 }

// kernel: generator_forward.7
= control target key start
LH: loop header
LB: loop body
LE: loop exit
PB: predicated region body
PF: predicated region fallthrough
CT: control target
= control target key end

     0   :  { %s4027_s18 = smov 0   ;;  %s5310_s0 = inlined_call_operand.vmem [shape: bf16[2,16,16,64], index: 0, kind: input, shape index: {}]   ;;  %s5311_s1 = inlined_call_operand.vmem [shape: bf16[5,128,128], index: 1, kind: input, shape index: {}]   ;;  %s5312_s2 = inlined_call_operand.vmem [shape: f32[1,128], index: 2, kind: input, shape index: {}]   ;;  %s5313_s3 = inlined_call_operand.vmem [shape: f32[1,64], index: 3, kind: input, shape index: {}]   ;;  %s5314_s4 = inlined_call_operand.vmem [shape: f32[1,64], index: 4, kind: input, shape index: {}]   ;;  %s5315_s5 = inlined_call_operand.vmem [shape: bf16[2,16,16,128], index: 5, kind: output, shape index: {}]  }
   0x1 LB: > { %s3286_s19 = sadd.s32 4294967295, %s3993_s18   ;;  %p3290_p0 = scmp.ge.s32.totalorder %s3993_s18, 1  ;;  %s3993_s18 = sphi %s4027_s18, %s15_s18  }
   0x2   : > { %p187_p1 = scmp.lt.s32.totalorder %s3993_s18, 3 }
   0x4   : > { %p188_p2 = pnand %p3290_p0, %p187_p1 }
   0x6   : > { %191 = sbr.rel (%p188_p2) target bundleno = 735 (0x2df), region = 40 }
   0xb   : > { %p215_p3 = scmp.lt.s32.totalorder %s3286_s19, 1  ;;  %vm493_vm0 = vcmask 516096   ;;  %vm501_vm1 = vsmask.f32 256  ;;  %v527_v0 = vld [vmem:[#allocation2 + $0x6c] sm:$0x1] }
   0xc   : > { %vm4039_vm2 = vmand %vm493_vm0, %vm501_vm1  ;;  %vm551_vm3 = vsmask.f32 7938  ;;  %v577_v2 = vld [vmem:[#allocation2 + $0x74] sm:$0x1]  ;;  %v4047_v3 = vld [vmem:[%s5313_s3] ss:$0 sm:$0xff] }
   0xd   : > { %s5355_s19 = smov (!%p215_p3, %s3286_s19), 1  ;;  %v528_v4 = vsel %vm4039_vm2, 0, %v527_v0  ;;  %vm4053_vm4 = vmand %vm493_vm0, %vm551_vm3  ;;  %v4067_v6 = vld [vmem:[%s5314_s4] ss:$0 sm:$0xff]  ;;  %v515_v8 = vld [vmem:[#allocation2 + $0x3c] sm:$0x1] }
   0xe   : > { %s3611_s20 = sshll.u32 %s5355_s19, 7  ;;  %529 = vst [vmem:[#allocation2 + $0x6c] sm:$0x1] %v528_v4  ;;  %v578_v7 = vsel %vm4053_vm4, 0, %v577_v2  ;;  %v516_v11 = vsel %vm4039_vm2, 0, %v515_v8  ;;  %vm490_vm6 = vcmask 519168  }
   0xf   : > { %s4062_s25 = scalar_lea.vmem %s5310_s0, %s3611_s20  ;;  %579 = vst [vmem:[#allocation2 + $0x74] sm:$0x1] %v578_v7  ;;  %v565_v16 = vld [vmem:[#allocation2 + $0x44] sm:$0x1]  ;;  %v539_v21 = vld [vmem:[#allocation2 + $0x9c] sm:$0x1]  ;;  %vm4110_vm14 = vmand %vm490_vm6, %vm551_vm3  ;;  %s5180_s7 = scalar_lea.vmem %s5315_s5, %s3611_s20 }
  0x10   : > { %v3822_v9 = vld [vmem:[%s4062_s25 + $0x40] sm:$0xff]   ;;  %517 = vst [vmem:[#allocation2 + $0x3c] sm:$0x1] %v516_v11  ;;  %v566_v18 = vsel %vm4053_vm4, 0, %v565_v16  ;;  %vm601_vm5 = vsmask.f32 4368 }
  0x11   : > { %v3818_v10 = vld [vmem:[%s4062_s25 + $0x20] sm:$0xff]   ;;  %v3705_v12 = vunpack.c.l.bf16 %v3822_v9  ;;  %v3706_v13 = vunpack.c.h.bf16 %v3822_v9  ;;  %567 = vst [vmem:[#allocation2 + $0x44] sm:$0x1] %v566_v18  ;;  %v540_v30 = vsel %vm4039_vm2, 0, %v539_v21  ;;  %vm4103_vm13 = vmor %vm501_vm1, %vm601_vm5  ;;  %vm1289_vm15 = vsmask.f32 3328 }
  0x12   : > { %v3689_v14 = vunpack.c.l.bf16 %v3818_v10  ;;  %v3690_v15 = vunpack.c.h.bf16 %v3818_v10  ;;  %v3826_v17 = vld [vmem:[%s4062_s25 + $0x60] sm:$0xff]   ;;  %541 = vst [vmem:[#allocation2 + $0x9c] sm:$0x1] %v540_v30  ;;  %v4120_v30 = vld [vmem:[#allocation2 + $0x14] sm:$0x1]  ;;  %s3995_s28 = smov 64  }
  0x13   : > { %v3721_v19 = vunpack.c.l.bf16 %v3826_v17  ;;  %v3722_v20 = vunpack.c.h.bf16 %v3826_v17  ;;  %v589_v22 = vld [vmem:[#allocation2 + $0xa4] sm:$0x1]  ;;  %v310_v23 = vmul.f32 %v4047_v3, %v3705_v12  ;;  %v311_v24 = vmul.f32 %v4047_v3, %v3706_v13 }
  0x14   : > { %v302_v25 = vmul.f32 %v4047_v3, %v3689_v14  ;;  %v303_v26 = vmul.f32 %v4047_v3, %v3690_v15  ;;  %v4083_v27 = vld [vmem:[%s4062_s25] sm:$0xff]   ;;  %v590_v31 = vsel %vm4053_vm4, 0, %v589_v22  ;;  %vm1290_vm1 = vsmask.f32 7440 }
  0x15   : > { %v318_v28 = vmul.f32 %v4047_v3, %v3721_v19  ;;  %v319_v29 = vmul.f32 %v4047_v3, %v3722_v20  ;;  %v346_v32 = vadd.f32 %v4067_v6, %v310_v23  ;;  %v347_v33 = vadd.f32 %v4067_v6, %v311_v24  ;;  %591 = vst [vmem:[#allocation2 + $0xa4] sm:$0x1] %v590_v31  ;;  %v981_v2 = vld [vmem:[#allocation2 + $0x6c] sm:$0xf] }
  0x16   : > { %v338_v34 = vadd.f32 %v4067_v6, %v302_v25  ;;  %v339_v35 = vadd.f32 %v4067_v6, %v303_v26  ;;  %v3673_v38 = vunpack.c.l.bf16 %v4083_v27  ;;  %v3674_v39 = vunpack.c.h.bf16 %v4083_v27  ;;  %v985_v9 = vld [vmem:[#allocation2 + $0x74] sm:$0x1] }
  0x17   : > { %v354_v36 = vadd.f32 %v4067_v6, %v318_v28  ;;  %v355_v37 = vadd.f32 %v4067_v6, %v319_v29  ;;  %vm378_vm7 = vcmp.ge.f32.partialorder %v346_v32, 0.0  ;;  %vm379_vm8 = vcmp.ge.f32.partialorder %v347_v33, 0.0  ;;  %v953_v18 = vld [vmem:[#allocation2 + $0x3c] sm:$0xf]  ;;  %v503_v29 = vld [vmem:[#allocation2 + $0xc] sm:$0x1] }
  0x18   : > { %v410_v40 = vmul.f32 0.2, %v346_v32  ;;  %v411_v41 = vmul.f32 0.2, %v347_v33  ;;  %vm370_vm9 = vcmp.ge.f32.partialorder %v338_v34, 0.0  ;;  %vm371_vm10 = vcmp.ge.f32.partialorder %v339_v35, 0.0 }
  0x19   : > { %v402_v42 = vmul.f32 0.2, %v338_v34  ;;  %v294_v43 = vmul.f32 %v4047_v3, %v3673_v38  ;;  %v403_v46 = vmul.f32 0.2, %v339_v35  ;;  %vm386_vm11 = vcmp.ge.f32.partialorder %v354_v36, 0.0 }
  0x1a   : > { %v442_v44 = vsel %vm378_vm7, %v346_v32, %v410_v40  ;;  %v443_v45 = vsel %vm379_vm8, %v347_v33, %v411_v41  ;;  %vm387_vm12 = vcmp.ge.f32.partialorder %v355_v37, 0.0  ;;  %v418_v52 = vmul.f32 0.2, %v354_v36  ;;  %v957_v26 = vld [vmem:[#allocation2 + $0x44] sm:$0x1]  ;;  %vm4171_vm7 = vmor %vm1289_vm15, %vm1290_vm1 }
  0x1b   : > { %v474_v47 = vpack.c.bf16 %v442_v44, %v442_v44  ;;  %v475_v48 = vpack.c.bf16 %v443_v45, %v443_v45  ;;  %v434_v49 = vsel %vm370_vm9, %v338_v34, %v402_v42  ;;  %v435_v50 = vsel %vm371_vm10, %v339_v35, %v403_v46  ;;  %v3819_v35 = vld [vmem:[%s4062_s25 + $0x28] sm:$0xff]   ;;  %v1009_v38 = vld [vmem:[#allocation2 + $0x9c] sm:$0xf] }
  0x1c   : > { %v466_v51 = vpack.c.bf16 %v434_v49, %v434_v49  ;;  %v419_v53 = vmul.f32 0.2, %v355_v37  ;;  %v467_v58 = vpack.c.bf16 %v435_v50, %v435_v50  ;;  %v450_v61 = vsel %vm386_vm11, %v354_v36, %v418_v52  ;;  %v1013_v49 = vld [vmem:[#allocation2 + $0xa4] sm:$0x1] }
  0x1d   : > { %v740_v54 = vshrl.u32 %v474_v47, 16  ;;  %v743_v55 = vshll.u32 %v474_v47, 16  ;;  %v748_v56 = vshrl.u32 %v475_v48, 16  ;;  %v751_v57 = vshll.u32 %v475_v48, 16  ;;  %v4134_v47 = vld [vmem:[#allocation2 + $0x48] sm:$0x1] }
  0x1e   : > { %v672_v59 = vshrl.u32 %v466_v51, 16  ;;  %v675_v60 = vshll.u32 %v466_v51, 16  ;;  %v451_v4 = vsel %vm387_vm12, %v355_v37, %v419_v53  ;;  %v482_v7 = vpack.c.bf16 %v450_v61, %v450_v61 }
  0x1f   : > { %v742_v63 = vrot.slane %v740_v54, 7  ;;  %v750_v0 = vrot.slane %v748_v56, 7  ;;  %v680_v11 = vshrl.u32 %v467_v58, 16  ;;  %v683_v12 = vshll.u32 %v467_v58, 16 }
  0x20   : > { %v674_v10 = vrot.slane %v672_v59, 7  ;;  %v483_v13 = vpack.c.bf16 %v451_v4, %v451_v4  ;;  %v808_v22 = vshrl.u32 %v482_v7, 16  ;;  %v811_v28 = vshll.u32 %v482_v7, 16 }
  0x21   : > { %v745_v14 = vor.u32 %v743_v55, %v742_v63  ;;  %v746_v15 = vrot.slane %v742_v63, 4  ;;  %v753_v16 = vor.u32 %v751_v57, %v750_v0  ;;  %v755_v17 = vrot.slane %v750_v0, 4 }
  0x22   : > { %v677_v19 = vor.u32 %v675_v60, %v674_v10  ;;  %v678_v20 = vrot.slane %v674_v10, 4  ;;  %v682_v21 = vrot.slane %v680_v11, 7  ;;  %v810_v34 = vrot.slane %v808_v22, 7  ;;  %v4150_v60 = vld [vmem:[%s4062_s25 + $0x8] sm:$0xff]  }
  0x23   : > { %v754_v23 = vsel %vm4103_vm13, %v746_v15, %v753_v16  ;;  %v982_v24 = vsel %vm4110_vm14, %v745_v14, %v981_v2  ;;  %v986_v25 = vsel %vm4039_vm2, %v755_v17, %v985_v9  ;;  %v816_v36 = vshrl.u32 %v483_v13, 16 }
  0x24   : > { %983 = vst [vmem:[#allocation2 + $0x6c] sm:$0xf] %v982_v24  ;;  %v685_v31 = vor.u32 %v683_v12, %v682_v21  ;;  %v687_v32 = vrot.slane %v682_v21, 4  ;;  %v954_v33 = vsel %vm4110_vm14, %v677_v19, %v953_v18  ;;  %v819_v37 = vshll.u32 %v483_v13, 16 }
  0x25   : > { %984 = vst.msk [vmem:[#allocation2 + $0x70] sm:$0xf] %vm490_vm6, %v754_v23  ;;  %v295_v40 = vmul.f32 %v4047_v3, %v3674_v39  ;;  %v330_v41 = vadd.f32 %v4067_v6, %v294_v43  ;;  %v813_v45 = vor.u32 %v811_v28, %v810_v34  ;;  %v814_v46 = vrot.slane %v810_v34, 4 }
  0x26   : > { %987 = vst [vmem:[#allocation2 + $0x74] sm:$0x1] %v986_v25  ;;  %v686_v42 = vsel %vm4103_vm13, %v678_v20, %v685_v31  ;;  %v958_v44 = vsel %vm4039_vm2, %v687_v32, %v957_v26  ;;  %v818_v48 = vrot.slane %v816_v36, 7  ;;  %v504_v50 = vsel %vm4039_vm2, 0, %v503_v29 }
  0x27   : > { %955 = vst [vmem:[#allocation2 + $0x3c] sm:$0xf] %v954_v33  ;;  %v331_v27 = vadd.f32 %v4067_v6, %v295_v40  ;;  %vm362_vm3 = vcmp.ge.f32.partialorder %v330_v41, 0.0  ;;  %v394_v39 = vmul.f32 0.2, %v330_v41  ;;  %v1010_v43 = vsel %vm4110_vm14, %v813_v45, %v1009_v38 }
  0x28   : > { %956 = vst.msk [vmem:[#allocation2 + $0x40] sm:$0xf] %vm490_vm6, %v686_v42  ;;  %v554_v51 = vsel %vm4053_vm4, 0, %v4120_v30  ;;  %v3693_v52 = vunpack.c.l.bf16 %v3819_v35  ;;  %v821_v53 = vor.u32 %v819_v37, %v818_v48  ;;  %v823_v54 = vrot.slane %v818_v48, 4 }
  0x29   : > { %959 = vst [vmem:[#allocation2 + $0x44] sm:$0x1] %v958_v44  ;;  %vm363_vm5 = vcmp.ge.f32.partialorder %v331_v27, 0.0  ;;  %v395_v55 = vmul.f32 0.2, %v331_v27  ;;  %v426_v56 = vsel %vm362_vm3, %v330_v41, %v394_v39  ;;  %v3694_v57 = vunpack.c.h.bf16 %v3819_v35 }
  0x2a   : > { %1011 = vst [vmem:[#allocation2 + $0x9c] sm:$0xf] %v1010_v43  ;;  %v304_v58 = vmul.f32 %v4047_v3, %v3693_v52  ;;  %v519_v59 = vsel %vm4039_vm2, 0, %v4134_v47  ;;  %v822_v63 = vsel %vm4103_vm13, %v814_v46, %v821_v53  ;;  %v1014_v0 = vsel %vm4039_vm2, %v823_v54, %v1013_v49 }
  0x2b   : > { %v1064_v61 = vld [vmem:[#allocation2 + $0x6c] sm:$0xf]  ;;  %v427_v2 = vsel %vm363_vm5, %v331_v27, %v395_v55  ;;  %v4156_v4 = vpack.c.bf16 %v426_v56, %v426_v56  ;;  %505 = vst [vmem:[#allocation2 + $0xc] sm:$0x1] %v504_v50  ;;  %v4162_v12 = vmul.f32 %v4047_v3, %v3694_v57  ;;  %v3677_v17 = vunpack.c.l.bf16 %v4150_v60 }
  0x2c   : > { %v1065_v7 = vld [vmem:[#allocation2 + $0x70] sm:$0xf]  ;;  %v1509_v9 = vshrl.u32 %v1064_v61, 16  ;;  %v1512_v10 = vshll.u32 %v1064_v61, 16  ;;  %1012 = vst.msk [vmem:[#allocation2 + $0xa0] sm:$0xf] %vm490_vm6, %v822_v63  ;;  %v4159_v11 = vpack.c.bf16 %v427_v2, %v427_v2  ;;  %v4165_v16 = vadd.f32 %v4067_v6, %v304_v58 }
  0x2d   : > { %v1066_v13 = vld [vmem:[#allocation2 + $0x74] sm:$0x1]  ;;  %v1518_v14 = vshll.u32 %v1065_v7, 16  ;;  %v1522_v15 = vshrl.u32 %v1065_v7, 16  ;;  %1015 = vst [vmem:[#allocation2 + $0xa4] sm:$0x1] %v1014_v0 }
  0x2e   : > { %v1511_v18 = vrot.slane %v1509_v9, 4  ;;  %v1514_v19 = vrot.slane %v1512_v10, 5  ;;  %v1528_v20 = vshll.u32 %v1066_v13, 16  ;;  %v1052_v21 = vld [vmem:[#allocation2 + $0x3c] sm:$0xf]  ;;  %v604_v22 = vshrl.u32 %v4156_v4, 16 }
  0x2f   : > { %v1520_v23 = vrot.slane %v1518_v14, 5  ;;  %v1524_v24 = vrot.slane %v1522_v15, 4  ;;  %v1053_v25 = vld [vmem:[#allocation2 + $0x40] sm:$0xf]  ;;  %v1413_v26 = vshrl.u32 %v1052_v21, 16  ;;  %v1416_v28 = vshll.u32 %v1052_v21, 16 }
  0x30   : > { %v1515_v29 = vor.u32 %v1514_v19, %v1511_v18  ;;  %v1530_v30 = vrot.slane %v1528_v20, 5  ;;  %v1054_v31 = vld [vmem:[#allocation2 + $0x44] sm:$0x1]  ;;  %v1422_v32 = vshll.u32 %v1053_v25, 16  ;;  %v1426_v33 = vshrl.u32 %v1053_v25, 16 }
  0x31   : > { %v1525_v35 = vor.u32 %v1524_v24, %v1520_v23  ;;  %v1415_v36 = vrot.slane %v1413_v26, 4  ;;  %v1418_v37 = vrot.slane %v1416_v28, 5  ;;  %v1432_v38 = vshll.u32 %v1054_v31, 16  ;;  %v1076_v40 = vld [vmem:[#allocation2 + $0x9c] sm:$0xf] }
  0x32   : > { %v1516_v41 = vrot.slane %v1515_v29, 4  ;;  %v1424_v42 = vrot.slane %v1422_v32, 5  ;;  %v1428_v44 = vrot.slane %v1426_v33, 4  ;;  %v1605_v45 = vshrl.u32 %v1076_v40, 16  ;;  %555 = vst [vmem:[#allocation2 + $0x14] sm:$0x1] %v554_v51 }
  0x33   : > { %v1526_v46 = vrot.slane %v1525_v35, 4  ;;  %v1419_v47 = vor.u32 %v1418_v37, %v1415_v36  ;;  %v1434_v48 = vrot.slane %v1432_v38, 5  ;;  %v1077_v27 = vld [vmem:[#allocation2 + $0xa0] sm:$0xf]  ;;  %v1608_v39 = vshll.u32 %v1076_v40, 16 }
  0x34   : > { %v1521_v43 = vsel %vm4171_vm7, %v1516_v41, %v1520_v23  ;;  %v1429_v49 = vor.u32 %v1428_v44, %v1424_v42  ;;  %v1078_v50 = vld [vmem:[#allocation2 + $0xa4] sm:$0x1]  ;;  %v1607_v52 = vrot.slane %v1605_v45, 4  ;;  %v1614_v53 = vshll.u32 %v1077_v27, 16  ;;  %520 = vst [vmem:[#allocation2 + $0x48] sm:$0x1] %v519_v59 }
  0x35   : > { %v1531_v54 = vsel %vm4171_vm7, %v1526_v46, %v1530_v30  ;;  %v1718_v55 = vunpack.c.l.b16 %v1521_v43  ;;  %v1420_v56 = vrot.slane %v1419_v47, 4  ;;  %v1610_v57 = vrot.slane %v1608_v39, 5  ;;  %v925_v25 = vld [vmem:[#allocation2 + $0xc] sm:$0xf]  ;;  %v568_v30 = vld [vmem:[#allocation2 + $0x50] sm:$0x1] }
  0x36   : > { %v1719_v51 = vunpack.c.l.b16 %v1531_v54  ;;  %v1430_v58 = vrot.slane %v1429_v49, 4  ;;  %v1616_v61 = vrot.slane %v1614_v53, 5  ;;  %v1618_v63 = vshrl.u32 %v1077_v27, 16  ;;  %v556_v49 = vld [vmem:[#allocation2 + $0x20] sm:$0x1] }
  0x37   : > { %v1425_v0 = vsel %vm4171_vm7, %v1420_v56, %v1424_v42  ;;  %v1611_v2 = vor.u32 %v1610_v57, %v1607_v52  ;;  %v1624_v7 = vshll.u32 %v1078_v50, 16  ;;  %v606_v9 = vrot.slane %v604_v22, 7  ;;  %v506_v42 = vld [vmem:[#allocation2 + $0x18] sm:$0x1]  ;;  %v4213_v50 = vld [vmem:[%s4062_s25 + $0x30] sm:$0xff]  }
  0x38   : > { %v4181_v10 = vpack.c.b16 %v1719_v51, %v1718_v55  ;;  %v1435_v13 = vsel %vm4171_vm7, %v1430_v58, %v1434_v48  ;;  %v1710_v14 = vunpack.c.l.b16 %v1425_v0  ;;  %v1620_v15 = vrot.slane %v1618_v63, 4  ;;  %v521_v55 = vld [vmem:[#allocation2 + $0x54] sm:$0x1] }
  0x39   : > { %v1711_v18 = vunpack.c.l.b16 %v1435_v13  ;;  %v1612_v19 = vrot.slane %v1611_v2, 4  ;;  %v1626_v59 = vrot.slane %v1624_v7, 5  ;;  %v607_v20 = vshll.u32 %v4156_v4, 16  ;;  %v929_v35 = vld [vmem:[#allocation2 + $0x14] sm:$0x1] }
  0x3a   : > { %1767 = vrot.lane.b32.xlu0 %v4181_v10, %s3995_s28  ;;  %v1621_v21 = vor.u32 %v1620_v15, %v1616_v61  ;;  %v610_v23 = vrot.slane %v606_v9, 4  ;;  %v612_v22 = vshrl.u32 %v4159_v11, 16  ;;  %v615_v24 = vshll.u32 %v4159_v11, 16 }
  0x3b   : > { %v4190_v26 = vpack.c.b16 %v1711_v18, %v1710_v14  ;;  %v1617_v28 = vsel %vm4171_vm7, %v1612_v19, %v1616_v61  ;;  %v609_v29 = vor.u32 %v607_v20, %v606_v9  ;;  %v341_v4 = vadd.f32 %v4067_v6, %v4162_v12  ;;  %v960_v61 = vld [vmem:[#allocation2 + $0x48] sm:$0xf] }
  0x3c   : > { %v1622_v31 = vrot.slane %v1621_v21, 4  ;;  %v1726_v32 = vunpack.c.l.b16 %v1617_v28  ;;  %v614_v33 = vrot.slane %v612_v22, 7  ;;  %vm372_vm8 = vcmp.ge.f32.partialorder %v4165_v16, 0.0 }
  0x3d   : > { %1759 = vrot.lane.b32.xlu1 %v4190_v26, %s3995_s28  ;;  %v926_v11 = vsel %vm4110_vm14, %v609_v29, %v925_v25  ;;  %vm373_vm9 = vcmp.ge.f32.partialorder %v341_v4, 0.0  ;;  %v404_v36 = vmul.f32 0.2, %v4165_v16  ;;  %v405_v37 = vmul.f32 0.2, %v341_v4 }
  0x3e   : > { %v1627_v12 = vsel %vm4171_vm7, %v1622_v31, %v1626_v59  ;;  %v617_v38 = vor.u32 %v615_v24, %v614_v33  ;;  %v619_v40 = vrot.slane %v614_v33, 4  ;;  %927 = vst [vmem:[#allocation2 + $0xc] sm:$0xf] %v926_v11  ;;  %v569_v41 = vsel %vm4053_vm4, 0, %v568_v30 }
  0x3f   : > { %v1727_v44 = vunpack.c.l.b16 %v1627_v12  ;;  %v436_v45 = vsel %vm372_vm8, %v4165_v16, %v404_v36  ;;  %v437_v46 = vsel %vm373_vm9, %v341_v4, %v405_v37  ;;  %570 = vst [vmem:[#allocation2 + $0x50] sm:$0x1] %v569_v41  ;;  %v3678_v47 = vunpack.c.h.bf16 %v4150_v60 }
  0x40   : > { %v618_v48 = vsel %vm4103_vm13, %v610_v23, %v617_v38  ;;  %v930_v27 = vsel %vm4039_vm2, %v619_v40, %v929_v35  ;;  %v468_v39 = vpack.c.bf16 %v436_v45, %v436_v45  ;;  %v469_v43 = vpack.c.bf16 %v437_v46, %v437_v46 }
  0x41   : > { %v4215_v52 = vpack.c.b16 %v1727_v44, %v1726_v32  ;;  %928 = vst.msk [vmem:[#allocation2 + $0x10] sm:$0xf] %vm490_vm6, %v618_v48  ;;  %v296_v16 = vmul.f32 %v4047_v3, %v3677_v17  ;;  %v297_v53 = vmul.f32 %v4047_v3, %v3678_v47  ;;  %v507_v54 = vsel %vm4039_vm2, 0, %v506_v42 }
  0x42   : > { %931 = vst [vmem:[#allocation2 + $0x14] sm:$0x1] %v930_v27  ;;  %v689_v56 = vshrl.u32 %v468_v39, 16  ;;  %v692_v57 = vshll.u32 %v468_v39, 16  ;;  %v697_v51 = vshrl.u32 %v469_v43, 16  ;;  %v700_v58 = vshll.u32 %v469_v43, 16 }
  0x43   : > { %1775 = vrot.lane.b32.xlu0 %v4215_v52, %s3995_s28  ;;  %v332_v63 = vadd.f32 %v4067_v6, %v296_v16  ;;  %v333_v60 = vadd.f32 %v4067_v6, %v297_v53  ;;  %508 = vst [vmem:[#allocation2 + $0x18] sm:$0x1] %v507_v54  ;;  %v557_v17 = vsel %vm4053_vm4, 0, %v556_v49  ;;  %v3697_v0 = vunpack.c.l.bf16 %v4213_v50  ;;  %v571_v54 = vld [vmem:[#allocation2 + $0x5c] sm:$0x1] }
  0x44   : > { %v691_v2 = vrot.slane %v689_v56, 7  ;;  %v699_v7 = vrot.slane %v697_v51, 7  ;;  %558 = vst [vmem:[#allocation2 + $0x20] sm:$0x1] %v557_v17  ;;  %v3698_v9 = vunpack.c.h.bf16 %v4213_v50  ;;  %v522_v13 = vsel %vm4039_vm2, 0, %v521_v55 }
  0x45   : > { %v1040_v14 = vld [vmem:[#allocation2 + $0xc] sm:$0xf]  ;;  %vm364_vm10 = vcmp.ge.f32.partialorder %v332_v63, 0.0  ;;  %vm365_vm11 = vcmp.ge.f32.partialorder %v333_v60, 0.0  ;;  %v396_v15 = vmul.f32 0.2, %v332_v63  ;;  %v306_v18 = vmul.f32 %v4047_v3, %v3697_v0 }
  0x46   : > { %v1317_v19 = vshrl.u32 %v1040_v14, 16  ;;  %v1320_v59 = vshll.u32 %v1040_v14, 16  ;;  %v694_v20 = vor.u32 %v692_v57, %v691_v2  ;;  %v695_v21 = vrot.slane %v691_v2, 4  ;;  %v964_v23 = vld [vmem:[#allocation2 + $0x50] sm:$0x1] }
  0x47   : > { %v702_v22 = vor.u32 %v700_v58, %v699_v7  ;;  %v704_v24 = vrot.slane %v699_v7, 4  ;;  %v397_v25 = vmul.f32 0.2, %v333_v60  ;;  %v428_v28 = vsel %vm364_vm10, %v332_v63, %v396_v15  ;;  %523 = vst [vmem:[#allocation2 + $0x54] sm:$0x1] %v522_v13 }
  0x48   : > { %v1041_v29 = vld [vmem:[#allocation2 + $0x10] sm:$0xf]  ;;  %v1319_v4 = vrot.slane %v1317_v19, 4  ;;  %v1322_v30 = vrot.slane %v1320_v59, 5  ;;  %v961_v31 = vsel %vm4110_vm14, %v694_v20, %v960_v61  ;;  %v460_v32 = vpack.c.bf16 %v428_v28, %v428_v28 }
  0x49   : > { %v1042_v33 = vld [vmem:[#allocation2 + $0x14] sm:$0x1]  ;;  %v1326_v35 = vshll.u32 %v1041_v29, 16  ;;  %v1330_v11 = vshrl.u32 %v1041_v29, 16  ;;  %v703_v36 = vsel %vm4103_vm13, %v695_v21, %v702_v22  ;;  %962 = vst [vmem:[#allocation2 + $0x48] sm:$0xf] %v961_v31  ;;  %v965_v37 = vsel %vm4039_vm2, %v704_v24, %v964_v23 }
  0x4a   : > { %v1323_v12 = vor.u32 %v1322_v30, %v1319_v4  ;;  %v1336_v38 = vshll.u32 %v1042_v33, 16  ;;  %963 = vst.msk [vmem:[#allocation2 + $0x4c] sm:$0xf] %vm490_vm6, %v703_v36  ;;  %v429_v40 = vsel %vm365_vm11, %v333_v60, %v397_v25  ;;  %v621_v41 = vshrl.u32 %v460_v32, 16  ;;  %v932_v16 = vld [vmem:[#allocation2 + $0x18] sm:$0xf] }
  0x4b   : > { %v1328_v42 = vrot.slane %v1326_v35, 5  ;;  %v1332_v44 = vrot.slane %v1330_v11, 4  ;;  %966 = vst [vmem:[#allocation2 + $0x50] sm:$0x1] %v965_v37  ;;  %v461_v45 = vpack.c.bf16 %v429_v40, %v429_v40  ;;  %v624_v46 = vshll.u32 %v460_v32, 16  ;;  %v3823_v4 = vld [vmem:[%s4062_s25 + $0x48] sm:$0xff]  }
  0x4c   : > { %v1324_v47 = vrot.slane %v1323_v12, 4  ;;  %v1338_v48 = vrot.slane %v1336_v38, 5  ;;  %v623_v27 = vrot.slane %v621_v41, 7  ;;  %v307_v39 = vmul.f32 %v4047_v3, %v3698_v9  ;;  %v936_v60 = vld [vmem:[#allocation2 + $0x20] sm:$0x1] }
  0x4d   : > { %v1333_v43 = vor.u32 %v1332_v44, %v1328_v42  ;;  %v629_v49 = vshrl.u32 %v461_v45, 16  ;;  %v632_v50 = vshll.u32 %v461_v45, 16  ;;  %v342_v53 = vadd.f32 %v4067_v6, %v306_v18  ;;  %v530_v22 = vld [vmem:[#allocation2 + $0x78] sm:$0x1]  ;;  %v580_v35 = vld [vmem:[#allocation2 + $0x80] sm:$0x1] }
  0x4e   : > { %v1329_v55 = vsel %vm4171_vm7, %v1324_v47, %v1328_v42  ;;  %v626_v56 = vor.u32 %v624_v46, %v623_v27  ;;  %v627_v57 = vrot.slane %v623_v27, 4  ;;  %v343_v51 = vadd.f32 %v4067_v6, %v307_v39 }
  0x4f   : > { %v1334_v58 = vrot.slane %v1333_v43, 4  ;;  %v1702_v61 = vunpack.c.l.b16 %v1329_v55  ;;  %v631_v63 = vrot.slane %v629_v49, 7  ;;  %vm374_vm12 = vcmp.ge.f32.partialorder %v342_v53, 0.0 }
  0x50   : > { %v1055_v17 = vld [vmem:[#allocation2 + $0x48] sm:$0xf]  ;;  %v933_v0 = vsel %vm4110_vm14, %v626_v56, %v932_v16  ;;  %vm375_vm15 = vcmp.ge.f32.partialorder %v343_v51, 0.0  ;;  %v406_v2 = vmul.f32 0.2, %v342_v53  ;;  %v572_v7 = vsel %vm4053_vm4, 0, %v571_v54 }
  0x51   : > { %v1339_v9 = vsel %vm4171_vm7, %v1334_v58, %v1338_v48  ;;  %v1056_v13 = vld [vmem:[#allocation2 + $0x4c] sm:$0xf]  ;;  %v1437_v14 = vshrl.u32 %v1055_v17, 16  ;;  %v1440_v15 = vshll.u32 %v1055_v17, 16  ;;  %v634_v18 = vor.u32 %v632_v50, %v631_v63  ;;  %934 = vst [vmem:[#allocation2 + $0x18] sm:$0xf] %v933_v0 }
  0x52   : > { %v1703_v19 = vunpack.c.l.b16 %v1339_v9  ;;  %v1057_v59 = vld [vmem:[#allocation2 + $0x50] sm:$0x1]  ;;  %v1446_v20 = vshll.u32 %v1056_v13, 16  ;;  %v1450_v21 = vshrl.u32 %v1056_v13, 16  ;;  %v636_v23 = vrot.slane %v631_v63, 4 }
  0x53   : > { %v1439_v24 = vrot.slane %v1437_v14, 4  ;;  %v1442_v25 = vrot.slane %v1440_v15, 5  ;;  %v1456_v28 = vshll.u32 %v1057_v59, 16  ;;  %v635_v29 = vsel %vm4103_vm13, %v627_v57, %v634_v18  ;;  %573 = vst [vmem:[#allocation2 + $0x5c] sm:$0x1] %v572_v7 }
  0x54   : > { %v4257_v30 = vpack.c.b16 %v1703_v19, %v1702_v61  ;;  %v1448_v31 = vrot.slane %v1446_v20, 5  ;;  %v1452_v32 = vrot.slane %v1450_v21, 4  ;;  %935 = vst.msk [vmem:[#allocation2 + $0x1c] sm:$0xf] %vm490_vm6, %v635_v29  ;;  %v937_v33 = vsel %vm4039_vm2, %v636_v23, %v936_v60  ;;  %v967_v58 = vld [vmem:[#allocation2 + $0x54] sm:$0xf] }
  0x55   : > { %v1443_v11 = vor.u32 %v1442_v25, %v1439_v24  ;;  %v1458_v36 = vrot.slane %v1456_v28, 5  ;;  %938 = vst [vmem:[#allocation2 + $0x20] sm:$0x1] %v937_v33  ;;  %v407_v37 = vmul.f32 0.2, %v343_v51  ;;  %v438_v12 = vsel %vm374_vm12, %v342_v53, %v406_v2  ;;  %v3828_v20 = vld [vmem:[%s4062_s25 + $0x70] sm:$0xff]  }
  0x56   : > { %1751 = vrot.lane.b32.xlu1 %v4257_v30, %s3995_s28  ;;  %v1453_v38 = vor.u32 %v1452_v32, %v1448_v31  ;;  %v470_v40 = vpack.c.bf16 %v438_v12, %v438_v12  ;;  %v3709_v41 = vunpack.c.l.bf16 %v3823_v4  ;;  %v3710_v42 = vunpack.c.h.bf16 %v3823_v4 }
  0x57   : > { %v1444_v44 = vrot.slane %v1443_v11, 4  ;;  %v439_v45 = vsel %vm375_vm15, %v343_v51, %v407_v37  ;;  %v531_v46 = vsel %vm4039_vm2, 0, %v530_v22  ;;  %v581_v47 = vsel %vm4053_vm4, 0, %v580_v35 }
  0x58   : > { %v1454_v48 = vrot.slane %v1453_v38, 4  ;;  %v1043_v27 = vld [vmem:[#allocation2 + $0x18] sm:$0xf]  ;;  %v471_v39 = vpack.c.bf16 %v439_v45, %v439_v45  ;;  %v706_v43 = vshrl.u32 %v470_v40, 16  ;;  %v709_v49 = vshll.u32 %v470_v40, 16 }
  0x59   : > { %v1449_v50 = vsel %vm4171_vm7, %v1444_v44, %v1448_v31  ;;  %v1341_v16 = vshrl.u32 %v1043_v27, 16  ;;  %v1344_v53 = vshll.u32 %v1043_v27, 16  ;;  %v312_v54 = vmul.f32 %v4047_v3, %v3709_v41  ;;  %532 = vst [vmem:[#allocation2 + $0x78] sm:$0x1] %v531_v46  ;;  %v545_v40 = vld [vmem:[#allocation2 + $0xb4] sm:$0x1] }
  0x5a   : > { %v1459_v55 = vsel %vm4171_vm7, %v1454_v48, %v1458_v36  ;;  %v1712_v56 = vunpack.c.l.b16 %v1449_v50  ;;  %v708_v57 = vrot.slane %v706_v43, 7  ;;  %v714_v51 = vshrl.u32 %v471_v39, 16  ;;  %582 = vst [vmem:[#allocation2 + $0x80] sm:$0x1] %v581_v47  ;;  %v971_v24 = vld [vmem:[#allocation2 + $0x5c] sm:$0x1] }
  0x5b   : > { %v1713_v61 = vunpack.c.l.b16 %v1459_v55  ;;  %v1044_v63 = vld [vmem:[#allocation2 + $0x1c] sm:$0xf]  ;;  %v1343_v60 = vrot.slane %v1341_v16, 4  ;;  %v1346_v17 = vrot.slane %v1344_v53, 5  ;;  %v717_v0 = vshll.u32 %v471_v39, 16 }
  0x5c   : > { %v1045_v2 = vld [vmem:[#allocation2 + $0x20] sm:$0x1]  ;;  %v1350_v7 = vshll.u32 %v1044_v63, 16  ;;  %v1354_v9 = vshrl.u32 %v1044_v63, 16  ;;  %v711_v13 = vor.u32 %v709_v49, %v708_v57  ;;  %v712_v14 = vrot.slane %v708_v57, 4  ;;  %v4586_v1 = vld [vmem:[#allocation2 + $0x18] sm:$0xff] }
  0x5d   : > { %v4275_v15 = vpack.c.b16 %v1713_v61, %v1712_v56  ;;  %v1347_v18 = vor.u32 %v1346_v17, %v1343_v60  ;;  %v1360_v19 = vshll.u32 %v1045_v2, 16  ;;  %v716_v59 = vrot.slane %v714_v51, 7  ;;  %v595_v41 = vld [vmem:[#allocation2 + $0xbc] sm:$0x1] }
  0x5e   : > { %v1352_v21 = vrot.slane %v1350_v7, 5  ;;  %v1356_v23 = vrot.slane %v1354_v9, 4  ;;  %v968_v22 = vsel %vm4110_vm14, %v711_v13, %v967_v58  ;;  %v313_v25 = vmul.f32 %v4047_v3, %v3710_v42  ;;  %v4292_v42 = vld [vmem:[%s4062_s25 + $0x68] sm:$0xff]  }
  0x5f   : > { %1761 = vrot.lane.b32.xlu0 %v4275_v15, %s3995_s28  ;;  %v1348_v28 = vrot.slane %v1347_v18, 4  ;;  %v1362_v29 = vrot.slane %v1360_v19, 5  ;;  %v719_v4 = vor.u32 %v717_v0, %v716_v59  ;;  %v721_v31 = vrot.slane %v716_v59, 4  ;;  %969 = vst [vmem:[#allocation2 + $0x54] sm:$0xf] %v968_v22 }
  0x60   : > { %v1357_v32 = vor.u32 %v1356_v23, %v1352_v21  ;;  %v348_v33 = vadd.f32 %v4067_v6, %v312_v54  ;;  %v349_v35 = vadd.f32 %v4067_v6, %v313_v25  ;;  %v3729_v11 = vunpack.c.l.bf16 %v3828_v20  ;;  %v988_v19 = vld [vmem:[#allocation2 + $0x78] sm:$0xf] }
  0x61   : > { %v1353_v36 = vsel %vm4171_vm7, %v1348_v28, %v1352_v21  ;;  %v720_v37 = vsel %vm4103_vm13, %v712_v14, %v719_v4  ;;  %v972_v12 = vsel %vm4039_vm2, %v721_v31, %v971_v24  ;;  %v3730_v38 = vunpack.c.h.bf16 %v3828_v20 }
  0x62   : > { %v1358_v44 = vrot.slane %v1357_v32, 4  ;;  %v1704_v45 = vunpack.c.l.b16 %v1353_v36  ;;  %970 = vst.msk [vmem:[#allocation2 + $0x58] sm:$0xf] %vm490_vm6, %v720_v37  ;;  %vm380_vm1 = vcmp.ge.f32.partialorder %v348_v33, 0.0  ;;  %vm381_vm3 = vcmp.ge.f32.partialorder %v349_v35, 0.0 }
  0x63   : > { %973 = vst [vmem:[#allocation2 + $0x5c] sm:$0x1] %v972_v12  ;;  %v412_v46 = vmul.f32 0.2, %v348_v33  ;;  %v413_v47 = vmul.f32 0.2, %v349_v35  ;;  %v322_v48 = vmul.f32 %v4047_v3, %v3729_v11  ;;  %v323_v27 = vmul.f32 %v4047_v3, %v3730_v38 }
  0x64   : > { %v1363_v39 = vsel %vm4171_vm7, %v1358_v44, %v1362_v29  ;;  %v546_v43 = vsel %vm4039_vm2, 0, %v545_v40  ;;  %v596_v49 = vsel %vm4053_vm4, 0, %v595_v41  ;;  %v3725_v50 = vunpack.c.l.bf16 %v4292_v42  ;;  %v992_v11 = vld [vmem:[#allocation2 + $0x80] sm:$0x1] }
  0x65   : > { %v1705_v16 = vunpack.c.l.b16 %v1363_v39  ;;  %v444_v53 = vsel %vm380_vm1, %v348_v33, %v412_v46  ;;  %v445_v54 = vsel %vm381_vm3, %v349_v35, %v413_v47  ;;  %v358_v55 = vadd.f32 %v4067_v6, %v322_v48  ;;  %547 = vst [vmem:[#allocation2 + $0xb4] sm:$0x1] %v546_v43 }
  0x66   : > { %v1058_v56 = vld [vmem:[#allocation2 + $0x54] sm:$0xf]  ;;  %v476_v57 = vpack.c.bf16 %v444_v53, %v444_v53  ;;  %v477_v51 = vpack.c.bf16 %v445_v54, %v445_v54  ;;  %v359_v58 = vadd.f32 %v4067_v6, %v323_v27  ;;  %597 = vst [vmem:[#allocation2 + $0xbc] sm:$0x1] %v596_v49  ;;  %v3726_v61 = vunpack.c.h.bf16 %v4292_v42 }
  0x67   : > { %v4307_v63 = vpack.c.b16 %v1705_v16, %v1704_v45  ;;  %v1461_v60 = vshrl.u32 %v1058_v56, 16  ;;  %v1464_v17 = vshll.u32 %v1058_v56, 16  ;;  %vm390_vm5 = vcmp.ge.f32.partialorder %v358_v55, 0.0  ;;  %v542_v45 = vld [vmem:[#allocation2 + $0xa8] sm:$0x1] }
  0x68   : > { %v757_v0 = vshrl.u32 %v476_v57, 16  ;;  %v760_v2 = vshll.u32 %v476_v57, 16  ;;  %v765_v7 = vshrl.u32 %v477_v51, 16  ;;  %v768_v9 = vshll.u32 %v477_v51, 16  ;;  %v592_v16 = vld [vmem:[#allocation2 + $0xb0] sm:$0x1] }
  0x69   : > { %1753 = vrot.lane.b32.xlu1 %v4307_v63, %s3995_s28  ;;  %v1059_v13 = vld [vmem:[#allocation2 + $0x58] sm:$0xf]  ;;  %v1463_v14 = vrot.slane %v1461_v60, 4  ;;  %v1466_v18 = vrot.slane %v1464_v17, 5  ;;  %vm391_vm8 = vcmp.ge.f32.partialorder %v359_v58, 0.0  ;;  %v320_v59 = vmul.f32 %v4047_v3, %v3725_v50 }
  0x6a   : > { %v1060_v20 = vld [vmem:[#allocation2 + $0x5c] sm:$0x1]  ;;  %v1470_v21 = vshll.u32 %v1059_v13, 16  ;;  %v1474_v23 = vshrl.u32 %v1059_v13, 16  ;;  %v759_v22 = vrot.slane %v757_v0, 7  ;;  %v767_v24 = vrot.slane %v765_v7, 7 }
  0x6b   : > { %v1467_v25 = vor.u32 %v1466_v18, %v1463_v14  ;;  %v1480_v28 = vshll.u32 %v1060_v20, 16  ;;  %v422_v29 = vmul.f32 0.2, %v358_v55  ;;  %v423_v4 = vmul.f32 0.2, %v359_v58 }
  0x6c   : > { %v1472_v31 = vrot.slane %v1470_v21, 5  ;;  %v1476_v32 = vrot.slane %v1474_v23, 4  ;;  %v762_v33 = vor.u32 %v760_v2, %v759_v22  ;;  %v763_v35 = vrot.slane %v759_v22, 4 }
  0x6d   : > { %v1468_v36 = vrot.slane %v1467_v25, 4  ;;  %v1482_v37 = vrot.slane %v1480_v28, 5  ;;  %v770_v12 = vor.u32 %v768_v9, %v767_v24  ;;  %v772_v38 = vrot.slane %v767_v24, 4 }
  0x6e   : > { %v1477_v40 = vor.u32 %v1476_v32, %v1472_v31  ;;  %v989_v41 = vsel %vm4110_vm14, %v762_v33, %v988_v19  ;;  %v454_v42 = vsel %vm390_vm5, %v358_v55, %v422_v29  ;;  %v455_v44 = vsel %vm391_vm8, %v359_v58, %v423_v4  ;;  %v1027_v19 = vld [vmem:[#allocation2 + $0xbc] sm:$0x1] }
  0x6f   : > { %v1473_v46 = vsel %vm4171_vm7, %v1468_v36, %v1472_v31  ;;  %v771_v47 = vsel %vm4103_vm13, %v763_v35, %v770_v12  ;;  %990 = vst [vmem:[#allocation2 + $0x78] sm:$0xf] %v989_v41  ;;  %v993_v48 = vsel %vm4039_vm2, %v772_v38, %v992_v11  ;;  %v486_v27 = vpack.c.bf16 %v454_v42, %v454_v42  ;;  %v3825_v31 = vld [vmem:[%s4062_s25 + $0x58] sm:$0xff]  }
  0x70   : > { %v1478_v39 = vrot.slane %v1477_v40, 4  ;;  %v1714_v43 = vunpack.c.l.b16 %v1473_v46  ;;  %991 = vst.msk [vmem:[#allocation2 + $0x7c] sm:$0xf] %vm490_vm6, %v771_v47  ;;  %v487_v49 = vpack.c.bf16 %v455_v44, %v455_v44  ;;  %v321_v50 = vmul.f32 %v4047_v3, %v3726_v61  ;;  %v1023_v3 = vld [vmem:[#allocation2 + $0xb4] sm:$0xf] }
  0x71   : > { %994 = vst [vmem:[#allocation2 + $0x80] sm:$0x1] %v993_v48  ;;  %v842_v53 = vshrl.u32 %v486_v27, 16  ;;  %v845_v54 = vshll.u32 %v486_v27, 16  ;;  %v356_v55 = vadd.f32 %v4067_v6, %v320_v59  ;;  %v543_v56 = vsel %vm4039_vm2, 0, %v542_v45 }
  0x72   : > { %v1483_v57 = vsel %vm4171_vm7, %v1478_v39, %v1482_v37  ;;  %v850_v51 = vshrl.u32 %v487_v49, 16  ;;  %v853_v58 = vshll.u32 %v487_v49, 16  ;;  %v357_v60 = vadd.f32 %v4067_v6, %v321_v50  ;;  %544 = vst [vmem:[#allocation2 + $0xa8] sm:$0x1] %v543_v56  ;;  %v536_v37 = vld [vmem:[#allocation2 + $0x90] sm:$0x1] }
  0x73   : > { %v1715_v17 = vunpack.c.l.b16 %v1483_v57  ;;  %v844_v0 = vrot.slane %v842_v53, 7  ;;  %vm388_vm9 = vcmp.ge.f32.partialorder %v356_v55, 0.0  ;;  %v420_v61 = vmul.f32 0.2, %v356_v55 }
  0x74   : > { %v852_v2 = vrot.slane %v850_v51, 7  ;;  %vm389_vm10 = vcmp.ge.f32.partialorder %v357_v60, 0.0  ;;  %v421_v7 = vmul.f32 0.2, %v357_v60  ;;  %v593_v9 = vsel %vm4053_vm4, 0, %v592_v16 }
  0x75   : > { %v4332_v13 = vpack.c.b16 %v1715_v17, %v1714_v43  ;;  %v847_v14 = vor.u32 %v845_v54, %v844_v0  ;;  %v848_v18 = vrot.slane %v844_v0, 4  ;;  %v452_v59 = vsel %vm388_vm9, %v356_v55, %v420_v61  ;;  %594 = vst [vmem:[#allocation2 + $0xb0] sm:$0x1] %v593_v9  ;;  %v586_v54 = vld [vmem:[#allocation2 + $0x98] sm:$0x1] }
  0x76   : > { %v1067_v6 = vld [vmem:[#allocation2 + $0x78] sm:$0xf]  ;;  %v855_v20 = vor.u32 %v853_v58, %v852_v2  ;;  %v857_v21 = vrot.slane %v852_v2, 4  ;;  %v453_v23 = vsel %vm389_vm10, %v357_v60, %v421_v7  ;;  %v484_v22 = vpack.c.bf16 %v452_v59, %v452_v59  ;;  %v4349_v0 = vld [vmem:[%s5313_s3] ss:$0 sm:$0xff] }
  0x77   : > { %1763 = vrot.lane.b32.xlu1 %v4332_v13, %s3995_s28  ;;  %v1068_v24 = vld [vmem:[#allocation2 + $0x7c] sm:$0xf]  ;;  %v1533_v25 = vshrl.u32 %v1067_v6, 16  ;;  %v1536_v28 = vshll.u32 %v1067_v6, 16  ;;  %v1024_v29 = vsel %vm4110_vm14, %v847_v14, %v1023_v3  ;;  %v485_v4 = vpack.c.bf16 %v453_v23, %v453_v23 }
  0x78   : > { %v1069_v32 = vld [vmem:[#allocation2 + $0x80] sm:$0x1]  ;;  %v1542_v33 = vshll.u32 %v1068_v24, 16  ;;  %v1546_v35 = vshrl.u32 %v1068_v24, 16  ;;  %v856_v11 = vsel %vm4103_vm13, %v848_v18, %v855_v20  ;;  %1025 = vst [vmem:[#allocation2 + $0xb4] sm:$0xf] %v1024_v29  ;;  %v1028_v36 = vsel %vm4039_vm2, %v857_v21, %v1027_v19 }
  0x79   : > { %v1535_v12 = vrot.slane %v1533_v25, 4  ;;  %v1538_v38 = vrot.slane %v1536_v28, 5  ;;  %v1552_v40 = vshll.u32 %v1069_v32, 16  ;;  %1026 = vst.msk [vmem:[#allocation2 + $0xb8] sm:$0xf] %vm490_vm6, %v856_v11  ;;  %v825_v41 = vshrl.u32 %v484_v22, 16 }
  0x7a   : > { %v1544_v42 = vrot.slane %v1542_v33, 5  ;;  %v1548_v44 = vrot.slane %v1546_v35, 4  ;;  %1029 = vst [vmem:[#allocation2 + $0xbc] sm:$0x1] %v1028_v36  ;;  %v828_v45 = vshll.u32 %v484_v22, 16  ;;  %v833_v46 = vshrl.u32 %v485_v4, 16 }
  0x7b   : > { %v1539_v47 = vor.u32 %v1538_v38, %v1535_v12  ;;  %v1554_v48 = vrot.slane %v1552_v40, 5  ;;  %v827_v27 = vrot.slane %v825_v41, 7  ;;  %v836_v39 = vshll.u32 %v485_v4, 16  ;;  %v1016_v50 = vld [vmem:[#allocation2 + $0xa8] sm:$0xf]  ;;  %v3824_v19 = vld [vmem:[%s4062_s25 + $0x50] sm:$0xff]  }
  0x7c   : > { %v1549_v43 = vor.u32 %v1548_v44, %v1544_v42  ;;  %v835_v49 = vrot.slane %v833_v46, 7  ;;  %v3717_v16 = vunpack.c.l.bf16 %v3825_v31  ;;  %v3718_v53 = vunpack.c.h.bf16 %v3825_v31  ;;  %v1020_v9 = vld [vmem:[#allocation2 + $0xb0] sm:$0x1]  ;;  %v533_v44 = vld [vmem:[#allocation2 + $0x84] sm:$0x1] }
  0x7d   : > { %v1540_v55 = vrot.slane %v1539_v47, 4  ;;  %v830_v56 = vor.u32 %v828_v45, %v827_v27  ;;  %v831_v57 = vrot.slane %v827_v27, 4  ;;  %v537_v51 = vsel %vm4039_vm2, 0, %v536_v37  ;;  %v4372_v37 = vld [vmem:[%s5314_s4] ss:$0 sm:$0xff] }
  0x7e   : > { %v1550_v58 = vrot.slane %v1549_v43, 4  ;;  %v838_v60 = vor.u32 %v836_v39, %v835_v49  ;;  %v840_v17 = vrot.slane %v835_v49, 4  ;;  %v316_v3 = vmul.f32 %v4349_v0, %v3717_v16  ;;  %538 = vst [vmem:[#allocation2 + $0x90] sm:$0x1] %v537_v51 }
  0x7f   : > { %v1545_v61 = vsel %vm4171_vm7, %v1540_v55, %v1544_v42  ;;  %v1082_v2 = vld [vmem:[#allocation2 + $0xb4] sm:$0xf]  ;;  %v1017_v7 = vsel %vm4110_vm14, %v830_v56, %v1016_v50  ;;  %v317_v14 = vmul.f32 %v4349_v0, %v3718_v53  ;;  %v587_v18 = vsel %vm4053_vm4, 0, %v586_v54 }
  0x80   : > { %v1555_v59 = vsel %vm4171_vm7, %v1550_v58, %v1554_v48  ;;  %v1720_v6 = vunpack.c.l.b16 %v1545_v61  ;;  %v1083_v20 = vld [vmem:[#allocation2 + $0xb8] sm:$0xf]  ;;  %v1653_v21 = vshrl.u32 %v1082_v2, 16  ;;  %v1656_v23 = vshll.u32 %v1082_v2, 16  ;;  %1018 = vst [vmem:[#allocation2 + $0xa8] sm:$0xf] %v1017_v7 }
  0x81   : > { %v1721_v22 = vunpack.c.l.b16 %v1555_v59  ;;  %v1084_v24 = vld [vmem:[#allocation2 + $0xbc] sm:$0x1]  ;;  %v1662_v25 = vshll.u32 %v1083_v20, 16  ;;  %v1666_v28 = vshrl.u32 %v1083_v20, 16  ;;  %v839_v29 = vsel %vm4103_vm13, %v831_v57, %v838_v60  ;;  %588 = vst [vmem:[#allocation2 + $0x98] sm:$0x1] %v587_v18 }
  0x82   : > { %v1655_v4 = vrot.slane %v1653_v21, 4  ;;  %v1658_v31 = vrot.slane %v1656_v23, 5  ;;  %v1672_v32 = vshll.u32 %v1084_v24, 16  ;;  %1019 = vst.msk [vmem:[#allocation2 + $0xac] sm:$0xf] %vm490_vm6, %v839_v29  ;;  %v1021_v33 = vsel %vm4039_vm2, %v840_v17, %v1020_v9 }
  0x83   : > { %v4367_v35 = vpack.c.b16 %v1721_v22, %v1720_v6  ;;  %v1664_v11 = vrot.slane %v1662_v25, 5  ;;  %v1668_v36 = vrot.slane %v1666_v28, 4  ;;  %1022 = vst [vmem:[#allocation2 + $0xb0] sm:$0x1] %v1021_v33  ;;  %v352_v12 = vadd.f32 %v4372_v37, %v316_v3  ;;  %v583_v24 = vld [vmem:[#allocation2 + $0x8c] sm:$0x1] }
  0x84   : > { %v1659_v38 = vor.u32 %v1658_v31, %v1655_v4  ;;  %v1674_v40 = vrot.slane %v1672_v32, 5  ;;  %v353_v41 = vadd.f32 %v4372_v37, %v317_v14  ;;  %v3713_v42 = vunpack.c.l.bf16 %v3824_v19 }
  0x85   : > { %1769 = vrot.lane.b32.xlu2 %v4367_v35, %s3995_s28  ;;  %v1669_v45 = vor.u32 %v1668_v36, %v1664_v11  ;;  %vm384_vm11 = vcmp.ge.f32.partialorder %v352_v12, 0.0  ;;  %v416_v46 = vmul.f32 0.2, %v352_v12  ;;  %v3714_v47 = vunpack.c.h.bf16 %v3824_v19  ;;  %v1002_v33 = vld [vmem:[#allocation2 + $0x90] sm:$0xf] }
  0x86   : > { %v1660_v48 = vrot.slane %v1659_v38, 4  ;;  %vm385_vm12 = vcmp.ge.f32.partialorder %v353_v41, 0.0  ;;  %v417_v27 = vmul.f32 0.2, %v353_v41  ;;  %v314_v39 = vmul.f32 %v4349_v0, %v3713_v42 }
  0x87   : > { %v1670_v43 = vrot.slane %v1669_v45, 4  ;;  %v1079_v49 = vld [vmem:[#allocation2 + $0xa8] sm:$0xf]  ;;  %v448_v50 = vsel %vm384_vm11, %v352_v12, %v416_v46  ;;  %v315_v16 = vmul.f32 %v4349_v0, %v3714_v47  ;;  %v534_v53 = vsel %vm4039_vm2, 0, %v533_v44  ;;  %v3817_v44 = vld [vmem:[%s4062_s25 + $0x18] sm:$0xff]  }
  0x88   : > { %v1665_v54 = vsel %vm4171_vm7, %v1660_v48, %v1664_v11  ;;  %v1629_v55 = vshrl.u32 %v1079_v49, 16  ;;  %v1632_v56 = vshll.u32 %v1079_v49, 16  ;;  %v449_v57 = vsel %vm385_vm12, %v353_v41, %v417_v27  ;;  %535 = vst [vmem:[#allocation2 + $0x84] sm:$0x1] %v534_v53  ;;  %v1006_v41 = vld [vmem:[#allocation2 + $0x98] sm:$0x1] }
  0x89   : > { %v1675_v51 = vsel %vm4171_vm7, %v1670_v43, %v1674_v40  ;;  %v1730_v58 = vunpack.c.l.b16 %v1665_v54  ;;  %v1080_v60 = vld [vmem:[#allocation2 + $0xac] sm:$0xf]  ;;  %v480_v17 = vpack.c.bf16 %v448_v50, %v448_v50  ;;  %v481_v3 = vpack.c.bf16 %v449_v57, %v449_v57  ;;  %v512_v48 = vld [vmem:[#allocation2 + $0x30] sm:$0x1]  ;;  %v562_v49 = vld [vmem:[#allocation2 + $0x38] sm:$0x1] }
  0x8a   : > { %v1731_v61 = vunpack.c.l.b16 %v1675_v51  ;;  %v1081_v2 = vld [vmem:[#allocation2 + $0xb0] sm:$0x1]  ;;  %v1631_v7 = vrot.slane %v1629_v55, 4  ;;  %v1634_v9 = vrot.slane %v1632_v56, 5  ;;  %v1638_v14 = vshll.u32 %v1080_v60, 16 }
  0x8b   : > { %v1642_v18 = vshrl.u32 %v1080_v60, 16  ;;  %v1648_v19 = vshll.u32 %v1081_v2, 16  ;;  %v791_v59 = vshrl.u32 %v480_v17, 16  ;;  %v794_v6 = vshll.u32 %v480_v17, 16  ;;  %v548_v60 = vld [vmem:[#allocation2 + $0xc0] sm:$0x1] }
  0x8c   : > { %v4386_v20 = vpack.c.b16 %v1731_v61, %v1730_v58  ;;  %v1635_v21 = vor.u32 %v1634_v9, %v1631_v7  ;;  %v1640_v23 = vrot.slane %v1638_v14, 5  ;;  %v799_v22 = vshrl.u32 %v481_v3, 16  ;;  %v3829_v58 = vld [vmem:[%s4062_s25 + $0x78] sm:$0xff]  }
  0x8d   : > { %v1644_v25 = vrot.slane %v1642_v18, 4  ;;  %v1650_v28 = vrot.slane %v1648_v19, 5  ;;  %v793_v29 = vrot.slane %v791_v59, 7  ;;  %v802_v4 = vshll.u32 %v481_v3, 16 }
  0x8e   : > { %1779 = vrot.lane.b32.xlu0 %v4386_v20, %s3995_s28  ;;  %v1636_v31 = vrot.slane %v1635_v21, 4  ;;  %v801_v32 = vrot.slane %v799_v22, 7  ;;  %v350_v11 = vadd.f32 %v4372_v37, %v314_v39  ;;  %v351_v36 = vadd.f32 %v4372_v37, %v315_v16 }
  0x8f   : > { %v1645_v12 = vor.u32 %v1644_v25, %v1640_v23  ;;  %v796_v38 = vor.u32 %v794_v6, %v793_v29  ;;  %v797_v40 = vrot.slane %v793_v29, 4  ;;  %v584_v42 = vsel %vm4053_vm4, 0, %v583_v24  ;;  %v995_v29 = vld [vmem:[#allocation2 + $0x84] sm:$0xf] }
  0x90   : > { %v1641_v45 = vsel %vm4171_vm7, %v1636_v31, %v1640_v23  ;;  %v804_v46 = vor.u32 %v802_v4, %v801_v32  ;;  %v806_v47 = vrot.slane %v801_v32, 4  ;;  %vm382_vm15 = vcmp.ge.f32.partialorder %v350_v11, 0.0  ;;  %585 = vst [vmem:[#allocation2 + $0x8c] sm:$0x1] %v584_v42  ;;  %v4420_v23 = vld [vmem:[%s4062_s25 + $0x10] sm:$0xff]  }
  0x91   : > { %v1646_v27 = vrot.slane %v1645_v12, 4  ;;  %v1728_v39 = vunpack.c.l.b16 %v1641_v45  ;;  %v1003_v43 = vsel %vm4110_vm14, %v796_v38, %v1002_v33  ;;  %vm383_vm1 = vcmp.ge.f32.partialorder %v351_v36, 0.0 }
  0x92   : > { %v805_v50 = vsel %vm4103_vm13, %v797_v40, %v804_v46  ;;  %1004 = vst [vmem:[#allocation2 + $0x90] sm:$0xf] %v1003_v43  ;;  %v1007_v16 = vsel %vm4039_vm2, %v806_v47, %v1006_v41  ;;  %v414_v53 = vmul.f32 0.2, %v350_v11  ;;  %v415_v54 = vmul.f32 0.2, %v351_v36 }
  0x93   : > { %v1651_v55 = vsel %vm4171_vm7, %v1646_v27, %v1650_v28  ;;  %1005 = vst.msk [vmem:[#allocation2 + $0x94] sm:$0xf] %vm490_vm6, %v805_v50  ;;  %v3685_v56 = vunpack.c.l.bf16 %v3817_v44  ;;  %v3686_v57 = vunpack.c.h.bf16 %v3817_v44  ;;  %v513_v51 = vsel %vm4039_vm2, 0, %v512_v48 }
  0x94   : > { %v1729_v17 = vunpack.c.l.b16 %v1651_v55  ;;  %1008 = vst [vmem:[#allocation2 + $0x98] sm:$0x1] %v1007_v16  ;;  %v446_v3 = vsel %vm382_vm15, %v350_v11, %v414_v53  ;;  %v447_v61 = vsel %vm383_vm1, %v351_v36, %v415_v54  ;;  %v563_v2 = vsel %vm4053_vm4, 0, %v562_v49 }
  0x95   : > { %v478_v7 = vpack.c.bf16 %v446_v3, %v446_v3  ;;  %v479_v9 = vpack.c.bf16 %v447_v61, %v447_v61  ;;  %v300_v14 = vmul.f32 %v4349_v0, %v3685_v56  ;;  %v301_v18 = vmul.f32 %v4349_v0, %v3686_v57  ;;  %514 = vst [vmem:[#allocation2 + $0x30] sm:$0x1] %v513_v51  ;;  %v598_v57 = vld [vmem:[#allocation2 + $0xc8] sm:$0x1] }
  0x96   : > { %v4415_v19 = vpack.c.b16 %v1729_v17, %v1728_v39  ;;  %564 = vst [vmem:[#allocation2 + $0x38] sm:$0x1] %v563_v2  ;;  %v3733_v59 = vunpack.c.l.bf16 %v3829_v58  ;;  %v3734_v6 = vunpack.c.h.bf16 %v3829_v58  ;;  %v549_v21 = vsel %vm4039_vm2, 0, %v548_v60 }
  0x97   : > { %v774_v22 = vshrl.u32 %v478_v7, 16  ;;  %v777_v24 = vshll.u32 %v478_v7, 16  ;;  %v782_v25 = vshrl.u32 %v479_v9, 16  ;;  %v785_v28 = vshll.u32 %v479_v9, 16  ;;  %550 = vst [vmem:[#allocation2 + $0xc0] sm:$0x1] %v549_v21 }
  0x98   : > { %1777 = vrot.lane.b32.xlu2 %v4415_v19, %s3995_s28  ;;  %v336_v4 = vadd.f32 %v4372_v37, %v300_v14  ;;  %v337_v31 = vadd.f32 %v4372_v37, %v301_v18  ;;  %v324_v32 = vmul.f32 %v4349_v0, %v3733_v59  ;;  %v325_v33 = vmul.f32 %v4349_v0, %v3734_v6  ;;  %v999_v16 = vld [vmem:[#allocation2 + $0x8c] sm:$0x1] }
  0x99   : > { %v1073_v11 = vld [vmem:[#allocation2 + $0x90] sm:$0xf]  ;;  %v776_v36 = vrot.slane %v774_v22, 7  ;;  %v784_v12 = vrot.slane %v782_v25, 7  ;;  %v3681_v38 = vunpack.c.l.bf16 %v4420_v23  ;;  %v3682_v40 = vunpack.c.h.bf16 %v4420_v23 }
  0x9a   : > { %v1074_v41 = vld [vmem:[#allocation2 + $0x94] sm:$0xf]  ;;  %v1581_v42 = vshrl.u32 %v1073_v11, 16  ;;  %v1584_v44 = vshll.u32 %v1073_v11, 16  ;;  %vm368_vm3 = vcmp.ge.f32.partialorder %v336_v4, 0.0  ;;  %vm369_vm5 = vcmp.ge.f32.partialorder %v337_v31, 0.0 }
  0x9b   : > { %v1075_v45 = vld [vmem:[#allocation2 + $0x98] sm:$0x1]  ;;  %v1590_v46 = vshll.u32 %v1074_v41, 16  ;;  %v1594_v47 = vshrl.u32 %v1074_v41, 16  ;;  %v779_v48 = vor.u32 %v777_v24, %v776_v36  ;;  %v780_v27 = vrot.slane %v776_v36, 4 }
  0x9c   : > { %v1583_v39 = vrot.slane %v1581_v42, 4  ;;  %v1586_v43 = vrot.slane %v1584_v44, 5  ;;  %v1600_v49 = vshll.u32 %v1075_v45, 16  ;;  %v787_v50 = vor.u32 %v785_v28, %v784_v12  ;;  %v946_v42 = vld [vmem:[#allocation2 + $0x30] sm:$0xf] }
  0x9d   : > { %v1592_v53 = vrot.slane %v1590_v46, 5  ;;  %v1596_v54 = vrot.slane %v1594_v47, 4  ;;  %v789_v55 = vrot.slane %v784_v12, 4  ;;  %v996_v56 = vsel %vm4110_vm14, %v779_v48, %v995_v29 }
  0x9e   : > { %v1587_v51 = vor.u32 %v1586_v43, %v1583_v39  ;;  %v1602_v58 = vrot.slane %v1600_v49, 5  ;;  %v788_v60 = vsel %vm4103_vm13, %v780_v27, %v787_v50  ;;  %997 = vst [vmem:[#allocation2 + $0x84] sm:$0xf] %v996_v56  ;;  %v400_v17 = vmul.f32 0.2, %v336_v4 }
  0x9f   : > { %v1597_v3 = vor.u32 %v1596_v54, %v1592_v53  ;;  %998 = vst.msk [vmem:[#allocation2 + $0x88] sm:$0xf] %vm490_vm6, %v788_v60  ;;  %v1000_v61 = vsel %vm4039_vm2, %v789_v55, %v999_v16  ;;  %v401_v2 = vmul.f32 0.2, %v337_v31  ;;  %v360_v7 = vadd.f32 %v4372_v37, %v324_v32 }
  0xa0   : > { %v1588_v9 = vrot.slane %v1587_v51, 4  ;;  %1001 = vst [vmem:[#allocation2 + $0x8c] sm:$0x1] %v1000_v61  ;;  %v432_v14 = vsel %vm368_vm3, %v336_v4, %v400_v17  ;;  %v361_v18 = vadd.f32 %v4372_v37, %v325_v33  ;;  %v599_v59 = vsel %vm4053_vm4, 0, %v598_v57  ;;  %v950_v51 = vld [vmem:[#allocation2 + $0x38] sm:$0x1] }
  0xa1   : > { %v1598_v6 = vrot.slane %v1597_v3, 4  ;;  %v433_v21 = vsel %vm369_vm5, %v337_v31, %v401_v2  ;;  %v464_v23 = vpack.c.bf16 %v432_v14, %v432_v14  ;;  %vm392_vm8 = vcmp.ge.f32.partialorder %v360_v7, 0.0  ;;  %600 = vst [vmem:[#allocation2 + $0xc8] sm:$0x1] %v599_v59  ;;  %v509_v3 = vld [vmem:[#allocation2 + $0x24] sm:$0x1] }
  0xa2   : > { %v1593_v22 = vsel %vm4171_vm7, %v1588_v9, %v1592_v53  ;;  %v465_v24 = vpack.c.bf16 %v433_v21, %v433_v21  ;;  %vm393_vm9 = vcmp.ge.f32.partialorder %v361_v18, 0.0  ;;  %v424_v25 = vmul.f32 0.2, %v360_v7 }
  0xa3   : > { %v1603_v28 = vsel %vm4171_vm7, %v1598_v6, %v1602_v58  ;;  %v1724_v29 = vunpack.c.l.b16 %v1593_v22  ;;  %v655_v4 = vshrl.u32 %v464_v23, 16  ;;  %v658_v32 = vshll.u32 %v464_v23, 16 }
  0xa4   : > { %v1725_v33 = vunpack.c.l.b16 %v1603_v28  ;;  %v663_v11 = vshrl.u32 %v465_v24, 16  ;;  %v666_v36 = vshll.u32 %v465_v24, 16  ;;  %v425_v12 = vmul.f32 0.2, %v361_v18  ;;  %v559_v28 = vld [vmem:[#allocation2 + $0x2c] sm:$0x1] }
  0xa5   : > { %v1070_v31 = vld [vmem:[#allocation2 + $0x84] sm:$0xf]  ;;  %v657_v41 = vrot.slane %v655_v4, 7  ;;  %v456_v44 = vsel %vm392_vm8, %v360_v7, %v424_v25  ;;  %v298_v45 = vmul.f32 %v4349_v0, %v3681_v38  ;;  %v299_v46 = vmul.f32 %v4349_v0, %v3682_v40 }
  0xa6   : > { %v4450_v47 = vpack.c.b16 %v1725_v33, %v1724_v29  ;;  %v1071_v48 = vld [vmem:[#allocation2 + $0x88] sm:$0xf]  ;;  %v1557_v27 = vshrl.u32 %v1070_v31, 16  ;;  %v1560_v39 = vshll.u32 %v1070_v31, 16  ;;  %v665_v43 = vrot.slane %v663_v11, 7 }
  0xa7   : > { %v1072_v49 = vld [vmem:[#allocation2 + $0x8c] sm:$0x1]  ;;  %v1566_v50 = vshll.u32 %v1071_v48, 16  ;;  %v1570_v16 = vshrl.u32 %v1071_v48, 16  ;;  %v660_v53 = vor.u32 %v658_v32, %v657_v41  ;;  %v661_v54 = vrot.slane %v657_v41, 4 }
  0xa8   : > { %1773 = vrot.lane.b32.xlu0 %v4450_v47, %s3995_s28  ;;  %v1559_v55 = vrot.slane %v1557_v27, 4  ;;  %v1562_v56 = vrot.slane %v1560_v39, 5  ;;  %v1576_v57 = vshll.u32 %v1072_v49, 16  ;;  %v668_v38 = vor.u32 %v666_v36, %v665_v43 }
  0xa9   : > { %v1568_v40 = vrot.slane %v1566_v50, 5  ;;  %v1572_v58 = vrot.slane %v1570_v16, 4  ;;  %v670_v60 = vrot.slane %v665_v43, 4  ;;  %v947_v17 = vsel %vm4110_vm14, %v660_v53, %v946_v42  ;;  %v1030_v42 = vld [vmem:[#allocation2 + $0xc0] sm:$0xf] }
  0xaa   : > { %v1563_v61 = vor.u32 %v1562_v56, %v1559_v55  ;;  %v1578_v2 = vrot.slane %v1576_v57, 5  ;;  %v669_v7 = vsel %vm4103_vm13, %v661_v54, %v668_v38  ;;  %948 = vst [vmem:[#allocation2 + $0x30] sm:$0xf] %v947_v17  ;;  %v457_v9 = vsel %vm393_vm9, %v361_v18, %v425_v12 }
  0xab   : > { %v1573_v14 = vor.u32 %v1572_v58, %v1568_v40  ;;  %949 = vst.msk [vmem:[#allocation2 + $0x34] sm:$0xf] %vm490_vm6, %v669_v7  ;;  %v951_v59 = vsel %vm4039_vm2, %v670_v60, %v950_v51  ;;  %v488_v6 = vpack.c.bf16 %v456_v44, %v456_v44  ;;  %v489_v21 = vpack.c.bf16 %v457_v9, %v457_v9  ;;  %v1034_v44 = vld [vmem:[#allocation2 + $0xc8] sm:$0x1] }
  0xac   : > { %v1564_v23 = vrot.slane %v1563_v61, 4  ;;  %952 = vst [vmem:[#allocation2 + $0x38] sm:$0x1] %v951_v59  ;;  %v334_v22 = vadd.f32 %v4372_v37, %v298_v45  ;;  %v335_v24 = vadd.f32 %v4372_v37, %v299_v46  ;;  %v510_v25 = vsel %vm4039_vm2, 0, %v509_v3 }
  0xad   : > { %v1574_v29 = vrot.slane %v1573_v14, 4  ;;  %v859_v18 = vshrl.u32 %v488_v6, 16  ;;  %v862_v4 = vshll.u32 %v488_v6, 16  ;;  %v867_v32 = vshrl.u32 %v489_v21, 16  ;;  %511 = vst [vmem:[#allocation2 + $0x24] sm:$0x1] %v510_v25 }
  0xae   : > { %v1569_v33 = vsel %vm4171_vm7, %v1564_v23, %v1568_v40  ;;  %v870_v11 = vshll.u32 %v489_v21, 16  ;;  %vm366_vm10 = vcmp.ge.f32.partialorder %v334_v22, 0.0  ;;  %vm367_vm11 = vcmp.ge.f32.partialorder %v335_v24, 0.0 }
  0xaf   : > { %v1579_v36 = vsel %vm4171_vm7, %v1574_v29, %v1578_v2  ;;  %v1722_v12 = vunpack.c.l.b16 %v1569_v33  ;;  %v861_v31 = vrot.slane %v859_v18, 7  ;;  %v869_v41 = vrot.slane %v867_v32, 7  ;;  %v3821_v29 = vld [vmem:[%s4062_s25 + $0x38] sm:$0xff]  }
  0xb0   : > { %v1723_v45 = vunpack.c.l.b16 %v1579_v36  ;;  %v398_v46 = vmul.f32 0.2, %v334_v22  ;;  %v399_v48 = vmul.f32 0.2, %v335_v24  ;;  %v560_v27 = vsel %vm4053_vm4, 0, %v559_v28 }
  0xb1   : > { %v4472_v39 = vld [vmem:[#allocation2 + $0x30] sm:$0xf]  ;;  %v864_v43 = vor.u32 %v862_v4, %v861_v31  ;;  %v865_v49 = vrot.slane %v861_v31, 4  ;;  %v872_v50 = vor.u32 %v870_v11, %v869_v41  ;;  %v874_v16 = vrot.slane %v869_v41, 4  ;;  %561 = vst [vmem:[#allocation2 + $0x2c] sm:$0x1] %v560_v27 }
  0xb2   : > { %v4474_v53 = vpack.c.b16 %v1723_v45, %v1722_v12  ;;  %v4476_v54 = vld [vmem:[#allocation2 + $0x34] sm:$0xf]  ;;  %v1389_v55 = vshrl.u32 %v4472_v39, 16  ;;  %v1392_v56 = vshll.u32 %v4472_v39, 16  ;;  %v430_v57 = vsel %vm366_vm10, %v334_v22, %v398_v46  ;;  %v3948_v36 = vld [vmem:[#allocation2 + $0xc] sm:$0xf] }
  0xb3   : > { %v4481_v38 = vld [vmem:[#allocation2 + $0x38] sm:$0x1]  ;;  %v1398_v51 = vshll.u32 %v4476_v54, 16  ;;  %v1402_v40 = vshrl.u32 %v4476_v54, 16  ;;  %v873_v58 = vsel %vm4103_vm13, %v865_v49, %v872_v50  ;;  %v1031_v60 = vsel %vm4110_vm14, %v864_v43, %v1030_v42  ;;  %v3949_v31 = vld [vmem:[#allocation2 + $0x10] sm:$0xf] }
  0xb4   : > { %1771 = vrot.lane.b32.xlu2 %v4474_v53, %s3995_s28  ;;  %v1391_v17 = vrot.slane %v1389_v55, 4  ;;  %v1394_v3 = vrot.slane %v1392_v56, 5  ;;  %v1408_v61 = vshll.u32 %v4481_v38, 16  ;;  %1032 = vst [vmem:[#allocation2 + $0xc0] sm:$0xf] %v1031_v60  ;;  %v1035_v2 = vsel %vm4039_vm2, %v874_v16, %v1034_v44 }
  0xb5   : > { %v1400_v7 = vrot.slane %v1398_v51, 5  ;;  %v1404_v9 = vrot.slane %v1402_v40, 4  ;;  %1033 = vst.msk [vmem:[#allocation2 + $0xc4] sm:$0xf] %vm490_vm6, %v873_v58  ;;  %v431_v14 = vsel %vm367_vm11, %v335_v24, %v399_v48  ;;  %v462_v59 = vpack.c.bf16 %v430_v57, %v430_v57  ;;  %v939_v44 = vld [vmem:[#allocation2 + $0x24] sm:$0xf] }
  0xb6   : > { %v1395_v6 = vor.u32 %v1394_v3, %v1391_v17  ;;  %v1410_v21 = vrot.slane %v1408_v61, 5  ;;  %1036 = vst [vmem:[#allocation2 + $0xc8] sm:$0x1] %v1035_v2  ;;  %v463_v23 = vpack.c.bf16 %v431_v14, %v431_v14  ;;  %vm2154_vm12 = vcmask 1042432  }
  0xb7   : > { %v1405_v22 = vor.u32 %v1404_v9, %v1400_v7  ;;  %v638_v25 = vshrl.u32 %v462_v59, 16  ;;  %v641_v28 = vshll.u32 %v462_v59, 16  ;;  %vm2155_vm15 = vcmask 1046532  }
  0xb8   : > { %v1396_v18 = vrot.slane %v1395_v6, 4  ;;  %v646_v4 = vshrl.u32 %v463_v23, 16  ;;  %v649_v32 = vshll.u32 %v463_v23, 16  ;;  %v3444_v12 = vrot.slane %v3948_v36, 9  ;;  %v943_v40 = vld [vmem:[#allocation2 + $0x2c] sm:$0x1]  ;;  %vm4505_vm1 = vmor %vm2154_vm12, %vm2155_vm15 }
  0xb9   : > { %v1406_v33 = vrot.slane %v1405_v22, 4  ;;  %v640_v11 = vrot.slane %v638_v25, 7  ;;  %v2166_v24 = vrot.slane %v3949_v31, 5  ;;  %v3701_v45 = vunpack.c.l.bf16 %v3821_v29  ;;  %v524_v25 = vld [vmem:[#allocation2 + $0x60] sm:$0x1] }
  0xba   : > { %v1401_v41 = vsel %vm4171_vm7, %v1396_v18, %v1400_v7  ;;  %v648_v42 = vrot.slane %v646_v4, 7  ;;  %v3702_v46 = vunpack.c.h.bf16 %v3821_v29  ;;  %v2190_v62 = vrot.slane %v4481_v38, 5 }
  0xbb   : > { %v1411_v48 = vsel %vm4171_vm7, %v1406_v33, %v1410_v21  ;;  %v1708_v27 = vunpack.c.l.b16 %v1401_v41  ;;  %v1085_v43 = vld [vmem:[#allocation2 + $0xc0] sm:$0xf]  ;;  %v643_v49 = vor.u32 %v641_v28, %v640_v11  ;;  %v644_v50 = vrot.slane %v640_v11, 4  ;;  %v574_v28 = vld [vmem:[#allocation2 + $0x68] sm:$0x1] }
  0xbc   : > { %v1709_v16 = vunpack.c.l.b16 %v1411_v48  ;;  %v1086_v55 = vld [vmem:[#allocation2 + $0xc4] sm:$0xf]  ;;  %v1677_v56 = vshrl.u32 %v1085_v43, 16  ;;  %v1680_v57 = vshll.u32 %v1085_v43, 16  ;;  %v651_v51 = vor.u32 %v649_v32, %v648_v42  ;;  %v3950_v32 = vld [vmem:[#allocation2 + $0x14] sm:$0x1] }
  0xbd   : > { %v1087_v58 = vld [vmem:[#allocation2 + $0xc8] sm:$0x1]  ;;  %v1686_v60 = vshll.u32 %v1086_v55, 16  ;;  %v1690_v17 = vshrl.u32 %v1086_v55, 16  ;;  %v653_v3 = vrot.slane %v648_v42, 4  ;;  %v940_v61 = vsel %vm4110_vm14, %v643_v49, %v939_v44 }
  0xbe   : > { %v4509_v7 = vpack.c.b16 %v1709_v16, %v1708_v27  ;;  %v1679_v9 = vrot.slane %v1677_v56, 4  ;;  %v1682_v14 = vrot.slane %v1680_v57, 5  ;;  %v1696_v59 = vshll.u32 %v1087_v58, 16  ;;  %941 = vst [vmem:[#allocation2 + $0x24] sm:$0xf] %v940_v61 }
  0xbf   : > { %v1688_v6 = vrot.slane %v1686_v60, 5  ;;  %v1692_v21 = vrot.slane %v1690_v17, 4  ;;  %v652_v23 = vsel %vm4103_vm13, %v644_v50, %v651_v51  ;;  %v944_v22 = vsel %vm4039_vm2, %v653_v3, %v943_v40  ;;  %v3952_v50 = vld [vmem:[#allocation2 + $0x1c] sm:$0xf] }
  0xc0   : > { %1757 = vrot.lane.b32.xlu0 %v4509_v7, %s3995_s28  ;;  %v1683_v29 = vor.u32 %v1682_v14, %v1679_v9  ;;  %942 = vst.msk [vmem:[#allocation2 + $0x28] sm:$0xf] %vm490_vm6, %v652_v23  ;;  %v2167_v18 = vsel %vm4505_vm1, %v3444_v12, %v2166_v24  ;;  %v2168_v4 = vrot.slane %v2166_v24, 4  ;;  %v2169_v33 = vrot.slane %v3950_v32, 5 }
  0xc1   : > { %v1693_v11 = vor.u32 %v1692_v21, %v1688_v6  ;;  %v1698_v36 = vrot.slane %v1696_v59, 5  ;;  %945 = vst [vmem:[#allocation2 + $0x2c] sm:$0x1] %v944_v22  ;;  %v308_v31 = vmul.f32 %v4349_v0, %v3701_v45  ;;  %v309_v41 = vmul.f32 %v4349_v0, %v3702_v46  ;;  %v3951_v45 = vld [vmem:[#allocation2 + $0x18] sm:$0xf] }
  0xc2   : > { %v1684_v42 = vrot.slane %v1683_v29, 4  ;;  %v525_v44 = vsel %vm4039_vm2, 0, %v524_v25  ;;  %v575_v48 = vsel %vm4053_vm4, 0, %v574_v28  ;;  %v2279_v43 = vunpack.c.l.b16 %v2167_v18  ;;  %v3646_v18 = vld [vmem:[%s5311_s1 + $0x78] sm:$0xff] }
  0xc3   : > { %v1694_v27 = vrot.slane %v1693_v11, 4  ;;  %v344_v12 = vadd.f32 %v4372_v37, %v308_v31  ;;  %v345_v24 = vadd.f32 %v4372_v37, %v309_v41  ;;  %526 = vst [vmem:[#allocation2 + $0x60] sm:$0x1] %v525_v44  ;;  %v2170_v0 = vsel %vm4505_vm1, %v2168_v4, %v2169_v33  ;;  %v3953_v37 = vld [vmem:[#allocation2 + $0x20] sm:$0x1]  ;;  %3845 = vmatpush.bf16.msra.mxu1 %v3646_v18 }
  0xc4   : > { %v1689_v49 = vsel %vm4171_vm7, %v1684_v42, %v1688_v6  ;;  %576 = vst [vmem:[#allocation2 + $0x68] sm:$0x1] %v575_v48  ;;  %v3445_v46 = vrot.slane %v3951_v45, 9  ;;  %v2173_v16 = vrot.slane %v3952_v50, 5  ;;  %v2176_v57 = vrot.slane %v3953_v37, 5  ;;  %3846 = vmatpush.bf16.msra.mxu2 %v3646_v18  ;;  %1912 = vmatpush.bf16.msra.mxu0 %v3646_v18 }
  0xc5   : > { %v1699_v5 = vsel %vm4171_vm7, %v1694_v27, %v1698_v36  ;;  %v1748_v55 = vunpack.c.l.b16 %v1689_v49  ;;  %v4534_v56 = vld [vmem:[#allocation2 + $0x24] sm:$0xf]  ;;  %vm376_vm4 = vcmp.ge.f32.partialorder %v344_v12, 0.0  ;;  %vm377_vm3 = vcmp.ge.f32.partialorder %v345_v24, 0.0  ;;  %3847 = vmatpush.bf16.msra.mxu3 %v3646_v18 }
  0xc6   : > { %v1749_v51 = vunpack.c.l.b16 %v1699_v5  ;;  %v1365_v40 = vshrl.u32 %v4534_v56, 16  ;;  %v1368_v58 = vshll.u32 %v4534_v56, 16  ;;  %v2280_v17 = vunpack.c.l.b16 %v2170_v0 }
  0xc7   : > { %v4538_v60 = vld [vmem:[#allocation2 + $0x28] sm:$0xf]  ;;  %v408_v3 = vmul.f32 0.2, %v344_v12  ;;  %v409_v61 = vmul.f32 0.2, %v345_v24  ;;  %v2174_v9 = vsel %vm4505_vm1, %v3445_v46, %v2173_v16 }
  0xc8   : > { %v1750_v14 = vpack.c.b16 %v1749_v51, %v1748_v55  ;;  %v4542_v59 = vld [vmem:[#allocation2 + $0x2c] sm:$0x1]  ;;  %v1367_v6 = vrot.slane %v1365_v40, 4  ;;  %v1370_v21 = vrot.slane %v1368_v58, 5  ;;  %v1374_v23 = vshll.u32 %v4538_v60, 16  ;;  %v4588_v8 = vld [vmem:[#allocation2 + $0x24] sm:$0xff] }
  0xc9   : > { %v1378_v22 = vshrl.u32 %v4538_v60, 16  ;;  %v1384_v25 = vshll.u32 %v4542_v59, 16  ;;  %v440_v28 = vsel %vm376_vm4, %v344_v12, %v408_v3  ;;  %v441_v29 = vsel %vm377_vm3, %v345_v24, %v409_v61 }
  0xca   : > { %1781 = vrot.lane.b32.xlu1 %v1750_v14, %s3995_s28  ;;  %v1371_v4 = vor.u32 %v1370_v21, %v1367_v6  ;;  %v1376_v32 = vrot.slane %v1374_v23, 5  ;;  %v472_v33 = vpack.c.bf16 %v440_v28, %v440_v28  ;;  %v473_v11 = vpack.c.bf16 %v441_v29, %v441_v29  ;;  %v974_v37 = vld [vmem:[#allocation2 + $0x60] sm:$0xf] }
  0xcb   : > { %v1380_v36 = vrot.slane %v1378_v22, 4  ;;  %v1386_v31 = vrot.slane %v1384_v25, 5  ;;  %v4552_v41 = vpack.c.b16 %v2280_v17, %v2279_v43  ;;  %v2175_v42 = vrot.slane %v2173_v16, 4  ;;  %v978_v51 = vld [vmem:[#allocation2 + $0x68] sm:$0x1] }
  0xcc   : > { %v1372_v44 = vrot.slane %v1371_v4, 4  ;;  %v723_v48 = vshrl.u32 %v472_v33, 16  ;;  %v726_v27 = vshll.u32 %v472_v33, 16  ;;  %v731_v12 = vshrl.u32 %v473_v11, 16  ;;  %v3954_v4 = vld [vmem:[#allocation2 + $0x3c] sm:$0xf] }
  0xcd   : > { %v1381_v24 = vor.u32 %v1380_v36, %v1376_v32  ;;  %v734_v49 = vshll.u32 %v473_v11, 16  ;;  %v2177_v0 = vsel %vm4505_vm1, %v2175_v42, %v2176_v57  ;;  %v2281_v45 = vunpack.c.l.b16 %v2174_v9  ;;  %v3645_v57 = vld [vmem:[%s5311_s1 + $0x70] sm:$0xff]  ;;  %v3955_v33 = vld [vmem:[#allocation2 + $0x40] sm:$0xf] }
  0xce   : > { %v1377_v46 = vsel %vm4171_vm7, %v1372_v44, %v1376_v32  ;;  %v725_v43 = vrot.slane %v723_v48, 7  ;;  %v733_v50 = vrot.slane %v731_v12, 7  ;;  %v2282_v16 = vunpack.c.l.b16 %v2177_v0  ;;  %3848 = vmatpush.bf16.msra.mxu1 %v3645_v57  ;;  %3849 = vmatpush.bf16.msra.mxu2 %v3645_v57  ;;  %v3956_v48 = vld [vmem:[#allocation2 + $0x44] sm:$0x1] }
  0xcf   : > { %v1382_v5 = vrot.slane %v1381_v24, 4  ;;  %v1706_v55 = vunpack.c.l.b16 %v1377_v46  ;;  %v2187_v9 = vrot.slane %v4476_v54, 5  ;;  %v3644_v54 = vld [vmem:[%s5311_s1 + $0x68] sm:$0xff]  ;;  %v3447_v25 = vrot.slane %v4472_v39, 9  ;;  %1913 = vmatpush.bf16.msra.mxu0 %v3645_v57  ;;  %3850 = vmatpush.bf16.msra.mxu3 %v3645_v57  ;;  %v3643_v39 = vld [vmem:[%s5311_s1 + $0x60] sm:$0xff]  ;;  %v3641_v57 = vld [vmem:[%s5311_s1 + $0x50] sm:$0xff] }
  0xd0   : > { %v728_v40 = vor.u32 %v726_v27, %v725_v43  ;;  %v729_v58 = vrot.slane %v725_v43, 4  ;;  %v736_v17 = vor.u32 %v734_v49, %v733_v50  ;;  %v738_v3 = vrot.slane %v733_v50, 4 }
  0xd1   : > { %v1387_v61 = vsel %vm4171_vm7, %v1382_v5, %v1386_v31  ;;  %v4560_v14 = vpack.c.b16 %v2282_v16, %v2281_v45  ;;  %v2189_v28 = vrot.slane %v2187_v9, 4  ;;  %v2188_v38 = vsel %vm4505_vm1, %v3447_v25, %v2187_v9  ;;  %v3642_v31 = vld [vmem:[%s5311_s1 + $0x58] sm:$0xff] }
  0xd2   : > { %v1707_v6 = vunpack.c.l.b16 %v1387_v61  ;;  %2328 = vrot.lane.b32.xlu1 %v4552_v41, %s3995_s28  ;;  %v737_v21 = vsel %vm4103_vm13, %v729_v58, %v736_v17  ;;  %v975_v23 = vsel %vm4110_vm14, %v728_v40, %v974_v37  ;;  %v979_v22 = vsel %vm4039_vm2, %v738_v3, %v978_v51  ;;  %3851 = vmatpush.bf16.msra.mxu1 %v3644_v54 }
  0xd3   : > { %976 = vst [vmem:[#allocation2 + $0x60] sm:$0xf] %v975_v23  ;;  %2330 = vrot.lane.b32.xlu0 %v4560_v14, %s3995_s28  ;;  %v2191_v18 = vsel %vm4505_vm1, %v2189_v28, %v2190_v62  ;;  %3852 = vmatpush.bf16.msra.mxu2 %v3644_v54  ;;  %v3448_v32 = vrot.slane %v3954_v4, 9  ;;  %v2194_v11 = vrot.slane %v3955_v33, 5  ;;  %v2285_v42 = vunpack.c.l.b16 %v2188_v38  ;;  %v4628_v23 = vpop.permute.xlu0 %1767 }
  0xd4   : > { %v4581_v29 = vpack.c.b16 %v1707_v6, %v1706_v55  ;;  %977 = vst.msk [vmem:[#allocation2 + $0x64] sm:$0xf] %vm490_vm6, %v737_v21  ;;  %1914 = vmatpush.bf16.msra.mxu0 %v3644_v54  ;;  %3853 = vmatpush.bf16.msra.mxu3 %v3644_v54  ;;  %v2286_v44 = vunpack.c.l.b16 %v2191_v18  ;;  %v2197_v27 = vrot.slane %v3956_v48, 5  ;;  %v3996_v45 = vmov 0  }
  0xd5   : > { %980 = vst [vmem:[#allocation2 + $0x68] sm:$0x1] %v979_v22  ;;  %v2195_v0 = vsel %vm4505_vm1, %v3448_v32, %v2194_v11  ;;  %v2196_v16 = vrot.slane %v2194_v11, 4 }
  0xd6   : > { %1755 = vrot.lane.b32.xlu2 %v4581_v29, %s3995_s28  ;;  %3854 = vmatpush.bf16.msra.mxu1 %v3643_v39  ;;  %491 = vst.msk [vmem:[#allocation2] sm:$0xf] %vm490_vm6, %v3996_v45  ;;  %v2287_v51 = vunpack.c.l.b16 %v2195_v0  ;;  %v4619_v17 = vpack.c.b16 %v2286_v44, %v2285_v42 }
  0xd7   : > { %3855 = vmatpush.bf16.msra.mxu2 %v3643_v39  ;;  %492 = vst.msk [vmem:[#allocation2 + $0x4] sm:$0xf] %vm490_vm6, %v3996_v45  ;;  %v2198_v3 = vsel %vm4505_vm1, %v2196_v16, %v2197_v27  ;;  %v2180_v27 = vrot.slane %v4538_v60, 5  ;;  %v3446_v60 = vrot.slane %v4534_v56, 9 }
  0xd8   : > { %1915 = vmatpush.bf16.msra.mxu0 %v3643_v39  ;;  %3856 = vmatpush.bf16.msra.mxu3 %v3643_v39  ;;  %494 = vst.msk [vmem:[#allocation2 + $0x8] sm:$0x1] %vm493_vm0, %v3996_v45  ;;  %v2288_v9 = vunpack.c.l.b16 %v2198_v3  ;;  %v3640_v39 = vld [vmem:[%s5311_s1 + $0x48] sm:$0xff]  ;;  %v2183_v3 = vrot.slane %v4542_v59, 5  ;;  %v3638_v59 = vld [vmem:[%s5311_s1 + $0x38] sm:$0xff] }
  0xd9   : > { %496 = vst.msk [vmem:[#allocation2 + $0xcc] sm:$0xf] %vm490_vm6, %v3996_v45 }
  0xda   : > { %v4597_v36 = vld [vmem:[#allocation2 + $0x60] sm:$0xf]  ;;  %1178 = vrot.lane.b32.xlu1 %v4586_v1, %s3995_s28  ;;  %3857 = vmatpush.bf16.msra.mxu1 %v3642_v31  ;;  %497 = vst.msk [vmem:[#allocation2 + $0xd0] sm:$0xf] %vm490_vm6, %v3996_v45  ;;  %v4631_v54 = vpack.c.b16 %v2288_v9, %v2287_v51 }
  0xdb   : > { %v4604_v12 = vld [vmem:[#allocation2 + $0x64] sm:$0xf]  ;;  %v1485_v24 = vshrl.u32 %v4597_v36, 16  ;;  %v1488_v49 = vshll.u32 %v4597_v36, 16  ;;  %1180 = vrot.lane.b32.xlu0 %v4588_v8, %s3995_s28  ;;  %3858 = vmatpush.bf16.msra.mxu2 %v3642_v31  ;;  %498 = vst.msk [vmem:[#allocation2 + $0xd4] sm:$0x1] %vm493_vm0, %v3996_v45 }
  0xdc   : > { %v4613_v46 = vld [vmem:[#allocation2 + $0x68] sm:$0x1]  ;;  %v1494_v43 = vshll.u32 %v4604_v12, 16  ;;  %v1498_v50 = vshrl.u32 %v4604_v12, 16  ;;  %1916 = vmatpush.bf16.msra.mxu0 %v3642_v31  ;;  %3859 = vmatpush.bf16.msra.mxu3 %v3642_v31  ;;  %vm1208_vm0 = vcmask 523264  }
  0xdd   : > { %v1487_v5 = vrot.slane %v1485_v24, 4  ;;  %v1490_v55 = vrot.slane %v1488_v49, 5  ;;  %v1504_v37 = vshll.u32 %v4613_v46, 16  ;;  %v4636_v28 = vld [vmem:[#allocation2] sm:$0xf]  ;;  %v4655_v24 = vpop.permute.xlu1 %1759 }
  0xde   : > { %v1496_v40 = vrot.slane %v1494_v43, 5  ;;  %v1500_v58 = vrot.slane %v1498_v50, 4  ;;  %3860 = vmatpush.bf16.msra.mxu1 %v3641_v57  ;;  %v1293_v38 = vshrl.u32 %v4636_v28, 16  ;;  %v1296_v18 = vshll.u32 %v4636_v28, 16  ;;  %v4649_v33 = vld [vmem:[#allocation2 + $0x4] sm:$0xf] }
  0xdf   : > { %v1491_v61 = vor.u32 %v1490_v55, %v1487_v5  ;;  %v1506_v21 = vrot.slane %v1504_v37, 5  ;;  %3861 = vmatpush.bf16.msra.mxu2 %v3641_v57  ;;  %v4651_v31 = vld [vmem:[#allocation2 + $0x8] sm:$0x1]  ;;  %v1302_v48 = vshll.u32 %v4649_v33, 16  ;;  %v1306_v49 = vshrl.u32 %v4649_v33, 16  ;;  %v3639_v43 = vld [vmem:[%s5311_s1 + $0x40] sm:$0xff] }
  0xe0   : > { %v1501_v6 = vor.u32 %v1500_v58, %v1496_v40  ;;  %1917 = vmatpush.bf16.msra.mxu0 %v3641_v57  ;;  %3862 = vmatpush.bf16.msra.mxu3 %v3641_v57  ;;  %v1295_v42 = vrot.slane %v1293_v38, 4  ;;  %v1298_v44 = vrot.slane %v1296_v18, 5  ;;  %v1312_v0 = vshll.u32 %v4651_v31, 16  ;;  %v4662_v55 = vld [vmem:[#allocation2 + $0x3c] sm:$0xff]  ;;  %v3653_v18 = vld [vmem:[%s5311_s1 + $0xb0] sm:$0xff] }
  0xe1   : > { %v1492_v22 = vrot.slane %v1491_v61, 4  ;;  %v1304_v16 = vrot.slane %v1302_v48, 5  ;;  %v1308_v5 = vrot.slane %v1306_v49, 4  ;;  %v3654_v37 = vld [vmem:[%s5311_s1 + $0xb8] sm:$0xff]  ;;  %v2182_v58 = vrot.slane %v2180_v27, 4  ;;  %v4672_v61 = vpop.permute.xlu0 %1775 }
  0xe2   : > { %v1502_v25 = vrot.slane %v1501_v6, 4  ;;  %2334 = vrot.lane.b32.xlu1 %v4619_v17, %s3995_s28  ;;  %3863 = vmatpush.bf16.msra.mxu1 %v3640_v39  ;;  %v1299_v50 = vor.u32 %v1298_v44, %v1295_v42  ;;  %v1314_v9 = vrot.slane %v1312_v0, 5  ;;  %v3662_v6 = vld [vmem:[%s5311_s1 + $0xf8] sm:$0xff]  ;;  %v1801_v56 = vsel %vm1208_vm0, %v4509_v7, %v4655_v24  ;;  %v3661_v42 = vld [vmem:[%s5311_s1 + $0xf0] sm:$0xff] }
  0xe3   : > { %v1497_v62 = vsel %vm4171_vm7, %v1492_v22, %v1496_v40  ;;  %2336 = vrot.lane.b32.xlu0 %v4631_v54, %s3995_s28  ;;  %3864 = vmatpush.bf16.msra.mxu2 %v3640_v39  ;;  %v4669_v40 = vld [vmem:[#allocation2 + $0x48] sm:$0xff]  ;;  %v1309_v57 = vor.u32 %v1308_v5, %v1304_v16  ;;  %v3670_v7 = vld [vmem:[%s5311_s1 + $0x138] sm:$0xff]  ;;  %v1833_v38 = vsel %vm1208_vm0, %v4450_v47, %v4672_v61  ;;  %v3637_v44 = vld [vmem:[%s5311_s1 + $0x30] sm:$0xff] }
  0xe4   : > { %v1507_v4 = vsel %vm4171_vm7, %v1502_v25, %v1506_v21  ;;  %v1716_v32 = vunpack.c.l.b16 %v1497_v62  ;;  %1918 = vmatpush.bf16.msra.mxu0 %v3640_v39  ;;  %3865 = vmatpush.bf16.msra.mxu3 %v3640_v39  ;;  %v1300_v51 = vrot.slane %v1299_v50, 4  ;;  %v4694_v62 = vld [vmem:[#allocation2 + $0xc] sm:$0xff]  ;;  %v3957_v49 = vld [vmem:[#allocation2 + $0x54] sm:$0xf]  ;;  %v3959_v50 = vld [vmem:[#allocation2 + $0x5c] sm:$0x1] }
  0xe5   : > { %v1717_v11 = vunpack.c.l.b16 %v1507_v4  ;;  %v1310_v25 = vrot.slane %v1309_v57, 4  ;;  %v2181_v4 = vsel %vm4505_vm1, %v3446_v60, %v2180_v27  ;;  %v1752_v48 = vpop.permute.xlu1 %1751  ;;  %v4714_v27 = vpop.permute.xlu2 %1769  ;;  %v3450_v0 = vrot.slane %v3957_v49, 9 }
  0xe6   : > { %3866 = vmatpush.bf16.msra.mxu1 %v3639_v43  ;;  %v1305_v21 = vsel %vm4171_vm7, %v1300_v51, %v1304_v16  ;;  %v2211_v16 = vrot.slane %v3959_v50, 5  ;;  %v2283_v5 = vunpack.c.l.b16 %v2181_v4  ;;  %v3652_v51 = vld [vmem:[%s5311_s1 + $0xa8] sm:$0xff] }
  0xe7   : > { %v1740_v45 = vpack.c.b16 %v1717_v11, %v1716_v32  ;;  %3867 = vmatpush.bf16.msra.mxu2 %v3639_v43  ;;  %v1700_v39 = vunpack.c.l.b16 %v1305_v21  ;;  %v2184_v32 = vsel %vm4505_vm1, %v2182_v58, %v2183_v3  ;;  %v1315_v11 = vsel %vm4171_vm7, %v1310_v25, %v1314_v9  ;;  %v3669_v58 = vld [vmem:[%s5311_s1 + $0x130] sm:$0xff]  ;;  %v3660_v3 = vld [vmem:[%s5311_s1 + $0xe8] sm:$0xff]  ;;  %v3651_v25 = vld [vmem:[%s5311_s1 + $0xa0] sm:$0xff] }
  0xe8   : > { %1919 = vmatpush.bf16.msra.mxu0 %v3639_v43  ;;  %3868 = vmatpush.bf16.msra.mxu3 %v3639_v43  ;;  %v1701_v47 = vunpack.c.l.b16 %v1315_v11  ;;  %v2284_v60 = vunpack.c.l.b16 %v2184_v32  ;;  %v3650_v11 = vld [vmem:[%s5311_s1 + $0x98] sm:$0xff] }
  0xe9   : > { %1765 = vrot.lane.b32.xlu2 %v1740_v45, %s3995_s28  ;;  %v1817_v22 = vsel %vm1208_vm0, %v1740_v45, %v4628_v23  ;;  %1940 = vmatmul.bf16.vlgmr.msra.gmra.mxu1 %v1801_v56  ;;  %v3958_v45 = vld [vmem:[#allocation2 + $0x58] sm:$0xf]  ;;  %v3636_v56 = vld [vmem:[%s5311_s1 + $0x28] sm:$0xff]  ;;  %v4751_v32 = vpop.permute.xlu0 %1761 }
  0xea   : > { %1184 = vrot.lane.b32.xlu1 %v4662_v55, %s3995_s28  ;;  %1960 = vmatmul.bf16.vlgmr.msra.gmra.mxu2 %v1817_v22  ;;  %v2208_v43 = vrot.slane %v3958_v45, 5  ;;  %v4735_v22 = vpack.c.b16 %v2284_v60, %v2283_v5  ;;  %v3634_v5 = vld [vmem:[%s5311_s1 + $0x18] sm:$0xff] }
  0xeb   : > { %1186 = vrot.lane.b32.xlu0 %v4669_v40, %s3995_s28  ;;  %2489 = vmatpush.bf16.msrb.mxu2 %v3654_v37  ;;  %v1732_v37 = vpack.c.b16 %v1701_v47, %v1700_v39  ;;  %v3659_v39 = vld [vmem:[%s5311_s1 + $0xe0] sm:$0xff]  ;;  %v1805_v47 = vsel %vm1208_vm0, %v4190_v26, %v4751_v32 }
  0xec   : > { %2744 = vmatpush.bf16.msrb.mxu3 %v3662_v6  ;;  %2049 = vmatpush.bf16.msrb.mxu1 %v3638_v59  ;;  %v2209_v57 = vsel %vm4505_vm1, %v3450_v0, %v2208_v43  ;;  %v2210_v9 = vrot.slane %v2208_v43, 4 }
  0xed   : > { %1980 = vmatmul.bf16.vlgmr.msra.gmra.mxu3 %v1833_v38  ;;  %2978 = vmatpush.bf16.msrb.mxu0 %v3670_v7  ;;  %v1785_v6 = vsel %vm1208_vm0, %v1732_v37, %v1752_v48  ;;  %v2291_v21 = vunpack.c.l.b16 %v2209_v57  ;;  %v3668_v38 = vld [vmem:[%s5311_s1 + $0x128] sm:$0xff]  ;;  %v4768_v48 = vld [vmem:[#allocation2 + $0x30] sm:$0xff]  ;;  %v4773_v0 = vpop.permute.xlu1 %1753 }
  0xee   : > { %1920 = vmatmul.bf16.vlgmr.msra.gmra.mxu0 %v1785_v6  ;;  %v2212_v59 = vsel %vm4505_vm1, %v2210_v9, %v2211_v16  ;;  %v1789_v26 = vsel %vm1208_vm0, %v4257_v30, %v4773_v0  ;;  %v3658_v16 = vld [vmem:[%s5311_s1 + $0xd8] sm:$0xff]  ;;  %v3961_v37 = vld [vmem:[#allocation2 + $0x4c] sm:$0xf] }
  0xef   : > { %2490 = vmatpush.bf16.msrb.mxu2 %v3653_v18  ;;  %v2292_v7 = vunpack.c.l.b16 %v2212_v59  ;;  %v3635_v18 = vld [vmem:[%s5311_s1 + $0x20] sm:$0xff] }
  0xf0   : > { %2745 = vmatpush.bf16.msrb.mxu3 %v3661_v42  ;;  %2050 = vmatpush.bf16.msrb.mxu1 %v3637_v44  ;;  %v1821_v44 = vsel %vm1208_vm0, %v4181_v10, %v4714_v27 }
  0xf1   : > { %1176 = vrot.lane.b32.xlu2 %v4694_v62, %s3995_s28  ;;  %2979 = vmatpush.bf16.msrb.mxu0 %v3669_v58  ;;  %v4749_v4 = vpack.c.b16 %v2292_v7, %v2291_v21  ;;  %v3962_v58 = vld [vmem:[#allocation2 + $0x50] sm:$0x1] }
  0xf2   : > { %v4758_v42 = vpop.permute.xlu2 %1777 }
  0xf3   : > { %2491 = vmatpush.bf16.msrb.mxu2 %v3652_v51  ;;  %2340 = vrot.lane.b32.xlu1 %v4749_v4, %s3995_s28  ;;  %v1837_v49 = vsel %vm1208_vm0, %v4215_v52, %v4758_v42  ;;  %v2201_v51 = vrot.slane %v3961_v37, 5  ;;  %v4866_v37 = vld [vmem:[#allocation2 + $0x6c] sm:$0xff] }
  0xf4   : > { %2746 = vmatpush.bf16.msrb.mxu3 %v3660_v3  ;;  %2051 = vmatpush.bf16.msrb.mxu1 %v3636_v56  ;;  %v2204_v3 = vrot.slane %v3962_v58, 5  ;;  %v2658_v2 = vsel %vm1208_vm0, %v4866_v37, %v4628_v23 }
  0xf5   : > { %2980 = vmatpush.bf16.msrb.mxu0 %v3668_v38  ;;  %v4780_v10 = vpop.permute.xlu1 %1763  ;;  %v2203_v9 = vrot.slane %v2201_v51, 4  ;;  %v3451_v38 = vrot.slane %v4597_v36, 9  ;;  %v3657_v36 = vld [vmem:[%s5311_s1 + $0xd0] sm:$0xff] }
  0xf6   : > { %v1809_v52 = vsel %vm1208_vm0, %v4275_v15, %v4780_v10  ;;  %v3667_v15 = vld [vmem:[%s5311_s1 + $0x120] sm:$0xff] }
  0xf7   : > { %2492 = vmatpush.bf16.msrb.mxu2 %v3651_v25  ;;  %v2205_v56 = vsel %vm4505_vm1, %v2203_v9, %v2204_v3  ;;  %v2215_v25 = vrot.slane %v4604_v12, 5  ;;  %v2159_v3 = vrot.slane %v4649_v33, 5  ;;  %v3443_v9 = vrot.slane %v4636_v28, 9 }
  0xf8   : > { %2747 = vmatpush.bf16.msrb.mxu3 %v3659_v39  ;;  %2052 = vmatpush.bf16.msrb.mxu1 %v3635_v18  ;;  %v2290_v21 = vunpack.c.l.b16 %v2205_v56  ;;  %v4818_v39 = vld [vmem:[#allocation2 + $0x54] sm:$0xff]  ;;  %v2162_v56 = vrot.slane %v4651_v31, 5 }
  0xf9   : > { %2332 = vrot.lane.b32.xlu2 %v4735_v22, %s3995_s28  ;;  %1945 = vmatmul.bf16.gmra.mxu1 %v1805_v47  ;;  %v2217_v18 = vrot.slane %v2215_v25, 4  ;;  %v2160_v33 = vsel %vm4505_vm1, %v3443_v9, %v2159_v3  ;;  %v3968_v9 = vld [vmem:[#allocation2 + $0x74] sm:$0x1] }
  0xfa   : > { %1965 = vmatmul.bf16.gmra.mxu2 %v1821_v44  ;;  %2981 = vmatpush.bf16.msrb.mxu0 %v3667_v15  ;;  %v2216_v44 = vsel %vm4505_vm1, %v3451_v38, %v2215_v25  ;;  %v4851_v15 = vld [vmem:[#allocation2 + $0x60] sm:$0xff]  ;;  %v2277_v31 = vunpack.c.l.b16 %v2160_v33 }
  0xfb   : > { %2493 = vmatpush.bf16.msrb.mxu2 %v3650_v11  ;;  %v2218_v11 = vrot.slane %v4613_v46, 5  ;;  %v3666_v46 = vld [vmem:[%s5311_s1 + $0x118] sm:$0xff]  ;;  %1190 = vrot.lane.b32.xlu1 %v4851_v15, %s3995_s28 }
  0xfc   : > { %2748 = vmatpush.bf16.msrb.mxu3 %v3658_v16  ;;  %2053 = vmatpush.bf16.msrb.mxu1 %v3634_v5  ;;  %v3665_v16 = vld [vmem:[%s5311_s1 + $0x110] sm:$0xff]  ;;  %v3632_v5 = vld [vmem:[%s5311_s1 + $0x8] sm:$0xff] }
  0xfd   : > { %1985 = vmatmul.bf16.gmra.mxu3 %v1837_v49  ;;  %v2219_v12 = vsel %vm4505_vm1, %v2217_v18, %v2218_v11  ;;  %v3633_v49 = vld [vmem:[%s5311_s1 + $0x10] sm:$0xff] }
  0xfe   : > { %1925 = vmatmul.bf16.gmra.mxu0 %v1789_v26  ;;  %v2294_v26 = vunpack.c.l.b16 %v2219_v12 }
  0xff   : > { %2982 = vmatpush.bf16.msrb.mxu0 %v3666_v46 }
 0x100   : > { %v4790_v50 = vpop.permute.xlu0 %1779  ;;  %2749 = vmatpush.bf16.msrb.mxu3 %v3657_v36  ;;  %2054 = vmatpush.bf16.msrb.mxu1 %v3633_v49  ;;  %v3964_v36 = vld [vmem:[#allocation2 + $0x78] sm:$0xf] }
 0x101   : > { %1182 = vrot.lane.b32.xlu2 %v4768_v48, %s3995_s28  ;;  %v1841_v30 = vsel %vm1208_vm0, %v4415_v19, %v4790_v50  ;;  %v3649_v19 = vld [vmem:[%s5311_s1 + $0x90] sm:$0xff]  ;;  %v3453_v46 = vrot.slane %v3964_v36, 9  ;;  %v4928_v36 = vld [vmem:[#allocation2 + $0x84] sm:$0xff] }
 0x102   : > { %2494 = vmatpush.bf16.msrb.mxu2 %v3649_v19  ;;  %v3664_v19 = vld [vmem:[%s5311_s1 + $0x108] sm:$0xff] }
 0x103   : > { %2983 = vmatpush.bf16.msrb.mxu0 %v3665_v16 }
 0x104   : > { %2055 = vmatpush.bf16.msrb.mxu1 %v3632_v5 }
 0x107   : > { %2984 = vmatpush.bf16.msrb.mxu0 %v3664_v19  ;;  %v3967_v19 = vld [vmem:[#allocation2 + $0x70] sm:$0xf] }
 0x109   : > { %1950 = vmatmul.bf16.gmra.mxu1 %v1809_v52  ;;  %v3648_v52 = vld [vmem:[%s5311_s1 + $0x88] sm:$0xff] }
 0x10a   : > { %2495 = vmatpush.bf16.msrb.mxu2 %v3648_v52 }
 0x10d   : > { %1990 = vmatmul.bf16.gmra.mxu3 %v1841_v30  ;;  %v3656_v30 = vld [vmem:[%s5311_s1 + $0xc8] sm:$0xff] }
 0x10e   : > { %v4785_v45 = vpop.permute.xlu2 %1771  ;;  %2750 = vmatpush.bf16.msrb.mxu3 %v3656_v30 }
 0x10f   : > { %v1825_v43 = vsel %vm1208_vm0, %v4367_v35, %v4785_v45  ;;  %v3960_v35 = vld [vmem:[#allocation2 + $0x48] sm:$0xf] }
 0x110   : > { %1970 = vmatmul.bf16.gmra.mxu2 %v1825_v43  ;;  %v3449_v60 = vrot.slane %v3960_v35, 9  ;;  %v3647_v35 = vld [vmem:[%s5311_s1 + $0x80] sm:$0xff] }
 0x111   : > { %2496 = vmatpush.bf16.msrb.mxu2 %v3647_v35 }
 0x112   : > { %v2202_v57 = vsel %vm4505_vm1, %v3449_v60, %v2201_v51  ;;  %v3631_v60 = vld [vmem:[%s5311_s1] sm:$0xff] }
 0x113   : > { %v2289_v6 = vunpack.c.l.b16 %v2202_v57  ;;  %2056 = vmatpush.bf16.msrb.mxu1 %v3631_v60  ;;  %v3655_v57 = vld [vmem:[%s5311_s1 + $0xc0] sm:$0xff] }
 0x114   : > { %2751 = vmatpush.bf16.msrb.mxu3 %v3655_v57  ;;  %v2222_v57 = vrot.slane %v3967_v19, 5 }
 0x115   : > { %v4811_v59 = vpack.c.b16 %v2290_v21, %v2289_v6  ;;  %v2161_v6 = vrot.slane %v2159_v3, 4 }
 0x117   : > { %2338 = vrot.lane.b32.xlu2 %v4811_v59, %s3995_s28  ;;  %v2163_v21 = vsel %vm4505_vm1, %v2161_v6, %v2162_v56  ;;  %v2225_v6 = vrot.slane %v3968_v9, 5 }
 0x118   : > { %v2278_v18 = vunpack.c.l.b16 %v2163_v21 }
 0x11a   : > { %v4816_v7 = vpop.permute.xlu0 %1773  ;;  %v2309_v12 = vpack.c.b16 %v2278_v18, %v2277_v31  ;;  %v2644_v18 = vsel %vm1208_vm0, %v4586_v1, %v4773_v0 }
 0x11b   : > { %v1829_v47 = vsel %vm1208_vm0, %v4474_v53, %v4816_v7  ;;  %v2293_v53 = vunpack.c.l.b16 %v2216_v44 }
 0x11d   : > { %v4843_v43 = vpack.c.b16 %v2294_v26, %v2293_v53  ;;  %v3965_v53 = vld [vmem:[#allocation2 + $0x80] sm:$0x1] }
 0x11e   : > { %v2232_v26 = vrot.slane %v3965_v53, 5  ;;  %v3970_v53 = vld [vmem:[#allocation2 + $0x84] sm:$0xf] }
 0x11f   : > { %1188 = vrot.lane.b32.xlu2 %v4818_v39, %s3995_s28  ;;  %2342 = vrot.lane.b32.xlu0 %v4843_v43, %s3995_s28 }
 0x120   : > { %1975 = vmatmul.bf16.gmra.mxu2 %v1829_v47  ;;  %v3963_v47 = vld [vmem:[#allocation2 + $0x7c] sm:$0xf] }
 0x121   : > { %v2229_v44 = vrot.slane %v3963_v47, 5  ;;  %v3613_v47 = vld [vmem:[#allocation2] sm:$0xff] }
 0x123   : > { %v2231_v49 = vrot.slane %v2229_v44, 4  ;;  %v2230_v16 = vsel %vm4505_vm1, %v3453_v46, %v2229_v44  ;;  %v3969_v46 = vld [vmem:[#allocation2 + $0x88] sm:$0xf] }
 0x124   : > { %v2297_v35 = vunpack.c.l.b16 %v2230_v16 }
 0x127   : > { %1192 = vrot.lane.b32.xlu0 %v4866_v37, %s3995_s28 }
 0x130   : > { %v4868_v51 = vpop.permute.xlu2 %1755 }
 0x131   : > { %v1793_v58 = vsel %vm1208_vm0, %v4307_v63, %v4868_v51  ;;  %v3663_v63 = vld [vmem:[%s5311_s1 + $0x100] sm:$0xff] }
 0x132   : > { %1930 = vmatmul.bf16.gmra.mxu0 %v1793_v58  ;;  %v4891_v25 = vpop.permute.xlu0 %1757  ;;  %v3966_v58 = vld [vmem:[#allocation2 + $0x6c] sm:$0xf] }
 0x133   : > { %2985 = vmatpush.bf16.msrb.mxu0 %v3663_v63  ;;  %v1797_v11 = vsel %vm1208_vm0, %v4581_v29, %v4891_v25  ;;  %v2233_v29 = vsel %vm4505_vm1, %v2231_v49, %v2232_v26  ;;  %v3452_v3 = vrot.slane %v3966_v58, 9  ;;  %v2224_v63 = vrot.slane %v2222_v57, 4 }
 0x134   : > { %v2298_v60 = vunpack.c.l.b16 %v2233_v29  ;;  %v2236_v49 = vrot.slane %v3969_v46, 5  ;;  %v3454_v26 = vrot.slane %v3970_v53, 9  ;;  %v3974_v46 = vld [vmem:[#allocation2 + $0xa4] sm:$0x1] }
 0x135   : > { %v2223_v56 = vsel %vm4505_vm1, %v3452_v3, %v2222_v57  ;;  %v2226_v21 = vsel %vm4505_vm1, %v2224_v63, %v2225_v6  ;;  %v4939_v3 = vld [vmem:[#allocation2 + $0x78] sm:$0xff]  ;;  %v2646_v57 = vsel %vm1208_vm0, %v4588_v8, %v4868_v51 }
 0x136   : > { %v2295_v33 = vunpack.c.l.b16 %v2223_v56  ;;  %v4952_v56 = vld [vmem:[#allocation2 + $0x90] sm:$0xff] }
 0x13c   : > { %v4893_v38 = vpop.permute.xlu1 %1781 }
 0x13d   : > { %v1845_v28 = vsel %vm1208_vm0, %v4386_v20, %v4893_v38 }
 0x13e   : > { %1995 = vmatmul.bf16.gmra.mxu3 %v1845_v28  ;;  %v2296_v28 = vunpack.c.l.b16 %v2226_v21  ;;  %v2648_v21 = vsel %vm1208_vm0, %v4768_v48, %v4891_v25 }
 0x142   : > { %1935 = vmatmul.bf16.gmra.mxu0 %v1797_v11  ;;  %v4922_v11 = vpack.c.b16 %v2296_v28, %v2295_v33 }
 0x143   : > { %v4901_v52 = vpop.permute.xlu2 %1765 }
 0x144   : > { %v1813_v20 = vsel %vm1208_vm0, %v4332_v13, %v4901_v52  ;;  %v2329_v30 = vpop.permute.xlu1 %2328  ;;  %v4911_v13 = vpack.c.b16 %v2298_v60, %v2297_v35  ;;  %2344 = vrot.lane.b32.xlu2 %v4922_v11, %s3995_s28 }
 0x145   : > { %1955 = vmatmul.bf16.gmra.mxu1 %v1813_v20  ;;  %v2362_v5 = vsel %vm1208_vm0, %v2309_v12, %v2329_v30  ;;  %v2331_v31 = vpop.permute.xlu0 %2330  ;;  %v2238_v20 = vrot.slane %v2236_v49, 4  ;;  %v3971_v30 = vld [vmem:[#allocation2 + $0x8c] sm:$0x1] }
 0x146   : > { %2497 = vmatmul.bf16.vlgmr.msrb.gmra.mxu2 %v2362_v5  ;;  %2346 = vrot.lane.b32.xlu1 %v4911_v13, %s3995_s28  ;;  %v2878_v12 = vsel %vm1208_vm0, %v4560_v14, %v2331_v31  ;;  %v2239_v16 = vrot.slane %v3971_v30, 5  ;;  %v2366_v29 = vsel %vm1208_vm0, %v4552_v41, %v2331_v31  ;;  %v2237_v5 = vsel %vm4505_vm1, %v3454_v26, %v2236_v49  ;;  %v3975_v30 = vld [vmem:[#allocation2 + $0x90] sm:$0xf] }
 0x147   : > { %v2299_v60 = vunpack.c.l.b16 %v2237_v5  ;;  %v2253_v49 = vrot.slane %v3974_v46, 5  ;;  %v3977_v5 = vld [vmem:[#allocation2 + $0x98] sm:$0x1] }
 0x148   : > { %v2240_v35 = vsel %vm4505_vm1, %v2238_v20, %v2239_v16  ;;  %v3976_v16 = vld [vmem:[#allocation2 + $0x94] sm:$0xf] }
 0x149   : > { %v2300_v58 = vunpack.c.l.b16 %v2240_v35  ;;  %v2246_v35 = vrot.slane %v3977_v5, 5  ;;  %v2652_v5 = vsel %vm1208_vm0, %v4669_v40, %v4751_v32 }
 0x14b   : > { %v1177_v44 = vpop.permute.xlu2 %1176  ;;  %v4941_v19 = vpack.c.b16 %v2300_v58, %v2299_v60 }
 0x14c   : > { %v1211_v0 = vsel %vm1208_vm0, %v3613_v47, %v1177_v44  ;;  %1194 = vrot.lane.b32.xlu2 %v4939_v3, %s3995_s28  ;;  %v1179_v9 = vpop.permute.xlu1 %1178  ;;  %v3973_v44 = vld [vmem:[#allocation2 + $0x9c] sm:$0xf] }
 0x14d   : > { %2348 = vrot.lane.b32.xlu0 %v4941_v19, %s3995_s28  ;;  %v1215_v63 = vsel %vm1208_vm0, %v4694_v62, %v1179_v9  ;;  %v1181_v28 = vpop.permute.xlu0 %1180 }
 0x14e   : > { %2752 = vmatmul.bf16.vlgmr.msrb.gmra.mxu3 %v2644_v18  ;;  %1196 = vrot.lane.b32.xlu1 %v4928_v36, %s3995_s28  ;;  %v3972_v18 = vld [vmem:[#allocation2 + $0xa0] sm:$0xf]  ;;  %v1219_v62 = vsel %vm1208_vm0, %v4586_v1, %v1181_v28  ;;  %v3455_v1 = vrot.slane %v3975_v30, 9 }
 0x14f   : > { %v2250_v47 = vrot.slane %v3972_v18, 5  ;;  %v3978_v18 = vld [vmem:[#allocation2 + $0xac] sm:$0xf] }
 0x152   : > { %2986 = vmatmul.bf16.vlgmr.msrb.gmra.mxu0 %v2878_v12  ;;  %v2252_v12 = vrot.slane %v2250_v47, 4 }
 0x153   : > { %v2333_v41 = vpop.permute.xlu2 %2332 }
 0x154   : > { %v2880_v6 = vsel %vm1208_vm0, %v4735_v22, %v2333_v41  ;;  %v2370_v33 = vsel %vm1208_vm0, %v4560_v14, %v2333_v41  ;;  %v2335_v51 = vpop.permute.xlu1 %2334  ;;  %v3456_v14 = vrot.slane %v3973_v44, 9  ;;  %v2254_v53 = vsel %vm4505_vm1, %v2252_v12, %v2253_v49  ;;  %v3980_v12 = vld [vmem:[#allocation2 + $0xb0] sm:$0x1] }
 0x155   : > { %2057 = vmatmul.bf16.vlgmr.msrb.gmra.mxu1 %v1211_v0  ;;  %1198 = vrot.lane.b32.xlu0 %v4952_v56, %s3995_s28  ;;  %v2882_v31 = vsel %vm1208_vm0, %v4619_v17, %v2335_v51  ;;  %v2374_v0 = vsel %vm1208_vm0, %v4735_v22, %v2335_v51  ;;  %v2304_v20 = vunpack.c.l.b16 %v2254_v53  ;;  %v2650_v51 = vsel %vm1208_vm0, %v4662_v55, %v4655_v24  ;;  %v3979_v24 = vld [vmem:[#allocation2 + $0xa8] sm:$0xf] }
 0x156   : > { %2502 = vmatmul.bf16.gmra.mxu2 %v2366_v29  ;;  %v2251_v25 = vsel %vm4505_vm1, %v3456_v14, %v2250_v47  ;;  %v2243_v29 = vrot.slane %v3976_v16, 5  ;;  %v2257_v47 = vrot.slane %v3978_v18, 5  ;;  %v3457_v44 = vrot.slane %v3979_v24, 9 }
 0x157   : > { %v2303_v26 = vunpack.c.l.b16 %v2251_v25  ;;  %v2260_v46 = vrot.slane %v3980_v12, 5 }
 0x158   : > { %v2244_v22 = vsel %vm4505_vm1, %v3455_v1, %v2243_v29  ;;  %v2245_v58 = vrot.slane %v2243_v29, 4  ;;  %v2259_v14 = vrot.slane %v2257_v47, 4  ;;  %v2258_v25 = vsel %vm4505_vm1, %v3457_v44, %v2257_v47 }
 0x159   : > { %v4973_v60 = vpack.c.b16 %v2304_v20, %v2303_v26  ;;  %v2301_v41 = vunpack.c.l.b16 %v2244_v22  ;;  %v5006_v26 = vld [vmem:[#allocation2 + $0x9c] sm:$0xff]  ;;  %v2305_v20 = vunpack.c.l.b16 %v2258_v25 }
 0x15a   : > { %v2247_v9 = vsel %vm4505_vm1, %v2245_v58, %v2246_v35  ;;  %v2261_v53 = vsel %vm4505_vm1, %v2259_v14, %v2260_v46  ;;  %v3981_v14 = vld [vmem:[#allocation2 + $0xc4] sm:$0xf]  ;;  %v3982_v25 = vld [vmem:[#allocation2 + $0xc0] sm:$0xf] }
 0x15b   : > { %2352 = vrot.lane.b32.xlu1 %v4973_v60, %s3995_s28  ;;  %v2306_v30 = vunpack.c.l.b16 %v2261_v53  ;;  %v2272_v12 = vrot.slane %v3981_v14, 5  ;;  %v3459_v53 = vrot.slane %v3982_v25, 9 }
 0x15c   : > { %v1185_v22 = vpop.permute.xlu1 %1184 }
 0x15d   : > { %v5016_v16 = vpack.c.b16 %v2306_v30, %v2305_v20  ;;  %v1227_v32 = vsel %vm1208_vm0, %v4768_v48, %v1185_v22  ;;  %v2274_v20 = vrot.slane %v2272_v12, 4  ;;  %v3983_v30 = vld [vmem:[#allocation2 + $0xc8] sm:$0x1] }
 0x15e   : > { %2757 = vmatmul.bf16.gmra.mxu3 %v2646_v57 }
 0x15f   : > { %2354 = vrot.lane.b32.xlu0 %v5016_v16, %s3995_s28 }
 0x162   : > { %2991 = vmatmul.bf16.gmra.mxu0 %v2880_v6  ;;  %v2302_v6 = vunpack.c.l.b16 %v2247_v9  ;;  %v5029_v9 = vld [vmem:[#allocation2 + $0xb4] sm:$0xff] }
 0x165   : > { %2062 = vmatmul.bf16.gmra.mxu1 %v1215_v63  ;;  %v2337_v63 = vpop.permute.xlu0 %2336  ;;  %v2341_v48 = vpop.permute.xlu1 %2340 }
 0x166   : > { %2507 = vmatmul.bf16.gmra.mxu2 %v2370_v33  ;;  %v4983_v33 = vpack.c.b16 %v2302_v6, %v2301_v41  ;;  %v2884_v28 = vsel %vm1208_vm0, %v4631_v54, %v2337_v63  ;;  %v2378_v49 = vsel %vm1208_vm0, %v4619_v17, %v2337_v63  ;;  %v5010_v1 = vpop.f32.mrf.mxu1  ;;  %v2888_v44 = vsel %vm1208_vm0, %v4749_v4, %v2341_v48 }
 0x167   : > { %1204 = vrot.lane.b32.xlu0 %v5029_v9, %s3995_s28 }
 0x168   : > { %2350 = vrot.lane.b32.xlu2 %v4983_v33, %s3995_s28 }
 0x16b   : > { %v5014_v17 = vpop.f32.mrf.mxu0 }
 0x16d   : > { %v4977_v57 = vpop.f32.mrf.mxu2  ;;  %v1187_v24 = vpop.permute.xlu0 %1186 }
 0x16e   : > { %2762 = vmatmul.bf16.gmra.mxu3 %v2648_v21  ;;  %v1183_v21 = vpop.permute.xlu2 %1182  ;;  %v5031_v6 = vpop.f32.mrf.mxu1 }
 0x170   : > { %1200 = vrot.lane.b32.xlu2 %v5006_v26, %s3995_s28 }
 0x172   : > { %2996 = vmatmul.bf16.gmra.mxu0 %v2882_v31  ;;  %v4992_v31 = vld [vmem:[#allocation2 + $0xa8] sm:$0xff] }
 0x173   : > { %1202 = vrot.lane.b32.xlu1 %v4992_v31, %s3995_s28  ;;  %v5033_v63 = vpop.f32.mrf.mxu0 }
 0x175   : > { %2067 = vmatmul.bf16.gmra.mxu1 %v1219_v62  ;;  %v1223_v62 = vsel %vm1208_vm0, %v4588_v8, %v1183_v21  ;;  %v5008_v8 = vpop.f32.mrf.mxu3 }
 0x176   : > { %2512 = vmatmul.bf16.gmra.mxu2 %v2374_v0  ;;  %v5000_v0 = vpop.f32.mrf.mxu2  ;;  %5328 = vst [vmem:[#allocation3_spill] sm:$0xff] %v5008_v8  ;;  %v2339_v29 = vpop.permute.xlu2 %2338 }
 0x177   : > { %v2886_v58 = vsel %vm1208_vm0, %v4811_v59, %v2339_v29  ;;  %v5049_v47 = vpop.f32.mrf.mxu1 }
 0x17d   : > { %v5027_v41 = vpop.f32.mrf.mxu3 }
 0x17e   : > { %2767 = vmatmul.bf16.gmra.mxu3 %v2650_v51  ;;  %v5023_v35 = vpop.f32.mrf.mxu2  ;;  %5330 = vst [vmem:[#allocation5_spill] sm:$0xff] %v5027_v41  ;;  %v2382_v51 = vsel %vm1208_vm0, %v4631_v54, %v2339_v29  ;;  %v2654_v54 = vsel %vm1208_vm0, %v4818_v39, %v4780_v10  ;;  %v2275_v29 = vrot.slane %v3983_v30, 5  ;;  %v2386_v10 = vsel %vm1208_vm0, %v4811_v59, %v2341_v48  ;;  %v3985_v48 = vld [vmem:[#allocation2 + $0xb4] sm:$0xf] }
 0x17f   : > { %5329 = vst [vmem:[#allocation4_spill] sm:$0xff] %v5023_v35  ;;  %v5066_v22 = vpop.f32.mrf.mxu1  ;;  %v3458_v14 = vrot.slane %v3985_v48, 9 }
 0x182   : > { %3001 = vmatmul.bf16.gmra.mxu0 %v2884_v28  ;;  %v5043_v28 = vld [vmem:[#allocation2 + $0xc0] sm:$0xff] }
 0x183   : > { %1206 = vrot.lane.b32.xlu0 %v5043_v28, %s3995_s28 }
 0x185   : > { %2072 = vmatmul.bf16.gmra.mxu1 %v1223_v62  ;;  %v5045_v18 = vpop.f32.mrf.mxu3  ;;  %v5051_v62 = vpop.f32.mrf.mxu0 }
 0x186   : > { %2517 = vmatmul.bf16.gmra.mxu2 %v2378_v49  ;;  %v5041_v21 = vpop.f32.mrf.mxu2  ;;  %5332 = vst [vmem:[#allocation7_spill] sm:$0xff] %v5045_v18  ;;  %v1231_v49 = vsel %vm1208_vm0, %v4662_v55, %v1187_v24 }
 0x187   : > { %5331 = vst [vmem:[#allocation6_spill] sm:$0xff] %v5041_v21 }
 0x18d   : > { %v5072_v55 = vpop.f32.mrf.mxu0 }
 0x18e   : > { %2772 = vmatmul.bf16.gmra.mxu3 %v2652_v5  ;;  %v5064_v5 = vpop.f32.mrf.mxu3 }
 0x18f   : > { %5334 = vst [vmem:[#allocation9_spill] sm:$0xff] %v5064_v5 }
 0x192   : > { %3006 = vmatmul.bf16.gmra.mxu0 %v2886_v58  ;;  %v2273_v58 = vsel %vm4505_vm1, %v3459_v53, %v2272_v12  ;;  %v3986_v12 = vld [vmem:[#allocation2 + $0xbc] sm:$0x1] }
 0x193   : > { %v5058_v46 = vpop.f32.mrf.mxu2  ;;  %v2267_v53 = vrot.slane %v3986_v12, 5 }
 0x194   : > { %5333 = vst [vmem:[#allocation8_spill] sm:$0xff] %v5058_v46 }
 0x195   : > { %2077 = vmatmul.bf16.gmra.mxu1 %v1227_v32  ;;  %v2276_v32 = vsel %vm4505_vm1, %v2274_v20, %v2275_v29 }
 0x196   : > { %2522 = vmatmul.bf16.gmra.mxu2 %v2382_v51  ;;  %v2325_v51 = vunpack.c.l.b16 %v2273_v58  ;;  %v5087_v58 = vpop.f32.mrf.mxu3 }
 0x197   : > { %5336 = vst [vmem:[#allocation11_spill] sm:$0xff] %v5087_v58 }
 0x19b   : > { %v5078_v30 = vpop.f32.mrf.mxu2 }
 0x19c   : > { %5335 = vst [vmem:[#allocation10_spill] sm:$0xff] %v5078_v30 }
 0x19e   : > { %2777 = vmatmul.bf16.gmra.mxu3 %v2654_v54  ;;  %v2326_v54 = vunpack.c.l.b16 %v2276_v32 }
 0x1a0   : > { %v5074_v24 = vpack.c.b16 %v2326_v54, %v2325_v51  ;;  %v5089_v54 = vpop.f32.mrf.mxu1 }
 0x1a2   : > { %3011 = vmatmul.bf16.gmra.mxu0 %v2888_v44  ;;  %v3984_v44 = vld [vmem:[#allocation2 + $0xb8] sm:$0xf]  ;;  %2358 = vrot.lane.b32.xlu1 %v5074_v24, %s3995_s28 }
 0x1a3   : > { %v2264_v59 = vrot.slane %v3984_v44, 5  ;;  %v1189_v44 = vpop.permute.xlu2 %1188  ;;  %v5107_v18 = vpop.f32.mrf.mxu2 }
 0x1a4   : > { %5337 = vst [vmem:[#allocation12_spill] sm:$0xff] %v5107_v18 }
 0x1a5   : > { %2082 = vmatmul.bf16.gmra.mxu1 %v1231_v49  ;;  %v2266_v25 = vrot.slane %v2264_v59, 4  ;;  %v2343_v49 = vpop.permute.xlu0 %2342  ;;  %v2265_v20 = vsel %vm4505_vm1, %v3458_v14, %v2264_v59 }
 0x1a6   : > { %2527 = vmatmul.bf16.gmra.mxu2 %v2386_v10  ;;  %v2656_v10 = vsel %vm1208_vm0, %v4851_v15, %v4901_v52  ;;  %v2307_v32 = vunpack.c.l.b16 %v2265_v20  ;;  %v2890_v59 = vsel %vm1208_vm0, %v4843_v43, %v2343_v49  ;;  %v1088_v52 = vld [vmem:[#allocation2 + $0xcc] sm:$0xf]  ;;  %v1235_v20 = vsel %vm1208_vm0, %v4669_v40, %v1189_v44  ;;  %v5111_v44 = vpop.f32.mrf.mxu3 }
 0x1a7   : > { %v2268_v29 = vsel %vm4505_vm1, %v2266_v25, %v2267_v53  ;;  %v1089_v25 = vld [vmem:[#allocation2 + $0xd0] sm:$0xf]  ;;  %v1090_v53 = vld [vmem:[#allocation2 + $0xd4] sm:$0x1]  ;;  %v2390_v5 = vsel %vm1208_vm0, %v4749_v4, %v2343_v49  ;;  %5338 = vst [vmem:[#allocation13_spill] sm:$0xff] %v5111_v44  ;;  %v1191_v49 = vpop.permute.xlu1 %1190 }
 0x1a8   : > { %v2308_v51 = vunpack.c.l.b16 %v2268_v29  ;;  %v2868_v12 = vrot.slane %v1089_v25, 5  ;;  %v3560_v29 = vrot.slane %v1088_v52, 9  ;;  %v2871_v58 = vrot.slane %v1090_v53, 5  ;;  %v5115_v30 = vpop.f32.mrf.mxu1 }
 0x1a9   : > { %v2630_v21 = vshll.u32 %v1090_v53, 16 }
 0x1aa   : > { %v5095_v14 = vpack.c.b16 %v2308_v51, %v2307_v32  ;;  %v2869_v32 = vsel %vm4505_vm1, %v3560_v29, %v2868_v12  ;;  %v2611_v29 = vshrl.u32 %v1088_v52, 16 }
 0x1ab   : > { %v2873_v41 = vunpack.c.l.b16 %v2869_v32  ;;  %v2345_v4 = vpop.permute.xlu2 %2344  ;;  %v2620_v32 = vshll.u32 %v1089_v25, 16 }
 0x1ac   : > { %2356 = vrot.lane.b32.xlu2 %v5095_v14, %s3995_s28  ;;  %v2394_v23 = vsel %vm1208_vm0, %v4843_v43, %v2345_v4 }
 0x1ae   : > { %2782 = vmatmul.bf16.gmra.mxu3 %v2656_v10  ;;  %v2870_v10 = vrot.slane %v2868_v12, 4  ;;  %v5126_v12 = vpop.f32.mrf.mxu2 }
 0x1af   : > { %v5091_v48 = vpop.f32.mrf.mxu0  ;;  %5339 = vst [vmem:[#allocation14_spill] sm:$0xff] %v5126_v12 }
 0x1b0   : > { %v2872_v51 = vsel %vm4505_vm1, %v2870_v10, %v2871_v58  ;;  %v2614_v10 = vshll.u32 %v1088_v52, 16  ;;  %v2632_v52 = vrot.slane %v2630_v21, 5 }
 0x1b1   : > { %v2874_v8 = vunpack.c.l.b16 %v2872_v51  ;;  %v2624_v51 = vshrl.u32 %v1089_v25, 16 }
 0x1b2   : > { %3016 = vmatmul.bf16.gmra.mxu0 %v2890_v59  ;;  %v2616_v44 = vrot.slane %v2614_v10, 5 }
 0x1b3   : > { %v5113_v59 = vpack.c.b16 %v2874_v8, %v2873_v41  ;;  %v2626_v18 = vrot.slane %v2624_v51, 4 }
 0x1b5   : > { %2087 = vmatmul.bf16.gmra.mxu1 %v1235_v20  ;;  %2876 = vrot.lane.b32.xlu1 %v5113_v59, %s3995_s28  ;;  %v1239_v20 = vsel %vm1208_vm0, %v4818_v39, %v1191_v49 }
 0x1b6   : > { %2532 = vmatmul.bf16.gmra.mxu2 %v2390_v5  ;;  %v2892_v5 = vsel %vm1208_vm0, %v4922_v11, %v2345_v4 }
 0x1b7   : > { %v5109_v40 = vpop.f32.mrf.mxu0 }
 0x1be   : > { %2787 = vmatmul.bf16.gmra.mxu3 %v2658_v2  ;;  %v2613_v2 = vrot.slane %v2611_v29, 4 }
 0x1bf   : > { %v5122_v58 = vpop.f32.mrf.mxu0 }
 0x1c0   : > { %v2617_v46 = vor.u32 %v2616_v44, %v2613_v2 }
 0x1c1   : > { %v5128_v8 = vpop.f32.mrf.mxu3 }
 0x1c2   : > { %5340 = vst [vmem:[#allocation15_spill] sm:$0xff] %v5128_v8  ;;  %v5130_v41 = vpop.f32.mrf.mxu1  ;;  %3021 = vmatmul.bf16.gmra.mxu0 %v2892_v5  ;;  %v2622_v8 = vrot.slane %v2620_v32, 5  ;;  %v2618_v43 = vrot.slane %v2617_v46, 4 }
 0x1c4   : > { %v2627_v49 = vor.u32 %v2626_v18, %v2622_v8  ;;  %v2623_v25 = vsel %vm4171_vm7, %v2618_v43, %v2622_v8  ;;  %v1193_v18 = vpop.permute.xlu0 %1192 }
 0x1c5   : > { %2092 = vmatmul.bf16.gmra.mxu1 %v1239_v20  ;;  %v2347_v20 = vpop.permute.xlu1 %2346  ;;  %v2639_v44 = vunpack.c.l.b16 %v2623_v25  ;;  %v1243_v8 = vsel %vm1208_vm0, %v4851_v15, %v1193_v18  ;;  %v5161_v15 = vld [vmem:[%s5312_s2] ss:$0 sm:$0xff] }
 0x1c6   : > { %2537 = vmatmul.bf16.gmra.mxu2 %v2394_v23  ;;  %v2628_v4 = vrot.slane %v2627_v49, 4  ;;  %v2660_v23 = vsel %vm1208_vm0, %v4939_v3, %v4714_v27  ;;  %v2894_v21 = vsel %vm1208_vm0, %v4911_v13, %v2347_v20  ;;  %v2398_v34 = vsel %vm1208_vm0, %v4922_v11, %v2347_v20 }
 0x1c7   : > { %v5136_v12 = vpop.f32.mrf.mxu0 }
 0x1c8   : > { %v2633_v53 = vsel %vm4171_vm7, %v2628_v4, %v2632_v52 }
 0x1c9   : > { %v5138_v35 = vpop.f32.mrf.mxu3  ;;  %v2498_v39 = vpop.f32.mrf.mxu2  ;;  %v2640_v29 = vunpack.c.l.b16 %v2633_v53 }
 0x1ca   : > { %v5140_v5 = vpop.f32.mrf.mxu1 }
 0x1cb   : > { %v2641_v46 = vpack.c.b16 %v2640_v29, %v2639_v44 }
 0x1cc   : > { %v2349_v29 = vpop.permute.xlu0 %2348 }
 0x1cd   : > { %2642 = vrot.lane.b32.xlu2 %v2641_v46, %s3995_s28 }
 0x1ce   : > { %2792 = vmatmul.bf16.gmra.mxu3 %v2660_v23 }
 0x1cf   : > { %v2987_v10 = vpop.f32.mrf.mxu0 }
 0x1d1   : > { %v2500_v32 = vpop.f32.mrf.mxu2  ;;  %v2753_v51 = vpop.f32.mrf.mxu3 }
 0x1d2   : > { %v2058_v2 = vpop.f32.mrf.mxu1  ;;  %3026 = vmatmul.bf16.gmra.mxu0 %v2894_v21  ;;  %v2896_v21 = vsel %vm1208_vm0, %v4941_v19, %v2349_v29 }
 0x1d3   : > { %v2059_v27 = vadd.f32 %v2058_v2, %v5014_v17  ;;  %v2662_v17 = vsel %vm1208_vm0, %v4928_v36, %v4785_v45 }
 0x1d5   : > { %2097 = vmatmul.bf16.gmra.mxu1 %v1243_v8  ;;  %v2578_v49 = vadd.f32 %v2498_v39, %v2059_v27  ;;  %v1195_v39 = vpop.permute.xlu2 %1194  ;;  %v2402_v8 = vsel %vm1208_vm0, %v4911_v13, %v2349_v29 }
 0x1d6   : > { %2542 = vmatmul.bf16.gmra.mxu2 %v2398_v34 }
 0x1d7   : > { %v2989_v43 = vpop.f32.mrf.mxu0  ;;  %v2833_v52 = vadd.f32 %v2753_v51, %v2578_v49 }
 0x1d9   : > { %v2503_v4 = vpop.f32.mrf.mxu2  ;;  %v2755_v25 = vpop.f32.mrf.mxu3  ;;  %v3067_v44 = vadd.f32 %v2987_v10, %v2833_v52 }
 0x1da   : > { %v2060_v23 = vpop.f32.mrf.mxu1 }
 0x1db   : > { %v2061_v53 = vadd.f32 %v2060_v23, %v5033_v63  ;;  %v3103_v63 = vadd.f32 %v5161_v15, %v3067_v44 }
 0x1dd   : > { %v2579_v11 = vadd.f32 %v2500_v32, %v2061_v53  ;;  %v1247_v32 = vsel %vm1208_vm0, %v4866_v37, %v1195_v39  ;;  %3882 = vtanh.f32 %v3103_v63 }
 0x1de   : > { %2797 = vmatmul.bf16.gmra.mxu3 %v2662_v17  ;;  %v1197_v17 = vpop.permute.xlu1 %1196 }
 0x1df   : > { %v2834_v20 = vadd.f32 %v2755_v25, %v2579_v11  ;;  %v2992_v18 = vpop.f32.mrf.mxu0  ;;  %v2664_v11 = vsel %vm1208_vm0, %v4952_v56, %v4816_v7 }
 0x1e1   : > { %v3068_v10 = vadd.f32 %v2989_v43, %v2834_v20  ;;  %v2505_v46 = vpop.f32.mrf.mxu2  ;;  %v2758_v51 = vpop.f32.mrf.mxu3 }
 0x1e2   : > { %v2063_v2 = vpop.f32.mrf.mxu1  ;;  %3031 = vmatmul.bf16.gmra.mxu0 %v2896_v21 }
 0x1e3   : > { %v3104_v45 = vadd.f32 %v5161_v15, %v3068_v10  ;;  %v2064_v34 = vadd.f32 %v2063_v2, %v5051_v62  ;;  %v3883_v23 = vpop.eup %3882 }
 0x1e5   : > { %2102 = vmatmul.bf16.gmra.mxu1 %v1247_v32  ;;  %3884 = vtanh.f32 %v3104_v45  ;;  %v2580_v27 = vadd.f32 %v2503_v4, %v2064_v34  ;;  %v2351_v4 = vpop.permute.xlu2 %2350 }
 0x1e6   : > { %2547 = vmatmul.bf16.gmra.mxu2 %v2402_v8  ;;  %v2898_v21 = vsel %vm1208_vm0, %v4983_v33, %v2351_v4  ;;  %v2406_v2 = vsel %vm1208_vm0, %v4941_v19, %v2351_v4  ;;  %v2353_v19 = vpop.permute.xlu1 %2352 }
 0x1e7   : > { %v2994_v49 = vpop.f32.mrf.mxu0  ;;  %v2835_v43 = vadd.f32 %v2758_v51, %v2580_v27  ;;  %v2900_v4 = vsel %vm1208_vm0, %v4973_v60, %v2353_v19 }
 0x1e9   : > { %v2508_v52 = vpop.f32.mrf.mxu2  ;;  %v2760_v25 = vpop.f32.mrf.mxu3  ;;  %v3069_v44 = vadd.f32 %v2992_v18, %v2835_v43 }
 0x1ea   : > { %v2065_v37 = vpop.f32.mrf.mxu1 }
 0x1eb   : > { %v3885_v53 = vpop.eup %3884  ;;  %v2066_v13 = vadd.f32 %v2065_v37, %v5072_v55  ;;  %v3105_v63 = vadd.f32 %v5161_v15, %v3069_v44 }
 0x1ec   : > { %v3738_v62 = vpack.c.bf16 %v3885_v53, %v3883_v23 }
 0x1ed   : > { %v2581_v29 = vadd.f32 %v2505_v46, %v2066_v13  ;;  %v1251_v46 = vsel %vm1208_vm0, %v4939_v3, %v1197_v17  ;;  %3886 = vtanh.f32 %v3105_v63 }
 0x1ee   : > { %3739 = vst [vmem:[%s5180_s7] sm:$0xff] %v3738_v62   ;;  %2802 = vmatmul.bf16.gmra.mxu3 %v2664_v11 }
 0x1ef   : > { %v2836_v39 = vadd.f32 %v2760_v25, %v2581_v29  ;;  %v2997_v20 = vpop.f32.mrf.mxu0 }
 0x1f1   : > { %v3070_v10 = vadd.f32 %v2994_v49, %v2836_v39  ;;  %v2510_v55 = vpop.f32.mrf.mxu2  ;;  %v2763_v51 = vpop.f32.mrf.mxu3 }
 0x1f2   : > { %v2068_v18 = vpop.f32.mrf.mxu1  ;;  %3036 = vmatmul.bf16.gmra.mxu0 %v2898_v21  ;;  %v2410_v21 = vsel %vm1208_vm0, %v4983_v33, %v2353_v19 }
 0x1f3   : > { %v3106_v7 = vadd.f32 %v5161_v15, %v3070_v10  ;;  %v2069_v32 = vadd.f32 %v2068_v18, %v5091_v48  ;;  %v3887_v43 = vpop.eup %3886  ;;  %v2666_v48 = vsel %vm1208_vm0, %v5006_v26, %v4672_v61 }
 0x1f5   : > { %2107 = vmatmul.bf16.gmra.mxu1 %v1251_v46  ;;  %3888 = vtanh.f32 %v3106_v7  ;;  %v2582_v45 = vadd.f32 %v2508_v52, %v2069_v32  ;;  %v1199_v52 = vpop.permute.xlu0 %1198 }
 0x1f6   : > { %2552 = vmatmul.bf16.gmra.mxu2 %v2406_v2 }
 0x1f7   : > { %v2999_v8 = vpop.f32.mrf.mxu0  ;;  %v2837_v34 = vadd.f32 %v2763_v51, %v2582_v45 }
 0x1f9   : > { %v2513_v27 = vpop.f32.mrf.mxu2  ;;  %v2765_v49 = vpop.f32.mrf.mxu3  ;;  %v3071_v53 = vadd.f32 %v2997_v20, %v2837_v34  ;;  %v1255_v20 = vsel %vm1208_vm0, %v4928_v36, %v1199_v52 }
 0x1fa   : > { %v2070_v3 = vpop.f32.mrf.mxu1 }
 0x1fb   : > { %v3889_v25 = vpop.eup %3888  ;;  %v2071_v23 = vadd.f32 %v2070_v3, %v5109_v40  ;;  %v3107_v29 = vadd.f32 %v5161_v15, %v3071_v53 }
 0x1fc   : > { %v3743_v37 = vpack.c.bf16 %v3889_v25, %v3887_v43 }
 0x1fd   : > { %v2583_v13 = vadd.f32 %v2510_v55, %v2071_v23  ;;  %3890 = vtanh.f32 %v3107_v29  ;;  %v2355_v33 = vpop.permute.xlu0 %2354 }
 0x1fe   : > { %3830 = vst [vmem:[%s5180_s7 + $0x8] sm:$0xff] %v3743_v37   ;;  %2807 = vmatmul.bf16.gmra.mxu3 %v2666_v48  ;;  %v2902_v3 = vsel %vm1208_vm0, %v5016_v16, %v2355_v33 }
 0x1ff   : > { %v2838_v62 = vadd.f32 %v2765_v49, %v2583_v13  ;;  %v3002_v44 = vpop.f32.mrf.mxu0  ;;  %v2414_v13 = vsel %vm1208_vm0, %v4973_v60, %v2355_v33 }
 0x201   : > { %v3072_v11 = vadd.f32 %v2999_v8, %v2838_v62  ;;  %v2515_v40 = vpop.f32.mrf.mxu2  ;;  %v2768_v17 = vpop.f32.mrf.mxu3 }
 0x202   : > { %v2073_v39 = vpop.f32.mrf.mxu1  ;;  %3041 = vmatmul.bf16.gmra.mxu0 %v2900_v4 }
 0x203   : > { %v3108_v61 = vadd.f32 %v5161_v15, %v3072_v11  ;;  %v2074_v63 = vadd.f32 %v2073_v39, %v5122_v58  ;;  %v3891_v7 = vpop.eup %3890  ;;  %v2668_v58 = vsel %vm1208_vm0, %v4992_v31, %v4758_v42 }
 0x205   : > { %2112 = vmatmul.bf16.gmra.mxu1 %v1255_v20  ;;  %3892 = vtanh.f32 %v3108_v61  ;;  %v2584_v10 = vadd.f32 %v2513_v27, %v2074_v63  ;;  %v1201_v27 = vpop.permute.xlu2 %1200 }
 0x206   : > { %2557 = vmatmul.bf16.gmra.mxu2 %v2410_v21  ;;  %v1259_v19 = vsel %vm1208_vm0, %v4952_v56, %v1201_v27  ;;  %v1203_v21 = vpop.permute.xlu1 %1202 }
 0x207   : > { %v3004_v55 = vpop.f32.mrf.mxu0  ;;  %v2839_v51 = vadd.f32 %v2768_v17, %v2584_v10 }
 0x209   : > { %v2518_v18 = vpop.f32.mrf.mxu2  ;;  %v2770_v46 = vpop.f32.mrf.mxu3  ;;  %v3073_v8 = vadd.f32 %v3002_v44, %v2839_v51 }
 0x20a   : > { %v2075_v36 = vpop.f32.mrf.mxu1 }
 0x20b   : > { %v3893_v2 = vpop.eup %3892  ;;  %v2076_v32 = vadd.f32 %v2075_v36, %v5136_v12  ;;  %v3109_v25 = vadd.f32 %v5161_v15, %v3073_v8  ;;  %v1263_v36 = vsel %vm1208_vm0, %v5006_v26, %v1203_v21 }
 0x20c   : > { %v3748_v45 = vpack.c.bf16 %v3893_v2, %v3891_v7 }
 0x20d   : > { %v2585_v34 = vadd.f32 %v2515_v40, %v2076_v32  ;;  %3894 = vtanh.f32 %v3109_v25  ;;  %v2357_v60 = vpop.permute.xlu2 %2356 }
 0x20e   : > { %3831 = vst [vmem:[%s5180_s7 + $0x10] sm:$0xff] %v3748_v45   ;;  %2812 = vmatmul.bf16.gmra.mxu3 %v2668_v58  ;;  %v2418_v2 = vsel %vm1208_vm0, %v5016_v16, %v2357_v60 }
 0x20f   : > { %v2840_v49 = vadd.f32 %v2770_v46, %v2585_v34  ;;  %v3007_v43 = vpop.f32.mrf.mxu0 }
 0x211   : > { %v3074_v23 = vadd.f32 %v3004_v55, %v2840_v49  ;;  %v2520_v12 = vpop.f32.mrf.mxu2  ;;  %v2773_v37 = vpop.f32.mrf.mxu3  ;;  %v2904_v55 = vsel %vm1208_vm0, %v5095_v14, %v2357_v60 }
 0x212   : > { %v2078_v53 = vpop.f32.mrf.mxu1  ;;  %3046 = vmatmul.bf16.gmra.mxu0 %v2902_v3 }
 0x213   : > { %v3110_v42 = vadd.f32 %v5161_v15, %v3074_v23  ;;  %v2079_v48 = vadd.f32 %v2078_v53, %v5010_v1  ;;  %v3895_v11 = vpop.eup %3894  ;;  %v2670_v1 = vsel %vm1208_vm0, %v5029_v9, %v4790_v50 }
 0x214   : > { %v2359_v16 = vpop.permute.xlu1 %2358 }
 0x215   : > { %2117 = vmatmul.bf16.gmra.mxu1 %v1259_v19  ;;  %3896 = vtanh.f32 %v3110_v42  ;;  %v2586_v52 = vadd.f32 %v2518_v18, %v2079_v48  ;;  %v2907_v19 = vsel %vm1208_vm0, %v5074_v24, %v2359_v16 }
 0x216   : > { %2562 = vmatmul.bf16.gmra.mxu2 %v2414_v13 }
 0x217   : > { %v3009_v62 = vpop.f32.mrf.mxu0  ;;  %v2841_v44 = vadd.f32 %v2773_v37, %v2586_v52 }
 0x219   : > { %v2523_v4 = vpop.f32.mrf.mxu2  ;;  %v2775_v29 = vpop.f32.mrf.mxu3  ;;  %v3075_v20 = vadd.f32 %v3007_v43, %v2841_v44 }
 0x21a   : > { %v2080_v56 = vpop.f32.mrf.mxu1 }
 0x21b   : > { %v3897_v40 = vpop.eup %3896  ;;  %v2081_v17 = vadd.f32 %v2080_v56, %v5031_v6  ;;  %v3111_v51 = vadd.f32 %v5161_v15, %v3075_v20 }
 0x21c   : > { %v3753_v39 = vpack.c.bf16 %v3897_v40, %v3895_v11 }
 0x21d   : > { %v2587_v61 = vadd.f32 %v2520_v12, %v2081_v17  ;;  %3898 = vtanh.f32 %v3111_v51  ;;  %v1205_v12 = vpop.permute.xlu0 %1204 }
 0x21e   : > { %3832 = vst [vmem:[%s5180_s7 + $0x18] sm:$0xff] %v3753_v39   ;;  %2817 = vmatmul.bf16.gmra.mxu3 %v2670_v1 }
 0x21f   : > { %v2842_v63 = vadd.f32 %v2775_v29, %v2587_v61  ;;  %v3012_v10 = vpop.f32.mrf.mxu0  ;;  %v3630_v29 = vld [vmem:[#allocation2 + $0xcc] sm:$0xff] }
 0x221   : > { %v3076_v18 = vadd.f32 %v3009_v62, %v2842_v63  ;;  %v2525_v6 = vpop.f32.mrf.mxu2  ;;  %v2778_v46 = vpop.f32.mrf.mxu3  ;;  %v1267_v62 = vsel %vm1208_vm0, %v4992_v31, %v1205_v12 }
 0x222   : > { %v2083_v7 = vpop.f32.mrf.mxu1  ;;  %3051 = vmatmul.bf16.gmra.mxu0 %v2904_v55 }
 0x223   : > { %v3112_v50 = vadd.f32 %v5161_v15, %v3076_v18  ;;  %v2084_v32 = vadd.f32 %v2083_v7, %v5049_v47  ;;  %v3899_v27 = vpop.eup %3898  ;;  %v2673_v47 = vsel %vm1208_vm0, %v5043_v28, %v4893_v38  ;;  %v2422_v28 = vsel %vm1208_vm0, %v5095_v14, %v2359_v16 }
 0x225   : > { %2122 = vmatmul.bf16.gmra.mxu1 %v1263_v36  ;;  %3900 = vtanh.f32 %v3112_v50  ;;  %v2588_v45 = vadd.f32 %v2523_v4, %v2084_v32  ;;  %v1207_v63 = vpop.permute.xlu0 %1206 }
 0x226   : > { %2567 = vmatmul.bf16.gmra.mxu2 %v2418_v2  ;;  %v1271_v36 = vsel %vm1208_vm0, %v5029_v9, %v1207_v63 }
 0x227   : > { %v3014_v8 = vpop.f32.mrf.mxu0  ;;  %v2843_v33 = vadd.f32 %v2778_v46, %v2588_v45  ;;  %v2643_v56 = vpop.permute.xlu2 %2642 }
 0x228   : > { %v2677_v14 = vsel %vm1208_vm0, %v3630_v29, %v2643_v56  ;;  %v2877_v1 = vpop.permute.xlu1 %2876 }
 0x229   : > { %v2528_v34 = vpop.f32.mrf.mxu2  ;;  %v2780_v58 = vpop.f32.mrf.mxu3  ;;  %v3077_v25 = vadd.f32 %v3012_v10, %v2843_v33  ;;  %v2911_v51 = vsel %vm1208_vm0, %v5113_v59, %v2877_v1 }
 0x22a   : > { %v2085_v26 = vpop.f32.mrf.mxu1 }
 0x22b   : > { %v3901_v49 = vpop.eup %3900  ;;  %v2086_v43 = vadd.f32 %v2085_v26, %v5066_v22  ;;  %v3113_v42 = vadd.f32 %v5161_v15, %v3077_v25 }
 0x22c   : > { %v3758_v3 = vpack.c.bf16 %v3901_v49, %v3899_v27 }
 0x22d   : > { %v2589_v23 = vadd.f32 %v2525_v6, %v2086_v43  ;;  %3902 = vtanh.f32 %v3113_v42 }
 0x22e   : > { %3833 = vst [vmem:[%s5180_s7 + $0x20] sm:$0xff] %v3758_v3   ;;  %2822 = vmatmul.bf16.gmra.mxu3 %v2673_v47 }
 0x22f   : > { %v2844_v37 = vadd.f32 %v2780_v58, %v2589_v23  ;;  %v3017_v53 = vpop.f32.mrf.mxu0 }
 0x231   : > { %v3078_v13 = vadd.f32 %v3014_v8, %v2844_v37  ;;  %v2530_v22 = vpop.f32.mrf.mxu2  ;;  %v2783_v48 = vpop.f32.mrf.mxu3 }
 0x232   : > { %v2088_v52 = vpop.f32.mrf.mxu1  ;;  %3056 = vmatmul.bf16.gmra.mxu0 %v2907_v19 }
 0x233   : > { %v3114_v38 = vadd.f32 %v5161_v15, %v3078_v13  ;;  %v2089_v44 = vadd.f32 %v2088_v52, %v5089_v54  ;;  %v3903_v17 = vpop.eup %3902 }
 0x235   : > { %2127 = vmatmul.bf16.gmra.mxu1 %v1267_v62  ;;  %3904 = vtanh.f32 %v3114_v38  ;;  %v2590_v24 = vadd.f32 %v2528_v34, %v2089_v44 }
 0x236   : > { %2572 = vmatmul.bf16.gmra.mxu2 %v2422_v28 }
 0x237   : > { %v3019_v4 = vpop.f32.mrf.mxu0  ;;  %v2845_v11 = vadd.f32 %v2783_v48, %v2590_v24 }
 0x239   : > { %v2533_v40 = vpop.f32.mrf.mxu2  ;;  %v2785_v31 = vpop.f32.mrf.mxu3  ;;  %v3079_v54 = vadd.f32 %v3017_v53, %v2845_v11 }
 0x23a   : > { %v2090_v39 = vpop.f32.mrf.mxu1 }
 0x23b   : > { %v3905_v20 = vpop.eup %3904  ;;  %v2091_v60 = vadd.f32 %v2090_v39, %v5115_v30  ;;  %v3115_v18 = vadd.f32 %v5161_v15, %v3079_v54  ;;  %v5341_v39 = vld [vmem:[#allocation4_spill] sm:$0xff] }
 0x23c   : > { %v3763_v61 = vpack.c.bf16 %v3905_v20, %v3903_v17 }
 0x23d   : > { %v2591_v21 = vadd.f32 %v2530_v22, %v2091_v60  ;;  %3906 = vtanh.f32 %v3115_v18 }
 0x23e   : > { %3834 = vst [vmem:[%s5180_s7 + $0x28] sm:$0xff] %v3763_v61   ;;  %2827 = vmatmul.bf16.gmra.mxu3 %v2677_v14 }
 0x23f   : > { %v2846_v10 = vadd.f32 %v2785_v31, %v2591_v21  ;;  %v3022_v55 = vpop.f32.mrf.mxu0 }
 0x241   : > { %v3080_v6 = vadd.f32 %v3019_v4, %v2846_v10  ;;  %v2535_v46 = vpop.f32.mrf.mxu2  ;;  %v2788_v7 = vpop.f32.mrf.mxu3  ;;  %v5342_v10 = vld [vmem:[#allocation6_spill] sm:$0xff] }
 0x242   : > { %v2093_v30 = vpop.f32.mrf.mxu1  ;;  %3061 = vmatmul.bf16.gmra.mxu0 %v2911_v51 }
 0x243   : > { %v3116_v50 = vadd.f32 %v5161_v15, %v3080_v6  ;;  %v2094_v2 = vadd.f32 %v2093_v30, %v5130_v41  ;;  %v3907_v34 = vpop.eup %3906 }
 0x245   : > { %2132 = vmatmul.bf16.gmra.mxu1 %v1271_v36  ;;  %3908 = vtanh.f32 %v3116_v50  ;;  %v2592_v32 = vadd.f32 %v2533_v40, %v2094_v2 }
 0x247   : > { %v3024_v59 = vpop.f32.mrf.mxu0  ;;  %v2847_v45 = vadd.f32 %v2788_v7, %v2592_v32 }
 0x249   : > { %v2538_v8 = vpop.f32.mrf.mxu2  ;;  %v2790_v33 = vpop.f32.mrf.mxu3  ;;  %v3081_v49 = vadd.f32 %v3022_v55, %v2847_v45  ;;  %v5343_v45 = vld [vmem:[#allocation8_spill] sm:$0xff] }
 0x24a   : > { %v2095_v58 = vpop.f32.mrf.mxu1 }
 0x24b   : > { %v3909_v27 = vpop.eup %3908  ;;  %v2096_v26 = vadd.f32 %v2095_v58, %v5140_v5  ;;  %v3117_v41 = vadd.f32 %v5161_v15, %v3081_v49 }
 0x24c   : > { %v3768_v9 = vpack.c.bf16 %v3909_v27, %v3907_v34 }
 0x24d   : > { %v2593_v43 = vadd.f32 %v2535_v46, %v2096_v26  ;;  %3910 = vtanh.f32 %v3117_v41 }
 0x24e   : > { %3835 = vst [vmem:[%s5180_s7 + $0x30] sm:$0xff] %v3768_v9  }
 0x24f   : > { %v2848_v3 = vadd.f32 %v2790_v33, %v2593_v43  ;;  %v3027_v25 = vpop.f32.mrf.mxu0 }
 0x251   : > { %v3082_v16 = vadd.f32 %v3024_v59, %v2848_v3  ;;  %v2540_v23 = vpop.f32.mrf.mxu2  ;;  %v2793_v47 = vpop.f32.mrf.mxu3  ;;  %v5344_v3 = vld [vmem:[#allocation10_spill] sm:$0xff] }
 0x252   : > { %v2098_v12 = vpop.f32.mrf.mxu1 }
 0x253   : > { %v3118_v37 = vadd.f32 %v5161_v15, %v3082_v16  ;;  %v2099_v53 = vadd.f32 %v2098_v12, %v4977_v57  ;;  %v3911_v48 = vpop.eup %3910 }
 0x255   : > { %3912 = vtanh.f32 %v3118_v37  ;;  %v2594_v5 = vadd.f32 %v2538_v8, %v2099_v53 }
 0x257   : > { %v3029_v19 = vpop.f32.mrf.mxu0  ;;  %v2849_v42 = vadd.f32 %v2793_v47, %v2594_v5 }
 0x259   : > { %v2543_v13 = vpop.f32.mrf.mxu2  ;;  %v2795_v22 = vpop.f32.mrf.mxu3  ;;  %v3083_v44 = vadd.f32 %v3027_v25, %v2849_v42 }
 0x25a   : > { %v2100_v52 = vpop.f32.mrf.mxu1 }
 0x25b   : > { %v3913_v62 = vpop.eup %3912  ;;  %v2101_v38 = vadd.f32 %v2100_v52, %v5000_v0  ;;  %v3119_v11 = vadd.f32 %v5161_v15, %v3083_v44 }
 0x25c   : > { %v3773_v28 = vpack.c.bf16 %v3913_v62, %v3911_v48 }
 0x25d   : > { %v2595_v24 = vadd.f32 %v2540_v23, %v2101_v38  ;;  %3914 = vtanh.f32 %v3119_v11  ;;  %v5346_v11 = vld [vmem:[#allocation14_spill] sm:$0xff] }
 0x25e   : > { %3836 = vst [vmem:[%s5180_s7 + $0x38] sm:$0xff] %v3773_v28  }
 0x25f   : > { %v2850_v4 = vadd.f32 %v2795_v22, %v2595_v24  ;;  %v3032_v29 = vpop.f32.mrf.mxu0  ;;  %v5345_v22 = vld [vmem:[#allocation12_spill] sm:$0xff] }
 0x261   : > { %v3084_v57 = vadd.f32 %v3029_v19, %v2850_v4  ;;  %v2545_v56 = vpop.f32.mrf.mxu2  ;;  %v2798_v40 = vpop.f32.mrf.mxu3 }
 0x262   : > { %v2103_v31 = vpop.f32.mrf.mxu1 }
 0x263   : > { %v3120_v17 = vadd.f32 %v5161_v15, %v3084_v57  ;;  %v2104_v20 = vadd.f32 %v2103_v31, %v5341_v39  ;;  %v3915_v1 = vpop.eup %3914 }
 0x265   : > { %3916 = vtanh.f32 %v3120_v17  ;;  %v2596_v0 = vadd.f32 %v2543_v13, %v2104_v20 }
 0x267   : > { %v3034_v60 = vpop.f32.mrf.mxu0  ;;  %v2851_v14 = vadd.f32 %v2798_v40, %v2596_v0 }
 0x269   : > { %v2548_v61 = vpop.f32.mrf.mxu2  ;;  %v2800_v54 = vpop.f32.mrf.mxu3  ;;  %v3085_v18 = vadd.f32 %v3032_v29, %v2851_v14 }
 0x26a   : > { %v2105_v21 = vpop.f32.mrf.mxu1 }
 0x26b   : > { %v3917_v63 = vpop.eup %3916  ;;  %v2106_v55 = vadd.f32 %v2105_v21, %v5342_v10  ;;  %v3121_v30 = vadd.f32 %v5161_v15, %v3085_v18 }
 0x26c   : > { %v3778_v51 = vpack.c.bf16 %v3917_v63, %v3915_v1  ;;  %v5347_v1 = vld [vmem:[#allocation3_spill] sm:$0xff] }
 0x26d   : > { %v2597_v6 = vadd.f32 %v2545_v56, %v2106_v55  ;;  %3918 = vtanh.f32 %v3121_v30  ;;  %v5348_v30 = vld [vmem:[#allocation5_spill] sm:$0xff] }
 0x26e   : > { %3837 = vst [vmem:[%s5180_s7 + $0x40] sm:$0xff] %v3778_v51  }
 0x26f   : > { %v2852_v46 = vadd.f32 %v2800_v54, %v2597_v6  ;;  %v3037_v7 = vpop.f32.mrf.mxu0 }
 0x271   : > { %v3086_v36 = vadd.f32 %v3034_v60, %v2852_v46  ;;  %v2550_v50 = vpop.f32.mrf.mxu2  ;;  %v2803_v2 = vpop.f32.mrf.mxu3 }
 0x272   : > { %v2108_v32 = vpop.f32.mrf.mxu1 }
 0x273   : > { %v3122_v59 = vadd.f32 %v5161_v15, %v3086_v36  ;;  %v2109_v8 = vadd.f32 %v2108_v32, %v5343_v45  ;;  %v3919_v9 = vpop.eup %3918 }
 0x275   : > { %3920 = vtanh.f32 %v3122_v59  ;;  %v2598_v33 = vadd.f32 %v2548_v61, %v2109_v8 }
 0x277   : > { %v3039_v34 = vpop.f32.mrf.mxu0  ;;  %v2853_v58 = vadd.f32 %v2803_v2, %v2598_v33 }
 0x279   : > { %v2553_v27 = vpop.f32.mrf.mxu2  ;;  %v2805_v26 = vpop.f32.mrf.mxu3  ;;  %v3087_v16 = vadd.f32 %v3037_v7, %v2853_v58 }
 0x27a   : > { %v2110_v49 = vpop.f32.mrf.mxu1 }
 0x27b   : > { %v3921_v43 = vpop.eup %3920  ;;  %v2111_v25 = vadd.f32 %v2110_v49, %v5344_v3  ;;  %v3123_v37 = vadd.f32 %v5161_v15, %v3087_v16 }
 0x27c   : > { %v3783_v41 = vpack.c.bf16 %v3921_v43, %v3919_v9  ;;  %v5349_v9 = vld [vmem:[#allocation7_spill] sm:$0xff] }
 0x27d   : > { %v2599_v23 = vadd.f32 %v2550_v50, %v2111_v25  ;;  %3922 = vtanh.f32 %v3123_v37 }
 0x27e   : > { %3838 = vst [vmem:[%s5180_s7 + $0x48] sm:$0xff] %v3783_v41  }
 0x27f   : > { %v2854_v47 = vadd.f32 %v2805_v26, %v2599_v23  ;;  %v3042_v12 = vpop.f32.mrf.mxu0 }
 0x281   : > { %v3088_v53 = vadd.f32 %v3039_v34, %v2854_v47  ;;  %v2555_v5 = vpop.f32.mrf.mxu2  ;;  %v2808_v19 = vpop.f32.mrf.mxu3 }
 0x282   : > { %v2113_v42 = vpop.f32.mrf.mxu1 }
 0x283   : > { %v3124_v13 = vadd.f32 %v5161_v15, %v3088_v53  ;;  %v2114_v48 = vadd.f32 %v2113_v42, %v5345_v22  ;;  %v3923_v24 = vpop.eup %3922 }
 0x285   : > { %3924 = vtanh.f32 %v3124_v13  ;;  %v2600_v52 = vadd.f32 %v2553_v27, %v2114_v48 }
 0x287   : > { %v3044_v62 = vpop.f32.mrf.mxu0  ;;  %v2855_v38 = vadd.f32 %v2808_v19, %v2600_v52 }
 0x289   : > { %v2558_v28 = vpop.f32.mrf.mxu2  ;;  %v2810_v44 = vpop.f32.mrf.mxu3  ;;  %v3089_v40 = vadd.f32 %v3042_v12, %v2855_v38  ;;  %v5350_v12 = vld [vmem:[#allocation9_spill] sm:$0xff] }
 0x28a   : > { %v2115_v4 = vpop.f32.mrf.mxu1 }
 0x28b   : > { %v3925_v29 = vpop.eup %3924  ;;  %v2116_v57 = vadd.f32 %v2115_v4, %v5346_v11  ;;  %v3125_v20 = vadd.f32 %v5161_v15, %v3089_v40 }
 0x28c   : > { %v3788_v56 = vpack.c.bf16 %v3925_v29, %v3923_v24 }
 0x28d   : > { %v2601_v31 = vadd.f32 %v2555_v5, %v2116_v57  ;;  %3926 = vtanh.f32 %v3125_v20 }
 0x28e   : > { %3839 = vst [vmem:[%s5180_s7 + $0x50] sm:$0xff] %v3788_v56  }
 0x28f   : > { %v2856_v17 = vadd.f32 %v2810_v44, %v2601_v31  ;;  %v3047_v39 = vpop.f32.mrf.mxu0  ;;  %v5351_v44 = vld [vmem:[#allocation11_spill] sm:$0xff] }
 0x291   : > { %v3090_v0 = vadd.f32 %v3044_v62, %v2856_v17  ;;  %v2560_v60 = vpop.f32.mrf.mxu2  ;;  %v2813_v14 = vpop.f32.mrf.mxu3  ;;  %v5352_v17 = vld [vmem:[#allocation13_spill] sm:$0xff] }
 0x292   : > { %v2118_v61 = vpop.f32.mrf.mxu1 }
 0x293   : > { %v3126_v54 = vadd.f32 %v5161_v15, %v3090_v0  ;;  %v2119_v21 = vadd.f32 %v2118_v61, %v5347_v1  ;;  %v3927_v6 = vpop.eup %3926 }
 0x295   : > { %3928 = vtanh.f32 %v3126_v54  ;;  %v2602_v63 = vadd.f32 %v2558_v28, %v2119_v21 }
 0x297   : > { %v3049_v10 = vpop.f32.mrf.mxu0  ;;  %v2857_v55 = vadd.f32 %v2813_v14, %v2602_v63 }
 0x299   : > { %v2563_v51 = vpop.f32.mrf.mxu2  ;;  %v2815_v18 = vpop.f32.mrf.mxu3  ;;  %v3091_v2 = vadd.f32 %v3047_v39, %v2857_v55 }
 0x29a   : > { %v2120_v46 = vpop.f32.mrf.mxu1 }
 0x29b   : > { %v3929_v7 = vpop.eup %3928  ;;  %v2121_v36 = vadd.f32 %v2120_v46, %v5348_v30  ;;  %v3127_v8 = vadd.f32 %v5161_v15, %v3091_v2 }
 0x29c   : > { %v3793_v50 = vpack.c.bf16 %v3929_v7, %v3927_v6 }
 0x29d   : > { %v2603_v32 = vadd.f32 %v2560_v60, %v2121_v36  ;;  %3930 = vtanh.f32 %v3127_v8 }
 0x29e   : > { %3840 = vst [vmem:[%s5180_s7 + $0x58] sm:$0xff] %v3793_v50  }
 0x29f   : > { %v2858_v59 = vadd.f32 %v2815_v18, %v2603_v32  ;;  %v3052_v45 = vpop.f32.mrf.mxu0 }
 0x2a1   : > { %v3092_v33 = vadd.f32 %v3049_v10, %v2858_v59  ;;  %v2818_v34 = vpop.f32.mrf.mxu3  ;;  %v2565_v27 = vpop.f32.mrf.mxu2 }
 0x2a2   : > { %v2123_v58 = vpop.f32.mrf.mxu1 }
 0x2a3   : > { %v3128_v26 = vadd.f32 %v5161_v15, %v3092_v33  ;;  %v2124_v49 = vadd.f32 %v2123_v58, %v5349_v9  ;;  %v3931_v16 = vpop.eup %3930 }
 0x2a5   : > { %3932 = vtanh.f32 %v3128_v26  ;;  %v2604_v43 = vadd.f32 %v2563_v51, %v2124_v49  ;;  %v5353_v51 = vld [vmem:[#allocation15_spill] sm:$0xff] }
 0x2a7   : > { %v2859_v3 = vadd.f32 %v2818_v34, %v2604_v43  ;;  %v3054_v25 = vpop.f32.mrf.mxu0 }
 0x2a9   : > { %v2820_v41 = vpop.f32.mrf.mxu3  ;;  %v3093_v5 = vadd.f32 %v3052_v45, %v2859_v3  ;;  %v2568_v19 = vpop.f32.mrf.mxu2 }
 0x2aa   : > { %v2125_v23 = vpop.f32.mrf.mxu1 }
 0x2ab   : > { %v3933_v47 = vpop.eup %3932  ;;  %v2126_v37 = vadd.f32 %v2125_v23, %v5350_v12  ;;  %v3129_v22 = vadd.f32 %v5161_v15, %v3093_v5 }
 0x2ac   : > { %v3798_v53 = vpack.c.bf16 %v3933_v47, %v3931_v16 }
 0x2ad   : > { %v2605_v42 = vadd.f32 %v2565_v27, %v2126_v37  ;;  %3934 = vtanh.f32 %v3129_v22 }
 0x2ae   : > { %3841 = vst [vmem:[%s5180_s7 + $0x60] sm:$0xff] %v3798_v53  }
 0x2af   : > { %v2860_v13 = vadd.f32 %v2820_v41, %v2605_v42  ;;  %v3057_v38 = vpop.f32.mrf.mxu0 }
 0x2b1   : > { %v3094_v48 = vadd.f32 %v3054_v25, %v2860_v13  ;;  %v2823_v52 = vpop.f32.mrf.mxu3  ;;  %v2570_v29 = vpop.f32.mrf.mxu2 }
 0x2b2   : > { %v2128_v62 = vpop.f32.mrf.mxu1 }
 0x2b3   : > { %v3130_v28 = vadd.f32 %v5161_v15, %v3094_v48  ;;  %v2129_v24 = vadd.f32 %v2128_v62, %v5351_v44  ;;  %v3935_v56 = vpop.eup %3934 }
 0x2b5   : > { %3936 = vtanh.f32 %v3130_v28  ;;  %v2606_v4 = vadd.f32 %v2568_v19, %v2129_v24 }
 0x2b7   : > { %v2861_v11 = vadd.f32 %v2823_v52, %v2606_v4  ;;  %v3059_v60 = vpop.f32.mrf.mxu0 }
 0x2b9   : > { %v2825_v57 = vpop.f32.mrf.mxu3  ;;  %v3095_v0 = vadd.f32 %v3057_v38, %v2861_v11  ;;  %v2573_v1 = vpop.f32.mrf.mxu2 }
 0x2ba   : > { %v2130_v40 = vpop.f32.mrf.mxu1 }
 0x2bb   : > { %v3937_v31 = vpop.eup %3936  ;;  %v2131_v39 = vadd.f32 %v2130_v40, %v5352_v17  ;;  %v3131_v54 = vadd.f32 %v5161_v15, %v3095_v0 }
 0x2bc   : > { %v3803_v20 = vpack.c.bf16 %v3937_v31, %v3935_v56 }
 0x2bd   : > { %v2607_v14 = vadd.f32 %v2570_v29, %v2131_v39  ;;  %3938 = vtanh.f32 %v3131_v54 }
 0x2be   : > { %3842 = vst [vmem:[%s5180_s7 + $0x68] sm:$0xff] %v3803_v20  }
 0x2bf   : > { %v2862_v61 = vadd.f32 %v2825_v57, %v2607_v14  ;;  %v3062_v46 = vpop.f32.mrf.mxu0 }
 0x2c1   : > { %v3096_v21 = vadd.f32 %v3059_v60, %v2862_v61  ;;  %v2828_v10 = vpop.f32.mrf.mxu3  ;;  %v2575_v50 = vpop.f32.mrf.mxu2 }
 0x2c2   : > { %v2133_v63 = vpop.f32.mrf.mxu1 }
 0x2c3   : > { %v3132_v55 = vadd.f32 %v5161_v15, %v3096_v21  ;;  %v2134_v18 = vadd.f32 %v2133_v63, %v5353_v51  ;;  %v3939_v30 = vpop.eup %3938 }
 0x2c5   : > { %3940 = vtanh.f32 %v3132_v55  ;;  %v2608_v6 = vadd.f32 %v2573_v1, %v2134_v18 }
 0x2c7   : > { %v2863_v7 = vadd.f32 %v2828_v10, %v2608_v6  ;;  %v3064_v27 = vpop.f32.mrf.mxu0 }
 0x2c9   : > { %v3097_v45 = vadd.f32 %v3062_v46, %v2863_v7  ;;  %v2830_v8 = vpop.f32.mrf.mxu3 }
 0x2ca   : > { %v2135_v36 = vpop.f32.mrf.mxu1 }
 0x2cb   : > { %v3941_v2 = vpop.eup %3940  ;;  %v2136_v32 = vadd.f32 %v2135_v36, %v5138_v35  ;;  %v3133_v58 = vadd.f32 %v5161_v15, %v3097_v45 }
 0x2cc   : > { %v3808_v59 = vpack.c.bf16 %v3941_v2, %v3939_v30 }
 0x2cd   : > { %v2609_v33 = vadd.f32 %v2575_v50, %v2136_v32  ;;  %3942 = vtanh.f32 %v3133_v58 }
 0x2ce   : > { %3843 = vst [vmem:[%s5180_s7 + $0x70] sm:$0xff] %v3808_v59  }
 0x2cf   : > { %v2864_v34 = vadd.f32 %v2830_v8, %v2609_v33 }
 0x2d1   : > { %v3098_v26 = vadd.f32 %v3064_v27, %v2864_v34 }
 0x2d3   : > { %v3134_v9 = vadd.f32 %v5161_v15, %v3098_v26  ;;  %v3943_v49 = vpop.eup %3942 }
 0x2d5   : > { %3944 = vtanh.f32 %v3134_v9 }
 0x2db   : > { %v3945_v43 = vpop.eup %3944 }
 0x2dc   : > { %v3813_v3 = vpack.c.bf16 %v3945_v43, %v3943_v49 }
 0x2de   : > { %3844 = vst [vmem:[%s5180_s7 + $0x78] sm:$0xff] %v3813_v3  }
 0x2df PF: > { %s15_s18 = sadd.s32 1, %s3993_s18  }
 0x2e0   : > { %p12_p4 = scmp.ge.s32.totalorder %s15_s18, 4  }
 0x2e2   :  { %14 = sbr.rel (!%p12_p4) target bundleno = 1 (0x1), region = 76 }

</bundles_post_ra>
